<compile_context>
chip_gen: v7x
topology: tpu7x:2x2x1
jax: 0.10.0
libtpu: 0.0.40
codegen_flags: <defaults>
</compile_context>

<pallas_src>
import jax
import jax.numpy as jnp
from jax.experimental import pallas as pl
from jax.experimental.pallas import tpu as pltpu

REDUCED_DIM = 26      # Skeleton.reduced_dim
PADDED_DIM = 32       # layer-1 contraction dim padded for aligned loads
KSIZE = 4             # all ConvTranspose2d layers use kernel_size=4
BN_EPS = 1e-5

# (C_in, C_out, stride, padding, use_bn, activation)
LAYERS = [
    (REDUCED_DIM, 128, 1, 0, True, "relu"),
    (128, 64, 2, 1, True, "relu"),
    (64, 32, 2, 1, True, "relu"),
    (32, 16, 2, 1, True, "relu"),
    (16, 3, 2, 1, False, "tanh"),
]


# ----------------------------------------------------------------------------
# Pallas kernels
# ----------------------------------------------------------------------------
def _matmul_bn_relu_kernel(p_ref, w_ref, gb_ref, o_ref):
    """Fused batched matmul (MXU, bf16 in / f32 acc) -> train-mode BN -> ReLU."""
    y = jnp.einsum("smk,skc->smc", p_ref[...], w_ref[...],
                   preferred_element_type=jnp.float32)
    # Conv bias is intentionally omitted: it is exactly cancelled by the BN mean
    # subtraction.  Statistics are over ALL S*M rows (= N*H_out*W_out), so they
    # match PyTorch training-mode BatchNorm2d exactly (biased variance).
    # TODO(synk): eval-mode BatchNorm (running statistics) is not implemented;
    # this matches the module's default .train() behaviour.
    mean = jnp.mean(y, axis=(0, 1), keepdims=True)                       # (1,1,C)
    var = jnp.maximum(
        jnp.mean(y * y, axis=(0, 1), keepdims=True) - mean * mean, 0.0)  # (1,1,C)
    scale = gb_ref[0:1, :] * jax.lax.rsqrt(var + BN_EPS)                 # (1,1,C)
    shift = gb_ref[1:2, :] - mean * scale                                # (1,1,C)
    o_ref[...] = jnp.maximum(y * scale + shift, 0.0)


def _matmul_bias_tanh_t_kernel(p_ref, w_ref, b_ref, o_ref):
    """Transposed final layer: o (C, TM) = tanh(W (C,K) @ patches (K,TM) + b)."""
    y = jnp.dot(w_ref[...], p_ref[...], preferred_element_type=jnp.float32)
    o_ref[...] = jnp.tanh(y + b_ref[...])


# ----------------------------------------------------------------------------
# Pallas wrappers
# ----------------------------------------------------------------------------
def matmul_bn_relu(patches, wsub, gb):
    """patches (S,M,K) bf16, wsub (S,K,C) bf16, gb (2,C) f32 -> (S,M,C) f32.

    Small BN layers: single invocation so batch statistics stay global/exact.
    """
    S, M, K = patches.shape
    C = wsub.shape[2]
    return pl.pallas_call(
        _matmul_bn_relu_kernel,
        out_shape=jax.ShapeDtypeStruct((S, M, C), jnp.float32),
        grid=(1,),
        in_specs=[
            pl.BlockSpec((S, M, K), lambda i: (0, 0, 0)),
            pl.BlockSpec((S, K, C), lambda i: (0, 0, 0)),
            pl.BlockSpec((2, C), lambda i: (0, 0)),
        ],
        out_specs=pl.BlockSpec((S, M, C), lambda i: (0, 0, 0)),
    )(patches, wsub, gb)


def matmul_bias_tanh_t(patches_t, wsub_t, bias_col, *, tile_m=512):
    """patches_t (4,K,M) bf16, wsub_t (4,C,K) bf16, bias (C,1) f32 -> (4,C,M) f32.

    Tiled over (sub-grid, M); both axes independent -> "parallel" semantics
    (megacore sharding on v7x) with pipelined DMA.  Output is lane-dense.
    """
    S, K, M = patches_t.shape
    C = wsub_t.shape[1]
    tm = tile_m if M % tile_m == 0 else M
    return pl.pallas_call(
        _matmul_bias_tanh_t_kernel,
        out_shape=jax.ShapeDtypeStruct((S, C, M), jnp.float32),
        grid=(S, M // tm),
        in_specs=[
            pl.BlockSpec((None, K, tm), lambda s, m: (s, 0, m)),
            pl.BlockSpec((None, C, K), lambda s, m: (s, 0, 0)),
            pl.BlockSpec((C, 1), lambda s, m: (0, 0)),
        ],
        out_specs=pl.BlockSpec((None, C, tm), lambda s, m: (s, 0, m)),
        compiler_params=pltpu.CompilerParams(
            dimension_semantics=("parallel", "parallel")),
    )(patches_t, wsub_t, bias_col)


# ----------------------------------------------------------------------------
# Sub-pixel decomposition of ConvTranspose2d(k=4, s=2, p=1)
#
# For output row oy = 2u + py only kernel taps ky = 3 - py - 2a (a in {0,1})
# contribute, reading x[u + py + a - 1] (zero outside).  Same along x.
# => 4 sub-grids, each a 2x2 conv over the 1-padded input (K_eff = 4*C_in).
# ----------------------------------------------------------------------------
def subpixel_patches(x_nhwc):
    """(N,H,W,C) -> (4, N*H*W, 4*C); sub-grid order s = 2*py + px, K order (a,b,ci)."""
    N, H, W, C = x_nhwc.shape
    xp = jnp.pad(x_nhwc, ((0, 0), (1, 1), (1, 1), (0, 0)))
    sub = []
    for py in range(2):
        for px in range(2):
            taps = [xp[:, py + a:py + a + H, px + b:px + b + W, :].reshape(N * H * W, C)
                    for a in range(2) for b in range(2)]
            sub.append(jnp.concatenate(taps, axis=1))
    return jnp.stack(sub, axis=0)


def subpixel_weights(w):
    """PyTorch (C_in,C_out,4,4) -> (4, 4*C_in, C_out) sub-kernels matching subpixel_patches."""
    cin, cout = w.shape[0], w.shape[1]
    sub = []
    for py in range(2):
        for px in range(2):
            taps = [w[:, :, 3 - py - 2 * a, 3 - px - 2 * b]
                    for a in range(2) for b in range(2)]        # each (cin, cout)
            sub.append(jnp.stack(taps, axis=0).reshape(4 * cin, cout))
    return jnp.stack(sub, axis=0)


def subpixel_patches_t(x_nhwc):
    """Transposed patches: (N,H,W,C) -> (4, 4*C, N*H*W) (K on sublanes, M on lanes)."""
    N, H, W, C = x_nhwc.shape
    xp = jnp.pad(x_nhwc, ((0, 0), (1, 1), (1, 1), (0, 0)))
    sub = []
    for py in range(2):
        for px in range(2):
            taps = [jnp.transpose(xp[:, py + a:py + a + H, px + b:px + b + W, :],
                                  (3, 0, 1, 2)).reshape(C, N * H * W)
                    for a in range(2) for b in range(2)]
            sub.append(jnp.concatenate(taps, axis=0))
    return jnp.stack(sub, axis=0)


def subpixel_weights_t(w):
    """PyTorch (C_in,C_out,4,4) -> (4, C_out, 4*C_in) matching subpixel_patches_t."""
    cin, cout = w.shape[0], w.shape[1]
    sub = []
    for py in range(2):
        for px in range(2):
            taps = [jnp.transpose(w[:, :, 3 - py - 2 * a, 3 - px - 2 * b])
                    for a in range(2) for b in range(2)]        # each (cout, cin)
            sub.append(jnp.concatenate(taps, axis=1))
    return jnp.stack(sub, axis=0)


# ----------------------------------------------------------------------------
# Parameters (deterministic synthetic init; BN defaults gamma=1, beta=0)
# ----------------------------------------------------------------------------
def init_params(key):
    params = []
    for (cin, cout, *_rest) in LAYERS:
        key, kw, kb = jax.random.split(key, 3)
        w = jax.random.normal(kw, (cin, cout, KSIZE, KSIZE), jnp.float32) * 0.05
        b = jax.random.normal(kb, (cout,), jnp.float32) * 0.05
        gamma = jnp.ones((cout,), jnp.float32)
        beta = jnp.zeros((cout,), jnp.float32)
        params.append((w, b, gamma, beta))
    return params


# ----------------------------------------------------------------------------
# Forward pass:  z (N, 26, 1, 1) -> img (N, 3, 64, 64)  (NCHW, like PyTorch)
# ----------------------------------------------------------------------------
def gen_nn_ske_to_image(z_nchw, params):
    N = z_nchw.shape[0]

    # -- layer 1: ConvTranspose2d(26,128,k=4,s=1,p=0) on a 1x1 input + BN + ReLU
    #    degenerates to out[n,co,oy,ox] = sum_ci z[n,ci] * W[ci,co,oy,ox]
    w1, _b1, g1, be1 = params[0]
    z2 = jnp.pad(z_nchw.reshape(N, REDUCED_DIM),
                 ((0, 0), (0, PADDED_DIM - REDUCED_DIM)))
    w1m = jnp.transpose(w1, (2, 3, 0, 1)).reshape(KSIZE * KSIZE, REDUCED_DIM, 128)
    w1m = jnp.pad(w1m, ((0, 0), (0, PADDED_DIM - REDUCED_DIM), (0, 0)))
    p1 = jnp.broadcast_to(z2[None], (KSIZE * KSIZE, N, PADDED_DIM))
    y1 = matmul_bn_relu(p1.astype(jnp.bfloat16), w1m.astype(jnp.bfloat16),
                        jnp.stack([g1, be1], axis=0))            # (16, N, 128)
    x = jnp.transpose(y1, (1, 0, 2)).reshape(N, KSIZE, KSIZE, 128)  # NHWC

    # -- layers 2-4: sub-pixel ConvTranspose2d(k=4,s=2,p=1) + BN + ReLU
    for li in (1, 2, 3):
        _cin, cout, _s, _p, _bn, _act = LAYERS[li]
        w, _b, g, be = params[li]
        Nb, H, W, _ = x.shape
        pats = subpixel_patches(x)                               # (4, N*H*W, 4*Cin)
        wsub = subpixel_weights(w)                               # (4, 4*Cin, Cout)
        y = matmul_bn_relu(pats.astype(jnp.bfloat16), wsub.astype(jnp.bfloat16),
                           jnp.stack([g, be], axis=0))           # (4, N*H*W, Cout)
        y = y.reshape(2, 2, Nb, H, W, cout)                      # (py,px,n,u,v,c)
        x = jnp.transpose(y, (2, 3, 0, 4, 1, 5)).reshape(Nb, 2 * H, 2 * W, cout)

    # -- layer 5: sub-pixel ConvTranspose2d(16,3,k=4,s=2,p=1) + bias + Tanh,
    #    computed transposed (C, M) for lane-dense stores; lands directly in NCHW.
    w5, b5, _g5, _be5 = params[4]
    Nb, H, W, _ = x.shape
    pats_t = subpixel_patches_t(x)                               # (4, 64, N*H*W)
    wsub_t = subpixel_weights_t(w5)                              # (4, 3, 64)
    y = matmul_bias_tanh_t(pats_t.astype(jnp.bfloat16), wsub_t.astype(jnp.bfloat16),
                           b5.reshape(-1, 1))                    # (4, 3, N*H*W)
    y = y.reshape(2, 2, 3, Nb, H, W)                             # (py,px,c,n,u,v)
    img = jnp.transpose(y, (3, 2, 4, 0, 5, 1)).reshape(Nb, 3, 2 * H, 2 * W)
    return img


if __name__ == "__main__":
    key = jax.random.PRNGKey(0)
    kp, kz = jax.random.split(key)
    params = init_params(kp)

    # Input implied by the generator: z of shape (N, Skeleton.reduced_dim, 1, 1)
    z = jax.random.normal(kz, (2, REDUCED_DIM, 1, 1), jnp.float32)

    fwd = jax.jit(gen_nn_ske_to_image)
    img = fwd(z, params)
    img = jax.block_until_ready(img)

    assert img.shape == (2, 3, 64, 64), img.shape
    assert bool(jnp.all(jnp.isfinite(img)))
    # Tanh output range sanity check.
    assert bool(jnp.all(jnp.abs(img) <= 1.0 + 1e-6))
    print("KERNEL_OK")
</pallas_src>

<mosaic_0001>
module attributes {stable_mosaic.version = 11 : i64} {
  func.func @_matmul_bn_relu_kernel(%arg0: i32, %arg1: memref<16x2x32xbf16, #tpu.memory_space<vmem>>, %arg2: memref<16x32x128xbf16, #tpu.memory_space<vmem>>, %arg3: memref<2x128xf32, #tpu.memory_space<vmem>>, %arg4: memref<16x2x128xf32, #tpu.memory_space<vmem>>) attributes {dimension_semantics = [#tpu.dimension_semantics<arbitrary>], iteration_bounds = array<i64: 1>, scalar_prefetch = 0 : i64, scratch_operands = 0 : i64, tpu.core_type = #tpu.core_type<tc>, window_params = [{pipeline_mode = #tpu.pipeline_mode<synchronous>, transform_indices = @transform_0, window_bounds = array<i64: 16, 2, 32>}, {pipeline_mode = #tpu.pipeline_mode<synchronous>, transform_indices = @transform_1, window_bounds = array<i64: 16, 32, 128>}, {pipeline_mode = #tpu.pipeline_mode<synchronous>, transform_indices = @transform_2, window_bounds = array<i64: 2, 128>}, {pipeline_mode = #tpu.pipeline_mode<synchronous>, transform_indices = @transform_3, window_bounds = array<i64: 16, 2, 128>}]} {
    %c0 = arith.constant 0 : index
    %c0_0 = arith.constant 0 : index
    %c0_1 = arith.constant 0 : index
    %0 = vector.load %arg1[%c0, %c0_0, %c0_1] : memref<16x2x32xbf16, #tpu.memory_space<vmem>>, vector<16x2x32xbf16>
    %c0_2 = arith.constant 0 : index
    %c0_3 = arith.constant 0 : index
    %c0_4 = arith.constant 0 : index
    %1 = vector.load %arg2[%c0_2, %c0_3, %c0_4] : memref<16x32x128xbf16, #tpu.memory_space<vmem>>, vector<16x32x128xbf16>
    "tpu.trace_start"() <{level = 10 : i32, message = "smk,skc->smc"}> : () -> ()
    %cst = arith.constant dense<0.000000e+00> : vector<16x2x128xf32>
    %2 = tpu.matmul %0, %1, %cst {dimension_numbers = #tpu.dot_dimension_numbers<[2], [1], [1], [2], [0, 0, 0, 1, 1, 2], [0], [0]>} : vector<16x2x32xbf16>, vector<16x32x128xbf16>, vector<16x2x128xf32> -> vector<16x2x128xf32>
    "tpu.trace_stop"() : () -> ()
    %cst_5 = arith.constant dense<0.000000e+00> : vector<128xf32>
    %3 = vector.multi_reduction <add>, %2, %cst_5 [0, 1] : vector<16x2x128xf32> to vector<128xf32>
    %4 = vector.shape_cast %3 : vector<128xf32> to vector<1x1x128xf32>
    %cst_6 = arith.constant 3.200000e+01 : f32
    %5 = vector.broadcast %cst_6 : f32 to vector<1x1x128xf32>
    %6 = arith.divf %4, %5 : vector<1x1x128xf32>
    %7 = arith.mulf %2, %2 : vector<16x2x128xf32>
    %cst_7 = arith.constant dense<0.000000e+00> : vector<128xf32>
    %8 = vector.multi_reduction <add>, %7, %cst_7 [0, 1] : vector<16x2x128xf32> to vector<128xf32>
    %9 = vector.shape_cast %8 : vector<128xf32> to vector<1x1x128xf32>
    %cst_8 = arith.constant 3.200000e+01 : f32
    %10 = vector.broadcast %cst_8 : f32 to vector<1x1x128xf32>
    %11 = arith.divf %9, %10 : vector<1x1x128xf32>
    %12 = arith.mulf %6, %6 : vector<1x1x128xf32>
    %13 = arith.subf %11, %12 : vector<1x1x128xf32>
    %cst_9 = arith.constant 0.000000e+00 : f32
    %14 = vector.broadcast %cst_9 : f32 to vector<1x1x128xf32>
    %15 = arith.maximumf %13, %14 : vector<1x1x128xf32>
    %c0_10 = arith.constant 0 : index
    %c0_11 = arith.constant 0 : index
    %16 = vector.load %arg3[%c0_10, %c0_11] : memref<2x128xf32, #tpu.memory_space<vmem>>, vector<1x128xf32>
    %cst_12 = arith.constant 9.99999974E-6 : f32
    %17 = vector.broadcast %cst_12 : f32 to vector<1x1x128xf32>
    %18 = arith.addf %15, %17 : vector<1x1x128xf32>
    %19 = math.rsqrt %18 : vector<1x1x128xf32>
    %20 = vector.shape_cast %16 : vector<1x128xf32> to vector<1x1x128xf32>
    %21 = arith.mulf %20, %19 : vector<1x1x128xf32>
    %c1 = arith.constant 1 : index
    %c0_13 = arith.constant 0 : index
    %22 = vector.load %arg3[%c1, %c0_13] : memref<2x128xf32, #tpu.memory_space<vmem>>, vector<1x128xf32>
    %23 = arith.mulf %6, %21 : vector<1x1x128xf32>
    %24 = vector.shape_cast %22 : vector<1x128xf32> to vector<1x1x128xf32>
    %25 = arith.subf %24, %23 : vector<1x1x128xf32>
    %26 = vector.broadcast %21 : vector<1x1x128xf32> to vector<16x2x128xf32>
    %27 = arith.mulf %2, %26 : vector<16x2x128xf32>
    %28 = vector.broadcast %25 : vector<1x1x128xf32> to vector<16x2x128xf32>
    %29 = arith.addf %27, %28 : vector<16x2x128xf32>
    %cst_14 = arith.constant 0.000000e+00 : f32
    %30 = vector.broadcast %cst_14 : f32 to vector<16x2x128xf32>
    %31 = arith.maximumf %29, %30 : vector<16x2x128xf32>
    %c0_15 = arith.constant 0 : index
    %c0_16 = arith.constant 0 : index
    %c0_17 = arith.constant 0 : index
    %32 = vector.load %arg4[%c0_15, %c0_16, %c0_17] : memref<16x2x128xf32, #tpu.memory_space<vmem>>, vector<16x2x128xf32>
    tpu.vector_store %arg4[%c0_15, %c0_16, %c0_17], %31 {strides = array<i32>} : memref<16x2x128xf32, #tpu.memory_space<vmem>>, vector<16x2x128xf32>,
    return
  }
  func.func @transform_0(%arg0: i32) -> (i32, i32, i32) {
    %c0_i32 = arith.constant 0 : i32
    %c0_i32_0 = arith.constant 0 : i32
    %c0_i32_1 = arith.constant 0 : i32
    %c0_i32_2 = arith.constant 0 : i32
    return %c0_i32, %c0_i32_0, %c0_i32_1 : i32, i32, i32
  }
  func.func @transform_1(%arg0: i32) -> (i32, i32, i32) {
    %c0_i32 = arith.constant 0 : i32
    %c0_i32_0 = arith.constant 0 : i32
    %c0_i32_1 = arith.constant 0 : i32
    %c0_i32_2 = arith.constant 0 : i32
    return %c0_i32, %c0_i32_0, %c0_i32_1 : i32, i32, i32
  }
  func.func @transform_2(%arg0: i32) -> (i32, i32) {
    %c0_i32 = arith.constant 0 : i32
    %c0_i32_0 = arith.constant 0 : i32
    %c0_i32_1 = arith.constant 0 : i32
    return %c0_i32, %c0_i32_0 : i32, i32
  }
  func.func @transform_3(%arg0: i32) -> (i32, i32, i32) {
    %c0_i32 = arith.constant 0 : i32
    %c0_i32_0 = arith.constant 0 : i32
    %c0_i32_1 = arith.constant 0 : i32
    %c0_i32_2 = arith.constant 0 : i32
    return %c0_i32, %c0_i32_0, %c0_i32_1 : i32, i32, i32
  }
}

module attributes {stable_mosaic.version = 11 : i64} {
  func.func @_matmul_bn_relu_kernel(%arg0: i32, %arg1: memref<4x32x512xbf16, #tpu.memory_space<vmem>>, %arg2: memref<4x512x64xbf16, #tpu.memory_space<vmem>>, %arg3: memref<2x64xf32, #tpu.memory_space<vmem>>, %arg4: memref<4x32x64xf32, #tpu.memory_space<vmem>>) attributes {dimension_semantics = [#tpu.dimension_semantics<arbitrary>], iteration_bounds = array<i64: 1>, scalar_prefetch = 0 : i64, scratch_operands = 0 : i64, tpu.core_type = #tpu.core_type<tc>, window_params = [{pipeline_mode = #tpu.pipeline_mode<synchronous>, transform_indices = @transform_0, window_bounds = array<i64: 4, 32, 512>}, {pipeline_mode = #tpu.pipeline_mode<synchronous>, transform_indices = @transform_1, window_bounds = array<i64: 4, 512, 64>}, {pipeline_mode = #tpu.pipeline_mode<synchronous>, transform_indices = @transform_2, window_bounds = array<i64: 2, 64>}, {pipeline_mode = #tpu.pipeline_mode<synchronous>, transform_indices = @transform_3, window_bounds = array<i64: 4, 32, 64>}]} {
    %c0 = arith.constant 0 : index
    %c0_0 = arith.constant 0 : index
    %c0_1 = arith.constant 0 : index
    %0 = vector.load %arg1[%c0, %c0_0, %c0_1] : memref<4x32x512xbf16, #tpu.memory_space<vmem>>, vector<4x32x512xbf16>
    %c0_2 = arith.constant 0 : index
    %c0_3 = arith.constant 0 : index
    %c0_4 = arith.constant 0 : index
    %1 = vector.load %arg2[%c0_2, %c0_3, %c0_4] : memref<4x512x64xbf16, #tpu.memory_space<vmem>>, vector<4x512x64xbf16>
    "tpu.trace_start"() <{level = 10 : i32, message = "smk,skc->smc"}> : () -> ()
    %cst = arith.constant dense<0.000000e+00> : vector<4x32x64xf32>
    %2 = tpu.matmul %0, %1, %cst {dimension_numbers = #tpu.dot_dimension_numbers<[2], [1], [1], [2], [0, 0, 0, 1, 1, 2], [0], [0]>} : vector<4x32x512xbf16>, vector<4x512x64xbf16>, vector<4x32x64xf32> -> vector<4x32x64xf32>
    "tpu.trace_stop"() : () -> ()
    %cst_5 = arith.constant dense<0.000000e+00> : vector<64xf32>
    %3 = vector.multi_reduction <add>, %2, %cst_5 [0, 1] : vector<4x32x64xf32> to vector<64xf32>
    %4 = vector.shape_cast %3 : vector<64xf32> to vector<1x1x64xf32>
    %cst_6 = arith.constant 1.280000e+02 : f32
    %5 = vector.broadcast %cst_6 : f32 to vector<1x1x64xf32>
    %6 = arith.divf %4, %5 : vector<1x1x64xf32>
    %7 = arith.mulf %2, %2 : vector<4x32x64xf32>
    %cst_7 = arith.constant dense<0.000000e+00> : vector<64xf32>
    %8 = vector.multi_reduction <add>, %7, %cst_7 [0, 1] : vector<4x32x64xf32> to vector<64xf32>
    %9 = vector.shape_cast %8 : vector<64xf32> to vector<1x1x64xf32>
    %cst_8 = arith.constant 1.280000e+02 : f32
    %10 = vector.broadcast %cst_8 : f32 to vector<1x1x64xf32>
    %11 = arith.divf %9, %10 : vector<1x1x64xf32>
    %12 = arith.mulf %6, %6 : vector<1x1x64xf32>
    %13 = arith.subf %11, %12 : vector<1x1x64xf32>
    %cst_9 = arith.constant 0.000000e+00 : f32
    %14 = vector.broadcast %cst_9 : f32 to vector<1x1x64xf32>
    %15 = arith.maximumf %13, %14 : vector<1x1x64xf32>
    %c0_10 = arith.constant 0 : index
    %c0_11 = arith.constant 0 : index
    %16 = vector.load %arg3[%c0_10, %c0_11] : memref<2x64xf32, #tpu.memory_space<vmem>>, vector<1x64xf32>
    %cst_12 = arith.constant 9.99999974E-6 : f32
    %17 = vector.broadcast %cst_12 : f32 to vector<1x1x64xf32>
    %18 = arith.addf %15, %17 : vector<1x1x64xf32>
    %19 = math.rsqrt %18 : vector<1x1x64xf32>
    %20 = vector.shape_cast %16 : vector<1x64xf32> to vector<1x1x64xf32>
    %21 = arith.mulf %20, %19 : vector<1x1x64xf32>
    %c1 = arith.constant 1 : index
    %c0_13 = arith.constant 0 : index
    %22 = vector.load %arg3[%c1, %c0_13] : memref<2x64xf32, #tpu.memory_space<vmem>>, vector<1x64xf32>
    %23 = arith.mulf %6, %21 : vector<1x1x64xf32>
    %24 = vector.shape_cast %22 : vector<1x64xf32> to vector<1x1x64xf32>
    %25 = arith.subf %24, %23 : vector<1x1x64xf32>
    %26 = vector.broadcast %21 : vector<1x1x64xf32> to vector<4x32x64xf32>
    %27 = arith.mulf %2, %26 : vector<4x32x64xf32>
    %28 = vector.broadcast %25 : vector<1x1x64xf32> to vector<4x32x64xf32>
    %29 = arith.addf %27, %28 : vector<4x32x64xf32>
    %cst_14 = arith.constant 0.000000e+00 : f32
    %30 = vector.broadcast %cst_14 : f32 to vector<4x32x64xf32>
    %31 = arith.maximumf %29, %30 : vector<4x32x64xf32>
    %c0_15 = arith.constant 0 : index
    %c0_16 = arith.constant 0 : index
    %c0_17 = arith.constant 0 : index
    %32 = vector.load %arg4[%c0_15, %c0_16, %c0_17] : memref<4x32x64xf32, #tpu.memory_space<vmem>>, vector<4x32x64xf32>
    tpu.vector_store %arg4[%c0_15, %c0_16, %c0_17], %31 {strides = array<i32>} : memref<4x32x64xf32, #tpu.memory_space<vmem>>, vector<4x32x64xf32>,
    return
  }
  func.func @transform_0(%arg0: i32) -> (i32, i32, i32) {
    %c0_i32 = arith.constant 0 : i32
    %c0_i32_0 = arith.constant 0 : i32
    %c0_i32_1 = arith.constant 0 : i32
    %c0_i32_2 = arith.constant 0 : i32
    return %c0_i32, %c0_i32_0, %c0_i32_1 : i32, i32, i32
  }
  func.func @transform_1(%arg0: i32) -> (i32, i32, i32) {
    %c0_i32 = arith.constant 0 : i32
    %c0_i32_0 = arith.constant 0 : i32
    %c0_i32_1 = arith.constant 0 : i32
    %c0_i32_2 = arith.constant 0 : i32
    return %c0_i32, %c0_i32_0, %c0_i32_1 : i32, i32, i32
  }
  func.func @transform_2(%arg0: i32) -> (i32, i32) {
    %c0_i32 = arith.constant 0 : i32
    %c0_i32_0 = arith.constant 0 : i32
    %c0_i32_1 = arith.constant 0 : i32
    return %c0_i32, %c0_i32_0 : i32, i32
  }
  func.func @transform_3(%arg0: i32) -> (i32, i32, i32) {
    %c0_i32 = arith.constant 0 : i32
    %c0_i32_0 = arith.constant 0 : i32
    %c0_i32_1 = arith.constant 0 : i32
    %c0_i32_2 = arith.constant 0 : i32
    return %c0_i32, %c0_i32_0, %c0_i32_1 : i32, i32, i32
  }
}

module attributes {stable_mosaic.version = 11 : i64} {
  func.func @_matmul_bn_relu_kernel(%arg0: i32, %arg1: memref<4x128x256xbf16, #tpu.memory_space<vmem>>, %arg2: memref<4x256x32xbf16, #tpu.memory_space<vmem>>, %arg3: memref<2x32xf32, #tpu.memory_space<vmem>>, %arg4: memref<4x128x32xf32, #tpu.memory_space<vmem>>) attributes {dimension_semantics = [#tpu.dimension_semantics<arbitrary>], iteration_bounds = array<i64: 1>, scalar_prefetch = 0 : i64, scratch_operands = 0 : i64, tpu.core_type = #tpu.core_type<tc>, window_params = [{pipeline_mode = #tpu.pipeline_mode<synchronous>, transform_indices = @transform_0, window_bounds = array<i64: 4, 128, 256>}, {pipeline_mode = #tpu.pipeline_mode<synchronous>, transform_indices = @transform_1, window_bounds = array<i64: 4, 256, 32>}, {pipeline_mode = #tpu.pipeline_mode<synchronous>, transform_indices = @transform_2, window_bounds = array<i64: 2, 32>}, {pipeline_mode = #tpu.pipeline_mode<synchronous>, transform_indices = @transform_3, window_bounds = array<i64: 4, 128, 32>}]} {
    %c0 = arith.constant 0 : index
    %c0_0 = arith.constant 0 : index
    %c0_1 = arith.constant 0 : index
    %0 = vector.load %arg1[%c0, %c0_0, %c0_1] : memref<4x128x256xbf16, #tpu.memory_space<vmem>>, vector<4x128x256xbf16>
    %c0_2 = arith.constant 0 : index
    %c0_3 = arith.constant 0 : index
    %c0_4 = arith.constant 0 : index
    %1 = vector.load %arg2[%c0_2, %c0_3, %c0_4] : memref<4x256x32xbf16, #tpu.memory_space<vmem>>, vector<4x256x32xbf16>
    "tpu.trace_start"() <{level = 10 : i32, message = "smk,skc->smc"}> : () -> ()
    %cst = arith.constant dense<0.000000e+00> : vector<4x128x32xf32>
    %2 = tpu.matmul %0, %1, %cst {dimension_numbers = #tpu.dot_dimension_numbers<[2], [1], [1], [2], [0, 0, 0, 1, 1, 2], [0], [0]>} : vector<4x128x256xbf16>, vector<4x256x32xbf16>, vector<4x128x32xf32> -> vector<4x128x32xf32>
    "tpu.trace_stop"() : () -> ()
    %cst_5 = arith.constant dense<0.000000e+00> : vector<32xf32>
    %3 = vector.multi_reduction <add>, %2, %cst_5 [0, 1] : vector<4x128x32xf32> to vector<32xf32>
    %4 = vector.shape_cast %3 : vector<32xf32> to vector<1x1x32xf32>
    %cst_6 = arith.constant 5.120000e+02 : f32
    %5 = vector.broadcast %cst_6 : f32 to vector<1x1x32xf32>
    %6 = arith.divf %4, %5 : vector<1x1x32xf32>
    %7 = arith.mulf %2, %2 : vector<4x128x32xf32>
    %cst_7 = arith.constant dense<0.000000e+00> : vector<32xf32>
    %8 = vector.multi_reduction <add>, %7, %cst_7 [0, 1] : vector<4x128x32xf32> to vector<32xf32>
    %9 = vector.shape_cast %8 : vector<32xf32> to vector<1x1x32xf32>
    %cst_8 = arith.constant 5.120000e+02 : f32
    %10 = vector.broadcast %cst_8 : f32 to vector<1x1x32xf32>
    %11 = arith.divf %9, %10 : vector<1x1x32xf32>
    %12 = arith.mulf %6, %6 : vector<1x1x32xf32>
    %13 = arith.subf %11, %12 : vector<1x1x32xf32>
    %cst_9 = arith.constant 0.000000e+00 : f32
    %14 = vector.broadcast %cst_9 : f32 to vector<1x1x32xf32>
    %15 = arith.maximumf %13, %14 : vector<1x1x32xf32>
    %c0_10 = arith.constant 0 : index
    %c0_11 = arith.constant 0 : index
    %16 = vector.load %arg3[%c0_10, %c0_11] : memref<2x32xf32, #tpu.memory_space<vmem>>, vector<1x32xf32>
    %cst_12 = arith.constant 9.99999974E-6 : f32
    %17 = vector.broadcast %cst_12 : f32 to vector<1x1x32xf32>
    %18 = arith.addf %15, %17 : vector<1x1x32xf32>
    %19 = math.rsqrt %18 : vector<1x1x32xf32>
    %20 = vector.shape_cast %16 : vector<1x32xf32> to vector<1x1x32xf32>
    %21 = arith.mulf %20, %19 : vector<1x1x32xf32>
    %c1 = arith.constant 1 : index
    %c0_13 = arith.constant 0 : index
    %22 = vector.load %arg3[%c1, %c0_13] : memref<2x32xf32, #tpu.memory_space<vmem>>, vector<1x32xf32>
    %23 = arith.mulf %6, %21 : vector<1x1x32xf32>
    %24 = vector.shape_cast %22 : vector<1x32xf32> to vector<1x1x32xf32>
    %25 = arith.subf %24, %23 : vector<1x1x32xf32>
    %26 = vector.broadcast %21 : vector<1x1x32xf32> to vector<4x128x32xf32>
    %27 = arith.mulf %2, %26 : vector<4x128x32xf32>
    %28 = vector.broadcast %25 : vector<1x1x32xf32> to vector<4x128x32xf32>
    %29 = arith.addf %27, %28 : vector<4x128x32xf32>
    %cst_14 = arith.constant 0.000000e+00 : f32
    %30 = vector.broadcast %cst_14 : f32 to vector<4x128x32xf32>
    %31 = arith.maximumf %29, %30 : vector<4x128x32xf32>
    %c0_15 = arith.constant 0 : index
    %c0_16 = arith.constant 0 : index
    %c0_17 = arith.constant 0 : index
    %32 = vector.load %arg4[%c0_15, %c0_16, %c0_17] : memref<4x128x32xf32, #tpu.memory_space<vmem>>, vector<4x128x32xf32>
    tpu.vector_store %arg4[%c0_15, %c0_16, %c0_17], %31 {strides = array<i32>} : memref<4x128x32xf32, #tpu.memory_space<vmem>>, vector<4x128x32xf32>,
    return
  }
  func.func @transform_0(%arg0: i32) -> (i32, i32, i32) {
    %c0_i32 = arith.constant 0 : i32
    %c0_i32_0 = arith.constant 0 : i32
    %c0_i32_1 = arith.constant 0 : i32
    %c0_i32_2 = arith.constant 0 : i32
    return %c0_i32, %c0_i32_0, %c0_i32_1 : i32, i32, i32
  }
  func.func @transform_1(%arg0: i32) -> (i32, i32, i32) {
    %c0_i32 = arith.constant 0 : i32
    %c0_i32_0 = arith.constant 0 : i32
    %c0_i32_1 = arith.constant 0 : i32
    %c0_i32_2 = arith.constant 0 : i32
    return %c0_i32, %c0_i32_0, %c0_i32_1 : i32, i32, i32
  }
  func.func @transform_2(%arg0: i32) -> (i32, i32) {
    %c0_i32 = arith.constant 0 : i32
    %c0_i32_0 = arith.constant 0 : i32
    %c0_i32_1 = arith.constant 0 : i32
    return %c0_i32, %c0_i32_0 : i32, i32
  }
  func.func @transform_3(%arg0: i32) -> (i32, i32, i32) {
    %c0_i32 = arith.constant 0 : i32
    %c0_i32_0 = arith.constant 0 : i32
    %c0_i32_1 = arith.constant 0 : i32
    %c0_i32_2 = arith.constant 0 : i32
    return %c0_i32, %c0_i32_0, %c0_i32_1 : i32, i32, i32
  }
}

module attributes {stable_mosaic.version = 11 : i64} {
  func.func @_matmul_bn_relu_kernel(%arg0: i32, %arg1: memref<4x512x128xbf16, #tpu.memory_space<vmem>>, %arg2: memref<4x128x16xbf16, #tpu.memory_space<vmem>>, %arg3: memref<2x16xf32, #tpu.memory_space<vmem>>, %arg4: memref<4x512x16xf32, #tpu.memory_space<vmem>>) attributes {dimension_semantics = [#tpu.dimension_semantics<arbitrary>], iteration_bounds = array<i64: 1>, scalar_prefetch = 0 : i64, scratch_operands = 0 : i64, tpu.core_type = #tpu.core_type<tc>, window_params = [{pipeline_mode = #tpu.pipeline_mode<synchronous>, transform_indices = @transform_0, window_bounds = array<i64: 4, 512, 128>}, {pipeline_mode = #tpu.pipeline_mode<synchronous>, transform_indices = @transform_1, window_bounds = array<i64: 4, 128, 16>}, {pipeline_mode = #tpu.pipeline_mode<synchronous>, transform_indices = @transform_2, window_bounds = array<i64: 2, 16>}, {pipeline_mode = #tpu.pipeline_mode<synchronous>, transform_indices = @transform_3, window_bounds = array<i64: 4, 512, 16>}]} {
    %c0 = arith.constant 0 : index
    %c0_0 = arith.constant 0 : index
    %c0_1 = arith.constant 0 : index
    %0 = vector.load %arg1[%c0, %c0_0, %c0_1] : memref<4x512x128xbf16, #tpu.memory_space<vmem>>, vector<4x512x128xbf16>
    %c0_2 = arith.constant 0 : index
    %c0_3 = arith.constant 0 : index
    %c0_4 = arith.constant 0 : index
    %1 = vector.load %arg2[%c0_2, %c0_3, %c0_4] : memref<4x128x16xbf16, #tpu.memory_space<vmem>>, vector<4x128x16xbf16>
    "tpu.trace_start"() <{level = 10 : i32, message = "smk,skc->smc"}> : () -> ()
    %cst = arith.constant dense<0.000000e+00> : vector<4x512x16xf32>
    %2 = tpu.matmul %0, %1, %cst {dimension_numbers = #tpu.dot_dimension_numbers<[2], [1], [1], [2], [0, 0, 0, 1, 1, 2], [0], [0]>} : vector<4x512x128xbf16>, vector<4x128x16xbf16>, vector<4x512x16xf32> -> vector<4x512x16xf32>
    "tpu.trace_stop"() : () -> ()
    %cst_5 = arith.constant dense<0.000000e+00> : vector<16xf32>
    %3 = vector.multi_reduction <add>, %2, %cst_5 [0, 1] : vector<4x512x16xf32> to vector<16xf32>
    %4 = vector.shape_cast %3 : vector<16xf32> to vector<1x1x16xf32>
    %cst_6 = arith.constant 2.048000e+03 : f32
    %5 = vector.broadcast %cst_6 : f32 to vector<1x1x16xf32>
    %6 = arith.divf %4, %5 : vector<1x1x16xf32>
    %7 = arith.mulf %2, %2 : vector<4x512x16xf32>
    %cst_7 = arith.constant dense<0.000000e+00> : vector<16xf32>
    %8 = vector.multi_reduction <add>, %7, %cst_7 [0, 1] : vector<4x512x16xf32> to vector<16xf32>
    %9 = vector.shape_cast %8 : vector<16xf32> to vector<1x1x16xf32>
    %cst_8 = arith.constant 2.048000e+03 : f32
    %10 = vector.broadcast %cst_8 : f32 to vector<1x1x16xf32>
    %11 = arith.divf %9, %10 : vector<1x1x16xf32>
    %12 = arith.mulf %6, %6 : vector<1x1x16xf32>
    %13 = arith.subf %11, %12 : vector<1x1x16xf32>
    %cst_9 = arith.constant 0.000000e+00 : f32
    %14 = vector.broadcast %cst_9 : f32 to vector<1x1x16xf32>
    %15 = arith.maximumf %13, %14 : vector<1x1x16xf32>
    %c0_10 = arith.constant 0 : index
    %c0_11 = arith.constant 0 : index
    %16 = vector.load %arg3[%c0_10, %c0_11] : memref<2x16xf32, #tpu.memory_space<vmem>>, vector<1x16xf32>
    %cst_12 = arith.constant 9.99999974E-6 : f32
    %17 = vector.broadcast %cst_12 : f32 to vector<1x1x16xf32>
    %18 = arith.addf %15, %17 : vector<1x1x16xf32>
    %19 = math.rsqrt %18 : vector<1x1x16xf32>
    %20 = vector.shape_cast %16 : vector<1x16xf32> to vector<1x1x16xf32>
    %21 = arith.mulf %20, %19 : vector<1x1x16xf32>
    %c1 = arith.constant 1 : index
    %c0_13 = arith.constant 0 : index
    %22 = vector.load %arg3[%c1, %c0_13] : memref<2x16xf32, #tpu.memory_space<vmem>>, vector<1x16xf32>
    %23 = arith.mulf %6, %21 : vector<1x1x16xf32>
    %24 = vector.shape_cast %22 : vector<1x16xf32> to vector<1x1x16xf32>
    %25 = arith.subf %24, %23 : vector<1x1x16xf32>
    %26 = vector.broadcast %21 : vector<1x1x16xf32> to vector<4x512x16xf32>
    %27 = arith.mulf %2, %26 : vector<4x512x16xf32>
    %28 = vector.broadcast %25 : vector<1x1x16xf32> to vector<4x512x16xf32>
    %29 = arith.addf %27, %28 : vector<4x512x16xf32>
    %cst_14 = arith.constant 0.000000e+00 : f32
    %30 = vector.broadcast %cst_14 : f32 to vector<4x512x16xf32>
    %31 = arith.maximumf %29, %30 : vector<4x512x16xf32>
    %c0_15 = arith.constant 0 : index
    %c0_16 = arith.constant 0 : index
    %c0_17 = arith.constant 0 : index
    %32 = vector.load %arg4[%c0_15, %c0_16, %c0_17] : memref<4x512x16xf32, #tpu.memory_space<vmem>>, vector<4x512x16xf32>
    tpu.vector_store %arg4[%c0_15, %c0_16, %c0_17], %31 {strides = array<i32>} : memref<4x512x16xf32, #tpu.memory_space<vmem>>, vector<4x512x16xf32>,
    return
  }
  func.func @transform_0(%arg0: i32) -> (i32, i32, i32) {
    %c0_i32 = arith.constant 0 : i32
    %c0_i32_0 = arith.constant 0 : i32
    %c0_i32_1 = arith.constant 0 : i32
    %c0_i32_2 = arith.constant 0 : i32
    return %c0_i32, %c0_i32_0, %c0_i32_1 : i32, i32, i32
  }
  func.func @transform_1(%arg0: i32) -> (i32, i32, i32) {
    %c0_i32 = arith.constant 0 : i32
    %c0_i32_0 = arith.constant 0 : i32
    %c0_i32_1 = arith.constant 0 : i32
    %c0_i32_2 = arith.constant 0 : i32
    return %c0_i32, %c0_i32_0, %c0_i32_1 : i32, i32, i32
  }
  func.func @transform_2(%arg0: i32) -> (i32, i32) {
    %c0_i32 = arith.constant 0 : i32
    %c0_i32_0 = arith.constant 0 : i32
    %c0_i32_1 = arith.constant 0 : i32
    return %c0_i32, %c0_i32_0 : i32, i32
  }
  func.func @transform_3(%arg0: i32) -> (i32, i32, i32) {
    %c0_i32 = arith.constant 0 : i32
    %c0_i32_0 = arith.constant 0 : i32
    %c0_i32_1 = arith.constant 0 : i32
    %c0_i32_2 = arith.constant 0 : i32
    return %c0_i32, %c0_i32_0, %c0_i32_1 : i32, i32, i32
  }
}

module attributes {stable_mosaic.version = 11 : i64} {
  func.func @_matmul_bias_tanh_t_kernel(%arg0: i32, %arg1: i32, %arg2: memref<1x64x512xbf16, #tpu.memory_space<vmem>>, %arg3: memref<1x3x64xbf16, #tpu.memory_space<vmem>>, %arg4: memref<3x1xf32, #tpu.memory_space<vmem>>, %arg5: memref<1x3x512xf32, #tpu.memory_space<vmem>>) attributes {dimension_semantics = [#tpu.dimension_semantics<parallel>, #tpu.dimension_semantics<parallel>], iteration_bounds = array<i64: 4, 4>, scalar_prefetch = 0 : i64, scratch_operands = 0 : i64, tpu.core_type = #tpu.core_type<tc>, window_params = [{transform_indices = @transform_0, window_bounds = array<i64: 1, 64, 512>}, {transform_indices = @transform_1, window_bounds = array<i64: 1, 3, 64>}, {pipeline_mode = #tpu.pipeline_mode<synchronous>, transform_indices = @transform_2, window_bounds = array<i64: 3, 1>}, {transform_indices = @transform_3, window_bounds = array<i64: 1, 3, 512>}]} {
    %c0 = arith.constant 0 : index
    %c0_0 = arith.constant 0 : index
    %c0_1 = arith.constant 0 : index
    %0 = vector.load %arg3[%c0, %c0_0, %c0_1] : memref<1x3x64xbf16, #tpu.memory_space<vmem>>, vector<1x3x64xbf16>
    %1 = vector.shape_cast %0 : vector<1x3x64xbf16> to vector<3x64xbf16>
    %c0_2 = arith.constant 0 : index
    %c0_3 = arith.constant 0 : index
    %c0_4 = arith.constant 0 : index
    %2 = vector.load %arg2[%c0_2, %c0_3, %c0_4] : memref<1x64x512xbf16, #tpu.memory_space<vmem>>, vector<1x64x512xbf16>
    %3 = vector.shape_cast %2 : vector<1x64x512xbf16> to vector<64x512xbf16>
    %cst = arith.constant dense<0.000000e+00> : vector<3x512xf32>
    %4 = tpu.matmul %1, %3, %cst {dimension_numbers = #tpu.dot_dimension_numbers<[1], [0], [0], [1], [0, 0, 1, 1], [], []>} : vector<3x64xbf16>, vector<64x512xbf16>, vector<3x512xf32> -> vector<3x512xf32>
    %c0_5 = arith.constant 0 : index
    %c0_6 = arith.constant 0 : index
    %5 = vector.load %arg4[%c0_5, %c0_6] : memref<3x1xf32, #tpu.memory_space<vmem>>, vector<3x1xf32>
    %6 = vector.broadcast %5 : vector<3x1xf32> to vector<3x512xf32>
    %7 = arith.addf %4, %6 : vector<3x512xf32>
    %8 = math.tanh %7 : vector<3x512xf32>
    %c0_7 = arith.constant 0 : index
    %c0_8 = arith.constant 0 : index
    %c0_9 = arith.constant 0 : index
    %9 = vector.load %arg5[%c0_7, %c0_8, %c0_9] : memref<1x3x512xf32, #tpu.memory_space<vmem>>, vector<1x3x512xf32>
    %10 = vector.shape_cast %9 : vector<1x3x512xf32> to vector<3x512xf32>
    %11 = vector.shape_cast %8 : vector<3x512xf32> to vector<1x3x512xf32>
    tpu.vector_store %arg5[%c0_7, %c0_8, %c0_9], %11 {strides = array<i32>} : memref<1x3x512xf32, #tpu.memory_space<vmem>>, vector<1x3x512xf32>,
    return
  }
  func.func @transform_0(%arg0: i32, %arg1: i32) -> (i32, i32, i32) {
    %c0_i32 = arith.constant 0 : i32
    %c0_i32_0 = arith.constant 0 : i32
    return %arg0, %c0_i32, %arg1 : i32, i32, i32
  }
  func.func @transform_1(%arg0: i32, %arg1: i32) -> (i32, i32, i32) {
    %c0_i32 = arith.constant 0 : i32
    %c0_i32_0 = arith.constant 0 : i32
    %c0_i32_1 = arith.constant 0 : i32
    return %arg0, %c0_i32, %c0_i32_0 : i32, i32, i32
  }
  func.func @transform_2(%arg0: i32, %arg1: i32) -> (i32, i32) {
    %c0_i32 = arith.constant 0 : i32
    %c0_i32_0 = arith.constant 0 : i32
    %c0_i32_1 = arith.constant 0 : i32
    return %c0_i32, %c0_i32_0 : i32, i32
  }
  func.func @transform_3(%arg0: i32, %arg1: i32) -> (i32, i32, i32) {
    %c0_i32 = arith.constant 0 : i32
    %c0_i32_0 = arith.constant 0 : i32
    return %arg0, %c0_i32, %arg1 : i32, i32, i32
  }
}

</mosaic_0001>

<bundles_post_ra>
// kernel: gen_nn_ske_to_image.5
= control target key start
LH: loop header
LB: loop body
LE: loop exit
PB: predicated region body
PF: predicated region fallthrough
CT: control target
= control target key end

     0   :  { %v1416_v0 = vmov 0.0   ;;  %vm1417_vm0 = vmmov 0   ;;  %vm107_vm1 = vcmask 261120   ;;  %vm976_vm2 = vcmask 1041408   ;;  %s1832_s1 = inlined_call_operand.vmem [shape: bf16[16,32,128], index: 1, kind: input, shape index: {}]   ;;  %s1833_s0 = inlined_call_operand.vmem [shape: bf16[16,2,32], index: 0, kind: input, shape index: {}]   ;;  %s1834_s2 = inlined_call_operand.vmem [shape: f32[2,128], index: 2, kind: input, shape index: {}]   ;;  %s1835_s3 = inlined_call_operand.vmem [shape: f32[16,2,128], index: 3, kind: output, shape index: {}]  }
   0x1   :  { %1252 = vmatprep.subr.bf16.mxu0 %v1416_v0  ;;  %1260 = vmatprep.subr.bf16.mxu1 %v1416_v0  ;;  %v1382_v1 = vld [vmem:[%s1832_s1] sm:$0xff]   ;;  %v1383_v2 = vld [vmem:[%s1832_s1 + $0x10] sm:$0xff]   ;;  %v1384_v3 = vld [vmem:[%s1832_s1 + $0x8] sm:$0xff]  }
   0x2   :  { %1256 = vmatprep.mubr.msk.bf16.mxu0 %vm1417_vm0, %v1416_v0  ;;  %1264 = vmatprep.mubr.msk.bf16.mxu1 %vm1417_vm0, %v1416_v0  ;;  %v1385_v4 = vld [vmem:[%s1832_s1 + $0x18] sm:$0xff]   ;;  %v15_v5 = vld [vmem:[%s1833_s0] sm:$0x1]  ;;  %v16_v6 = vld [vmem:[%s1833_s0 + $0x1] sm:$0x1] }
   0x3   :  { %1253 = vmatpush3.bf16.msra.mxu0 %v1382_v1  ;;  %1261 = vmatpush3.bf16.msra.mxu1 %v1383_v2  ;;  %v1386_v7 = vld [vmem:[%s1832_s1 + $0x20] sm:$0xff]   ;;  %v1387_v8 = vld [vmem:[%s1832_s1 + $0x30] sm:$0xff]   ;;  %v1388_v9 = vld [vmem:[%s1832_s1 + $0x28] sm:$0xff]  }
   0x4   :  { %1254 = vmatprep.subr.bf16.mxu0 %v1416_v0  ;;  %1262 = vmatprep.subr.bf16.mxu1 %v1416_v0  ;;  %v1389_v10 = vld [vmem:[%s1832_s1 + $0x38] sm:$0xff]   ;;  %v17_v11 = vld [vmem:[%s1833_s0 + $0x2] sm:$0x1]  ;;  %v18_v12 = vld [vmem:[%s1833_s0 + $0x3] sm:$0x1] }
   0x5   :  { %v1390_v13 = vld [vmem:[%s1832_s1 + $0x40] sm:$0xff]   ;;  %v1391_v14 = vld [vmem:[%s1832_s1 + $0x50] sm:$0xff]   ;;  %v1392_v15 = vld [vmem:[%s1832_s1 + $0x48] sm:$0xff]  }
   0x6   :  { %v1393_v16 = vld [vmem:[%s1832_s1 + $0x58] sm:$0xff]   ;;  %v19_v17 = vld [vmem:[%s1833_s0 + $0x4] sm:$0x1]  ;;  %v20_v18 = vld [vmem:[%s1833_s0 + $0x5] sm:$0x1] }
   0x7   :  { %1255 = vmatpush3.bf16.msra.mxu0 %v1384_v3  ;;  %1263 = vmatpush3.bf16.msra.mxu1 %v1385_v4  ;;  %v1394_v19 = vld [vmem:[%s1832_s1 + $0x60] sm:$0xff]   ;;  %v1395_v20 = vld [vmem:[%s1832_s1 + $0x70] sm:$0xff]   ;;  %v1396_v21 = vld [vmem:[%s1832_s1 + $0x68] sm:$0xff]  }
   0x8   :  { %1268 = vmatprep.subr.bf16.mxu0 %v1416_v0  ;;  %1276 = vmatprep.subr.bf16.mxu1 %v1416_v0  ;;  %v1397_v22 = vld [vmem:[%s1832_s1 + $0x78] sm:$0xff]   ;;  %v21_v23 = vld [vmem:[%s1833_s0 + $0x6] sm:$0x1]  ;;  %v22_v24 = vld [vmem:[%s1833_s0 + $0x7] sm:$0x1] }
   0x9   :  { %v1398_v25 = vld [vmem:[%s1832_s1 + $0x80] sm:$0xff]   ;;  %v1399_v26 = vld [vmem:[%s1832_s1 + $0x90] sm:$0xff]   ;;  %v1400_v27 = vld [vmem:[%s1832_s1 + $0x88] sm:$0xff]  }
   0xa   :  { %1257 = vmatmul.mubr.msk.bf16.vlgmr.msra.gmra.mrb[0].mxu0 %vm107_vm1, %v15_v5  ;;  %1265 = vmatmul.mubr.msk.bf16.vlgmr.msra.gmra.mrb[0].mxu1 %vm107_vm1, %v16_v6  ;;  %v1401_v28 = vld [vmem:[%s1832_s1 + $0x98] sm:$0xff]   ;;  %v23_v29 = vld [vmem:[%s1833_s0 + $0x8] sm:$0x1]  ;;  %v1402_v30 = vld [vmem:[%s1832_s1 + $0xa0] sm:$0xff]  }
   0xb   :  { %1269 = vmatpush3.bf16.msra.mxu0 %v1386_v7  ;;  %1277 = vmatpush3.bf16.msra.mxu1 %v1387_v8  ;;  %v24_v31 = vld [vmem:[%s1833_s0 + $0x9] sm:$0x1]  ;;  %v1403_v32 = vld [vmem:[%s1832_s1 + $0xb0] sm:$0xff]   ;;  %v1405_v34 = vld [vmem:[%s1832_s1 + $0xb8] sm:$0xff]  }
   0xc   :  { %1270 = vmatprep.subr.bf16.mxu0 %v1416_v0  ;;  %1278 = vmatprep.subr.bf16.mxu1 %v1416_v0  ;;  %v1404_v33 = vld [vmem:[%s1832_s1 + $0xa8] sm:$0xff]   ;;  %v1406_v36 = vld [vmem:[%s1832_s1 + $0xc0] sm:$0xff]   ;;  %v1407_v38 = vld [vmem:[%s1832_s1 + $0xd0] sm:$0xff]  }
   0xd   :  { %1272 = vmatprep.mubr.msk.bf16.mxu0 %vm1417_vm0, %v1416_v0  ;;  %1280 = vmatprep.mubr.msk.bf16.mxu1 %vm1417_vm0, %v1416_v0  ;;  %v25_v35 = vld [vmem:[%s1833_s0 + $0xa] sm:$0x1]  ;;  %v26_v37 = vld [vmem:[%s1833_s0 + $0xb] sm:$0x1]  ;;  %v1409_v40 = vld [vmem:[%s1832_s1 + $0xd8] sm:$0xff]  }
   0xe   :  { %v1408_v39 = vld [vmem:[%s1832_s1 + $0xc8] sm:$0xff]   ;;  %v1410_v42 = vld [vmem:[%s1832_s1 + $0xe0] sm:$0xff]   ;;  %v1411_v44 = vld [vmem:[%s1832_s1 + $0xf0] sm:$0xff]  }
   0xf   :  { %1271 = vmatpush3.bf16.msra.mxu0 %v1388_v9  ;;  %1279 = vmatpush3.bf16.msra.mxu1 %v1389_v10  ;;  %v27_v41 = vld [vmem:[%s1833_s0 + $0xc] sm:$0x1]  ;;  %v28_v43 = vld [vmem:[%s1833_s0 + $0xd] sm:$0x1]  ;;  %v1413_v46 = vld [vmem:[%s1832_s1 + $0xf8] sm:$0xff]  }
  0x10   :  { %1284 = vmatprep.subr.bf16.mxu0 %v1416_v0  ;;  %1292 = vmatprep.subr.bf16.mxu1 %v1416_v0  ;;  %v1412_v45 = vld [vmem:[%s1832_s1 + $0xe8] sm:$0xff]  }
  0x11   :  { %v29_v47 = vld [vmem:[%s1833_s0 + $0xe] sm:$0x1]  ;;  %v30_v48 = vld [vmem:[%s1833_s0 + $0xf] sm:$0x1] }
  0x12   :  { %1273 = vmatmul.mubr.msk.bf16.vlgmr.msra.gmra.mrb[4].mxu0 %vm107_vm1, %v17_v11  ;;  %1281 = vmatmul.mubr.msk.bf16.vlgmr.msra.gmra.mrb[4].mxu1 %vm107_vm1, %v18_v12 }
  0x13   :  { %1285 = vmatpush3.bf16.msra.mxu0 %v1390_v13  ;;  %1293 = vmatpush3.bf16.msra.mxu1 %v1391_v14 }
  0x14   :  { %1286 = vmatprep.subr.bf16.mxu0 %v1416_v0  ;;  %1294 = vmatprep.subr.bf16.mxu1 %v1416_v0 }
  0x15   :  { %1288 = vmatprep.mubr.msk.bf16.mxu0 %vm1417_vm0, %v1416_v0  ;;  %1296 = vmatprep.mubr.msk.bf16.mxu1 %vm1417_vm0, %v1416_v0 }
  0x17   :  { %1287 = vmatpush3.bf16.msra.mxu0 %v1392_v15  ;;  %1295 = vmatpush3.bf16.msra.mxu1 %v1393_v16 }
  0x18   :  { %1300 = vmatprep.subr.bf16.mxu0 %v1416_v0  ;;  %1308 = vmatprep.subr.bf16.mxu1 %v1416_v0 }
  0x1a   :  { %1289 = vmatmul.mubr.msk.bf16.vlgmr.msra.gmra.mrb[8].mxu0 %vm107_vm1, %v19_v17  ;;  %1297 = vmatmul.mubr.msk.bf16.vlgmr.msra.gmra.mrb[8].mxu1 %vm107_vm1, %v20_v18 }
  0x1b   :  { %1301 = vmatpush3.bf16.msra.mxu0 %v1394_v19  ;;  %1309 = vmatpush3.bf16.msra.mxu1 %v1395_v20 }
  0x1c   :  { %1302 = vmatprep.subr.bf16.mxu0 %v1416_v0  ;;  %1310 = vmatprep.subr.bf16.mxu1 %v1416_v0 }
  0x1d   :  { %1304 = vmatprep.mubr.msk.bf16.mxu0 %vm1417_vm0, %v1416_v0  ;;  %1312 = vmatprep.mubr.msk.bf16.mxu1 %vm1417_vm0, %v1416_v0 }
  0x1f   :  { %1303 = vmatpush3.bf16.msra.mxu0 %v1396_v21  ;;  %1311 = vmatpush3.bf16.msra.mxu1 %v1397_v22 }
  0x20   :  { %1316 = vmatprep.subr.bf16.mxu0 %v1416_v0  ;;  %1324 = vmatprep.subr.bf16.mxu1 %v1416_v0 }
  0x22   :  { %1305 = vmatmul.mubr.msk.bf16.vlgmr.msra.gmra.mrb[12].mxu0 %vm107_vm1, %v21_v23  ;;  %1313 = vmatmul.mubr.msk.bf16.vlgmr.msra.gmra.mrb[12].mxu1 %vm107_vm1, %v22_v24 }
  0x23   :  { %1317 = vmatpush3.bf16.msra.mxu0 %v1398_v25  ;;  %1325 = vmatpush3.bf16.msra.mxu1 %v1399_v26 }
  0x24   :  { %1318 = vmatprep.subr.bf16.mxu0 %v1416_v0  ;;  %1326 = vmatprep.subr.bf16.mxu1 %v1416_v0 }
  0x25   :  { %1320 = vmatprep.mubr.msk.bf16.mxu0 %vm1417_vm0, %v1416_v0  ;;  %1328 = vmatprep.mubr.msk.bf16.mxu1 %vm1417_vm0, %v1416_v0 }
  0x27   :  { %1319 = vmatpush3.bf16.msra.mxu0 %v1400_v27  ;;  %1327 = vmatpush3.bf16.msra.mxu1 %v1401_v28 }
  0x28   :  { %1332 = vmatprep.subr.bf16.mxu0 %v1416_v0  ;;  %1340 = vmatprep.subr.bf16.mxu1 %v1416_v0 }
  0x2a   :  { %1321 = vmatmul.mubr.msk.bf16.vlgmr.msra.gmra.mrb[16].mxu0 %vm107_vm1, %v23_v29  ;;  %1329 = vmatmul.mubr.msk.bf16.vlgmr.msra.gmra.mrb[16].mxu1 %vm107_vm1, %v24_v31 }
  0x2b   :  { %1333 = vmatpush3.bf16.msra.mxu0 %v1402_v30  ;;  %1341 = vmatpush3.bf16.msra.mxu1 %v1403_v32 }
  0x2c   :  { %1334 = vmatprep.subr.bf16.mxu0 %v1416_v0  ;;  %1342 = vmatprep.subr.bf16.mxu1 %v1416_v0 }
  0x2d   :  { %1336 = vmatprep.mubr.msk.bf16.mxu0 %vm1417_vm0, %v1416_v0  ;;  %1344 = vmatprep.mubr.msk.bf16.mxu1 %vm1417_vm0, %v1416_v0 }
  0x2f   :  { %1335 = vmatpush3.bf16.msra.mxu0 %v1404_v33  ;;  %1343 = vmatpush3.bf16.msra.mxu1 %v1405_v34 }
  0x30   :  { %1348 = vmatprep.subr.bf16.mxu0 %v1416_v0  ;;  %1356 = vmatprep.subr.bf16.mxu1 %v1416_v0 }
  0x32   :  { %1337 = vmatmul.mubr.msk.bf16.vlgmr.msra.gmra.mrb[20].mxu0 %vm107_vm1, %v25_v35  ;;  %1345 = vmatmul.mubr.msk.bf16.vlgmr.msra.gmra.mrb[20].mxu1 %vm107_vm1, %v26_v37 }
  0x33   :  { %1349 = vmatpush3.bf16.msra.mxu0 %v1406_v36  ;;  %1357 = vmatpush3.bf16.msra.mxu1 %v1407_v38 }
  0x34   :  { %1350 = vmatprep.subr.bf16.mxu0 %v1416_v0  ;;  %1358 = vmatprep.subr.bf16.mxu1 %v1416_v0 }
  0x35   :  { %1352 = vmatprep.mubr.msk.bf16.mxu0 %vm1417_vm0, %v1416_v0  ;;  %1360 = vmatprep.mubr.msk.bf16.mxu1 %vm1417_vm0, %v1416_v0 }
  0x37   :  { %1351 = vmatpush3.bf16.msra.mxu0 %v1408_v39  ;;  %1359 = vmatpush3.bf16.msra.mxu1 %v1409_v40 }
  0x38   :  { %1364 = vmatprep.subr.bf16.mxu0 %v1416_v0  ;;  %1372 = vmatprep.subr.bf16.mxu1 %v1416_v0 }
  0x3a   :  { %1353 = vmatmul.mubr.msk.bf16.vlgmr.msra.gmra.mrb[24].mxu0 %vm107_vm1, %v27_v41  ;;  %1361 = vmatmul.mubr.msk.bf16.vlgmr.msra.gmra.mrb[24].mxu1 %vm107_vm1, %v28_v43 }
  0x3b   :  { %1365 = vmatpush3.bf16.msra.mxu0 %v1410_v42  ;;  %1373 = vmatpush3.bf16.msra.mxu1 %v1411_v44 }
  0x3c   :  { %1366 = vmatprep.subr.bf16.mxu0 %v1416_v0  ;;  %1374 = vmatprep.subr.bf16.mxu1 %v1416_v0 }
  0x3d   :  { %1368 = vmatprep.mubr.msk.bf16.mxu0 %vm1417_vm0, %v1416_v0  ;;  %1376 = vmatprep.mubr.msk.bf16.mxu1 %vm1417_vm0, %v1416_v0 }
  0x3f   :  { %1367 = vmatpush3.bf16.msra.mxu0 %v1412_v45  ;;  %1375 = vmatpush3.bf16.msra.mxu1 %v1413_v46 }
  0x42   :  { %1369 = vmatmul.mubr.msk.bf16.vlgmr.msra.gmra.mrb[28].mxu0 %vm107_vm1, %v29_v47  ;;  %1377 = vmatmul.mubr.msk.bf16.vlgmr.msra.gmra.mrb[28].mxu1 %vm107_vm1, %v30_v48 }
  0xdd   :  { %v1662_v49 = vpop.f32.mrb[0].mxu0  ;;  %v1668_v52 = vpop.f32.mrb[0].mxu1 }
  0xde   :  { %v977_v50 = vsel %vm976_vm2, %v1662_v49, 0.0  ;;  %v1016_v51 = vmul.f32 %v1662_v49, %v1662_v49  ;;  %v1258_v53 = vpop.f32.mrb[1].mxu0  ;;  %v978_v54 = vsel %vm976_vm2, %v1668_v52, 0.0  ;;  %v1017_v55 = vmul.f32 %v1668_v52, %v1668_v52  ;;  %v1266_v56 = vpop.f32.mrb[1].mxu1 }
  0xdf   :  { %v148_v57 = vpop.f32.mrb[2].mxu0  ;;  %v979_v59 = vadd.f32 %v978_v54, %v977_v50  ;;  %v203_v60 = vpop.f32.mrb[2].mxu1 }
  0xe0   :  { %v1032_v58 = vsel %vm976_vm2, %v1016_v51, 0.0  ;;  %v1259_v61 = vpop.f32.mrb[3].mxu0  ;;  %v1033_v62 = vsel %vm976_vm2, %v1017_v55, 0.0  ;;  %v1267_v63 = vpop.f32.mrb[3].mxu1 }
  0xe1   :  { %v1034_v0 = vadd.f32 %v1033_v62, %v1032_v58 }
  0xe5   :  { %v1676_v1 = vpop.f32.mrb[4].mxu0  ;;  %v1682_v4 = vpop.f32.mrb[4].mxu1 }
  0xe6   :  { %v980_v2 = vsel %vm976_vm2, %v1676_v1, 0.0  ;;  %v1018_v3 = vmul.f32 %v1676_v1, %v1676_v1  ;;  %v1274_v5 = vpop.f32.mrb[5].mxu0  ;;  %v982_v7 = vsel %vm976_vm2, %v1682_v4, 0.0  ;;  %v1019_v8 = vmul.f32 %v1682_v4, %v1682_v4  ;;  %v1282_v9 = vpop.f32.mrb[5].mxu1 }
  0xe7   :  { %v981_v6 = vadd.f32 %v980_v2, %v979_v59  ;;  %v258_v10 = vpop.f32.mrb[6].mxu0  ;;  %v313_v12 = vpop.f32.mrb[6].mxu1 }
  0xe8   :  { %v1035_v11 = vsel %vm976_vm2, %v1018_v3, 0.0  ;;  %v1275_v13 = vpop.f32.mrb[7].mxu0  ;;  %v1037_v16 = vsel %vm976_vm2, %v1019_v8, 0.0  ;;  %v1283_v17 = vpop.f32.mrb[7].mxu1 }
  0xe9   :  { %v1036_v14 = vadd.f32 %v1035_v11, %v1034_v0  ;;  %v983_v15 = vadd.f32 %v982_v7, %v981_v6 }
  0xeb   :  { %v1038_v18 = vadd.f32 %v1037_v16, %v1036_v14 }
  0xed   :  { %v1690_v19 = vpop.f32.mrb[8].mxu0  ;;  %v1696_v22 = vpop.f32.mrb[8].mxu1 }
  0xee   :  { %v984_v20 = vsel %vm976_vm2, %v1690_v19, 0.0  ;;  %v1020_v21 = vmul.f32 %v1690_v19, %v1690_v19  ;;  %v1290_v23 = vpop.f32.mrb[9].mxu0  ;;  %v986_v25 = vsel %vm976_vm2, %v1696_v22, 0.0  ;;  %v1021_v26 = vmul.f32 %v1696_v22, %v1696_v22  ;;  %v1298_v27 = vpop.f32.mrb[9].mxu1 }
  0xef   :  { %v985_v24 = vadd.f32 %v984_v20, %v983_v15  ;;  %v368_v28 = vpop.f32.mrb[10].mxu0  ;;  %v423_v30 = vpop.f32.mrb[10].mxu1 }
  0xf0   :  { %v1039_v29 = vsel %vm976_vm2, %v1020_v21, 0.0  ;;  %v1291_v31 = vpop.f32.mrb[11].mxu0  ;;  %v1041_v34 = vsel %vm976_vm2, %v1021_v26, 0.0  ;;  %v1299_v35 = vpop.f32.mrb[11].mxu1 }
  0xf1   :  { %v1040_v32 = vadd.f32 %v1039_v29, %v1038_v18  ;;  %v987_v33 = vadd.f32 %v986_v25, %v985_v24 }
  0xf3   :  { %v1042_v36 = vadd.f32 %v1041_v34, %v1040_v32 }
  0xf5   :  { %v1704_v37 = vpop.f32.mrb[12].mxu0  ;;  %v1710_v40 = vpop.f32.mrb[12].mxu1 }
  0xf6   :  { %v988_v38 = vsel %vm976_vm2, %v1704_v37, 0.0  ;;  %v1022_v39 = vmul.f32 %v1704_v37, %v1704_v37  ;;  %v1306_v41 = vpop.f32.mrb[13].mxu0  ;;  %v990_v43 = vsel %vm976_vm2, %v1710_v40, 0.0  ;;  %v1023_v44 = vmul.f32 %v1710_v40, %v1710_v40  ;;  %v1314_v45 = vpop.f32.mrb[13].mxu1 }
  0xf7   :  { %v989_v42 = vadd.f32 %v988_v38, %v987_v33  ;;  %v478_v46 = vpop.f32.mrb[14].mxu0  ;;  %v533_v48 = vpop.f32.mrb[14].mxu1 }
  0xf8   :  { %v1043_v47 = vsel %vm976_vm2, %v1022_v39, 0.0  ;;  %v1307_v50 = vpop.f32.mrb[15].mxu0  ;;  %v1045_v54 = vsel %vm976_vm2, %v1023_v44, 0.0  ;;  %v1315_v55 = vpop.f32.mrb[15].mxu1 }
  0xf9   :  { %v1044_v51 = vadd.f32 %v1043_v47, %v1042_v36  ;;  %v991_v53 = vadd.f32 %v990_v43, %v989_v42 }
  0xfb   :  { %v1046_v56 = vadd.f32 %v1045_v54, %v1044_v51 }
  0xfd   :  { %v1718_v57 = vpop.f32.mrb[16].mxu0  ;;  %v1724_v60 = vpop.f32.mrb[16].mxu1 }
  0xfe   :  { %v992_v58 = vsel %vm976_vm2, %v1718_v57, 0.0  ;;  %v1024_v59 = vmul.f32 %v1718_v57, %v1718_v57  ;;  %v1322_v61 = vpop.f32.mrb[17].mxu0  ;;  %v994_v63 = vsel %vm976_vm2, %v1724_v60, 0.0  ;;  %v1025_v0 = vmul.f32 %v1724_v60, %v1724_v60  ;;  %v1330_v2 = vpop.f32.mrb[17].mxu1 }
  0xff   :  { %v993_v62 = vadd.f32 %v992_v58, %v991_v53  ;;  %v588_v3 = vpop.f32.mrb[18].mxu0  ;;  %v643_v6 = vpop.f32.mrb[18].mxu1 }
 0x100   :  { %v1047_v5 = vsel %vm976_vm2, %v1024_v59, 0.0  ;;  %v1323_v7 = vpop.f32.mrb[19].mxu0  ;;  %v1049_v10 = vsel %vm976_vm2, %v1025_v0, 0.0  ;;  %v1331_v11 = vpop.f32.mrb[19].mxu1 }
 0x101   :  { %v1048_v8 = vadd.f32 %v1047_v5, %v1046_v56  ;;  %v995_v9 = vadd.f32 %v994_v63, %v993_v62 }
 0x103   :  { %v1050_v12 = vadd.f32 %v1049_v10, %v1048_v8 }
 0x105   :  { %v1732_v13 = vpop.f32.mrb[20].mxu0  ;;  %v1738_v16 = vpop.f32.mrb[20].mxu1 }
 0x106   :  { %v996_v14 = vsel %vm976_vm2, %v1732_v13, 0.0  ;;  %v1026_v15 = vmul.f32 %v1732_v13, %v1732_v13  ;;  %v1338_v17 = vpop.f32.mrb[21].mxu0  ;;  %v998_v20 = vsel %vm976_vm2, %v1738_v16, 0.0  ;;  %v1027_v21 = vmul.f32 %v1738_v16, %v1738_v16  ;;  %v1346_v23 = vpop.f32.mrb[21].mxu1 }
 0x107   :  { %v997_v18 = vadd.f32 %v996_v14, %v995_v9  ;;  %v698_v24 = vpop.f32.mrb[22].mxu0  ;;  %v753_v26 = vpop.f32.mrb[22].mxu1 }
 0x108   :  { %v1051_v25 = vsel %vm976_vm2, %v1026_v15, 0.0  ;;  %v1339_v27 = vpop.f32.mrb[23].mxu0  ;;  %v1053_v30 = vsel %vm976_vm2, %v1027_v21, 0.0  ;;  %v1347_v31 = vpop.f32.mrb[23].mxu1 }
 0x109   :  { %v1052_v28 = vadd.f32 %v1051_v25, %v1050_v12  ;;  %v999_v29 = vadd.f32 %v998_v20, %v997_v18 }
 0x10b   :  { %v1054_v32 = vadd.f32 %v1053_v30, %v1052_v28 }
 0x10d   :  { %v1746_v33 = vpop.f32.mrb[24].mxu0  ;;  %v1752_v36 = vpop.f32.mrb[24].mxu1 }
 0x10e   :  { %v1000_v34 = vsel %vm976_vm2, %v1746_v33, 0.0  ;;  %v1028_v35 = vmul.f32 %v1746_v33, %v1746_v33  ;;  %v1354_v38 = vpop.f32.mrb[25].mxu0  ;;  %v1002_v41 = vsel %vm976_vm2, %v1752_v36, 0.0  ;;  %v1029_v42 = vmul.f32 %v1752_v36, %v1752_v36  ;;  %v1362_v43 = vpop.f32.mrb[25].mxu1 }
 0x10f   :  { %v1001_v39 = vadd.f32 %v1000_v34, %v999_v29  ;;  %v808_v44 = vpop.f32.mrb[26].mxu0  ;;  %v863_v46 = vpop.f32.mrb[26].mxu1  ;;  %v1080_v38 = vlaneseq }
 0x110   :  { %v1055_v45 = vsel %vm976_vm2, %v1028_v35, 0.0  ;;  %v1355_v47 = vpop.f32.mrb[27].mxu0  ;;  %v1057_v51 = vsel %vm976_vm2, %v1029_v42, 0.0  ;;  %v1363_v53 = vpop.f32.mrb[27].mxu1 }
 0x111   :  { %v1056_v48 = vadd.f32 %v1055_v45, %v1054_v32  ;;  %v1003_v50 = vadd.f32 %v1002_v41, %v1001_v39  ;;  %v1081_v39 = vshrl.u32 %v1080_v38, 7  ;;  %v1073_v41 = vld [vmem:[%s1834_s2] sm:$0x1]  ;;  %v1077_v45 = vld [vmem:[%s1834_s2 + $0x1] sm:$0x1] }
 0x113   :  { %v1058_v54 = vadd.f32 %v1057_v51, %v1056_v48  ;;  %v1082_v42 = vsub.s32 0, %v1081_v39 }
 0x115   :  { %v915_v55 = vpop.f32.mrb[28].mxu0  ;;  %v970_v59 = vpop.f32.mrb[28].mxu1 }
 0x116   :  { %v1004_v56 = vsel %vm976_vm2, %v915_v55, 0.0  ;;  %v1030_v58 = vmul.f32 %v915_v55, %v915_v55  ;;  %v1370_v61 = vpop.f32.mrb[29].mxu0  ;;  %v1006_v63 = vsel %vm976_vm2, %v970_v59, 0.0  ;;  %v1031_v0 = vmul.f32 %v970_v59, %v970_v59  ;;  %v1378_v2 = vpop.f32.mrb[29].mxu1 }
 0x117   :  { %v1005_v62 = vadd.f32 %v1004_v56, %v1003_v50  ;;  %v918_v3 = vpop.f32.mrb[30].mxu0  ;;  %v973_v6 = vpop.f32.mrb[30].mxu1 }
 0x118   :  { %v1059_v5 = vsel %vm976_vm2, %v1030_v58, 0.0  ;;  %v1371_v7 = vpop.f32.mrb[31].mxu0  ;;  %v1061_v10 = vsel %vm976_vm2, %v1031_v0, 0.0  ;;  %v1379_v11 = vpop.f32.mrb[31].mxu1 }
 0x119   :  { %v1060_v8 = vadd.f32 %v1059_v5, %v1058_v54  ;;  %v1007_v9 = vadd.f32 %v1006_v63, %v1005_v62 }
 0x11b   :  { %v1008_v12 = vrot.slane %v1007_v9, 4  ;;  %v1062_v14 = vadd.f32 %v1061_v10, %v1060_v8 }
 0x11d   :  { %v1009_v15 = vadd.f32 %v1008_v12, %v1007_v9  ;;  %v1063_v17 = vrot.slane %v1062_v14, 4 }
 0x11f   :  { %v1010_v18 = vrot.slane %v1009_v15, 2  ;;  %v1064_v20 = vadd.f32 %v1063_v17, %v1062_v14 }
 0x121   :  { %v1011_v21 = vadd.f32 %v1010_v18, %v1009_v15  ;;  %v1065_v23 = vrot.slane %v1064_v20, 2 }
 0x123   :  { %v1012_v24 = vrot.slane %v1011_v21, 1  ;;  %v1066_v25 = vadd.f32 %v1065_v23, %v1064_v20 }
 0x125   :  { %v1013_v26 = vadd.f32 %v1012_v24, %v1011_v21  ;;  %v1067_v27 = vrot.slane %v1066_v25, 1 }
 0x127   :  { %v1015_v28 = vmul.f32 0.03125, %v1013_v26  ;;  %v1068_v29 = vadd.f32 %v1067_v27, %v1066_v25 }
 0x129   :  { %v1069_v30 = vmul.f32 0.03125, %v1068_v29  ;;  %v1070_v31 = vmul.f32 %v1015_v28, %v1015_v28 }
 0x12b   :  { %v1071_v32 = vsub.f32 %v1069_v30, %v1070_v31 }
 0x12d   :  { %v1072_v34 = vmax.f32 %v1071_v32, 0.0 }
 0x12f   :  { %v1074_v35 = vadd.f32 1e-05, %v1072_v34 }
 0x131   :  { %1414 = vrsqrt.f32 %v1074_v35 }
 0x13b   :  { %v1415_v43 = vpop.eup %1414 }
 0x13c   :  { %v1076_v44 = vmul.f32 %v1415_v43, %v1073_v41 }
 0x13e   :  { %v1078_v46 = vmul.f32 %v1076_v44, %v1015_v28  ;;  %v1083_v47 = vrot.slane %v1076_v44, %v1082_v42 }
 0x140   :  { %v1079_v48 = vsub.f32 %v1077_v45, %v1078_v46  ;;  %v1084_v50 = vmul.f32 %v1083_v47, %v1662_v49  ;;  %v1085_v51 = vmul.f32 %v1083_v47, %v1668_v52  ;;  %v1086_v53 = vmul.f32 %v1083_v47, %v1676_v1 }
 0x141   :  { %v1087_v54 = vmul.f32 %v1083_v47, %v1682_v4  ;;  %v1088_v56 = vmul.f32 %v1083_v47, %v1690_v19  ;;  %v1089_v58 = vmul.f32 %v1083_v47, %v1696_v22  ;;  %v1090_v61 = vmul.f32 %v1083_v47, %v1704_v37 }
 0x142   :  { %v1091_v62 = vmul.f32 %v1083_v47, %v1710_v40  ;;  %v1092_v63 = vmul.f32 %v1083_v47, %v1718_v57  ;;  %v1093_v0 = vmul.f32 %v1083_v47, %v1724_v60  ;;  %v1094_v49 = vmul.f32 %v1083_v47, %v1732_v13 }
 0x143   :  { %v1095_v52 = vmul.f32 %v1083_v47, %v1738_v16  ;;  %v1096_v1 = vmul.f32 %v1083_v47, %v1746_v33  ;;  %v1097_v4 = vmul.f32 %v1083_v47, %v1752_v36  ;;  %v1098_v2 = vmul.f32 %v1083_v47, %v915_v55 }
 0x144   :  { %v1099_v19 = vmul.f32 %v1083_v47, %v970_v59  ;;  %v1103_v3 = vrot.slane %v1079_v48, %v1082_v42 }
 0x146   :  { %v1104_v22 = vadd.f32 %v1103_v3, %v1084_v50  ;;  %v1105_v5 = vadd.f32 %v1103_v3, %v1085_v51  ;;  %v1106_v37 = vadd.f32 %v1103_v3, %v1086_v53  ;;  %v1107_v6 = vadd.f32 %v1103_v3, %v1087_v54 }
 0x147   :  { %v1108_v40 = vadd.f32 %v1103_v3, %v1088_v56  ;;  %v1109_v7 = vadd.f32 %v1103_v3, %v1089_v58  ;;  %v1110_v57 = vadd.f32 %v1103_v3, %v1090_v61  ;;  %v1111_v8 = vadd.f32 %v1103_v3, %v1091_v62 }
 0x148   :  { %v1112_v60 = vadd.f32 %v1103_v3, %v1092_v63  ;;  %v1113_v9 = vadd.f32 %v1103_v3, %v1093_v0  ;;  %v1114_v13 = vadd.f32 %v1103_v3, %v1094_v49  ;;  %v1115_v10 = vadd.f32 %v1103_v3, %v1095_v52 }
 0x149   :  { %v1116_v16 = vadd.f32 %v1103_v3, %v1096_v1  ;;  %v1117_v11 = vadd.f32 %v1103_v3, %v1097_v4  ;;  %v1118_v33 = vadd.f32 %v1103_v3, %v1098_v2  ;;  %v1119_v12 = vadd.f32 %v1103_v3, %v1099_v19 }
 0x14a   :  { %v1120_v36 = vmax.f32 %v1104_v22, 0.0  ;;  %v1121_v55 = vmax.f32 %v1105_v5, 0.0  ;;  %v1122_v59 = vmax.f32 %v1106_v37, 0.0  ;;  %v1123_v14 = vmax.f32 %v1107_v6, 0.0 }
 0x14b   :  { %v1124_v15 = vmax.f32 %v1108_v40, 0.0  ;;  %v1125_v17 = vmax.f32 %v1109_v7, 0.0  ;;  %v1126_v18 = vmax.f32 %v1110_v57, 0.0  ;;  %v1127_v20 = vmax.f32 %v1111_v8, 0.0 }
 0x14c   :  { %v1128_v21 = vmax.f32 %v1112_v60, 0.0  ;;  %v1129_v23 = vmax.f32 %v1113_v9, 0.0  ;;  %v1130_v24 = vmax.f32 %v1114_v13, 0.0  ;;  %v1131_v25 = vmax.f32 %v1115_v10, 0.0  ;;  %1136 = vst [vmem:[%s1835_s3] sm:$0x3] %v1120_v36 }
 0x14d   :  { %1137 = vst [vmem:[%s1835_s3 + $0x2] sm:$0x3] %v1121_v55  ;;  %1138 = vst [vmem:[%s1835_s3 + $0x4] sm:$0x3] %v1122_v59  ;;  %v1132_v26 = vmax.f32 %v1116_v16, 0.0  ;;  %v1133_v27 = vmax.f32 %v1117_v11, 0.0 }
 0x14e   :  { %1139 = vst [vmem:[%s1835_s3 + $0x6] sm:$0x3] %v1123_v14  ;;  %v1134_v28 = vmax.f32 %v1118_v33, 0.0  ;;  %v1135_v29 = vmax.f32 %v1119_v12, 0.0  ;;  %1140 = vst [vmem:[%s1835_s3 + $0x8] sm:$0x3] %v1124_v15 }
 0x14f   :  { %1141 = vst [vmem:[%s1835_s3 + $0xa] sm:$0x3] %v1125_v17  ;;  %1142 = vst [vmem:[%s1835_s3 + $0xc] sm:$0x3] %v1126_v18 }
 0x150   :  { %1143 = vst [vmem:[%s1835_s3 + $0xe] sm:$0x3] %v1127_v20  ;;  %1144 = vst [vmem:[%s1835_s3 + $0x10] sm:$0x3] %v1128_v21 }
 0x151   :  { %1145 = vst [vmem:[%s1835_s3 + $0x12] sm:$0x3] %v1129_v23  ;;  %1146 = vst [vmem:[%s1835_s3 + $0x14] sm:$0x3] %v1130_v24 }
 0x152   :  { %1147 = vst [vmem:[%s1835_s3 + $0x16] sm:$0x3] %v1131_v25  ;;  %1148 = vst [vmem:[%s1835_s3 + $0x18] sm:$0x3] %v1132_v26 }
 0x153   :  { %1149 = vst [vmem:[%s1835_s3 + $0x1a] sm:$0x3] %v1133_v27  ;;  %1150 = vst [vmem:[%s1835_s3 + $0x1c] sm:$0x3] %v1134_v28 }
 0x154   :  { %1151 = vst [vmem:[%s1835_s3 + $0x1e] sm:$0x3] %v1135_v29 }

// kernel: gen_nn_ske_to_image.6
= control target key start
LH: loop header
LB: loop body
LE: loop exit
PB: predicated region body
PF: predicated region fallthrough
CT: control target
= control target key end

     0   :  { %vm1623_vm0 = vcmask 523264   ;;  %s3051_s1 = inlined_call_operand.vmem [shape: bf16[4,512,64], index: 1, kind: input, shape index: {}]   ;;  %s3052_s0 = inlined_call_operand.vmem [shape: bf16[4,32,512], index: 0, kind: input, shape index: {}]   ;;  %s3053_s2 = inlined_call_operand.vmem [shape: f32[2,64], index: 2, kind: input, shape index: {}]   ;;  %s3054_s3 = inlined_call_operand.vmem [shape: f32[4,32,64], index: 3, kind: output, shape index: {}]  }
   0x1   :  { %v2187_v0 = vld [vmem:[%s3051_s1 + $0x40] sm:$0xff]   ;;  %v2191_v4 = vld [vmem:[%s3051_s1 + $0x48] sm:$0xff]   ;;  %v2195_v8 = vld [vmem:[%s3051_s1 + $0x50] sm:$0xff]  }
   0x2   :  { %v2188_v1 = vld [vmem:[%s3051_s1 + $0xc0] sm:$0xff]   ;;  %1963 = vmatprep.subr.bf16.mxu0 %v2187_v0  ;;  %v2192_v5 = vld [vmem:[%s3051_s1 + $0xc8] sm:$0xff]   ;;  %v2196_v9 = vld [vmem:[%s3051_s1 + $0xd0] sm:$0xff]  }
   0x3   :  { %v2189_v2 = vld [vmem:[%s3051_s1] sm:$0xff]   ;;  %1991 = vmatprep.subr.bf16.mxu1 %v2188_v1  ;;  %v2193_v6 = vld [vmem:[%s3051_s1 + $0x8] sm:$0xff]   ;;  %v2197_v10 = vld [vmem:[%s3051_s1 + $0x10] sm:$0xff]  }
   0x4   :  { %v2190_v3 = vld [vmem:[%s3051_s1 + $0x80] sm:$0xff]   ;;  %1964 = vmatpush3.bf16.msra.mxu0 %v2189_v2  ;;  %v2194_v7 = vld [vmem:[%s3051_s1 + $0x88] sm:$0xff]   ;;  %v2198_v11 = vld [vmem:[%s3051_s1 + $0x90] sm:$0xff]  }
   0x5   :  { %1992 = vmatpush3.bf16.msra.mxu1 %v2190_v3  ;;  %1965 = vmatprep.subr.bf16.mxu0 %v2191_v4  ;;  %v2199_v12 = vld [vmem:[%s3051_s1 + $0x58] sm:$0xff]   ;;  %v2203_v16 = vld [vmem:[%s3051_s1 + $0x60] sm:$0xff]   ;;  %v2207_v20 = vld [vmem:[%s3051_s1 + $0x68] sm:$0xff]  }
   0x6   :  { %1993 = vmatprep.subr.bf16.mxu1 %v2192_v5  ;;  %v2200_v13 = vld [vmem:[%s3051_s1 + $0xd8] sm:$0xff]   ;;  %v2204_v17 = vld [vmem:[%s3051_s1 + $0xe0] sm:$0xff]   ;;  %v2208_v21 = vld [vmem:[%s3051_s1 + $0xe8] sm:$0xff]  }
   0x7   :  { %v2201_v14 = vld [vmem:[%s3051_s1 + $0x18] sm:$0xff]   ;;  %v2205_v18 = vld [vmem:[%s3051_s1 + $0x20] sm:$0xff]   ;;  %v2209_v22 = vld [vmem:[%s3051_s1 + $0x28] sm:$0xff]  }
   0x8   :  { %1966 = vmatpush3.bf16.msra.mxu0 %v2193_v6  ;;  %v2202_v15 = vld [vmem:[%s3051_s1 + $0x98] sm:$0xff]   ;;  %v2206_v19 = vld [vmem:[%s3051_s1 + $0xa0] sm:$0xff]   ;;  %v2210_v23 = vld [vmem:[%s3051_s1 + $0xa8] sm:$0xff]  }
   0x9   :  { %1994 = vmatpush3.bf16.msra.mxu1 %v2194_v7  ;;  %1967 = vmatprep.subr.bf16.mxu0 %v2195_v8  ;;  %v2211_v24 = vld [vmem:[%s3051_s1 + $0x70] sm:$0xff]   ;;  %v2215_v28 = vld [vmem:[%s3051_s1 + $0x78] sm:$0xff]   ;;  %v2225_v36 = vld [vmem:[%s3051_s1 + $0x140] sm:$0xff]  }
   0xa   :  { %1995 = vmatprep.subr.bf16.mxu1 %v2196_v9  ;;  %v2212_v25 = vld [vmem:[%s3051_s1 + $0xf0] sm:$0xff]   ;;  %v2216_v29 = vld [vmem:[%s3051_s1 + $0xf8] sm:$0xff]   ;;  %v2226_v37 = vld [vmem:[%s3051_s1 + $0x1c0] sm:$0xff]  }
   0xb   :  { %v2213_v26 = vld [vmem:[%s3051_s1 + $0x30] sm:$0xff]   ;;  %v2217_v30 = vld [vmem:[%s3051_s1 + $0x38] sm:$0xff]   ;;  %v2227_v38 = vld [vmem:[%s3051_s1 + $0x100] sm:$0xff]  }
   0xc   :  { %1968 = vmatpush3.bf16.msra.mxu0 %v2197_v10  ;;  %v2214_v27 = vld [vmem:[%s3051_s1 + $0xb0] sm:$0xff]   ;;  %v2218_v31 = vld [vmem:[%s3051_s1 + $0xb8] sm:$0xff]   ;;  %v2228_v39 = vld [vmem:[%s3051_s1 + $0x180] sm:$0xff]  }
   0xd   :  { %1996 = vmatpush3.bf16.msra.mxu1 %v2198_v11  ;;  %1969 = vmatprep.subr.bf16.mxu0 %v2199_v12  ;;  %v2219_v32 = vld [vmem:[%s3052_s0] ss:$16 sps:$4 sm:$0xff]   ;;  %v2221_v33 = vld [vmem:[%s3052_s0 + $0x4] ss:$16 sps:$4 sm:$0xff]   ;;  %v2222_v34 = vld [vmem:[%s3052_s0 + $0x8] ss:$16 sps:$4 sm:$0xff]  }
   0xe   :  { %1997 = vmatprep.subr.bf16.mxu1 %v2200_v13  ;;  %v2224_v35 = vld [vmem:[%s3052_s0 + $0xc] ss:$16 sps:$4 sm:$0xff]   ;;  %567 = vmatprep.mubr.bf16.mxu0 %v2221_v33  ;;  %v2233_v44 = vld [vmem:[%s3052_s0 + $0x24] ss:$16 sps:$4 sm:$0xff]   ;;  %v2237_v46 = vld [vmem:[%s3052_s0 + $0x20] ss:$16 sps:$4 sm:$0xff]  }
   0xf   :  { %616 = vmatprep.mubr.bf16.mxu1 %v2224_v35  ;;  %v2229_v40 = vld [vmem:[%s3051_s1 + $0x148] sm:$0xff]   ;;  %v2239_v48 = vld [vmem:[%s3051_s1 + $0x150] sm:$0xff]   ;;  %v2243_v52 = vld [vmem:[%s3051_s1 + $0x158] sm:$0xff]  }
  0x10   :  { %1970 = vmatpush3.bf16.msra.mxu0 %v2201_v14  ;;  %v2230_v41 = vld [vmem:[%s3051_s1 + $0x1c8] sm:$0xff]   ;;  %v2240_v49 = vld [vmem:[%s3051_s1 + $0x1d0] sm:$0xff]   ;;  %v2244_v53 = vld [vmem:[%s3051_s1 + $0x1d8] sm:$0xff]  }
  0x11   :  { %1998 = vmatpush3.bf16.msra.mxu1 %v2202_v15  ;;  %1971 = vmatprep.subr.bf16.mxu0 %v2203_v16  ;;  %v2231_v42 = vld [vmem:[%s3051_s1 + $0x108] sm:$0xff]   ;;  %v2241_v50 = vld [vmem:[%s3051_s1 + $0x110] sm:$0xff]   ;;  %v2245_v54 = vld [vmem:[%s3051_s1 + $0x118] sm:$0xff]  }
  0x12   :  { %1999 = vmatprep.subr.bf16.mxu1 %v2204_v17  ;;  %v2232_v43 = vld [vmem:[%s3051_s1 + $0x188] sm:$0xff]   ;;  %v2242_v51 = vld [vmem:[%s3051_s1 + $0x190] sm:$0xff]   ;;  %v2246_v55 = vld [vmem:[%s3051_s1 + $0x198] sm:$0xff]  }
  0x13   :  { %v2235_v45 = vld [vmem:[%s3052_s0 + $0x2c] ss:$16 sps:$4 sm:$0xff]   ;;  %v2238_v47 = vld [vmem:[%s3052_s0 + $0x28] ss:$16 sps:$4 sm:$0xff]   ;;  %v2247_v56 = vld [vmem:[%s3051_s1 + $0x160] sm:$0xff]  }
  0x14   :  { %1972 = vmatpush3.bf16.msra.mxu0 %v2205_v18  ;;  %v2248_v57 = vld [vmem:[%s3051_s1 + $0x1e0] sm:$0xff]   ;;  %v2251_v60 = vld [vmem:[%s3051_s1 + $0x168] sm:$0xff]   ;;  %v2255_v0 = vld [vmem:[%s3051_s1 + $0x170] sm:$0xff]  }
  0x15   :  { %2000 = vmatpush3.bf16.msra.mxu1 %v2206_v19  ;;  %1973 = vmatprep.subr.bf16.mxu0 %v2207_v20  ;;  %v2249_v58 = vld [vmem:[%s3051_s1 + $0x120] sm:$0xff]   ;;  %v2252_v61 = vld [vmem:[%s3051_s1 + $0x1e8] sm:$0xff]   ;;  %v2256_v1 = vld [vmem:[%s3051_s1 + $0x1f0] sm:$0xff]  }
  0x16   :  { %2001 = vmatprep.subr.bf16.mxu1 %v2208_v21  ;;  %v2250_v59 = vld [vmem:[%s3051_s1 + $0x1a0] sm:$0xff]   ;;  %v2253_v62 = vld [vmem:[%s3051_s1 + $0x128] sm:$0xff]   ;;  %v2257_v2 = vld [vmem:[%s3051_s1 + $0x130] sm:$0xff]  }
  0x17   :  { %v2254_v63 = vld [vmem:[%s3051_s1 + $0x1a8] sm:$0xff]   ;;  %v2258_v3 = vld [vmem:[%s3051_s1 + $0x1b0] sm:$0xff]   ;;  %v2259_v4 = vld [vmem:[%s3051_s1 + $0x178] sm:$0xff]  }
  0x18   :  { %1974 = vmatpush3.bf16.msra.mxu0 %v2209_v22  ;;  %v2260_v5 = vld [vmem:[%s3051_s1 + $0x1f8] sm:$0xff]   ;;  %v2263_v8 = vld [vmem:[%s3052_s0 + $0x40] ss:$16 sps:$4 sm:$0xff]   ;;  %v2265_v9 = vld [vmem:[%s3052_s0 + $0x44] ss:$16 sps:$4 sm:$0xff]  }
  0x19   :  { %2002 = vmatpush3.bf16.msra.mxu1 %v2210_v23  ;;  %1975 = vmatprep.subr.bf16.mxu0 %v2211_v24  ;;  %v2261_v6 = vld [vmem:[%s3051_s1 + $0x138] sm:$0xff]   ;;  %v2269_v12 = vld [vmem:[%s3051_s1 + $0x240] sm:$0xff]   ;;  %v2273_v16 = vld [vmem:[%s3051_s1 + $0x248] sm:$0xff]  }
  0x1a   :  { %2003 = vmatprep.subr.bf16.mxu1 %v2212_v25  ;;  %v2262_v7 = vld [vmem:[%s3051_s1 + $0x1b8] sm:$0xff]   ;;  %v2270_v13 = vld [vmem:[%s3051_s1 + $0x2c0] sm:$0xff]   ;;  %v2274_v17 = vld [vmem:[%s3051_s1 + $0x2c8] sm:$0xff]  }
  0x1b   :  { %v2266_v10 = vld [vmem:[%s3052_s0 + $0x48] ss:$16 sps:$4 sm:$0xff]   ;;  %v2268_v11 = vld [vmem:[%s3052_s0 + $0x4c] ss:$16 sps:$4 sm:$0xff]   ;;  %v2271_v14 = vld [vmem:[%s3051_s1 + $0x200] sm:$0xff]  }
  0x1c   :  { %1976 = vmatpush3.bf16.msra.mxu0 %v2213_v26  ;;  %v2272_v15 = vld [vmem:[%s3051_s1 + $0x280] sm:$0xff]   ;;  %v2275_v18 = vld [vmem:[%s3051_s1 + $0x208] sm:$0xff]   ;;  %v2283_v24 = vld [vmem:[%s3051_s1 + $0x250] sm:$0xff]  }
  0x1d   :  { %2004 = vmatpush3.bf16.msra.mxu1 %v2214_v27  ;;  %1977 = vmatprep.subr.bf16.mxu0 %v2215_v28  ;;  %v2276_v19 = vld [vmem:[%s3051_s1 + $0x288] sm:$0xff]   ;;  %v2277_v20 = vld [vmem:[%s3052_s0 + $0x64] ss:$16 sps:$4 sm:$0xff]   ;;  %v2281_v22 = vld [vmem:[%s3052_s0 + $0x60] ss:$16 sps:$4 sm:$0xff]  }
  0x1e   :  { %2005 = vmatprep.subr.bf16.mxu1 %v2216_v29  ;;  %v2279_v21 = vld [vmem:[%s3052_s0 + $0x6c] ss:$16 sps:$4 sm:$0xff]   ;;  %v2282_v23 = vld [vmem:[%s3052_s0 + $0x68] ss:$16 sps:$4 sm:$0xff]   ;;  %v2284_v25 = vld [vmem:[%s3051_s1 + $0x2d0] sm:$0xff]  }
  0x1f   :  { %v2285_v26 = vld [vmem:[%s3051_s1 + $0x210] sm:$0xff]   ;;  %v2287_v28 = vld [vmem:[%s3051_s1 + $0x258] sm:$0xff]   ;;  %v2292_v33 = vld [vmem:[%s3051_s1 + $0x2e0] sm:$0xff]  }
  0x20   :  { %1978 = vmatpush3.bf16.msra.mxu0 %v2217_v30  ;;  %v2286_v27 = vld [vmem:[%s3051_s1 + $0x290] sm:$0xff]   ;;  %v2288_v29 = vld [vmem:[%s3051_s1 + $0x2d8] sm:$0xff]   ;;  %v2294_v35 = vld [vmem:[%s3051_s1 + $0x2a0] sm:$0xff]  }
  0x21   :  { %2006 = vmatpush3.bf16.msra.mxu1 %v2218_v31  ;;  %2019 = vmatprep.subr.bf16.mxu0 %v2225_v36  ;;  %v2289_v30 = vld [vmem:[%s3051_s1 + $0x218] sm:$0xff]   ;;  %v2295_v36 = vld [vmem:[%s3051_s1 + $0x268] sm:$0xff]  }
  0x22   :  { %2047 = vmatprep.subr.bf16.mxu1 %v2226_v37  ;;  %v2290_v31 = vld [vmem:[%s3051_s1 + $0x298] sm:$0xff]   ;;  %v2296_v37 = vld [vmem:[%s3051_s1 + $0x2e8] sm:$0xff]  }
  0x23   :  { %568 = vmatmul.mubr.bf16.vlgmr.msra.gmra.mrb[0].mxu0 %v2219_v32  ;;  %v2291_v32 = vld [vmem:[%s3051_s1 + $0x260] sm:$0xff]  }
  0x24   :  { %617 = vmatmul.mubr.bf16.vlgmr.msra.gmra.mrb[0].mxu1 %v2222_v34  ;;  %2020 = vmatpush3.bf16.msra.mxu0 %v2227_v38  ;;  %v2293_v34 = vld [vmem:[%s3051_s1 + $0x220] sm:$0xff]   ;;  %v2297_v38 = vld [vmem:[%s3051_s1 + $0x228] sm:$0xff]  }
  0x25   :  { %2048 = vmatpush3.bf16.msra.mxu1 %v2228_v39  ;;  %2021 = vmatprep.subr.bf16.mxu0 %v2229_v40  ;;  %v2298_v39 = vld [vmem:[%s3051_s1 + $0x2a8] sm:$0xff]   ;;  %v2299_v40 = vld [vmem:[%s3051_s1 + $0x270] sm:$0xff]  }
  0x26   :  { %2049 = vmatprep.subr.bf16.mxu1 %v2230_v41  ;;  %575 = vmatprep.mubr.bf16.mxu0 %v2233_v44  ;;  %v2300_v41 = vld [vmem:[%s3051_s1 + $0x2f0] sm:$0xff]   ;;  %v2303_v44 = vld [vmem:[%s3051_s1 + $0x278] sm:$0xff]  }
  0x27   :  { %624 = vmatprep.mubr.bf16.mxu1 %v2235_v45  ;;  %v2304_v45 = vld [vmem:[%s3051_s1 + $0x2f8] sm:$0xff]  }
  0x28   :  { %2022 = vmatpush3.bf16.msra.mxu0 %v2231_v42  ;;  %v2301_v42 = vld [vmem:[%s3051_s1 + $0x230] sm:$0xff]  }
  0x29   :  { %2050 = vmatpush3.bf16.msra.mxu1 %v2232_v43  ;;  %2023 = vmatprep.subr.bf16.mxu0 %v2239_v48  ;;  %v2302_v43 = vld [vmem:[%s3051_s1 + $0x2b0] sm:$0xff]  }
  0x2a   :  { %2051 = vmatprep.subr.bf16.mxu1 %v2240_v49  ;;  %v2307_v48 = vld [vmem:[%s3052_s0 + $0x80] ss:$16 sps:$4 sm:$0xff]   ;;  %v2309_v49 = vld [vmem:[%s3052_s0 + $0x84] ss:$16 sps:$4 sm:$0xff]  }
  0x2b   :  { %576 = vmatmul.mubr.bf16.gmra.mrb[4].mxu0 %v2237_v46  ;;  %v2305_v46 = vld [vmem:[%s3051_s1 + $0x238] sm:$0xff]  }
  0x2c   :  { %625 = vmatmul.mubr.bf16.gmra.mrb[4].mxu1 %v2238_v47  ;;  %2024 = vmatpush3.bf16.msra.mxu0 %v2241_v50  ;;  %v2306_v47 = vld [vmem:[%s3051_s1 + $0x2b8] sm:$0xff]  }
  0x2d   :  { %2052 = vmatpush3.bf16.msra.mxu1 %v2242_v51  ;;  %2025 = vmatprep.subr.bf16.mxu0 %v2243_v52  ;;  %v2310_v50 = vld [vmem:[%s3052_s0 + $0x88] ss:$16 sps:$4 sm:$0xff]   ;;  %v2312_v51 = vld [vmem:[%s3052_s0 + $0x8c] ss:$16 sps:$4 sm:$0xff]   ;;  %v2313_v52 = vld [vmem:[%s3051_s1 + $0x340] sm:$0xff]  }
  0x2e   :  { %2053 = vmatprep.subr.bf16.mxu1 %v2244_v53  ;;  %897 = vmatprep.mubr.bf16.mxu0 %v2265_v9  ;;  %v2314_v53 = vld [vmem:[%s3051_s1 + $0x3c0] sm:$0xff]  }
  0x2f   :  { %946 = vmatprep.mubr.bf16.mxu1 %v2268_v11  ;;  %v2336_v9 = vld [vmem:[%s3051_s1 + $0x3e0] sm:$0xff]  }
  0x30   :  { %2026 = vmatpush3.bf16.msra.mxu0 %v2245_v54  ;;  %v2315_v54 = vld [vmem:[%s3051_s1 + $0x300] sm:$0xff]  }
  0x31   :  { %2054 = vmatpush3.bf16.msra.mxu1 %v2246_v55  ;;  %2027 = vmatprep.subr.bf16.mxu0 %v2247_v56  ;;  %v2316_v55 = vld [vmem:[%s3051_s1 + $0x380] sm:$0xff]   ;;  %v2317_v56 = vld [vmem:[%s3051_s1 + $0x348] sm:$0xff]  }
  0x32   :  { %2055 = vmatprep.subr.bf16.mxu1 %v2248_v57  ;;  %v2318_v57 = vld [vmem:[%s3051_s1 + $0x3c8] sm:$0xff]   ;;  %v2338_v11 = vld [vmem:[%s3051_s1 + $0x3a0] sm:$0xff]  }
  0x34   :  { %2028 = vmatpush3.bf16.msra.mxu0 %v2249_v58  ;;  %v2319_v58 = vld [vmem:[%s3051_s1 + $0x308] sm:$0xff]  }
  0x35   :  { %2056 = vmatpush3.bf16.msra.mxu1 %v2250_v59  ;;  %2029 = vmatprep.subr.bf16.mxu0 %v2251_v60  ;;  %v2320_v59 = vld [vmem:[%s3051_s1 + $0x388] sm:$0xff]   ;;  %v2321_v60 = vld [vmem:[%s3052_s0 + $0xa4] ss:$16 sps:$4 sm:$0xff]  }
  0x36   :  { %2057 = vmatprep.subr.bf16.mxu1 %v2252_v61  ;;  %v2323_v61 = vld [vmem:[%s3052_s0 + $0xac] ss:$16 sps:$4 sm:$0xff]  }
  0x38   :  { %2030 = vmatpush3.bf16.msra.mxu0 %v2253_v62  ;;  %v2325_v62 = vld [vmem:[%s3052_s0 + $0xa0] ss:$16 sps:$4 sm:$0xff]  }
  0x39   :  { %2058 = vmatpush3.bf16.msra.mxu1 %v2254_v63  ;;  %2031 = vmatprep.subr.bf16.mxu0 %v2255_v0  ;;  %v2326_v63 = vld [vmem:[%s3052_s0 + $0xa8] ss:$16 sps:$4 sm:$0xff]   ;;  %v2327_v0 = vld [vmem:[%s3051_s1 + $0x350] sm:$0xff]  }
  0x3a   :  { %2059 = vmatprep.subr.bf16.mxu1 %v2256_v1  ;;  %v2328_v1 = vld [vmem:[%s3051_s1 + $0x3d0] sm:$0xff]  }
  0x3c   :  { %2032 = vmatpush3.bf16.msra.mxu0 %v2257_v2  ;;  %v2329_v2 = vld [vmem:[%s3051_s1 + $0x310] sm:$0xff]  }
  0x3d   :  { %2060 = vmatpush3.bf16.msra.mxu1 %v2258_v3  ;;  %2033 = vmatprep.subr.bf16.mxu0 %v2259_v4  ;;  %v2330_v3 = vld [vmem:[%s3051_s1 + $0x390] sm:$0xff]   ;;  %v2331_v4 = vld [vmem:[%s3051_s1 + $0x358] sm:$0xff]  }
  0x3e   :  { %2061 = vmatprep.subr.bf16.mxu1 %v2260_v5  ;;  %v2332_v5 = vld [vmem:[%s3051_s1 + $0x3d8] sm:$0xff]  }
  0x40   :  { %2034 = vmatpush3.bf16.msra.mxu0 %v2261_v6  ;;  %v2333_v6 = vld [vmem:[%s3051_s1 + $0x318] sm:$0xff]  }
  0x41   :  { %2062 = vmatpush3.bf16.msra.mxu1 %v2262_v7  ;;  %2075 = vmatprep.subr.bf16.mxu0 %v2269_v12  ;;  %v2334_v7 = vld [vmem:[%s3051_s1 + $0x398] sm:$0xff]   ;;  %v2339_v12 = vld [vmem:[%s3051_s1 + $0x368] sm:$0xff]  }
  0x42   :  { %2103 = vmatprep.subr.bf16.mxu1 %v2270_v13  ;;  %v2340_v13 = vld [vmem:[%s3051_s1 + $0x3e8] sm:$0xff]  }
  0x43   :  { %898 = vmatmul.mubr.bf16.vlgmr.msra.gmra.mrb[8].mxu0 %v2263_v8  ;;  %v2335_v8 = vld [vmem:[%s3051_s1 + $0x360] sm:$0xff]  }
  0x44   :  { %947 = vmatmul.mubr.bf16.vlgmr.msra.gmra.mrb[8].mxu1 %v2266_v10  ;;  %2076 = vmatpush3.bf16.msra.mxu0 %v2271_v14  ;;  %v2337_v10 = vld [vmem:[%s3051_s1 + $0x320] sm:$0xff]   ;;  %v2341_v14 = vld [vmem:[%s3051_s1 + $0x328] sm:$0xff]  }
  0x45   :  { %2104 = vmatpush3.bf16.msra.mxu1 %v2272_v15  ;;  %2077 = vmatprep.subr.bf16.mxu0 %v2273_v16  ;;  %v2342_v15 = vld [vmem:[%s3051_s1 + $0x3a8] sm:$0xff]   ;;  %v2343_v16 = vld [vmem:[%s3051_s1 + $0x370] sm:$0xff]  }
  0x46   :  { %2105 = vmatprep.subr.bf16.mxu1 %v2274_v17  ;;  %905 = vmatprep.mubr.bf16.mxu0 %v2277_v20  ;;  %v2344_v17 = vld [vmem:[%s3051_s1 + $0x3f0] sm:$0xff]   ;;  %v2347_v20 = vld [vmem:[%s3051_s1 + $0x378] sm:$0xff]  }
  0x47   :  { %954 = vmatprep.mubr.bf16.mxu1 %v2279_v21  ;;  %v2348_v21 = vld [vmem:[%s3051_s1 + $0x3f8] sm:$0xff]  }
  0x48   :  { %2078 = vmatpush3.bf16.msra.mxu0 %v2275_v18  ;;  %v2345_v18 = vld [vmem:[%s3051_s1 + $0x330] sm:$0xff]  }
  0x49   :  { %2106 = vmatpush3.bf16.msra.mxu1 %v2276_v19  ;;  %2079 = vmatprep.subr.bf16.mxu0 %v2283_v24  ;;  %v2346_v19 = vld [vmem:[%s3051_s1 + $0x3b0] sm:$0xff]  }
  0x4a   :  { %2107 = vmatprep.subr.bf16.mxu1 %v2284_v25  ;;  %v2351_v24 = vld [vmem:[%s3052_s0 + $0xc0] ss:$16 sps:$4 sm:$0xff]   ;;  %v2353_v25 = vld [vmem:[%s3052_s0 + $0xc4] ss:$16 sps:$4 sm:$0xff]  }
  0x4b   :  { %906 = vmatmul.mubr.bf16.gmra.mrb[12].mxu0 %v2281_v22  ;;  %v2349_v22 = vld [vmem:[%s3051_s1 + $0x338] sm:$0xff]  }
  0x4c   :  { %955 = vmatmul.mubr.bf16.gmra.mrb[12].mxu1 %v2282_v23  ;;  %2080 = vmatpush3.bf16.msra.mxu0 %v2285_v26  ;;  %v2350_v23 = vld [vmem:[%s3051_s1 + $0x3b8] sm:$0xff]  }
  0x4d   :  { %2108 = vmatpush3.bf16.msra.mxu1 %v2286_v27  ;;  %2081 = vmatprep.subr.bf16.mxu0 %v2287_v28  ;;  %v2354_v26 = vld [vmem:[%s3052_s0 + $0xc8] ss:$16 sps:$4 sm:$0xff]   ;;  %v2356_v27 = vld [vmem:[%s3052_s0 + $0xcc] ss:$16 sps:$4 sm:$0xff]   ;;  %v2357_v28 = vld [vmem:[%s3052_s0 + $0xe4] ss:$16 sps:$4 sm:$0xff]  }
  0x4e   :  { %2109 = vmatprep.subr.bf16.mxu1 %v2288_v29  ;;  %1227 = vmatprep.mubr.bf16.mxu0 %v2309_v49  ;;  %v2359_v29 = vld [vmem:[%s3052_s0 + $0xec] ss:$16 sps:$4 sm:$0xff]  }
  0x4f   :  { %1276 = vmatprep.mubr.bf16.mxu1 %v2312_v51 }
  0x50   :  { %2082 = vmatpush3.bf16.msra.mxu0 %v2289_v30  ;;  %v2361_v30 = vld [vmem:[%s3052_s0 + $0xe0] ss:$16 sps:$4 sm:$0xff]  }
  0x51   :  { %2110 = vmatpush3.bf16.msra.mxu1 %v2290_v31  ;;  %2083 = vmatprep.subr.bf16.mxu0 %v2291_v32  ;;  %v2362_v31 = vld [vmem:[%s3052_s0 + $0xe8] ss:$16 sps:$4 sm:$0xff]  }
  0x52   :  { %2111 = vmatprep.subr.bf16.mxu1 %v2292_v33 }
  0x54   :  { %2084 = vmatpush3.bf16.msra.mxu0 %v2293_v34 }
  0x55   :  { %2112 = vmatpush3.bf16.msra.mxu1 %v2294_v35  ;;  %2085 = vmatprep.subr.bf16.mxu0 %v2295_v36 }
  0x56   :  { %2113 = vmatprep.subr.bf16.mxu1 %v2296_v37 }
  0x58   :  { %2086 = vmatpush3.bf16.msra.mxu0 %v2297_v38 }
  0x59   :  { %2114 = vmatpush3.bf16.msra.mxu1 %v2298_v39  ;;  %2087 = vmatprep.subr.bf16.mxu0 %v2299_v40 }
  0x5a   :  { %2115 = vmatprep.subr.bf16.mxu1 %v2300_v41 }
  0x5c   :  { %2088 = vmatpush3.bf16.msra.mxu0 %v2301_v42 }
  0x5d   :  { %2116 = vmatpush3.bf16.msra.mxu1 %v2302_v43  ;;  %2089 = vmatprep.subr.bf16.mxu0 %v2303_v44 }
  0x5e   :  { %2117 = vmatprep.subr.bf16.mxu1 %v2304_v45 }
  0x60   :  { %2090 = vmatpush3.bf16.msra.mxu0 %v2305_v46 }
  0x61   :  { %2118 = vmatpush3.bf16.msra.mxu1 %v2306_v47  ;;  %2131 = vmatprep.subr.bf16.mxu0 %v2313_v52 }
  0x62   :  { %2159 = vmatprep.subr.bf16.mxu1 %v2314_v53 }
  0x63   :  { %1228 = vmatmul.mubr.bf16.vlgmr.msra.gmra.mrb[16].mxu0 %v2307_v48 }
  0x64   :  { %1277 = vmatmul.mubr.bf16.vlgmr.msra.gmra.mrb[16].mxu1 %v2310_v50  ;;  %2132 = vmatpush3.bf16.msra.mxu0 %v2315_v54 }
  0x65   :  { %2160 = vmatpush3.bf16.msra.mxu1 %v2316_v55  ;;  %2133 = vmatprep.subr.bf16.mxu0 %v2317_v56 }
  0x66   :  { %2161 = vmatprep.subr.bf16.mxu1 %v2318_v57  ;;  %1235 = vmatprep.mubr.bf16.mxu0 %v2321_v60 }
  0x67   :  { %1284 = vmatprep.mubr.bf16.mxu1 %v2323_v61 }
  0x68   :  { %2134 = vmatpush3.bf16.msra.mxu0 %v2319_v58 }
  0x69   :  { %2162 = vmatpush3.bf16.msra.mxu1 %v2320_v59  ;;  %2135 = vmatprep.subr.bf16.mxu0 %v2327_v0 }
  0x6a   :  { %2163 = vmatprep.subr.bf16.mxu1 %v2328_v1 }
  0x6b   :  { %1236 = vmatmul.mubr.bf16.gmra.mrb[20].mxu0 %v2325_v62 }
  0x6c   :  { %1285 = vmatmul.mubr.bf16.gmra.mrb[20].mxu1 %v2326_v63  ;;  %2136 = vmatpush3.bf16.msra.mxu0 %v2329_v2 }
  0x6d   :  { %2164 = vmatpush3.bf16.msra.mxu1 %v2330_v3  ;;  %2137 = vmatprep.subr.bf16.mxu0 %v2331_v4 }
  0x6e   :  { %2165 = vmatprep.subr.bf16.mxu1 %v2332_v5  ;;  %1557 = vmatprep.mubr.bf16.mxu0 %v2353_v25 }
  0x6f   :  { %1606 = vmatprep.mubr.bf16.mxu1 %v2356_v27 }
  0x70   :  { %2138 = vmatpush3.bf16.msra.mxu0 %v2333_v6 }
  0x71   :  { %2166 = vmatpush3.bf16.msra.mxu1 %v2334_v7  ;;  %2139 = vmatprep.subr.bf16.mxu0 %v2335_v8 }
  0x72   :  { %2167 = vmatprep.subr.bf16.mxu1 %v2336_v9 }
  0x74   :  { %2140 = vmatpush3.bf16.msra.mxu0 %v2337_v10 }
  0x75   :  { %2168 = vmatpush3.bf16.msra.mxu1 %v2338_v11  ;;  %2141 = vmatprep.subr.bf16.mxu0 %v2339_v12 }
  0x76   :  { %2169 = vmatprep.subr.bf16.mxu1 %v2340_v13 }
  0x78   :  { %2142 = vmatpush3.bf16.msra.mxu0 %v2341_v14 }
  0x79   :  { %2170 = vmatpush3.bf16.msra.mxu1 %v2342_v15  ;;  %2143 = vmatprep.subr.bf16.mxu0 %v2343_v16 }
  0x7a   :  { %2171 = vmatprep.subr.bf16.mxu1 %v2344_v17 }
  0x7c   :  { %2144 = vmatpush3.bf16.msra.mxu0 %v2345_v18 }
  0x7d   :  { %2172 = vmatpush3.bf16.msra.mxu1 %v2346_v19  ;;  %2145 = vmatprep.subr.bf16.mxu0 %v2347_v20 }
  0x7e   :  { %2173 = vmatprep.subr.bf16.mxu1 %v2348_v21 }
  0x80   :  { %2146 = vmatpush3.bf16.msra.mxu0 %v2349_v22 }
  0x81   :  { %2174 = vmatpush3.bf16.msra.mxu1 %v2350_v23 }
  0x83   :  { %1558 = vmatmul.mubr.bf16.vlgmr.msra.gmra.mrb[24].mxu0 %v2351_v24 }
  0x84   :  { %1607 = vmatmul.mubr.bf16.vlgmr.msra.gmra.mrb[24].mxu1 %v2354_v26  ;;  %1565 = vmatprep.mubr.bf16.mxu0 %v2357_v28 }
  0x85   :  { %1614 = vmatprep.mubr.bf16.mxu1 %v2359_v29 }
  0x8b   :  { %1566 = vmatmul.mubr.bf16.gmra.mrb[28].mxu0 %v2361_v30 }
  0x8c   :  { %1615 = vmatmul.mubr.bf16.gmra.mrb[28].mxu1 %v2362_v31 }
  0xf6   :  { %v1979_v32 = vpop.f32.mrb[0].mxu0 }
  0xf7   :  { %v2007_v33 = vpop.f32.mrb[0].mxu1  ;;  %v1980_v34 = vpop.f32.mrb[1].mxu0 }
  0xf8   :  { %v1981_v35 = vadd.f32 %v1980_v34, %v1979_v32  ;;  %v2008_v36 = vpop.f32.mrb[1].mxu1  ;;  %v1982_v37 = vpop.f32.mrb[2].mxu0 }
  0xf9   :  { %v2009_v38 = vadd.f32 %v2008_v36, %v2007_v33  ;;  %v2010_v39 = vpop.f32.mrb[2].mxu1  ;;  %v1983_v40 = vpop.f32.mrb[3].mxu0 }
  0xfa   :  { %v1984_v41 = vadd.f32 %v1983_v40, %v1982_v37  ;;  %v2011_v42 = vpop.f32.mrb[3].mxu1 }
  0xfb   :  { %v2865_v43 = vadd.f32 %v2009_v38, %v1981_v35  ;;  %v2012_v44 = vadd.f32 %v2011_v42, %v2010_v39 }
  0xfd   :  { %v2867_v45 = vadd.f32 %v2012_v44, %v1984_v41  ;;  %v1663_v61 = vmul.f32 %v2865_v43, %v2865_v43  ;;  %v1624_v6 = vsel %vm1623_vm0, %v2865_v43, 0.0 }
  0xfe   :  { %v1985_v46 = vpop.f32.mrb[4].mxu0 }
  0xff   :  { %v2013_v47 = vpop.f32.mrb[4].mxu1  ;;  %v1986_v48 = vpop.f32.mrb[5].mxu0  ;;  %v1664_v60 = vmul.f32 %v2867_v45, %v2867_v45  ;;  %v1625_v63 = vsel %vm1623_vm0, %v2867_v45, 0.0  ;;  %v1679_v12 = vsel %vm1623_vm0, %v1663_v61, 0.0 }
 0x100   :  { %v1987_v49 = vadd.f32 %v1986_v48, %v1985_v46  ;;  %v2014_v50 = vpop.f32.mrb[5].mxu1  ;;  %v1988_v51 = vpop.f32.mrb[6].mxu0  ;;  %v1626_v13 = vadd.f32 %v1625_v63, %v1624_v6 }
 0x101   :  { %v2015_v52 = vadd.f32 %v2014_v50, %v2013_v47  ;;  %v2016_v53 = vpop.f32.mrb[6].mxu1  ;;  %v1989_v54 = vpop.f32.mrb[7].mxu0  ;;  %v1680_v7 = vsel %vm1623_vm0, %v1664_v60, 0.0 }
 0x102   :  { %v1990_v55 = vadd.f32 %v1989_v54, %v1988_v51  ;;  %v2017_v56 = vpop.f32.mrb[7].mxu1  ;;  %v1681_v20 = vadd.f32 %v1680_v7, %v1679_v12 }
 0x103   :  { %v2869_v57 = vadd.f32 %v2015_v52, %v1987_v49  ;;  %v2018_v58 = vadd.f32 %v2017_v56, %v2016_v53 }
 0x105   :  { %v2871_v59 = vadd.f32 %v2018_v58, %v1990_v55  ;;  %v1665_v0 = vmul.f32 %v2869_v57, %v2869_v57  ;;  %v1627_v8 = vsel %vm1623_vm0, %v2869_v57, 0.0 }
 0x106   :  { %v1628_v21 = vadd.f32 %v1627_v8, %v1626_v13 }
 0x107   :  { %v1682_v16 = vsel %vm1623_vm0, %v1665_v0, 0.0  ;;  %v1666_v17 = vmul.f32 %v2871_v59, %v2871_v59  ;;  %v1629_v22 = vsel %vm1623_vm0, %v2871_v59, 0.0 }
 0x108   :  { %v1683_v25 = vadd.f32 %v1682_v16, %v1681_v20  ;;  %v1630_v28 = vadd.f32 %v1629_v22, %v1628_v21 }
 0x109   :  { %v1684_v26 = vsel %vm1623_vm0, %v1666_v17, 0.0 }
 0x10a   :  { %v1685_v33 = vadd.f32 %v1684_v26, %v1683_v25 }
 0x116   :  { %v2035_v62 = vpop.f32.mrb[8].mxu0 }
 0x117   :  { %v2063_v1 = vpop.f32.mrb[8].mxu1  ;;  %v2036_v2 = vpop.f32.mrb[9].mxu0 }
 0x118   :  { %v2037_v3 = vadd.f32 %v2036_v2, %v2035_v62  ;;  %v2064_v4 = vpop.f32.mrb[9].mxu1  ;;  %v2038_v5 = vpop.f32.mrb[10].mxu0 }
 0x119   :  { %v2065_v9 = vadd.f32 %v2064_v4, %v2063_v1  ;;  %v2066_v10 = vpop.f32.mrb[10].mxu1  ;;  %v2039_v11 = vpop.f32.mrb[11].mxu0 }
 0x11a   :  { %v2040_v14 = vadd.f32 %v2039_v11, %v2038_v5  ;;  %v2067_v15 = vpop.f32.mrb[11].mxu1 }
 0x11b   :  { %v2890_v18 = vadd.f32 %v2065_v9, %v2037_v3  ;;  %v2068_v19 = vadd.f32 %v2067_v15, %v2066_v10 }
 0x11d   :  { %v1667_v23 = vmul.f32 %v2890_v18, %v2890_v18  ;;  %v2896_v24 = vadd.f32 %v2068_v19, %v2040_v14  ;;  %v1631_v27 = vsel %vm1623_vm0, %v2890_v18, 0.0 }
 0x11e   :  { %v2041_v31 = vpop.f32.mrb[12].mxu0  ;;  %v1632_v34 = vadd.f32 %v1631_v27, %v1630_v28 }
 0x11f   :  { %v1686_v29 = vsel %vm1623_vm0, %v1667_v23, 0.0  ;;  %v1668_v30 = vmul.f32 %v2896_v24, %v2896_v24  ;;  %v2069_v32 = vpop.f32.mrb[12].mxu1  ;;  %v2042_v35 = vpop.f32.mrb[13].mxu0  ;;  %v1633_v37 = vsel %vm1623_vm0, %v2896_v24, 0.0 }
 0x120   :  { %v2070_v36 = vpop.f32.mrb[13].mxu1  ;;  %v2043_v38 = vadd.f32 %v2042_v35, %v2041_v31  ;;  %v2044_v40 = vpop.f32.mrb[14].mxu0  ;;  %v1687_v42 = vadd.f32 %v1686_v29, %v1685_v33  ;;  %v1634_v51 = vadd.f32 %v1633_v37, %v1632_v34 }
 0x121   :  { %v2071_v39 = vadd.f32 %v2070_v36, %v2069_v32  ;;  %v2072_v41 = vpop.f32.mrb[14].mxu1  ;;  %v2045_v44 = vpop.f32.mrb[15].mxu0  ;;  %v1688_v47 = vsel %vm1623_vm0, %v1668_v30, 0.0 }
 0x122   :  { %v2073_v46 = vpop.f32.mrb[15].mxu1  ;;  %v2046_v49 = vadd.f32 %v2045_v44, %v2044_v40  ;;  %v1689_v55 = vadd.f32 %v1688_v47, %v1687_v42 }
 0x123   :  { %v2907_v48 = vadd.f32 %v2071_v39, %v2043_v38  ;;  %v2074_v50 = vadd.f32 %v2073_v46, %v2072_v41 }
 0x125   :  { %v1635_v52 = vsel %vm1623_vm0, %v2907_v48, 0.0  ;;  %v1669_v53 = vmul.f32 %v2907_v48, %v2907_v48  ;;  %v2913_v54 = vadd.f32 %v2074_v50, %v2046_v49 }
 0x126   :  { %v1636_v56 = vadd.f32 %v1635_v52, %v1634_v51 }
 0x127   :  { %v1690_v58 = vsel %vm1623_vm0, %v1669_v53, 0.0  ;;  %v1637_v60 = vsel %vm1623_vm0, %v2913_v54, 0.0  ;;  %v1670_v61 = vmul.f32 %v2913_v54, %v2913_v54 }
 0x128   :  { %v1691_v62 = vadd.f32 %v1690_v58, %v1689_v55  ;;  %v1638_v63 = vadd.f32 %v1637_v60, %v1636_v56 }
 0x129   :  { %v1692_v0 = vsel %vm1623_vm0, %v1670_v61, 0.0 }
 0x12a   :  { %v1693_v1 = vadd.f32 %v1692_v0, %v1691_v62 }
 0x136   :  { %v2091_v2 = vpop.f32.mrb[16].mxu0 }
 0x137   :  { %v2092_v3 = vpop.f32.mrb[17].mxu0  ;;  %v2119_v4 = vpop.f32.mrb[16].mxu1 }
 0x138   :  { %v2093_v5 = vadd.f32 %v2092_v3, %v2091_v2  ;;  %v2094_v6 = vpop.f32.mrb[18].mxu0  ;;  %v2120_v7 = vpop.f32.mrb[17].mxu1 }
 0x139   :  { %v2095_v8 = vpop.f32.mrb[19].mxu0  ;;  %v2121_v9 = vadd.f32 %v2120_v7, %v2119_v4  ;;  %v2122_v10 = vpop.f32.mrb[18].mxu1 }
 0x13a   :  { %v2096_v11 = vadd.f32 %v2095_v8, %v2094_v6  ;;  %v2123_v12 = vpop.f32.mrb[19].mxu1 }
 0x13b   :  { %v2921_v13 = vadd.f32 %v2121_v9, %v2093_v5  ;;  %v2124_v14 = vadd.f32 %v2123_v12, %v2122_v10 }
 0x13d   :  { %v1639_v15 = vsel %vm1623_vm0, %v2921_v13, 0.0  ;;  %v1671_v16 = vmul.f32 %v2921_v13, %v2921_v13  ;;  %v2927_v17 = vadd.f32 %v2124_v14, %v2096_v11 }
 0x13e   :  { %v1640_v19 = vadd.f32 %v1639_v15, %v1638_v63  ;;  %v2097_v26 = vpop.f32.mrb[20].mxu0 }
 0x13f   :  { %v1694_v20 = vsel %vm1623_vm0, %v1671_v16, 0.0  ;;  %v1641_v21 = vsel %vm1623_vm0, %v2927_v17, 0.0  ;;  %v1672_v22 = vmul.f32 %v2927_v17, %v2927_v17  ;;  %v2125_v28 = vpop.f32.mrb[20].mxu1  ;;  %v2098_v29 = vpop.f32.mrb[21].mxu0 }
 0x140   :  { %v1695_v23 = vadd.f32 %v1694_v20, %v1693_v1  ;;  %v1642_v25 = vadd.f32 %v1641_v21, %v1640_v19  ;;  %v2099_v31 = vadd.f32 %v2098_v29, %v2097_v26  ;;  %v2126_v32 = vpop.f32.mrb[21].mxu1  ;;  %v2100_v33 = vpop.f32.mrb[22].mxu0 }
 0x141   :  { %v1696_v27 = vsel %vm1623_vm0, %v1672_v22, 0.0  ;;  %v2127_v34 = vadd.f32 %v2126_v32, %v2125_v28  ;;  %v2128_v35 = vpop.f32.mrb[22].mxu1  ;;  %v2101_v36 = vpop.f32.mrb[23].mxu0 }
 0x142   :  { %v1697_v30 = vadd.f32 %v1696_v27, %v1695_v23  ;;  %v2102_v37 = vadd.f32 %v2101_v36, %v2100_v33  ;;  %v2129_v38 = vpop.f32.mrb[23].mxu1 }
 0x143   :  { %v2935_v39 = vadd.f32 %v2127_v34, %v2099_v31  ;;  %v2130_v40 = vadd.f32 %v2129_v38, %v2128_v35 }
 0x145   :  { %v1643_v41 = vsel %vm1623_vm0, %v2935_v39, 0.0  ;;  %v1673_v42 = vmul.f32 %v2935_v39, %v2935_v39  ;;  %v2941_v44 = vadd.f32 %v2130_v40, %v2102_v37 }
 0x146   :  { %v1644_v46 = vadd.f32 %v1643_v41, %v1642_v25 }
 0x147   :  { %v1698_v47 = vsel %vm1623_vm0, %v1673_v42, 0.0  ;;  %v1645_v49 = vsel %vm1623_vm0, %v2941_v44, 0.0  ;;  %v1674_v50 = vmul.f32 %v2941_v44, %v2941_v44 }
 0x148   :  { %v1699_v51 = vadd.f32 %v1698_v47, %v1697_v30  ;;  %v1646_v52 = vadd.f32 %v1645_v49, %v1644_v46 }
 0x149   :  { %v1700_v53 = vsel %vm1623_vm0, %v1674_v50, 0.0 }
 0x14a   :  { %v1701_v55 = vadd.f32 %v1700_v53, %v1699_v51 }
 0x156   :  { %v2147_v56 = vpop.f32.mrb[24].mxu0 }
 0x157   :  { %v2175_v58 = vpop.f32.mrb[24].mxu1  ;;  %v2148_v60 = vpop.f32.mrb[25].mxu0 }
 0x158   :  { %v2149_v61 = vadd.f32 %v2148_v60, %v2147_v56  ;;  %v2176_v62 = vpop.f32.mrb[25].mxu1  ;;  %v2150_v63 = vpop.f32.mrb[26].mxu0 }
 0x159   :  { %v2177_v0 = vadd.f32 %v2176_v62, %v2175_v58  ;;  %v2178_v1 = vpop.f32.mrb[26].mxu1  ;;  %v2151_v2 = vpop.f32.mrb[27].mxu0 }
 0x15a   :  { %v2152_v3 = vadd.f32 %v2151_v2, %v2150_v63  ;;  %v2179_v4 = vpop.f32.mrb[27].mxu1 }
 0x15b   :  { %v2949_v5 = vadd.f32 %v2177_v0, %v2149_v61  ;;  %v2180_v6 = vadd.f32 %v2179_v4, %v2178_v1 }
 0x15d   :  { %v1647_v7 = vsel %vm1623_vm0, %v2949_v5, 0.0  ;;  %v1675_v8 = vmul.f32 %v2949_v5, %v2949_v5  ;;  %v2955_v9 = vadd.f32 %v2180_v6, %v2152_v3 }
 0x15e   :  { %v1648_v10 = vadd.f32 %v1647_v7, %v1646_v52  ;;  %v2153_v11 = vpop.f32.mrb[28].mxu0 }
 0x15f   :  { %v1702_v12 = vsel %vm1623_vm0, %v1675_v8, 0.0  ;;  %v1649_v14 = vsel %vm1623_vm0, %v2955_v9, 0.0  ;;  %v1676_v15 = vmul.f32 %v2955_v9, %v2955_v9  ;;  %v2181_v16 = vpop.f32.mrb[28].mxu1  ;;  %v2154_v19 = vpop.f32.mrb[29].mxu0 }
 0x160   :  { %v1703_v20 = vadd.f32 %v1702_v12, %v1701_v55  ;;  %v1650_v21 = vadd.f32 %v1649_v14, %v1648_v10  ;;  %v2155_v22 = vadd.f32 %v2154_v19, %v2153_v11  ;;  %v2182_v23 = vpop.f32.mrb[29].mxu1  ;;  %v2156_v25 = vpop.f32.mrb[30].mxu0  ;;  %v1727_v10 = vlaneseq  ;;  %v1720_v12 = vld [vmem:[%s3053_s2] sm:$0x1]  ;;  %v1724_v19 = vld [vmem:[%s3053_s2 + $0x1] sm:$0x1] }
 0x161   :  { %v1704_v26 = vsel %vm1623_vm0, %v1676_v15, 0.0  ;;  %v2183_v27 = vadd.f32 %v2182_v23, %v2181_v16  ;;  %v2184_v28 = vpop.f32.mrb[30].mxu1  ;;  %v2157_v29 = vpop.f32.mrb[31].mxu0 }
 0x162   :  { %v1705_v30 = vadd.f32 %v1704_v26, %v1703_v20  ;;  %v2158_v31 = vadd.f32 %v2157_v29, %v2156_v25  ;;  %v2185_v32 = vpop.f32.mrb[31].mxu1  ;;  %v1728_v11 = vshrl.u32 %v1727_v10, 7 }
 0x163   :  { %v1617_v33 = vadd.f32 %v2183_v27, %v2155_v22  ;;  %v2186_v34 = vadd.f32 %v2185_v32, %v2184_v28 }
 0x164   :  { %v1729_v14 = vsub.s32 0, %v1728_v11 }
 0x165   :  { %v1651_v35 = vsel %vm1623_vm0, %v1617_v33, 0.0  ;;  %v1677_v36 = vmul.f32 %v1617_v33, %v1617_v33  ;;  %v1620_v37 = vadd.f32 %v2186_v34, %v2158_v31 }
 0x166   :  { %v1652_v38 = vadd.f32 %v1651_v35, %v1650_v21 }
 0x167   :  { %v1706_v40 = vsel %vm1623_vm0, %v1677_v36, 0.0  ;;  %v1653_v41 = vsel %vm1623_vm0, %v1620_v37, 0.0  ;;  %v1678_v42 = vmul.f32 %v1620_v37, %v1620_v37 }
 0x168   :  { %v1707_v46 = vadd.f32 %v1706_v40, %v1705_v30  ;;  %v1654_v47 = vadd.f32 %v1653_v41, %v1652_v38 }
 0x169   :  { %v1708_v49 = vsel %vm1623_vm0, %v1678_v42, 0.0 }
 0x16a   :  { %v1655_v50 = vrot.slane %v1654_v47, 4  ;;  %v1709_v51 = vadd.f32 %v1708_v49, %v1707_v46 }
 0x16c   :  { %v1656_v52 = vadd.f32 %v1655_v50, %v1654_v47  ;;  %v1710_v53 = vrot.slane %v1709_v51, 4 }
 0x16e   :  { %v1657_v55 = vrot.slane %v1656_v52, 2  ;;  %v1711_v56 = vadd.f32 %v1710_v53, %v1709_v51 }
 0x170   :  { %v1658_v58 = vadd.f32 %v1657_v55, %v1656_v52  ;;  %v1712_v60 = vrot.slane %v1711_v56, 2 }
 0x172   :  { %v1659_v61 = vrot.slane %v1658_v58, 1  ;;  %v1713_v62 = vadd.f32 %v1712_v60, %v1711_v56 }
 0x174   :  { %v1660_v63 = vadd.f32 %v1659_v61, %v1658_v58  ;;  %v1714_v0 = vrot.slane %v1713_v62, 1 }
 0x176   :  { %v1662_v1 = vmul.f32 0.0078125, %v1660_v63  ;;  %v1715_v2 = vadd.f32 %v1714_v0, %v1713_v62 }
 0x178   :  { %v1716_v3 = vmul.f32 0.0078125, %v1715_v2  ;;  %v1717_v4 = vmul.f32 %v1662_v1, %v1662_v1 }
 0x17a   :  { %v1718_v6 = vsub.f32 %v1716_v3, %v1717_v4 }
 0x17c   :  { %v1719_v7 = vmax.f32 %v1718_v6, 0.0 }
 0x17e   :  { %v1721_v8 = vadd.f32 1e-05, %v1719_v7 }
 0x180   :  { %2363 = vrsqrt.f32 %v1721_v8 }
 0x18a   :  { %v2364_v15 = vpop.eup %2363 }
 0x18b   :  { %v1723_v16 = vmul.f32 %v2364_v15, %v1720_v12 }
 0x18d   :  { %v1725_v20 = vmul.f32 %v1723_v16, %v1662_v1  ;;  %v1730_v21 = vrot.slane %v1723_v16, %v1729_v14 }
 0x18f   :  { %v1726_v22 = vsub.f32 %v1724_v19, %v1725_v20  ;;  %v1731_v23 = vmul.f32 %v1730_v21, %v2865_v43  ;;  %v1732_v25 = vmul.f32 %v1730_v21, %v2867_v45  ;;  %v1736_v26 = vmul.f32 %v1730_v21, %v2896_v24 }
 0x190   :  { %v1737_v27 = vmul.f32 %v1730_v21, %v2907_v48  ;;  %v1738_v28 = vmul.f32 %v1730_v21, %v2913_v54  ;;  %v1739_v29 = vmul.f32 %v1730_v21, %v2921_v13  ;;  %v1740_v30 = vmul.f32 %v1730_v21, %v2927_v17 }
 0x191   :  { %v1741_v31 = vmul.f32 %v1730_v21, %v2935_v39  ;;  %v1742_v32 = vmul.f32 %v1730_v21, %v2941_v44  ;;  %v1743_v34 = vmul.f32 %v1730_v21, %v2949_v5  ;;  %v1744_v43 = vmul.f32 %v1730_v21, %v2955_v9 }
 0x192   :  { %v1745_v35 = vmul.f32 %v1730_v21, %v1617_v33  ;;  %v1733_v45 = vmul.f32 %v1730_v21, %v2869_v57  ;;  %v1734_v24 = vmul.f32 %v1730_v21, %v2871_v59  ;;  %v1746_v48 = vmul.f32 %v1730_v21, %v1620_v37 }
 0x193   :  { %v1750_v36 = vrot.slane %v1726_v22, %v1729_v14  ;;  %v1735_v54 = vmul.f32 %v1730_v21, %v2890_v18 }
 0x195   :  { %v1751_v13 = vadd.f32 %v1750_v36, %v1731_v23  ;;  %v1752_v38 = vadd.f32 %v1750_v36, %v1732_v25  ;;  %v1753_v17 = vadd.f32 %v1750_v36, %v1733_v45  ;;  %v1754_v40 = vadd.f32 %v1750_v36, %v1734_v24 }
 0x196   :  { %v1755_v39 = vadd.f32 %v1750_v36, %v1735_v54  ;;  %v1756_v41 = vadd.f32 %v1750_v36, %v1736_v26  ;;  %v1757_v44 = vadd.f32 %v1750_v36, %v1737_v27  ;;  %v1758_v42 = vadd.f32 %v1750_v36, %v1738_v28 }
 0x197   :  { %v1759_v5 = vadd.f32 %v1750_v36, %v1739_v29  ;;  %v1760_v46 = vadd.f32 %v1750_v36, %v1740_v30  ;;  %v1761_v9 = vadd.f32 %v1750_v36, %v1741_v31  ;;  %v1762_v33 = vadd.f32 %v1750_v36, %v1742_v32 }
 0x198   :  { %v1763_v47 = vadd.f32 %v1750_v36, %v1743_v34  ;;  %v1764_v57 = vadd.f32 %v1750_v36, %v1744_v43  ;;  %v1765_v49 = vadd.f32 %v1750_v36, %v1745_v35  ;;  %v1766_v59 = vadd.f32 %v1750_v36, %v1746_v48 }
 0x199   :  { %v1767_v37 = vmax.f32 %v1751_v13, 0.0  ;;  %v1768_v50 = vmax.f32 %v1752_v38, 0.0  ;;  %v1769_v51 = vmax.f32 %v1753_v17, 0.0  ;;  %v1770_v18 = vmax.f32 %v1754_v40, 0.0 }
 0x19a   :  { %v1771_v52 = vmax.f32 %v1755_v39, 0.0  ;;  %v1772_v53 = vmax.f32 %v1756_v41, 0.0  ;;  %v1773_v55 = vmax.f32 %v1757_v44, 0.0  ;;  %v1774_v56 = vmax.f32 %v1758_v42, 0.0 }
 0x19b   :  { %v1775_v58 = vmax.f32 %v1759_v5, 0.0  ;;  %v1776_v60 = vmax.f32 %v1760_v46, 0.0  ;;  %v1777_v61 = vmax.f32 %v1761_v9, 0.0  ;;  %v1778_v62 = vmax.f32 %v1762_v33, 0.0  ;;  %1783 = vst.msk [vmem:[%s3054_s3] sm:$0xff] %vm1623_vm0, %v1767_v37  ;;  %1784 = vst.msk [vmem:[%s3054_s3 + $0x8] sm:$0xff] %vm1623_vm0, %v1768_v50 }
 0x19c   :  { %1785 = vst.msk [vmem:[%s3054_s3 + $0x10] sm:$0xff] %vm1623_vm0, %v1769_v51  ;;  %1786 = vst.msk [vmem:[%s3054_s3 + $0x18] sm:$0xff] %vm1623_vm0, %v1770_v18  ;;  %v1779_v63 = vmax.f32 %v1763_v47, 0.0  ;;  %v1780_v0 = vmax.f32 %v1764_v57, 0.0  ;;  %v1781_v1 = vmax.f32 %v1765_v49, 0.0  ;;  %v1782_v2 = vmax.f32 %v1766_v59, 0.0 }
 0x19d   :  { %1787 = vst.msk [vmem:[%s3054_s3 + $0x20] sm:$0xff] %vm1623_vm0, %v1771_v52  ;;  %1788 = vst.msk [vmem:[%s3054_s3 + $0x28] sm:$0xff] %vm1623_vm0, %v1772_v53 }
 0x19e   :  { %1789 = vst.msk [vmem:[%s3054_s3 + $0x30] sm:$0xff] %vm1623_vm0, %v1773_v55  ;;  %1790 = vst.msk [vmem:[%s3054_s3 + $0x38] sm:$0xff] %vm1623_vm0, %v1774_v56 }
 0x19f   :  { %1791 = vst.msk [vmem:[%s3054_s3 + $0x40] sm:$0xff] %vm1623_vm0, %v1775_v58  ;;  %1792 = vst.msk [vmem:[%s3054_s3 + $0x48] sm:$0xff] %vm1623_vm0, %v1776_v60 }
 0x1a0   :  { %1793 = vst.msk [vmem:[%s3054_s3 + $0x50] sm:$0xff] %vm1623_vm0, %v1777_v61  ;;  %1794 = vst.msk [vmem:[%s3054_s3 + $0x58] sm:$0xff] %vm1623_vm0, %v1778_v62 }
 0x1a1   :  { %1795 = vst.msk [vmem:[%s3054_s3 + $0x60] sm:$0xff] %vm1623_vm0, %v1779_v63  ;;  %1796 = vst.msk [vmem:[%s3054_s3 + $0x68] sm:$0xff] %vm1623_vm0, %v1780_v0 }
 0x1a2   :  { %1797 = vst.msk [vmem:[%s3054_s3 + $0x70] sm:$0xff] %vm1623_vm0, %v1781_v1  ;;  %1798 = vst.msk [vmem:[%s3054_s3 + $0x78] sm:$0xff] %vm1623_vm0, %v1782_v2 }

// kernel: gen_nn_ske_to_image.7
= control target key start
LH: loop header
LB: loop body
LE: loop exit
PB: predicated region body
PF: predicated region fallthrough
CT: control target
= control target key end

     0   :  { %vm1299_vm0 = vcmask 261120   ;;  %s4146_s1 = inlined_call_operand.vmem [shape: bf16[4,256,32], index: 1, kind: input, shape index: {}]   ;;  %s4147_s0 = inlined_call_operand.vmem [shape: bf16[4,128,256], index: 0, kind: input, shape index: {}]   ;;  %s4148_s2 = inlined_call_operand.vmem [shape: f32[2,32], index: 2, kind: input, shape index: {}]   ;;  %s4149_s3 = inlined_call_operand.vmem [shape: f32[4,128,32], index: 3, kind: output, shape index: {}]  }
   0x1   :  { %v2295_v0 = vld [vmem:[%s4146_s1 + $0x40] sm:$0xff]   ;;  %v2297_v2 = vld [vmem:[%s4146_s1 + $0x48] sm:$0xff]   ;;  %v2299_v4 = vld [vmem:[%s4146_s1 + $0x50] sm:$0xff]  }
   0x2   :  { %v2296_v1 = vld [vmem:[%s4146_s1] sm:$0xff]   ;;  %2039 = vmatprep.subr.bf16.mxu0 %v2295_v0  ;;  %v2298_v3 = vld [vmem:[%s4146_s1 + $0x8] sm:$0xff]   ;;  %v2300_v5 = vld [vmem:[%s4146_s1 + $0x10] sm:$0xff]  }
   0x3   :  { %2040 = vmatpush3.bf16.msra.mxu0 %v2296_v1  ;;  %v2301_v6 = vld [vmem:[%s4146_s1 + $0x58] sm:$0xff]   ;;  %v2303_v8 = vld [vmem:[%s4146_s1 + $0x60] sm:$0xff]   ;;  %v2305_v10 = vld [vmem:[%s4146_s1 + $0x68] sm:$0xff]  }
   0x4   :  { %2041 = vmatprep.subr.bf16.mxu0 %v2297_v2  ;;  %v2302_v7 = vld [vmem:[%s4146_s1 + $0x18] sm:$0xff]   ;;  %v2304_v9 = vld [vmem:[%s4146_s1 + $0x20] sm:$0xff]   ;;  %v2306_v12 = vld [vmem:[%s4146_s1 + $0x28] sm:$0xff]  }
   0x5   :  { %v2311_v11 = vld [vmem:[%s4146_s1 + $0xc0] sm:$0xff]   ;;  %v2307_v15 = vld [vmem:[%s4146_s1 + $0x70] sm:$0xff]   ;;  %v2309_v17 = vld [vmem:[%s4146_s1 + $0x78] sm:$0xff]  }
   0x6   :  { %2103 = vmatprep.subr.bf16.mxu1 %v2311_v11  ;;  %v2314_v13 = vld [vmem:[%s4147_s0 + $0x4] ss:$8 sps:$4 sm:$0xff]   ;;  %v2308_v16 = vld [vmem:[%s4146_s1 + $0x30] sm:$0xff]   ;;  %v2310_v22 = vld [vmem:[%s4146_s1 + $0x38] sm:$0xff]  }
   0x7   :  { %2042 = vmatpush3.bf16.msra.mxu0 %v2298_v3  ;;  %v2315_v14 = vld [vmem:[%s4146_s1 + $0x80] sm:$0xff]   ;;  %415 = vmatprep.mubr.bf16.mxu0 %v2314_v13  ;;  %v2318_v18 = vld [vmem:[%s4146_s1 + $0xc8] sm:$0xff]   ;;  %v2320_v20 = vld [vmem:[%s4146_s1 + $0xd0] sm:$0xff]  }
   0x8   :  { %2043 = vmatprep.subr.bf16.mxu0 %v2299_v4  ;;  %2104 = vmatpush3.bf16.msra.mxu1 %v2315_v14  ;;  %v2319_v19 = vld [vmem:[%s4146_s1 + $0x88] sm:$0xff]   ;;  %v2323_v21 = vld [vmem:[%s4146_s1 + $0x90] sm:$0xff]   ;;  %v2316_v24 = vld [vmem:[%s4146_s1 + $0x140] sm:$0xff]  }
   0x9   :  { %2105 = vmatprep.subr.bf16.mxu1 %v2318_v18  ;;  %v2312_v23 = vld [vmem:[%s4147_s0] ss:$8 sps:$4 sm:$0xff]   ;;  %v2321_v26 = vld [vmem:[%s4147_s0 + $0x14] ss:$8 sps:$4 sm:$0xff]   ;;  %v2324_v34 = vld [vmem:[%s4147_s0 + $0x10] ss:$8 sps:$4 sm:$0xff]  }
   0xa   :  { %v2317_v25 = vld [vmem:[%s4146_s1 + $0x100] sm:$0xff]   ;;  %v2327_v27 = vld [vmem:[%s4146_s1 + $0xd8] sm:$0xff]   ;;  %v2325_v30 = vld [vmem:[%s4146_s1 + $0x148] sm:$0xff]  }
   0xb   :  { %2044 = vmatpush3.bf16.msra.mxu0 %v2300_v5  ;;  %v2328_v28 = vld [vmem:[%s4146_s1 + $0x98] sm:$0xff]   ;;  %v2329_v29 = vld [vmem:[%s4146_s1 + $0xe0] sm:$0xff]   ;;  %v2326_v32 = vld [vmem:[%s4146_s1 + $0x108] sm:$0xff]  }
   0xc   :  { %2045 = vmatprep.subr.bf16.mxu0 %v2301_v6  ;;  %2106 = vmatpush3.bf16.msra.mxu1 %v2319_v19  ;;  %v2332_v31 = vld [vmem:[%s4146_s1 + $0xa0] sm:$0xff]   ;;  %v2334_v33 = vld [vmem:[%s4146_s1 + $0x150] sm:$0xff]   ;;  %v2336_v35 = vld [vmem:[%s4146_s1 + $0xe8] sm:$0xff]  }
   0xd   :  { %2107 = vmatprep.subr.bf16.mxu1 %v2320_v20  ;;  %v2330_v36 = vld [vmem:[%s4147_s0 + $0x24] ss:$8 sps:$4 sm:$0xff]   ;;  %v2338_v38 = vld [vmem:[%s4146_s1 + $0xf0] sm:$0xff]   ;;  %v2343_v41 = vld [vmem:[%s4146_s1 + $0x158] sm:$0xff]  }
   0xe   :  { %v2337_v37 = vld [vmem:[%s4146_s1 + $0xa8] sm:$0xff]   ;;  %v2335_v39 = vld [vmem:[%s4146_s1 + $0x110] sm:$0xff]   ;;  %v2344_v42 = vld [vmem:[%s4146_s1 + $0x118] sm:$0xff]  }
   0xf   :  { %2046 = vmatpush3.bf16.msra.mxu0 %v2302_v7  ;;  %v2341_v40 = vld [vmem:[%s4146_s1 + $0xb0] sm:$0xff]   ;;  %v2345_v43 = vld [vmem:[%s4146_s1 + $0xf8] sm:$0xff]   ;;  %v2333_v45 = vld [vmem:[%s4147_s0 + $0x20] ss:$8 sps:$4 sm:$0xff]  }
  0x10   :  { %2047 = vmatprep.subr.bf16.mxu0 %v2303_v8  ;;  %2108 = vmatpush3.bf16.msra.mxu1 %v2323_v21  ;;  %v2346_v44 = vld [vmem:[%s4146_s1 + $0xb8] sm:$0xff]   ;;  %v2349_v46 = vld [vmem:[%s4147_s0 + $0x84] ss:$8 sps:$4 sm:$0xff]   ;;  %v2347_v48 = vld [vmem:[%s4147_s0 + $0x80] ss:$8 sps:$4 sm:$0xff]  }
  0x11   :  { %2109 = vmatprep.subr.bf16.mxu1 %v2327_v27  ;;  %v2339_v47 = vld [vmem:[%s4147_s0 + $0x34] ss:$8 sps:$4 sm:$0xff]   ;;  %688 = vmatprep.mubr.bf16.mxu1 %v2349_v46  ;;  %v2353_v49 = vld [vmem:[%s4146_s1 + $0x160] sm:$0xff]   ;;  %v2342_v54 = vld [vmem:[%s4147_s0 + $0x30] ss:$8 sps:$4 sm:$0xff]  }
  0x12   :  { %v2354_v50 = vld [vmem:[%s4146_s1 + $0x1c0] sm:$0xff]   ;;  %v2357_v53 = vld [vmem:[%s4147_s0 + $0x94] ss:$8 sps:$4 sm:$0xff]   ;;  %v2359_v56 = vld [vmem:[%s4147_s0 + $0x90] ss:$8 sps:$4 sm:$0xff]  }
  0x13   :  { %2048 = vmatpush3.bf16.msra.mxu0 %v2304_v9  ;;  %v2355_v51 = vld [vmem:[%s4146_s1 + $0x120] sm:$0xff]   ;;  %v2363_v57 = vld [vmem:[%s4146_s1 + $0x168] sm:$0xff]   ;;  %v2360_v63 = vld [vmem:[%s4147_s0 + $0x54] ss:$8 sps:$4 sm:$0xff]  }
  0x14   :  { %2049 = vmatprep.subr.bf16.mxu0 %v2305_v10  ;;  %2110 = vmatpush3.bf16.msra.mxu1 %v2328_v28  ;;  %v2356_v52 = vld [vmem:[%s4146_s1 + $0x180] sm:$0xff]   ;;  %v2364_v58 = vld [vmem:[%s4146_s1 + $0x1c8] sm:$0xff]   ;;  %v2373_v1 = vld [vmem:[%s4146_s1 + $0x170] sm:$0xff]  }
  0x15   :  { %2111 = vmatprep.subr.bf16.mxu1 %v2329_v29  ;;  %v2350_v55 = vld [vmem:[%s4147_s0 + $0x44] ss:$8 sps:$4 sm:$0xff]   ;;  %v2352_v62 = vld [vmem:[%s4147_s0 + $0x40] ss:$8 sps:$4 sm:$0xff]   ;;  %v2374_v2 = vld [vmem:[%s4146_s1 + $0x1d0] sm:$0xff]  }
  0x16   :  { %v2365_v59 = vld [vmem:[%s4146_s1 + $0x128] sm:$0xff]   ;;  %v2375_v3 = vld [vmem:[%s4146_s1 + $0x130] sm:$0xff]   ;;  %v2383_v7 = vld [vmem:[%s4146_s1 + $0x178] sm:$0xff]  }
  0x17   :  { %2050 = vmatpush3.bf16.msra.mxu0 %v2306_v12  ;;  %v2366_v60 = vld [vmem:[%s4146_s1 + $0x188] sm:$0xff]   ;;  %v2376_v4 = vld [vmem:[%s4146_s1 + $0x190] sm:$0xff]   ;;  %v2384_v9 = vld [vmem:[%s4146_s1 + $0x1d8] sm:$0xff]  }
  0x18   :  { %2051 = vmatprep.subr.bf16.mxu0 %v2307_v15  ;;  %2112 = vmatpush3.bf16.msra.mxu1 %v2332_v31  ;;  %v2367_v61 = vld [vmem:[%s4147_s0 + $0xa4] ss:$8 sps:$4 sm:$0xff]   ;;  %v2369_v0 = vld [vmem:[%s4147_s0 + $0xa0] ss:$8 sps:$4 sm:$0xff]   ;;  %v2377_v5 = vld [vmem:[%s4147_s0 + $0xb4] ss:$8 sps:$4 sm:$0xff]  }
  0x19   :  { %2113 = vmatprep.subr.bf16.mxu1 %v2336_v35  ;;  %v2362_v6 = vld [vmem:[%s4147_s0 + $0x50] ss:$8 sps:$4 sm:$0xff]   ;;  %v2370_v8 = vld [vmem:[%s4147_s0 + $0x64] ss:$8 sps:$4 sm:$0xff]   ;;  %v2389_v18 = vld [vmem:[%s4147_s0 + $0xc0] ss:$8 sps:$4 sm:$0xff]  }
  0x1a   :  { %v2385_v10 = vld [vmem:[%s4146_s1 + $0x138] sm:$0xff]   ;;  %v2387_v13 = vld [vmem:[%s4147_s0 + $0xc4] ss:$8 sps:$4 sm:$0xff]   ;;  %v2424_v46 = vld [vmem:[%s4147_s0 + $0x140] ss:$8 sps:$4 sm:$0xff]  }
  0x1b   :  { %2052 = vmatpush3.bf16.msra.mxu0 %v2308_v16  ;;  %v2386_v11 = vld [vmem:[%s4146_s1 + $0x198] sm:$0xff]   ;;  %v2393_v14 = vld [vmem:[%s4146_s1 + $0x1e0] sm:$0xff]   ;;  %v2401_v20 = vld [vmem:[%s4146_s1 + $0x1e8] sm:$0xff]  }
  0x1c   :  { %2053 = vmatprep.subr.bf16.mxu0 %v2309_v17  ;;  %2114 = vmatpush3.bf16.msra.mxu1 %v2337_v37  ;;  %v2379_v12 = vld [vmem:[%s4147_s0 + $0xb0] ss:$8 sps:$4 sm:$0xff]   ;;  %v2394_v15 = vld [vmem:[%s4146_s1 + $0x1a0] sm:$0xff]   ;;  %v2380_v17 = vld [vmem:[%s4147_s0 + $0x74] ss:$8 sps:$4 sm:$0xff]  }
  0x1d   :  { %2115 = vmatprep.subr.bf16.mxu1 %v2338_v38  ;;  %v2372_v16 = vld [vmem:[%s4147_s0 + $0x60] ss:$8 sps:$4 sm:$0xff]   ;;  %v2395_v19 = vld [vmem:[%s4147_s0 + $0xd4] ss:$8 sps:$4 sm:$0xff]   ;;  %v2403_v27 = vld [vmem:[%s4147_s0 + $0xe4] ss:$8 sps:$4 sm:$0xff]  }
  0x1e   :  { %v2402_v21 = vld [vmem:[%s4146_s1 + $0x1a8] sm:$0xff]   ;;  %v2417_v28 = vld [vmem:[%s4146_s1 + $0x1f8] sm:$0xff]  }
  0x1f   :  { %2054 = vmatpush3.bf16.msra.mxu0 %v2310_v22  ;;  %v2409_v22 = vld [vmem:[%s4146_s1 + $0x1f0] sm:$0xff]   ;;  %v2418_v29 = vld [vmem:[%s4146_s1 + $0x1b8] sm:$0xff]   ;;  %v2406_v35 = vld [vmem:[%s4147_s0 + $0x124] ss:$8 sps:$4 sm:$0xff]  }
  0x20   :  { %2167 = vmatprep.subr.bf16.mxu0 %v2316_v24  ;;  %2116 = vmatpush3.bf16.msra.mxu1 %v2341_v40  ;;  %v2382_v24 = vld [vmem:[%s4147_s0 + $0x70] ss:$8 sps:$4 sm:$0xff]   ;;  %v2398_v31 = vld [vmem:[%s4147_s0 + $0x114] ss:$8 sps:$4 sm:$0xff]   ;;  %v2421_v37 = vld [vmem:[%s4147_s0 + $0x184] ss:$8 sps:$4 sm:$0xff]  }
  0x21   :  { %2117 = vmatprep.subr.bf16.mxu1 %v2345_v43  ;;  %v2408_v38 = vld [vmem:[%s4147_s0 + $0x120] ss:$8 sps:$4 sm:$0xff]   ;;  %v2422_v43 = vld [vmem:[%s4147_s0 + $0x144] ss:$8 sps:$4 sm:$0xff]  }
  0x22   :  { %416 = vmatmul.mubr.bf16.vlgmr.msra.gmra.mrb[0].mxu0 %v2312_v23  ;;  %v2410_v23 = vld [vmem:[%s4146_s1 + $0x1b0] sm:$0xff]   ;;  %v2419_v40 = vld [vmem:[%s4147_s0 + $0x180] ss:$8 sps:$4 sm:$0xff]  }
  0x23   :  { %2168 = vmatpush3.bf16.msra.mxu0 %v2317_v25  ;;  %423 = vmatprep.mubr.bf16.mxu0 %v2321_v26  ;;  %v2392_v25 = vld [vmem:[%s4147_s0 + $0x104] ss:$8 sps:$4 sm:$0xff]   ;;  %v2397_v26 = vld [vmem:[%s4147_s0 + $0xd0] ss:$8 sps:$4 sm:$0xff]  }
  0x24   :  { %2169 = vmatprep.subr.bf16.mxu0 %v2325_v30  ;;  %2118 = vmatpush3.bf16.msra.mxu1 %v2346_v44  ;;  %v2390_v30 = vld [vmem:[%s4147_s0 + $0x100] ss:$8 sps:$4 sm:$0xff]   ;;  %v2427_v44 = vld [vmem:[%s4147_s0 + $0x190] ss:$8 sps:$4 sm:$0xff]  }
  0x25   :  { %2231 = vmatprep.subr.bf16.mxu1 %v2354_v50  ;;  %v2430_v50 = vld [vmem:[%s4147_s0 + $0x150] ss:$8 sps:$4 sm:$0xff]  }
  0x27   :  { %2170 = vmatpush3.bf16.msra.mxu0 %v2326_v32  ;;  %689 = vmatmul.mubr.bf16.vlgmr.msra.gmra.mrb[0].mxu1 %v2347_v48  ;;  %v2405_v32 = vld [vmem:[%s4147_s0 + $0xe0] ss:$8 sps:$4 sm:$0xff]  }
  0x28   :  { %2171 = vmatprep.subr.bf16.mxu0 %v2334_v33  ;;  %2232 = vmatpush3.bf16.msra.mxu1 %v2356_v52  ;;  %v2411_v33 = vld [vmem:[%s4147_s0 + $0xf4] ss:$8 sps:$4 sm:$0xff]   ;;  %v2433_v48 = vld [vmem:[%s4147_s0 + $0x1a0] ss:$8 sps:$4 sm:$0xff]   ;;  %v2439_v52 = vld [vmem:[%s4147_s0 + $0x1b0] ss:$8 sps:$4 sm:$0xff]  }
  0x29   :  { %696 = vmatprep.mubr.bf16.mxu1 %v2357_v53  ;;  %2233 = vmatprep.subr.bf16.mxu1 %v2364_v58  ;;  %v2443_v53 = vld [vmem:[%s4147_s0 + $0x1c4] ss:$8 sps:$4 sm:$0xff]   ;;  %v2442_v58 = vld [vmem:[%s4147_s0 + $0x170] ss:$8 sps:$4 sm:$0xff]  }
  0x2a   :  { %424 = vmatmul.mubr.bf16.gmra.mrb[4].mxu0 %v2324_v34  ;;  %v2400_v34 = vld [vmem:[%s4147_s0 + $0x110] ss:$8 sps:$4 sm:$0xff]  }
  0x2b   :  { %431 = vmatprep.mubr.bf16.mxu0 %v2330_v36  ;;  %2172 = vmatpush3.bf16.msra.mxu0 %v2335_v39  ;;  %v2413_v36 = vld [vmem:[%s4147_s0 + $0xf0] ss:$8 sps:$4 sm:$0xff]   ;;  %v2414_v39 = vld [vmem:[%s4147_s0 + $0x134] ss:$8 sps:$4 sm:$0xff]  }
  0x2c   :  { %2173 = vmatprep.subr.bf16.mxu0 %v2343_v41  ;;  %2234 = vmatpush3.bf16.msra.mxu1 %v2366_v60  ;;  %v2425_v41 = vld [vmem:[%s4147_s0 + $0x194] ss:$8 sps:$4 sm:$0xff]   ;;  %v2449_v60 = vld [vmem:[%s4147_s0 + $0x1e4] ss:$8 sps:$4 sm:$0xff]  }
  0x2d   :  { %2235 = vmatprep.subr.bf16.mxu1 %v2374_v2 }
  0x2f   :  { %2174 = vmatpush3.bf16.msra.mxu0 %v2344_v42  ;;  %697 = vmatmul.mubr.bf16.gmra.mrb[4].mxu1 %v2359_v56  ;;  %v2416_v42 = vld [vmem:[%s4147_s0 + $0x130] ss:$8 sps:$4 sm:$0xff]   ;;  %v2445_v56 = vld [vmem:[%s4147_s0 + $0x1c0] ss:$8 sps:$4 sm:$0xff]  }
  0x30   :  { %2175 = vmatprep.subr.bf16.mxu0 %v2353_v49  ;;  %704 = vmatprep.mubr.bf16.mxu1 %v2367_v61  ;;  %v2437_v49 = vld [vmem:[%s4147_s0 + $0x1b4] ss:$8 sps:$4 sm:$0xff]   ;;  %v2451_v61 = vld [vmem:[%s4147_s0 + $0x1e0] ss:$8 sps:$4 sm:$0xff]  }
  0x31   :  { %2236 = vmatpush3.bf16.msra.mxu1 %v2376_v4 }
  0x32   :  { %432 = vmatmul.mubr.bf16.gmra.mrb[8].mxu0 %v2333_v45  ;;  %2237 = vmatprep.subr.bf16.mxu1 %v2384_v9  ;;  %v2431_v45 = vld [vmem:[%s4147_s0 + $0x1a4] ss:$8 sps:$4 sm:$0xff]  }
  0x33   :  { %439 = vmatprep.mubr.bf16.mxu0 %v2339_v47  ;;  %2176 = vmatpush3.bf16.msra.mxu0 %v2355_v51  ;;  %v2428_v47 = vld [vmem:[%s4147_s0 + $0x154] ss:$8 sps:$4 sm:$0xff]   ;;  %v2434_v51 = vld [vmem:[%s4147_s0 + $0x164] ss:$8 sps:$4 sm:$0xff]  }
  0x34   :  { %2177 = vmatprep.subr.bf16.mxu0 %v2363_v57  ;;  %v2446_v57 = vld [vmem:[%s4147_s0 + $0x1d4] ss:$8 sps:$4 sm:$0xff]  }
  0x35   :  { %2238 = vmatpush3.bf16.msra.mxu1 %v2386_v11 }
  0x36   :  { %2239 = vmatprep.subr.bf16.mxu1 %v2393_v14 }
  0x37   :  { %2178 = vmatpush3.bf16.msra.mxu0 %v2365_v59  ;;  %705 = vmatmul.mubr.bf16.gmra.mrb[8].mxu1 %v2369_v0  ;;  %v2448_v59 = vld [vmem:[%s4147_s0 + $0x1d0] ss:$8 sps:$4 sm:$0xff]  }
  0x38   :  { %2179 = vmatprep.subr.bf16.mxu0 %v2373_v1  ;;  %712 = vmatprep.mubr.bf16.mxu1 %v2377_v5 }
  0x39   :  { %2240 = vmatpush3.bf16.msra.mxu1 %v2394_v15 }
  0x3a   :  { %440 = vmatmul.mubr.bf16.gmra.mrb[12].mxu0 %v2342_v54  ;;  %2241 = vmatprep.subr.bf16.mxu1 %v2401_v20  ;;  %v2436_v54 = vld [vmem:[%s4147_s0 + $0x160] ss:$8 sps:$4 sm:$0xff]  }
  0x3b   :  { %447 = vmatprep.mubr.bf16.mxu0 %v2350_v55  ;;  %2180 = vmatpush3.bf16.msra.mxu0 %v2375_v3  ;;  %v2440_v55 = vld [vmem:[%s4147_s0 + $0x174] ss:$8 sps:$4 sm:$0xff]  }
  0x3c   :  { %2181 = vmatprep.subr.bf16.mxu0 %v2383_v7 }
  0x3d   :  { %2242 = vmatpush3.bf16.msra.mxu1 %v2402_v21 }
  0x3e   :  { %2243 = vmatprep.subr.bf16.mxu1 %v2409_v22 }
  0x3f   :  { %2182 = vmatpush3.bf16.msra.mxu0 %v2385_v10  ;;  %713 = vmatmul.mubr.bf16.gmra.mrb[12].mxu1 %v2379_v12 }
  0x40   :  { %720 = vmatprep.mubr.bf16.mxu1 %v2387_v13 }
  0x41   :  { %2244 = vmatpush3.bf16.msra.mxu1 %v2410_v23 }
  0x42   :  { %448 = vmatmul.mubr.bf16.gmra.mrb[16].mxu0 %v2352_v62  ;;  %2245 = vmatprep.subr.bf16.mxu1 %v2417_v28  ;;  %v2452_v62 = vld [vmem:[%s4147_s0 + $0x1f4] ss:$8 sps:$4 sm:$0xff]  }
  0x43   :  { %455 = vmatprep.mubr.bf16.mxu0 %v2360_v63  ;;  %v2454_v63 = vld [vmem:[%s4147_s0 + $0x1f0] ss:$8 sps:$4 sm:$0xff]  }
  0x45   :  { %2246 = vmatpush3.bf16.msra.mxu1 %v2418_v29 }
  0x47   :  { %721 = vmatmul.mubr.bf16.gmra.mrb[16].mxu1 %v2389_v18 }
  0x48   :  { %728 = vmatprep.mubr.bf16.mxu1 %v2395_v19 }
  0x4a   :  { %456 = vmatmul.mubr.bf16.gmra.mrb[20].mxu0 %v2362_v6 }
  0x4b   :  { %463 = vmatprep.mubr.bf16.mxu0 %v2370_v8 }
  0x4f   :  { %729 = vmatmul.mubr.bf16.gmra.mrb[20].mxu1 %v2397_v26 }
  0x50   :  { %736 = vmatprep.mubr.bf16.mxu1 %v2403_v27 }
  0x52   :  { %464 = vmatmul.mubr.bf16.gmra.mrb[24].mxu0 %v2372_v16 }
  0x53   :  { %471 = vmatprep.mubr.bf16.mxu0 %v2380_v17 }
  0x57   :  { %737 = vmatmul.mubr.bf16.gmra.mrb[24].mxu1 %v2405_v32 }
  0x58   :  { %744 = vmatprep.mubr.bf16.mxu1 %v2411_v33 }
  0x5a   :  { %472 = vmatmul.mubr.bf16.gmra.mrb[28].mxu0 %v2382_v24 }
  0x5b   :  { %961 = vmatprep.mubr.bf16.mxu0 %v2392_v25 }
  0x5f   :  { %745 = vmatmul.mubr.bf16.gmra.mrb[28].mxu1 %v2413_v36 }
  0x60   :  { %1234 = vmatprep.mubr.bf16.mxu1 %v2421_v37 }
  0x62   :  { %962 = vmatmul.mubr.bf16.vlgmr.msra.gmra.mrb[32].mxu0 %v2390_v30 }
  0x63   :  { %969 = vmatprep.mubr.bf16.mxu0 %v2398_v31 }
  0x67   :  { %1235 = vmatmul.mubr.bf16.vlgmr.msra.gmra.mrb[32].mxu1 %v2419_v40 }
  0x68   :  { %1242 = vmatprep.mubr.bf16.mxu1 %v2425_v41 }
  0x6a   :  { %970 = vmatmul.mubr.bf16.gmra.mrb[36].mxu0 %v2400_v34 }
  0x6b   :  { %977 = vmatprep.mubr.bf16.mxu0 %v2406_v35 }
  0x6f   :  { %1243 = vmatmul.mubr.bf16.gmra.mrb[36].mxu1 %v2427_v44 }
  0x70   :  { %1250 = vmatprep.mubr.bf16.mxu1 %v2431_v45 }
  0x72   :  { %978 = vmatmul.mubr.bf16.gmra.mrb[40].mxu0 %v2408_v38 }
  0x73   :  { %985 = vmatprep.mubr.bf16.mxu0 %v2414_v39 }
  0x77   :  { %1251 = vmatmul.mubr.bf16.gmra.mrb[40].mxu1 %v2433_v48 }
  0x78   :  { %1258 = vmatprep.mubr.bf16.mxu1 %v2437_v49 }
  0x7a   :  { %986 = vmatmul.mubr.bf16.gmra.mrb[44].mxu0 %v2416_v42 }
  0x7b   :  { %993 = vmatprep.mubr.bf16.mxu0 %v2422_v43 }
  0x7f   :  { %1259 = vmatmul.mubr.bf16.gmra.mrb[44].mxu1 %v2439_v52 }
  0x80   :  { %1266 = vmatprep.mubr.bf16.mxu1 %v2443_v53 }
  0x82   :  { %994 = vmatmul.mubr.bf16.gmra.mrb[48].mxu0 %v2424_v46 }
  0x83   :  { %1001 = vmatprep.mubr.bf16.mxu0 %v2428_v47 }
  0x87   :  { %1267 = vmatmul.mubr.bf16.gmra.mrb[48].mxu1 %v2445_v56 }
  0x88   :  { %1274 = vmatprep.mubr.bf16.mxu1 %v2446_v57 }
  0x8a   :  { %1002 = vmatmul.mubr.bf16.gmra.mrb[52].mxu0 %v2430_v50 }
  0x8b   :  { %1009 = vmatprep.mubr.bf16.mxu0 %v2434_v51 }
  0x8f   :  { %1275 = vmatmul.mubr.bf16.gmra.mrb[52].mxu1 %v2448_v59 }
  0x90   :  { %1282 = vmatprep.mubr.bf16.mxu1 %v2449_v60 }
  0x92   :  { %1010 = vmatmul.mubr.bf16.gmra.mrb[56].mxu0 %v2436_v54 }
  0x93   :  { %1017 = vmatprep.mubr.bf16.mxu0 %v2440_v55 }
  0x97   :  { %1283 = vmatmul.mubr.bf16.gmra.mrb[56].mxu1 %v2451_v61 }
  0x98   :  { %1290 = vmatprep.mubr.bf16.mxu1 %v2452_v62 }
  0x9a   :  { %1018 = vmatmul.mubr.bf16.gmra.mrb[60].mxu0 %v2442_v58 }
  0x9f   :  { %1291 = vmatmul.mubr.bf16.gmra.mrb[60].mxu1 %v2454_v63 }
  0xf5   :  { %v2055_v0 = vpop.f32.mrb[0].mxu0 }
  0xf6   :  { %v2056_v1 = vpop.f32.mrb[1].mxu0 }
  0xf7   :  { %v2861_v2 = vadd.f32 %v2056_v1, %v2055_v0  ;;  %v2058_v3 = vpop.f32.mrb[2].mxu0 }
  0xf8   :  { %v2059_v4 = vpop.f32.mrb[3].mxu0 }
  0xf9   :  { %v2863_v5 = vadd.f32 %v2059_v4, %v2058_v3  ;;  %v1435_v18 = vmul.f32 %v2861_v2, %v2861_v2  ;;  %v1300_v27 = vsel %vm1299_vm0, %v2861_v2, 0.0 }
  0xfa   :  { %v2119_v17 = vpop.f32.mrb[0].mxu1 }
  0xfb   :  { %v1436_v14 = vmul.f32 %v2863_v5, %v2863_v5  ;;  %v2120_v20 = vpop.f32.mrb[1].mxu1  ;;  %v1301_v21 = vsel %vm1299_vm0, %v2863_v5, 0.0  ;;  %v1499_v32 = vsel %vm1299_vm0, %v1435_v18, 0.0 }
  0xfc   :  { %v2881_v24 = vadd.f32 %v2120_v20, %v2119_v17  ;;  %v2122_v25 = vpop.f32.mrb[2].mxu1  ;;  %v1302_v30 = vadd.f32 %v1301_v21, %v1300_v27 }
  0xfd   :  { %v2061_v6 = vpop.f32.mrb[4].mxu0  ;;  %v2123_v26 = vpop.f32.mrb[3].mxu1  ;;  %v1500_v28 = vsel %vm1299_vm0, %v1436_v14, 0.0 }
  0xfe   :  { %v2062_v7 = vpop.f32.mrb[5].mxu0  ;;  %v2888_v31 = vadd.f32 %v2123_v26, %v2122_v25  ;;  %v1501_v36 = vadd.f32 %v1500_v28, %v1499_v32 }
  0xff   :  { %v2865_v8 = vadd.f32 %v2062_v7, %v2061_v6  ;;  %v2064_v9 = vpop.f32.mrb[6].mxu0 }
 0x100   :  { %v2065_v10 = vpop.f32.mrb[7].mxu0 }
 0x101   :  { %v2867_v11 = vadd.f32 %v2065_v10, %v2064_v9  ;;  %v1437_v22 = vmul.f32 %v2865_v8, %v2865_v8  ;;  %v1303_v29 = vsel %vm1299_vm0, %v2865_v8, 0.0 }
 0x102   :  { %v1304_v37 = vadd.f32 %v1303_v29, %v1302_v30  ;;  %v2125_v43 = vpop.f32.mrb[4].mxu1 }
 0x103   :  { %v1502_v33 = vsel %vm1299_vm0, %v1437_v22, 0.0  ;;  %v1438_v34 = vmul.f32 %v2867_v11, %v2867_v11  ;;  %v1305_v39 = vsel %vm1299_vm0, %v2867_v11, 0.0  ;;  %v2126_v46 = vpop.f32.mrb[5].mxu1 }
 0x104   :  { %v1503_v44 = vadd.f32 %v1502_v33, %v1501_v36  ;;  %v2905_v50 = vadd.f32 %v2126_v46, %v2125_v43  ;;  %v2128_v51 = vpop.f32.mrb[6].mxu1  ;;  %v1306_v52 = vadd.f32 %v1305_v39, %v1304_v37 }
 0x105   :  { %v2067_v12 = vpop.f32.mrb[8].mxu0  ;;  %v1504_v47 = vsel %vm1299_vm0, %v1438_v34, 0.0  ;;  %v2129_v53 = vpop.f32.mrb[7].mxu1 }
 0x106   :  { %v2068_v13 = vpop.f32.mrb[9].mxu0  ;;  %v1505_v56 = vadd.f32 %v1504_v47, %v1503_v44  ;;  %v2910_v58 = vadd.f32 %v2129_v53, %v2128_v51 }
 0x107   :  { %v2871_v15 = vadd.f32 %v2068_v13, %v2067_v12  ;;  %v2070_v16 = vpop.f32.mrb[10].mxu0 }
 0x108   :  { %v2071_v19 = vpop.f32.mrb[11].mxu0 }
 0x109   :  { %v2879_v23 = vadd.f32 %v2071_v19, %v2070_v16  ;;  %v1439_v40 = vmul.f32 %v2871_v15, %v2871_v15  ;;  %v1307_v48 = vsel %vm1299_vm0, %v2871_v15, 0.0 }
 0x10a   :  { %v1308_v57 = vadd.f32 %v1307_v48, %v1306_v52  ;;  %v2131_v6 = vpop.f32.mrb[8].mxu1 }
 0x10b   :  { %v1506_v54 = vsel %vm1299_vm0, %v1439_v40, 0.0  ;;  %v1440_v55 = vmul.f32 %v2879_v23, %v2879_v23  ;;  %v1309_v59 = vsel %vm1299_vm0, %v2879_v23, 0.0  ;;  %v2132_v10 = vpop.f32.mrb[9].mxu1 }
 0x10c   :  { %v1507_v62 = vadd.f32 %v1506_v54, %v1505_v56  ;;  %v1310_v7 = vadd.f32 %v1309_v59, %v1308_v57  ;;  %v2926_v16 = vadd.f32 %v2132_v10, %v2131_v6  ;;  %v2134_v17 = vpop.f32.mrb[10].mxu1 }
 0x10d   :  { %v2073_v35 = vpop.f32.mrb[12].mxu0  ;;  %v1508_v0 = vsel %vm1299_vm0, %v1440_v55, 0.0  ;;  %v2135_v20 = vpop.f32.mrb[11].mxu1 }
 0x10e   :  { %v2074_v38 = vpop.f32.mrb[13].mxu0  ;;  %v1509_v18 = vadd.f32 %v1508_v0, %v1507_v62  ;;  %v2932_v26 = vadd.f32 %v2135_v20, %v2134_v17 }
 0x10f   :  { %v2898_v41 = vadd.f32 %v2074_v38, %v2073_v35  ;;  %v2076_v42 = vpop.f32.mrb[14].mxu0 }
 0x110   :  { %v2077_v45 = vpop.f32.mrb[15].mxu0 }
 0x111   :  { %v2903_v49 = vadd.f32 %v2077_v45, %v2076_v42  ;;  %v1441_v60 = vmul.f32 %v2898_v41, %v2898_v41  ;;  %v1311_v1 = vsel %vm1299_vm0, %v2898_v41, 0.0 }
 0x112   :  { %v1312_v19 = vadd.f32 %v1311_v1, %v1310_v7  ;;  %v2137_v37 = vpop.f32.mrb[12].mxu1 }
 0x113   :  { %v1510_v12 = vsel %vm1299_vm0, %v1441_v60, 0.0  ;;  %v1442_v13 = vmul.f32 %v2903_v49, %v2903_v49  ;;  %v1313_v21 = vsel %vm1299_vm0, %v2903_v49, 0.0  ;;  %v2138_v42 = vpop.f32.mrb[13].mxu1 }
 0x114   :  { %v1511_v25 = vadd.f32 %v1510_v12, %v1509_v18  ;;  %v1314_v30 = vadd.f32 %v1313_v21, %v1312_v19  ;;  %v2948_v46 = vadd.f32 %v2138_v42, %v2137_v37  ;;  %v2140_v47 = vpop.f32.mrb[14].mxu1 }
 0x115   :  { %v2079_v61 = vpop.f32.mrb[16].mxu0  ;;  %v1512_v27 = vsel %vm1299_vm0, %v1442_v13, 0.0  ;;  %v2141_v51 = vpop.f32.mrb[15].mxu1 }
 0x116   :  { %v2080_v63 = vpop.f32.mrb[17].mxu0  ;;  %v1513_v38 = vadd.f32 %v1512_v27, %v1511_v25  ;;  %v2955_v56 = vadd.f32 %v2141_v51, %v2140_v47 }
 0x117   :  { %v2919_v3 = vadd.f32 %v2080_v63, %v2079_v61  ;;  %v2082_v4 = vpop.f32.mrb[18].mxu0 }
 0x118   :  { %v2083_v9 = vpop.f32.mrb[19].mxu0 }
 0x119   :  { %v2924_v14 = vadd.f32 %v2083_v9, %v2082_v4  ;;  %v1443_v22 = vmul.f32 %v2919_v3, %v2919_v3  ;;  %v1315_v28 = vsel %vm1299_vm0, %v2919_v3, 0.0 }
 0x11a   :  { %v1316_v39 = vadd.f32 %v1315_v28, %v1314_v30  ;;  %v2143_v4 = vpop.f32.mrb[16].mxu1 }
 0x11b   :  { %v1514_v33 = vsel %vm1299_vm0, %v1443_v22, 0.0  ;;  %v1444_v34 = vmul.f32 %v2924_v14, %v2924_v14  ;;  %v1317_v43 = vsel %vm1299_vm0, %v2924_v14, 0.0  ;;  %v2144_v10 = vpop.f32.mrb[17].mxu1 }
 0x11c   :  { %v1515_v48 = vadd.f32 %v1514_v33, %v1513_v38  ;;  %v1318_v54 = vadd.f32 %v1317_v43, %v1316_v39  ;;  %v2969_v18 = vadd.f32 %v2144_v10, %v2143_v4  ;;  %v2146_v19 = vpop.f32.mrb[18].mxu1  ;;  %v1331_v4 = vsel %vm1299_vm0, %v2881_v24, 0.0 }
 0x11d   :  { %v2085_v29 = vpop.f32.mrb[20].mxu0  ;;  %v1516_v52 = vsel %vm1299_vm0, %v1444_v34, 0.0  ;;  %v2147_v21 = vpop.f32.mrb[19].mxu1 }
 0x11e   :  { %v2086_v32 = vpop.f32.mrb[21].mxu0  ;;  %v1517_v60 = vadd.f32 %v1516_v52, %v1515_v48 }
 0x11f   :  { %v2940_v35 = vadd.f32 %v2086_v32, %v2085_v29  ;;  %v2088_v36 = vpop.f32.mrb[22].mxu0  ;;  %v2974_v29 = vadd.f32 %v2147_v21, %v2146_v19  ;;  %v1453_v21 = vmul.f32 %v2905_v50, %v2905_v50 }
 0x120   :  { %v2089_v40 = vpop.f32.mrb[23].mxu0 }
 0x121   :  { %v1445_v44 = vmul.f32 %v2940_v35, %v2940_v35  ;;  %v2946_v45 = vadd.f32 %v2089_v40, %v2088_v36  ;;  %v1319_v53 = vsel %vm1299_vm0, %v2940_v35, 0.0 }
 0x122   :  { %v1320_v61 = vadd.f32 %v1319_v53, %v1318_v54  ;;  %v2149_v39 = vpop.f32.mrb[20].mxu1 }
 0x123   :  { %v1446_v55 = vmul.f32 %v2946_v45, %v2946_v45  ;;  %v1518_v57 = vsel %vm1299_vm0, %v1445_v44, 0.0  ;;  %v1321_v63 = vsel %vm1299_vm0, %v2946_v45, 0.0  ;;  %v2150_v43 = vpop.f32.mrb[21].mxu1 }
 0x124   :  { %v1519_v6 = vadd.f32 %v1518_v57, %v1517_v60  ;;  %v1322_v20 = vadd.f32 %v1321_v63, %v1320_v61  ;;  %v2987_v51 = vadd.f32 %v2150_v43, %v2149_v39  ;;  %v2152_v52 = vpop.f32.mrb[22].mxu1  ;;  %v1451_v57 = vmul.f32 %v2881_v24, %v2881_v24 }
 0x125   :  { %v2091_v59 = vpop.f32.mrb[24].mxu0  ;;  %v1520_v7 = vsel %vm1299_vm0, %v1446_v55, 0.0  ;;  %v2153_v55 = vpop.f32.mrb[23].mxu1 }
 0x126   :  { %v2092_v62 = vpop.f32.mrb[25].mxu0  ;;  %v1521_v27 = vadd.f32 %v1520_v7, %v1519_v6  ;;  %v1452_v6 = vmul.f32 %v2888_v31, %v2888_v31  ;;  %v1530_v19 = vsel %vm1299_vm0, %v1451_v57, 0.0  ;;  %v1456_v57 = vmul.f32 %v2932_v26, %v2932_v26 }
 0x127   :  { %v2960_v0 = vadd.f32 %v2092_v62, %v2091_v59  ;;  %v2094_v1 = vpop.f32.mrb[26].mxu0 }
 0x128   :  { %v2095_v9 = vpop.f32.mrb[27].mxu0 }
 0x129   :  { %v1323_v12 = vsel %vm1299_vm0, %v2960_v0, 0.0  ;;  %v1447_v13 = vmul.f32 %v2960_v0, %v2960_v0  ;;  %v2967_v17 = vadd.f32 %v2095_v9, %v2094_v1  ;;  %v2996_v1 = vadd.f32 %v2153_v55, %v2152_v52 }
 0x12a   :  { %v1324_v28 = vadd.f32 %v1323_v12, %v1322_v20  ;;  %v1333_v20 = vsel %vm1299_vm0, %v2888_v31, 0.0  ;;  %v1534_v52 = vsel %vm1299_vm0, %v1453_v21, 0.0  ;;  %v1540_v21 = vsel %vm1299_vm0, %v1456_v57, 0.0 }
 0x12b   :  { %v1522_v22 = vsel %vm1299_vm0, %v1447_v13, 0.0  ;;  %v1448_v25 = vmul.f32 %v2967_v17, %v2967_v17  ;;  %v1325_v30 = vsel %vm1299_vm0, %v2967_v17, 0.0 }
 0x12c   :  { %v1523_v33 = vadd.f32 %v1522_v22, %v1521_v27  ;;  %v1326_v40 = vadd.f32 %v1325_v30, %v1324_v28  ;;  %v2155_v27 = vpop.f32.mrb[24].mxu1 }
 0x12d   :  { %v2097_v32 = vpop.f32.mrb[28].mxu0  ;;  %v1524_v36 = vsel %vm1299_vm0, %v1448_v25, 0.0 }
 0x12e   :  { %v2098_v34 = vpop.f32.mrb[29].mxu0  ;;  %v1525_v53 = vadd.f32 %v1524_v36, %v1523_v33  ;;  %v2156_v33 = vpop.f32.mrb[25].mxu1  ;;  %v1335_v36 = vsel %vm1299_vm0, %v2905_v50, 0.0 }
 0x12f   :  { %v2979_v37 = vadd.f32 %v2098_v34, %v2097_v32  ;;  %v2100_v38 = vpop.f32.mrb[30].mxu0  ;;  %v1532_v34 = vsel %vm1299_vm0, %v1452_v6, 0.0 }
 0x130   :  { %v2101_v42 = vpop.f32.mrb[31].mxu0 }
 0x131   :  { %v1327_v44 = vsel %vm1299_vm0, %v2979_v37, 0.0  ;;  %v1449_v47 = vmul.f32 %v2979_v37, %v2979_v37  ;;  %v2985_v48 = vadd.f32 %v2101_v42, %v2100_v38  ;;  %v1454_v38 = vmul.f32 %v2910_v58, %v2910_v58 }
 0x132   :  { %v1328_v54 = vadd.f32 %v1327_v44, %v1326_v40  ;;  %v2158_v40 = vpop.f32.mrb[26].mxu1  ;;  %v3017_v44 = vadd.f32 %v2156_v33, %v2155_v27  ;;  %v1458_v33 = vmul.f32 %v2955_v56, %v2955_v56 }
 0x133   :  { %v1526_v59 = vsel %vm1299_vm0, %v1449_v47, 0.0  ;;  %v1329_v60 = vsel %vm1299_vm0, %v2985_v48, 0.0  ;;  %v1450_v61 = vmul.f32 %v2985_v48, %v2985_v48  ;;  %v2159_v47 = vpop.f32.mrb[27].mxu1 }
 0x134   :  { %v1527_v62 = vadd.f32 %v1526_v59, %v1525_v53  ;;  %v1330_v63 = vadd.f32 %v1329_v60, %v1328_v54  ;;  %v1337_v53 = vsel %vm1299_vm0, %v2910_v58, 0.0  ;;  %v1455_v54 = vmul.f32 %v2926_v16, %v2926_v16 }
 0x135   :  { %v1528_v7 = vsel %vm1299_vm0, %v1450_v61, 0.0  ;;  %v2183_v9 = vpop.f32.mrb[32].mxu0  ;;  %v3024_v55 = vadd.f32 %v2159_v47, %v2158_v40  ;;  %v1536_v61 = vsel %vm1299_vm0, %v1454_v38, 0.0 }
 0x136   :  { %v1332_v10 = vadd.f32 %v1331_v4, %v1330_v63  ;;  %v1529_v12 = vadd.f32 %v1528_v7, %v1527_v62  ;;  %v2184_v13 = vpop.f32.mrb[33].mxu0  ;;  %v1339_v62 = vsel %vm1299_vm0, %v2926_v16, 0.0 }
 0x137   :  { %v3008_v22 = vadd.f32 %v2184_v13, %v2183_v9  ;;  %v2186_v25 = vpop.f32.mrb[34].mxu0  ;;  %v1538_v9 = vsel %vm1299_vm0, %v1455_v54, 0.0 }
 0x138   :  { %v1334_v28 = vadd.f32 %v1333_v20, %v1332_v10  ;;  %v1531_v30 = vadd.f32 %v1530_v19, %v1529_v12  ;;  %v2187_v32 = vpop.f32.mrb[35].mxu0  ;;  %v1341_v10 = vsel %vm1299_vm0, %v2932_v26, 0.0  ;;  %v1457_v12 = vmul.f32 %v2948_v46, %v2948_v46  ;;  %v2161_v20 = vpop.f32.mrb[28].mxu1 }
 0x139   :  { %4175 = vst [vmem:[#allocation2_spill] sm:$0xff] %v3008_v22  ;;  %v3015_v39 = vadd.f32 %v2187_v32, %v2186_v25  ;;  %v1343_v32 = vsel %vm1299_vm0, %v2948_v46, 0.0 }
 0x13a   :  { %v1336_v42 = vadd.f32 %v1335_v36, %v1334_v28  ;;  %v1533_v43 = vadd.f32 %v1532_v34, %v1531_v30  ;;  %v2162_v30 = vpop.f32.mrb[29].mxu1  ;;  %v1542_v47 = vsel %vm1299_vm0, %v1457_v12, 0.0  ;;  %v1461_v12 = vmul.f32 %v2987_v51, %v2987_v51 }
 0x13b   :  { %4176 = vst [vmem:[#allocation3_spill] sm:$0xff] %v3015_v39  ;;  %v3045_v36 = vadd.f32 %v2162_v30, %v2161_v20  ;;  %v2164_v38 = vpop.f32.mrb[30].mxu1 }
 0x13c   :  { %v1338_v59 = vadd.f32 %v1337_v53, %v1336_v42  ;;  %v1535_v60 = vadd.f32 %v1534_v52, %v1533_v43  ;;  %v2165_v43 = vpop.f32.mrb[31].mxu1  ;;  %v1345_v52 = vsel %vm1299_vm0, %v2955_v56, 0.0  ;;  %v1459_v53 = vmul.f32 %v2969_v18, %v2969_v18 }
 0x13d   :  { %v2189_v63 = vpop.f32.mrb[36].mxu0 }
 0x13e   :  { %v1537_v4 = vadd.f32 %v1536_v61, %v1535_v60  ;;  %v1340_v6 = vadd.f32 %v1339_v62, %v1338_v59  ;;  %v2190_v7 = vpop.f32.mrb[37].mxu0  ;;  %v3052_v59 = vadd.f32 %v2165_v43, %v2164_v38  ;;  %v1544_v60 = vsel %vm1299_vm0, %v1458_v33, 0.0 }
 0x13f   :  { %v3036_v13 = vadd.f32 %v2190_v7, %v2189_v63  ;;  %v2192_v19 = vpop.f32.mrb[38].mxu0  ;;  %v1347_v61 = vsel %vm1299_vm0, %v2969_v18, 0.0  ;;  %v1460_v62 = vmul.f32 %v2974_v29, %v2974_v29  ;;  %v1351_v33 = vsel %vm1299_vm0, %v2987_v51, 0.0 }
 0x140   :  { %v1342_v25 = vadd.f32 %v1341_v10, %v1340_v6  ;;  %v1539_v27 = vadd.f32 %v1538_v9, %v1537_v4  ;;  %v2193_v28 = vpop.f32.mrb[39].mxu0  ;;  %v1546_v9 = vsel %vm1299_vm0, %v1459_v53, 0.0  ;;  %v1349_v10 = vsel %vm1299_vm0, %v2974_v29, 0.0 }
 0x141   :  { %4177 = vst [vmem:[#allocation4_spill] sm:$0xff] %v3036_v13  ;;  %v3043_v34 = vadd.f32 %v2193_v28, %v2192_v19  ;;  %v1462_v38 = vmul.f32 %v2996_v1, %v2996_v1 }
 0x142   :  { %v1344_v40 = vadd.f32 %v1343_v32, %v1342_v25  ;;  %v1541_v42 = vadd.f32 %v1540_v21, %v1539_v27  ;;  %v2247_v21 = vpop.f32.mrb[32].mxu1  ;;  %v1548_v32 = vsel %vm1299_vm0, %v1460_v62, 0.0 }
 0x143   :  { %4178 = vst [vmem:[#allocation5_spill] sm:$0xff] %v3043_v34  ;;  %v2248_v30 = vpop.f32.mrb[33].mxu1 }
 0x144   :  { %v1346_v54 = vadd.f32 %v1345_v52, %v1344_v40  ;;  %v1543_v57 = vadd.f32 %v1542_v47, %v1541_v42  ;;  %v2250_v42 = vpop.f32.mrb[34].mxu1  ;;  %v3073_v52 = vadd.f32 %v2248_v30, %v2247_v21 }
 0x145   :  { %v2195_v63 = vpop.f32.mrb[40].mxu0  ;;  %v2251_v53 = vpop.f32.mrb[35].mxu1 }
 0x146   :  { %v1348_v4 = vadd.f32 %v1347_v61, %v1346_v54  ;;  %v1545_v6 = vadd.f32 %v1544_v60, %v1543_v57  ;;  %v2196_v7 = vpop.f32.mrb[41].mxu0  ;;  %4181 = vst [vmem:[#allocation8_spill] sm:$0xff] %v3073_v52  ;;  %v1550_v54 = vsel %vm1299_vm0, %v1461_v12, 0.0  ;;  %v1353_v57 = vsel %vm1299_vm0, %v2996_v1, 0.0 }
 0x147   :  { %v3064_v19 = vadd.f32 %v2196_v7, %v2195_v63  ;;  %v2198_v20 = vpop.f32.mrb[42].mxu0  ;;  %v1463_v60 = vmul.f32 %v3017_v44, %v3017_v44  ;;  %v3080_v61 = vadd.f32 %v2251_v53, %v2250_v42  ;;  %v1355_v7 = vsel %vm1299_vm0, %v3017_v44, 0.0 }
 0x148   :  { %v1547_v25 = vadd.f32 %v1546_v9, %v1545_v6  ;;  %v1350_v27 = vadd.f32 %v1349_v10, %v1348_v4  ;;  %v2199_v28 = vpop.f32.mrb[43].mxu0  ;;  %v1464_v4 = vmul.f32 %v3024_v55, %v3024_v55  ;;  %v1552_v6 = vsel %vm1299_vm0, %v1462_v38, 0.0 }
 0x149   :  { %4179 = vst [vmem:[#allocation6_spill] sm:$0xff] %v3064_v19  ;;  %v3071_v40 = vadd.f32 %v2199_v28, %v2198_v20  ;;  %4182 = vst [vmem:[#allocation9_spill] sm:$0xff] %v3080_v61  ;;  %v1465_v9 = vmul.f32 %v3045_v36, %v3045_v36  ;;  %v1359_v28 = vsel %vm1299_vm0, %v3045_v36, 0.0 }
 0x14a   :  { %v1549_v43 = vadd.f32 %v1548_v32, %v1547_v25  ;;  %v1352_v47 = vadd.f32 %v1351_v33, %v1350_v27  ;;  %v1554_v25 = vsel %vm1299_vm0, %v1463_v60, 0.0  ;;  %v1357_v27 = vsel %vm1299_vm0, %v3024_v55, 0.0  ;;  %v2253_v33 = vpop.f32.mrb[36].mxu1 }
 0x14b   :  { %4180 = vst [vmem:[#allocation7_spill] sm:$0xff] %v3071_v40  ;;  %v2254_v53 = vpop.f32.mrb[37].mxu1 }
 0x14c   :  { %v1551_v62 = vadd.f32 %v1550_v54, %v1549_v43  ;;  %v1354_v63 = vadd.f32 %v1353_v57, %v1352_v47  ;;  %v1556_v43 = vsel %vm1299_vm0, %v1464_v4, 0.0  ;;  %v1558_v54 = vsel %vm1299_vm0, %v1465_v9, 0.0 }
 0x14d   :  { %v2201_v10 = vpop.f32.mrb[44].mxu0  ;;  %v1466_v57 = vmul.f32 %v3052_v59, %v3052_v59  ;;  %v1361_v4 = vsel %vm1299_vm0, %v3052_v59, 0.0 }
 0x14e   :  { %v1553_v12 = vadd.f32 %v1552_v6, %v1551_v62  ;;  %v1356_v20 = vadd.f32 %v1355_v7, %v1354_v63  ;;  %v2202_v21 = vpop.f32.mrb[45].mxu0  ;;  %v3102_v62 = vadd.f32 %v2254_v53, %v2253_v33  ;;  %v2256_v63 = vpop.f32.mrb[38].mxu1  ;;  %v1469_v53 = vmul.f32 %v3036_v13, %v3036_v13 }
 0x14f   :  { %v3094_v30 = vadd.f32 %v2202_v21, %v2201_v10  ;;  %v2204_v32 = vpop.f32.mrb[46].mxu0  ;;  %v2257_v10 = vpop.f32.mrb[39].mxu1 }
 0x150   :  { %v1555_v38 = vadd.f32 %v1554_v25, %v1553_v12  ;;  %v1358_v42 = vadd.f32 %v1357_v27, %v1356_v20  ;;  %v2205_v47 = vpop.f32.mrb[47].mxu0  ;;  %4185 = vst [vmem:[#allocation12_spill] sm:$0xff] %v3102_v62  ;;  %v1467_v12 = vmul.f32 %v3008_v22, %v3008_v22  ;;  %v3108_v9 = vadd.f32 %v2257_v10, %v2256_v63 }
 0x151   :  { %4183 = vst [vmem:[#allocation10_spill] sm:$0xff] %v3094_v30  ;;  %v3100_v60 = vadd.f32 %v2205_v47, %v2204_v32  ;;  %v1363_v25 = vsel %vm1299_vm0, %v3008_v22, 0.0  ;;  %v1468_v27 = vmul.f32 %v3015_v39, %v3015_v39  ;;  %v1560_v32 = vsel %vm1299_vm0, %v1466_v57, 0.0 }
 0x152   :  { %v1557_v6 = vadd.f32 %v1556_v43, %v1555_v38  ;;  %v1360_v7 = vadd.f32 %v1359_v28, %v1358_v42  ;;  %v1562_v43 = vsel %vm1299_vm0, %v1467_v12, 0.0  ;;  %v1365_v47 = vsel %vm1299_vm0, %v3015_v39, 0.0 }
 0x153   :  { %4184 = vst [vmem:[#allocation11_spill] sm:$0xff] %v3100_v60  ;;  %v1470_v12 = vmul.f32 %v3043_v34, %v3043_v34 }
 0x154   :  { %v1559_v20 = vadd.f32 %v1558_v54, %v1557_v6  ;;  %v1362_v21 = vadd.f32 %v1361_v4, %v1360_v7  ;;  %v2259_v6 = vpop.f32.mrb[40].mxu1 }
 0x155   :  { %v2207_v28 = vpop.f32.mrb[48].mxu0  ;;  %v2260_v57 = vpop.f32.mrb[41].mxu1 }
 0x156   :  { %v1364_v33 = vadd.f32 %v1363_v25, %v1362_v21  ;;  %v1561_v38 = vadd.f32 %v1560_v32, %v1559_v20  ;;  %v2208_v42 = vpop.f32.mrb[49].mxu0  ;;  %v1564_v21 = vsel %vm1299_vm0, %v1468_v27, 0.0  ;;  %v1367_v20 = vsel %vm1299_vm0, %v3036_v13, 0.0  ;;  %v2262_v32 = vpop.f32.mrb[42].mxu1 }
 0x157   :  { %v3120_v54 = vadd.f32 %v2208_v42, %v2207_v28  ;;  %v2210_v63 = vpop.f32.mrb[50].mxu0  ;;  %v3129_v42 = vadd.f32 %v2260_v57, %v2259_v6  ;;  %v2263_v22 = vpop.f32.mrb[43].mxu1  ;;  %v1471_v27 = vmul.f32 %v3064_v19, %v3064_v19  ;;  %v1371_v6 = vsel %vm1299_vm0, %v3064_v19, 0.0 }
 0x158   :  { %v1366_v7 = vadd.f32 %v1365_v47, %v1364_v33  ;;  %v1563_v10 = vadd.f32 %v1562_v43, %v1561_v38  ;;  %v2211_v4 = vpop.f32.mrb[51].mxu0  ;;  %v1566_v33 = vsel %vm1299_vm0, %v1469_v53, 0.0  ;;  %v1369_v38 = vsel %vm1299_vm0, %v3043_v34, 0.0 }
 0x159   :  { %4186 = vst [vmem:[#allocation13_spill] sm:$0xff] %v3120_v54  ;;  %v3127_v25 = vadd.f32 %v2211_v4, %v2210_v63  ;;  %v3136_v43 = vadd.f32 %v2263_v22, %v2262_v32  ;;  %v1472_v47 = vmul.f32 %v3071_v40, %v3071_v40  ;;  %v1373_v22 = vsel %vm1299_vm0, %v3071_v40, 0.0 }
 0x15a   :  { %v1368_v39 = vadd.f32 %v1367_v20, %v1366_v7  ;;  %v1565_v28 = vadd.f32 %v1564_v21, %v1563_v10  ;;  %v1568_v7 = vsel %vm1299_vm0, %v1470_v12, 0.0  ;;  %v1570_v20 = vsel %vm1299_vm0, %v1471_v27, 0.0 }
 0x15b   :  { %4187 = vst [vmem:[#allocation14_spill] sm:$0xff] %v3127_v25  ;;  %4188 = vst [vmem:[#allocation15_spill] sm:$0xff] %v3136_v43  ;;  %v1473_v32 = vmul.f32 %v3094_v30, %v3094_v30  ;;  %v1572_v12 = vsel %vm1299_vm0, %v1472_v47, 0.0  ;;  %v1474_v27 = vmul.f32 %v3100_v60, %v3100_v60 }
 0x15c   :  { %v1567_v63 = vadd.f32 %v1566_v33, %v1565_v28  ;;  %v1370_v4 = vadd.f32 %v1369_v38, %v1368_v39  ;;  %v2265_v28 = vpop.f32.mrb[44].mxu1 }
 0x15d   :  { %v2213_v10 = vpop.f32.mrb[52].mxu0  ;;  %v1574_v47 = vsel %vm1299_vm0, %v1473_v32, 0.0 }
 0x15e   :  { %v1372_v53 = vadd.f32 %v1371_v6, %v1370_v4  ;;  %v1569_v57 = vadd.f32 %v1568_v7, %v1567_v63  ;;  %v2214_v21 = vpop.f32.mrb[53].mxu0  ;;  %v2266_v4 = vpop.f32.mrb[45].mxu1  ;;  %v1375_v63 = vsel %vm1299_vm0, %v3094_v30, 0.0 }
 0x15f   :  { %v3148_v34 = vadd.f32 %v2214_v21, %v2213_v10  ;;  %v2216_v39 = vpop.f32.mrb[54].mxu0  ;;  %v3157_v6 = vadd.f32 %v2266_v4, %v2265_v28  ;;  %v2268_v10 = vpop.f32.mrb[46].mxu1  ;;  %v1476_v28 = vmul.f32 %v3127_v25, %v3127_v25 }
 0x160   :  { %v1374_v33 = vadd.f32 %v1373_v22, %v1372_v53  ;;  %v1571_v38 = vadd.f32 %v1570_v20, %v1569_v57  ;;  %v2217_v19 = vpop.f32.mrb[55].mxu0  ;;  %v2269_v13 = vpop.f32.mrb[47].mxu1  ;;  %v1377_v53 = vsel %vm1299_vm0, %v3100_v60, 0.0  ;;  %v1475_v57 = vmul.f32 %v3120_v54, %v3120_v54 }
 0x161   :  { %4189 = vst [vmem:[#allocation16_spill] sm:$0xff] %v3148_v34  ;;  %v3155_v7 = vadd.f32 %v2217_v19, %v2216_v39  ;;  %4191 = vst [vmem:[#allocation18_spill] sm:$0xff] %v3157_v6  ;;  %v3164_v30 = vadd.f32 %v2269_v13, %v2268_v10  ;;  %v1576_v19 = vsel %vm1299_vm0, %v1474_v27, 0.0  ;;  %v1379_v39 = vsel %vm1299_vm0, %v3120_v54, 0.0  ;;  %v2271_v10 = vpop.f32.mrb[48].mxu1 }
 0x162   :  { %v1376_v21 = vadd.f32 %v1375_v63, %v1374_v33  ;;  %v1573_v40 = vadd.f32 %v1572_v12, %v1571_v38  ;;  %v1578_v4 = vsel %vm1299_vm0, %v1475_v57, 0.0  ;;  %v1477_v13 = vmul.f32 %v3148_v34, %v3148_v34  ;;  %v2272_v54 = vpop.f32.mrb[49].mxu1 }
 0x163   :  { %4190 = vst [vmem:[#allocation17_spill] sm:$0xff] %v3155_v7  ;;  %4192 = vst [vmem:[#allocation19_spill] sm:$0xff] %v3164_v30  ;;  %v1478_v57 = vmul.f32 %v3155_v7, %v3155_v7 }
 0x164   :  { %v1575_v20 = vadd.f32 %v1574_v47, %v1573_v40  ;;  %v1378_v22 = vadd.f32 %v1377_v53, %v1376_v21  ;;  %v1381_v40 = vsel %vm1299_vm0, %v3127_v25, 0.0 }
 0x165   :  { %v2219_v12 = vpop.f32.mrb[56].mxu0 }
 0x166   :  { %v1577_v32 = vadd.f32 %v1576_v19, %v1575_v20  ;;  %v1380_v33 = vadd.f32 %v1379_v39, %v1378_v22  ;;  %v2220_v38 = vpop.f32.mrb[57].mxu0  ;;  %v1580_v20 = vsel %vm1299_vm0, %v1476_v28, 0.0  ;;  %v1383_v22 = vsel %vm1299_vm0, %v3148_v34, 0.0  ;;  %v2274_v39 = vpop.f32.mrb[50].mxu1 }
 0x167   :  { %v3176_v63 = vadd.f32 %v2220_v38, %v2219_v12  ;;  %v2222_v27 = vpop.f32.mrb[58].mxu0  ;;  %v3185_v38 = vadd.f32 %v2272_v54, %v2271_v10  ;;  %v2275_v60 = vpop.f32.mrb[51].mxu1 }
 0x168   :  { %v1579_v21 = vadd.f32 %v1578_v4, %v1577_v32  ;;  %v1382_v47 = vadd.f32 %v1381_v40, %v1380_v33  ;;  %v2223_v53 = vpop.f32.mrb[59].mxu0  ;;  %v1582_v32 = vsel %vm1299_vm0, %v1477_v13, 0.0  ;;  %v1385_v33 = vsel %vm1299_vm0, %v3155_v7, 0.0 }
 0x169   :  { %v3183_v19 = vadd.f32 %v2223_v53, %v2222_v27  ;;  %4194 = vst [vmem:[#allocation21_spill] sm:$0xff] %v3185_v38  ;;  %v1479_v28 = vmul.f32 %v3176_v63, %v3176_v63  ;;  %v3192_v4 = vadd.f32 %v2275_v60, %v2274_v39  ;;  %v1387_v54 = vsel %vm1299_vm0, %v3176_v63, 0.0  ;;  %v2277_v39 = vpop.f32.mrb[52].mxu1 }
 0x16a   :  { %v1581_v25 = vadd.f32 %v1580_v20, %v1579_v21  ;;  %v1384_v12 = vadd.f32 %v1383_v22, %v1382_v47  ;;  %v1584_v21 = vsel %vm1299_vm0, %v1478_v57, 0.0  ;;  %v2278_v7 = vpop.f32.mrb[53].mxu1 }
 0x16b   :  { %4193 = vst [vmem:[#allocation20_spill] sm:$0xff] %v3183_v19  ;;  %4195 = vst [vmem:[#allocation22_spill] sm:$0xff] %v3192_v4  ;;  %v1480_v27 = vmul.f32 %v3183_v19, %v3183_v19  ;;  %v1586_v20 = vsel %vm1299_vm0, %v1479_v28, 0.0  ;;  %v1389_v60 = vsel %vm1299_vm0, %v3183_v19, 0.0 }
 0x16c   :  { %v1583_v40 = vadd.f32 %v1582_v32, %v1581_v25  ;;  %v1386_v34 = vadd.f32 %v1385_v33, %v1384_v12 }
 0x16d   :  { %v2225_v10 = vpop.f32.mrb[60].mxu0  ;;  %v1588_v57 = vsel %vm1299_vm0, %v1480_v27, 0.0 }
 0x16e   :  { %v1585_v13 = vadd.f32 %v1584_v21, %v1583_v40  ;;  %v1388_v47 = vadd.f32 %v1387_v54, %v1386_v34  ;;  %v2226_v53 = vpop.f32.mrb[61].mxu0  ;;  %v3211_v21 = vadd.f32 %v2278_v7, %v2277_v39  ;;  %v2280_v54 = vpop.f32.mrb[54].mxu1  ;;  %v1395_v7 = vsel %vm1299_vm0, %v3073_v52, 0.0 }
 0x16f   :  { %v3202_v22 = vadd.f32 %v2226_v53, %v2225_v10  ;;  %v2228_v25 = vpop.f32.mrb[62].mxu0  ;;  %v2281_v19 = vpop.f32.mrb[55].mxu1  ;;  %v1484_v39 = vmul.f32 %v3080_v61, %v3080_v61 }
 0x170   :  { %v1587_v12 = vadd.f32 %v1586_v20, %v1585_v13  ;;  %v1390_v32 = vadd.f32 %v1389_v60, %v1388_v47  ;;  %v2229_v33 = vpop.f32.mrb[63].mxu0  ;;  %4196 = vst [vmem:[#allocation23_spill] sm:$0xff] %v3211_v21  ;;  %v1483_v13 = vmul.f32 %v3073_v52, %v3073_v52  ;;  %v1399_v52 = vsel %vm1299_vm0, %v3102_v62, 0.0 }
 0x171   :  { %v1391_v40 = vsel %vm1299_vm0, %v3202_v22, 0.0  ;;  %v1481_v34 = vmul.f32 %v3202_v22, %v3202_v22  ;;  %v3209_v28 = vadd.f32 %v2229_v33, %v2228_v25  ;;  %v3220_v33 = vadd.f32 %v2281_v19, %v2280_v54  ;;  %v2283_v19 = vpop.f32.mrb[56].mxu1 }
 0x172   :  { %v1589_v10 = vadd.f32 %v1588_v57, %v1587_v12  ;;  %v1392_v53 = vadd.f32 %v1391_v40, %v1390_v32  ;;  %v1594_v40 = vsel %vm1299_vm0, %v1483_v13, 0.0 }
 0x173   :  { %v1590_v27 = vsel %vm1299_vm0, %v1481_v34, 0.0  ;;  %v1393_v47 = vsel %vm1299_vm0, %v3209_v28, 0.0  ;;  %v1482_v20 = vmul.f32 %v3209_v28, %v3209_v28  ;;  %v1397_v34 = vsel %vm1299_vm0, %v3080_v61, 0.0 }
 0x174   :  { %v1591_v60 = vadd.f32 %v1590_v27, %v1589_v10  ;;  %v1394_v25 = vadd.f32 %v1393_v47, %v1392_v53  ;;  %v1485_v10 = vmul.f32 %v3102_v62, %v3102_v62  ;;  %v2284_v27 = vpop.f32.mrb[57].mxu1  ;;  %v1596_v47 = vsel %vm1299_vm0, %v1484_v39, 0.0 }
 0x175   :  { %v1592_v12 = vsel %vm1299_vm0, %v1482_v20, 0.0  ;;  %v1486_v20 = vmul.f32 %v3108_v9, %v3108_v9  ;;  %v2286_v13 = vpop.f32.mrb[58].mxu1  ;;  %v1487_v39 = vmul.f32 %v3129_v42, %v3129_v42 }
 0x176   :  { %v1396_v32 = vadd.f32 %v1395_v7, %v1394_v25  ;;  %v1593_v57 = vadd.f32 %v1592_v12, %v1591_v60  ;;  %v3237_v60 = vadd.f32 %v2284_v27, %v2283_v19  ;;  %v2287_v12 = vpop.f32.mrb[59].mxu1  ;;  %v1598_v61 = vsel %vm1299_vm0, %v1485_v10, 0.0 }
 0x177   :  { %v1600_v62 = vsel %vm1299_vm0, %v1486_v20, 0.0  ;;  %v1403_v19 = vsel %vm1299_vm0, %v3129_v42, 0.0  ;;  %v1405_v27 = vsel %vm1299_vm0, %v3136_v43, 0.0 }
 0x178   :  { %v1398_v54 = vadd.f32 %v1397_v34, %v1396_v32  ;;  %v1595_v53 = vadd.f32 %v1594_v40, %v1593_v57  ;;  %v1401_v32 = vsel %vm1299_vm0, %v3108_v9, 0.0  ;;  %v3244_v57 = vadd.f32 %v2287_v12, %v2286_v13  ;;  %v2289_v13 = vpop.f32.mrb[60].mxu1 }
 0x179   :  { %v2290_v20 = vpop.f32.mrb[61].mxu1  ;;  %v1407_v12 = vsel %vm1299_vm0, %v3157_v6, 0.0 }
 0x17a   :  { %v1400_v25 = vadd.f32 %v1399_v52, %v1398_v54  ;;  %v1597_v7 = vadd.f32 %v1596_v47, %v1595_v53  ;;  %v1488_v52 = vmul.f32 %v3136_v43, %v3136_v43  ;;  %v1602_v53 = vsel %vm1299_vm0, %v1487_v39, 0.0  ;;  %v2292_v39 = vpop.f32.mrb[62].mxu1 }
 0x17b   :  { %v1489_v47 = vmul.f32 %v3157_v6, %v3157_v6 }
 0x17c   :  { %v1402_v40 = vadd.f32 %v1401_v32, %v1400_v25  ;;  %v1599_v34 = vadd.f32 %v1598_v61, %v1597_v7  ;;  %v1604_v7 = vsel %vm1299_vm0, %v1488_v52, 0.0  ;;  %v3261_v32 = vadd.f32 %v2290_v20, %v2289_v13 }
 0x17d   :  { %v1606_v43 = vsel %vm1299_vm0, %v1489_v47, 0.0  ;;  %v1491_v52 = vmul.f32 %v3185_v38, %v3185_v38  ;;  %v1411_v13 = vsel %vm1299_vm0, %v3185_v38, 0.0 }
 0x17e   :  { %v1601_v54 = vadd.f32 %v1600_v62, %v1599_v34  ;;  %v1404_v10 = vadd.f32 %v1403_v19, %v1402_v40  ;;  %v1490_v62 = vmul.f32 %v3164_v30, %v3164_v30  ;;  %4197 = vst [vmem:[#allocation24_spill] sm:$0xff] %v3261_v32  ;;  %v2293_v19 = vpop.f32.mrb[63].mxu1 }
 0x17f   :  { %v1610_v20 = vsel %vm1299_vm0, %v1491_v52, 0.0  ;;  %v1417_v52 = vsel %vm1299_vm0, %v3220_v33, 0.0 }
 0x180   :  { %v1406_v61 = vadd.f32 %v1405_v27, %v1404_v10  ;;  %v1603_v25 = vadd.f32 %v1602_v53, %v1601_v54  ;;  %v1409_v54 = vsel %vm1299_vm0, %v3164_v30, 0.0  ;;  %v3268_v10 = vadd.f32 %v2293_v19, %v2292_v39 }
 0x181   :  { %v1608_v6 = vsel %vm1299_vm0, %v1490_v62, 0.0 }
 0x182   :  { %v1408_v40 = vadd.f32 %v1407_v12, %v1406_v61  ;;  %v1605_v34 = vadd.f32 %v1604_v7, %v1603_v25  ;;  %4198 = vst [vmem:[#allocation25_spill] sm:$0xff] %v3268_v10  ;;  %v1492_v61 = vmul.f32 %v3192_v4, %v3192_v4  ;;  %v1413_v7 = vsel %vm1299_vm0, %v3192_v4, 0.0 }
 0x183   :  { %v1493_v12 = vmul.f32 %v3211_v21, %v3211_v21 }
 0x184   :  { %v1410_v53 = vadd.f32 %v1409_v54, %v1408_v40  ;;  %v1607_v27 = vadd.f32 %v1606_v43, %v1605_v34  ;;  %v1612_v62 = vsel %vm1299_vm0, %v1492_v61, 0.0  ;;  %v1415_v40 = vsel %vm1299_vm0, %v3211_v21, 0.0 }
 0x185   :  { %v1494_v34 = vmul.f32 %v3220_v33, %v3220_v33  ;;  %v1614_v54 = vsel %vm1299_vm0, %v1493_v12, 0.0 }
 0x186   :  { %v1412_v25 = vadd.f32 %v1411_v13, %v1410_v53  ;;  %v1609_v47 = vadd.f32 %v1608_v6, %v1607_v27  ;;  %v1495_v53 = vmul.f32 %v3237_v60, %v3237_v60 }
 0x187   :  { %v1616_v61 = vsel %vm1299_vm0, %v1494_v34, 0.0 }
 0x188   :  { %v1611_v39 = vadd.f32 %v1610_v20, %v1609_v47  ;;  %v1414_v43 = vadd.f32 %v1413_v7, %v1412_v25  ;;  %v1419_v25 = vsel %vm1299_vm0, %v3237_v60, 0.0  ;;  %v1496_v47 = vmul.f32 %v3244_v57, %v3244_v57 }
 0x189   :  { %v1497_v20 = vmul.f32 %v3261_v32, %v3261_v32 }
 0x18a   :  { %v1613_v19 = vadd.f32 %v1612_v62, %v1611_v39  ;;  %v1416_v6 = vadd.f32 %v1415_v40, %v1414_v43  ;;  %v1618_v39 = vsel %vm1299_vm0, %v1495_v53, 0.0  ;;  %v1421_v43 = vsel %vm1299_vm0, %v3244_v57, 0.0 }
 0x18b   :  { %v1423_v62 = vsel %vm1299_vm0, %v3261_v32, 0.0  ;;  %v1425_v53 = vsel %vm1299_vm0, %v3268_v10, 0.0 }
 0x18c   :  { %v1615_v27 = vadd.f32 %v1614_v54, %v1613_v19  ;;  %v1418_v13 = vadd.f32 %v1417_v52, %v1416_v6  ;;  %v1620_v19 = vsel %vm1299_vm0, %v1496_v47, 0.0  ;;  %v1622_v6 = vsel %vm1299_vm0, %v1497_v20, 0.0 }
 0x18d   :  { %v1498_v54 = vmul.f32 %v3268_v10, %v3268_v10 }
 0x18e   :  { %v1617_v7 = vadd.f32 %v1616_v61, %v1615_v27  ;;  %v1420_v12 = vadd.f32 %v1419_v25, %v1418_v13 }
 0x18f   :  { %v1624_v25 = vsel %vm1299_vm0, %v1498_v54, 0.0  ;;  %v1643_v54 = vlaneseq }
 0x190   :  { %v1619_v40 = vadd.f32 %v1618_v39, %v1617_v7  ;;  %v1422_v34 = vadd.f32 %v1421_v43, %v1420_v12 }
 0x192   :  { %v1621_v52 = vadd.f32 %v1620_v19, %v1619_v40  ;;  %v1424_v27 = vadd.f32 %v1423_v62, %v1422_v34 }
 0x194   :  { %v1623_v13 = vadd.f32 %v1622_v6, %v1621_v52  ;;  %v1426_v61 = vadd.f32 %v1425_v53, %v1424_v27  ;;  %v3309_v53 = vshrl.u32 %v1643_v54, 7  ;;  %v4206_v54 = vld [vmem:[#allocation11_spill] sm:$0xff] }
 0x196   :  { %v1427_v21 = vrot.slane %v1426_v61, 4  ;;  %v1625_v4 = vadd.f32 %v1624_v25, %v1623_v13 }
 0x198   :  { %v1428_v7 = vadd.f32 %v1427_v21, %v1426_v61  ;;  %v1626_v12 = vrot.slane %v1625_v4, 4  ;;  %v4174_v21 = vsub.s32 0, %v3309_v53 }
 0x19a   :  { %v1429_v39 = vrot.slane %v1428_v7, 2  ;;  %v1627_v47 = vadd.f32 %v1626_v12, %v1625_v4  ;;  %v1636_v4 = vld [vmem:[%s4148_s2] sm:$0x1] }
 0x19c   :  { %v1430_v43 = vadd.f32 %v1429_v39, %v1428_v7  ;;  %v1628_v20 = vrot.slane %v1627_v47, 2 }
 0x19e   :  { %v1431_v38 = vrot.slane %v1430_v43, 1  ;;  %v1629_v30 = vadd.f32 %v1628_v20, %v1627_v47  ;;  %v4200_v20 = vld [vmem:[#allocation3_spill] sm:$0xff] }
 0x1a0   :  { %v1432_v32 = vadd.f32 %v1431_v38, %v1430_v43  ;;  %v1630_v40 = vrot.slane %v1629_v30, 1  ;;  %v4199_v43 = vld [vmem:[#allocation2_spill] sm:$0xff] }
 0x1a2   :  { %v1434_v62 = vmul.f32 0.001953125, %v1432_v32  ;;  %v1631_v34 = vadd.f32 %v1630_v40, %v1629_v30  ;;  %v3318_v30 = vld [vmem:[%s4148_s2 + $0x1] sm:$0x1]  ;;  %v4201_v40 = vld [vmem:[#allocation4_spill] sm:$0xff] }
 0x1a4   :  { %v1632_v19 = vmul.f32 0.001953125, %v1631_v34  ;;  %v1633_v10 = vmul.f32 %v1434_v62, %v1434_v62  ;;  %v4203_v34 = vld [vmem:[#allocation6_spill] sm:$0xff] }
 0x1a6   :  { %v1634_v6 = vsub.f32 %v1632_v19, %v1633_v10  ;;  %v4204_v19 = vld [vmem:[#allocation7_spill] sm:$0xff] }
 0x1a8   :  { %v1635_v52 = vmax.f32 %v1634_v6, 0.0 }
 0x1aa   :  { %v1637_v27 = vadd.f32 1e-05, %v1635_v52  ;;  %v4205_v52 = vld [vmem:[#allocation10_spill] sm:$0xff] }
 0x1ac   :  { %2455 = vrsqrt.f32 %v1637_v27 }
 0x1b6   :  { %v2456_v13 = vpop.eup %2455 }
 0x1b7   :  { %v1639_v38 = vmul.f32 %v2456_v13, %v1636_v4  ;;  %v4207_v13 = vld [vmem:[#allocation13_spill] sm:$0xff] }
 0x1b9   :  { %v3320_v32 = vmul.f32 %v1639_v38, %v1434_v62  ;;  %v3324_v10 = vrot.slane %v1639_v38, %v4174_v21  ;;  %v4202_v62 = vld [vmem:[#allocation5_spill] sm:$0xff]  ;;  %v4217_v21 = vld [vmem:[#allocation12_spill] sm:$0xff] }
 0x1bb   :  { %v1642_v61 = vsub.f32 %v3318_v30, %v3320_v32  ;;  %v3330_v25 = vmul.f32 %v2861_v2, %v3324_v10  ;;  %v3334_v7 = vmul.f32 %v2863_v5, %v3324_v10  ;;  %v3338_v12 = vmul.f32 %v2865_v8, %v3324_v10  ;;  %v4208_v30 = vld [vmem:[#allocation14_spill] sm:$0xff] }
 0x1bc   :  { %v3342_v39 = vmul.f32 %v2867_v11, %v3324_v10  ;;  %v3346_v47 = vmul.f32 %v2871_v15, %v3324_v10  ;;  %v3350_v2 = vmul.f32 %v2879_v23, %v3324_v10  ;;  %v3354_v5 = vmul.f32 %v2898_v41, %v3324_v10 }
 0x1bd   :  { %v3358_v8 = vmul.f32 %v2903_v49, %v3324_v10  ;;  %v3362_v11 = vmul.f32 %v2919_v3, %v3324_v10  ;;  %v3366_v15 = vmul.f32 %v2924_v14, %v3324_v10  ;;  %v3370_v23 = vmul.f32 %v2940_v35, %v3324_v10 }
 0x1be   :  { %v3374_v41 = vmul.f32 %v2946_v45, %v3324_v10  ;;  %v3378_v49 = vmul.f32 %v2960_v0, %v3324_v10  ;;  %v3382_v3 = vmul.f32 %v2967_v17, %v3324_v10  ;;  %v3386_v14 = vmul.f32 %v2979_v37, %v3324_v10 }
 0x1bf   :  { %v3390_v35 = vmul.f32 %v2985_v48, %v3324_v10  ;;  %v3394_v45 = vmul.f32 %v2881_v24, %v3324_v10  ;;  %v3398_v0 = vmul.f32 %v2888_v31, %v3324_v10  ;;  %v3402_v17 = vmul.f32 %v2905_v50, %v3324_v10 }
 0x1c0   :  { %v3406_v37 = vmul.f32 %v2910_v58, %v3324_v10  ;;  %v3410_v48 = vmul.f32 %v2926_v16, %v3324_v10  ;;  %v3414_v24 = vmul.f32 %v2932_v26, %v3324_v10  ;;  %v3418_v31 = vmul.f32 %v2948_v46, %v3324_v10 }
 0x1c1   :  { %v3422_v50 = vmul.f32 %v2955_v56, %v3324_v10  ;;  %v3426_v58 = vmul.f32 %v2969_v18, %v3324_v10  ;;  %v3430_v16 = vmul.f32 %v2974_v29, %v3324_v10  ;;  %v3434_v26 = vmul.f32 %v2987_v51, %v3324_v10 }
 0x1c2   :  { %v3438_v46 = vmul.f32 %v2996_v1, %v3324_v10  ;;  %v3442_v56 = vmul.f32 %v3017_v44, %v3324_v10  ;;  %v3446_v18 = vmul.f32 %v3024_v55, %v3324_v10  ;;  %v3450_v29 = vmul.f32 %v3045_v36, %v3324_v10 }
 0x1c3   :  { %v3454_v51 = vmul.f32 %v3052_v59, %v3324_v10  ;;  %v3458_v1 = vmul.f32 %v4199_v43, %v3324_v10  ;;  %v3462_v44 = vmul.f32 %v4200_v20, %v3324_v10  ;;  %v3466_v55 = vmul.f32 %v4201_v40, %v3324_v10  ;;  %v4209_v43 = vld [vmem:[#allocation16_spill] sm:$0xff]  ;;  %v4210_v40 = vld [vmem:[#allocation17_spill] sm:$0xff] }
 0x1c4   :  { %v3470_v36 = vmul.f32 %v4202_v62, %v3324_v10  ;;  %v3474_v59 = vmul.f32 %v4203_v34, %v3324_v10  ;;  %v3478_v6 = vmul.f32 %v4204_v19, %v3324_v10  ;;  %v3482_v27 = vmul.f32 %v4205_v52, %v3324_v10  ;;  %v4211_v19 = vld [vmem:[#allocation20_spill] sm:$0xff] }
 0x1c5   :  { %v3486_v4 = vmul.f32 %v4206_v54, %v3324_v10  ;;  %v3490_v38 = vmul.f32 %v4207_v13, %v3324_v10  ;;  %v3494_v32 = vmul.f32 %v4208_v30, %v3324_v10  ;;  %v3498_v20 = vmul.f32 %v4209_v43, %v3324_v10  ;;  %v4213_v30 = vld [vmem:[#allocation8_spill] sm:$0xff] }
 0x1c6   :  { %v3502_v62 = vmul.f32 %v4210_v40, %v3324_v10  ;;  %v3506_v34 = vmul.f32 %v3176_v63, %v3324_v10  ;;  %v3510_v52 = vmul.f32 %v4211_v19, %v3324_v10  ;;  %v3514_v54 = vmul.f32 %v3202_v22, %v3324_v10  ;;  %v4215_v40 = vld [vmem:[#allocation9_spill] sm:$0xff] }
 0x1c7   :  { %v3518_v13 = vmul.f32 %v3209_v28, %v3324_v10  ;;  %v3522_v43 = vmul.f32 %v4213_v30, %v3324_v10  ;;  %v3526_v63 = vmul.f32 %v4215_v40, %v3324_v10  ;;  %v3530_v19 = vmul.f32 %v4217_v21, %v3324_v10 }
 0x1c8   :  { %v3534_v22 = vmul.f32 %v3108_v9, %v3324_v10  ;;  %v3538_v28 = vmul.f32 %v3129_v42, %v3324_v10  ;;  %v3542_v30 = vmul.f32 %v3220_v33, %v3324_v10  ;;  %v3546_v40 = vmul.f32 %v3237_v60, %v3324_v10  ;;  %v4228_v33 = vld [vmem:[#allocation25_spill] sm:$0xff] }
 0x1c9   :  { %4212 = vst [vmem:[#allocation2_spill] sm:$0xff] %v3518_v13  ;;  %4214 = vst [vmem:[#allocation3_spill] sm:$0xff] %v3522_v43  ;;  %v3550_v21 = vmul.f32 %v3244_v57, %v3324_v10  ;;  %v4229_v60 = vsub.s32 0, %v3309_v53  ;;  %v4230_v57 = vld [vmem:[#allocation19_spill] sm:$0xff]  ;;  %v4232_v43 = vld [vmem:[#allocation22_spill] sm:$0xff] }
 0x1ca   :  { %4216 = vst [vmem:[#allocation4_spill] sm:$0xff] %v3526_v63  ;;  %4218 = vst [vmem:[#allocation5_spill] sm:$0xff] %v3530_v19  ;;  %v4224_v19 = vld [vmem:[#allocation24_spill] sm:$0xff]  ;;  %v4233_v13 = vld [vmem:[#allocation23_spill] sm:$0xff] }
 0x1cb   :  { %4219 = vst [vmem:[#allocation6_spill] sm:$0xff] %v3534_v22  ;;  %4220 = vst [vmem:[#allocation7_spill] sm:$0xff] %v3538_v28  ;;  %v3554_v9 = vmul.f32 %v4224_v19, %v3324_v10  ;;  %v4226_v22 = vld [vmem:[#allocation15_spill] sm:$0xff]  ;;  %v4227_v28 = vld [vmem:[#allocation18_spill] sm:$0xff] }
 0x1cc   :  { %4221 = vst [vmem:[#allocation10_spill] sm:$0xff] %v3542_v30  ;;  %4222 = vst [vmem:[#allocation11_spill] sm:$0xff] %v3546_v40  ;;  %v1700_v42 = vmul.f32 %v4226_v22, %v3324_v10  ;;  %v1701_v63 = vmul.f32 %v4227_v28, %v3324_v10  ;;  %v3562_v30 = vmul.f32 %v4228_v33, %v3324_v10  ;;  %v4231_v19 = vld [vmem:[#allocation21_spill] sm:$0xff] }
 0x1cd   :  { %4223 = vst [vmem:[#allocation13_spill] sm:$0xff] %v3550_v21  ;;  %4225 = vst [vmem:[#allocation14_spill] sm:$0xff] %v3554_v9  ;;  %v3566_v40 = vrot.slane %v1642_v61, %v4229_v60  ;;  %v1702_v21 = vmul.f32 %v4230_v57, %v3324_v10  ;;  %v1703_v9 = vmul.f32 %v4231_v19, %v3324_v10 }
 0x1ce   :  { %v1704_v22 = vmul.f32 %v4232_v43, %v3324_v10  ;;  %v1705_v28 = vmul.f32 %v4233_v13, %v3324_v10 }
 0x1cf   :  { %v3578_v33 = vadd.f32 %v3566_v40, %v3330_v25  ;;  %v3582_v53 = vadd.f32 %v3566_v40, %v3334_v7  ;;  %v3586_v61 = vadd.f32 %v3566_v40, %v3338_v12  ;;  %v3590_v60 = vadd.f32 %v3566_v40, %v3342_v39 }
 0x1d0   :  { %v3594_v43 = vadd.f32 %v3566_v40, %v3346_v47  ;;  %v3598_v10 = vadd.f32 %v3566_v40, %v3350_v2  ;;  %v3602_v25 = vadd.f32 %v3566_v40, %v3354_v5  ;;  %v3606_v7 = vadd.f32 %v3566_v40, %v3358_v8  ;;  %v4238_v13 = vld [vmem:[#allocation3_spill] sm:$0xff] }
 0x1d1   :  { %v3610_v12 = vadd.f32 %v3566_v40, %v3362_v11  ;;  %v3614_v39 = vadd.f32 %v3566_v40, %v3366_v15  ;;  %v3618_v47 = vadd.f32 %v3566_v40, %v3370_v23  ;;  %v3622_v2 = vadd.f32 %v3566_v40, %v3374_v41  ;;  %v4239_v57 = vld [vmem:[#allocation4_spill] sm:$0xff]  ;;  %v4240_v19 = vld [vmem:[#allocation5_spill] sm:$0xff] }
 0x1d2   :  { %v3626_v5 = vadd.f32 %v3566_v40, %v3378_v49  ;;  %v3630_v8 = vadd.f32 %v3566_v40, %v3382_v3  ;;  %v3634_v11 = vadd.f32 %v3566_v40, %v3386_v14  ;;  %v3638_v15 = vadd.f32 %v3566_v40, %v3390_v35 }
 0x1d3   :  { %v3642_v23 = vadd.f32 %v3566_v40, %v3394_v45  ;;  %v3646_v41 = vadd.f32 %v3566_v40, %v3398_v0  ;;  %v3650_v49 = vadd.f32 %v3566_v40, %v3402_v17  ;;  %v3654_v3 = vadd.f32 %v3566_v40, %v3406_v37 }
 0x1d4   :  { %v3658_v14 = vadd.f32 %v3566_v40, %v3410_v48  ;;  %v3662_v35 = vadd.f32 %v3566_v40, %v3414_v24  ;;  %v3666_v45 = vadd.f32 %v3566_v40, %v3418_v31  ;;  %v3670_v0 = vadd.f32 %v3566_v40, %v3422_v50 }
 0x1d5   :  { %v3674_v17 = vadd.f32 %v3566_v40, %v3426_v58  ;;  %v3678_v37 = vadd.f32 %v3566_v40, %v3430_v16  ;;  %v3682_v48 = vadd.f32 %v3566_v40, %v3434_v26  ;;  %v3686_v24 = vadd.f32 %v3566_v40, %v3438_v46 }
 0x1d6   :  { %v3690_v31 = vadd.f32 %v3566_v40, %v3442_v56  ;;  %v3694_v50 = vadd.f32 %v3566_v40, %v3446_v18  ;;  %v3698_v58 = vadd.f32 %v3566_v40, %v3450_v29  ;;  %v3702_v16 = vadd.f32 %v3566_v40, %v3454_v51 }
 0x1d7   :  { %v3706_v26 = vadd.f32 %v3566_v40, %v3458_v1  ;;  %v3710_v46 = vadd.f32 %v3566_v40, %v3462_v44  ;;  %v3714_v56 = vadd.f32 %v3566_v40, %v3466_v55  ;;  %v3718_v18 = vadd.f32 %v3566_v40, %v3470_v36 }
 0x1d8   :  { %v3722_v29 = vadd.f32 %v3566_v40, %v3474_v59  ;;  %v3726_v51 = vadd.f32 %v3566_v40, %v3478_v6  ;;  %v3730_v1 = vadd.f32 %v3566_v40, %v3482_v27  ;;  %v3734_v44 = vadd.f32 %v3566_v40, %v3486_v4 }
 0x1d9   :  { %v3738_v55 = vadd.f32 %v3566_v40, %v3490_v38  ;;  %v3742_v36 = vadd.f32 %v3566_v40, %v3494_v32  ;;  %v3746_v59 = vadd.f32 %v3566_v40, %v3498_v20  ;;  %v3750_v6 = vadd.f32 %v3566_v40, %v3502_v62  ;;  %v4236_v32 = vld [vmem:[#allocation2_spill] sm:$0xff] }
 0x1da   :  { %v3754_v27 = vadd.f32 %v3566_v40, %v3506_v34  ;;  %v3758_v4 = vadd.f32 %v3566_v40, %v3510_v52  ;;  %v3762_v38 = vadd.f32 %v3566_v40, %v3514_v54  ;;  %v3766_v20 = vadd.f32 %v3566_v40, %v4236_v32 }
 0x1db   :  { %v3770_v62 = vadd.f32 %v3566_v40, %v4238_v13  ;;  %v3774_v34 = vadd.f32 %v3566_v40, %v4239_v57  ;;  %v3778_v52 = vadd.f32 %v3566_v40, %v4240_v19  ;;  %v3792_v13 = vadd.f32 %v3566_v40, %v1701_v63 }
 0x1dc   :  { %4234 = vst [vmem:[#allocation16_spill] sm:$0xff] %v3758_v4  ;;  %4235 = vst [vmem:[#allocation17_spill] sm:$0xff] %v3762_v38  ;;  %v4242_v4 = vld [vmem:[#allocation6_spill] sm:$0xff]  ;;  %v4243_v38 = vld [vmem:[#allocation7_spill] sm:$0xff]  ;;  %v3795_v57 = vadd.f32 %v3566_v40, %v1702_v21  ;;  %v3798_v19 = vadd.f32 %v3566_v40, %v1703_v9 }
 0x1dd   :  { %4237 = vst [vmem:[#allocation20_spill] sm:$0xff] %v3766_v20  ;;  %4241 = vst [vmem:[#allocation8_spill] sm:$0xff] %v3778_v52  ;;  %v3782_v54 = vadd.f32 %v3566_v40, %v4242_v4  ;;  %v3786_v32 = vadd.f32 %v3566_v40, %v4243_v38  ;;  %v3789_v20 = vadd.f32 %v3566_v40, %v1700_v42  ;;  %v4247_v38 = vld [vmem:[#allocation10_spill] sm:$0xff]  ;;  %v4249_v42 = vld [vmem:[#allocation11_spill] sm:$0xff] }
 0x1de   :  { %4245 = vst [vmem:[#allocation12_spill] sm:$0xff] %v3792_v13  ;;  %4246 = vst [vmem:[#allocation24_spill] sm:$0xff] %v3798_v19  ;;  %v3801_v52 = vadd.f32 %v3566_v40, %v1704_v22  ;;  %v3804_v4 = vadd.f32 %v3566_v40, %v1705_v28  ;;  %v3812_v63 = vadd.f32 %v3566_v40, %v4249_v42  ;;  %v4251_v13 = vld [vmem:[#allocation13_spill] sm:$0xff]  ;;  %v4253_v9 = vld [vmem:[#allocation14_spill] sm:$0xff]  ;;  %v1779_v28 = vmax.f32 %v3578_v33, 0.0 }
 0x1df   :  { %4244 = vst [vmem:[#allocation9_spill] sm:$0xff] %v3786_v32  ;;  %v3808_v32 = vadd.f32 %v3566_v40, %v4247_v38  ;;  %v3816_v21 = vadd.f32 %v3566_v40, %v4251_v13  ;;  %v3820_v19 = vadd.f32 %v3566_v40, %v4253_v9  ;;  %v3824_v22 = vadd.f32 %v3566_v40, %v3562_v30 }
 0x1e0   :  { %4250 = vst [vmem:[#allocation18_spill] sm:$0xff] %v3812_v63  ;;  %v1780_v38 = vmax.f32 %v3582_v53, 0.0  ;;  %v1782_v42 = vmax.f32 %v3590_v60, 0.0  ;;  %v1783_v63 = vmax.f32 %v3594_v43, 0.0  ;;  %v1784_v13 = vmax.f32 %v3598_v10, 0.0  ;;  %1843 = vst.msk [vmem:[%s4149_s3] sm:$0xff] %vm1299_vm0, %v1779_v28 }
 0x1e1   :  { %4248 = vst [vmem:[#allocation15_spill] sm:$0xff] %v3808_v32  ;;  %4252 = vst [vmem:[#allocation25_spill] sm:$0xff] %v3816_v21  ;;  %v1781_v32 = vmax.f32 %v3586_v61, 0.0  ;;  %v1785_v21 = vmax.f32 %v3602_v25, 0.0  ;;  %v1786_v9 = vmax.f32 %v3606_v7, 0.0  ;;  %v1788_v30 = vmax.f32 %v3614_v39, 0.0 }
 0x1e2   :  { %4254 = vst [vmem:[#allocation19_spill] sm:$0xff] %v3820_v19  ;;  %v1787_v19 = vmax.f32 %v3610_v12, 0.0  ;;  %v1789_v40 = vmax.f32 %v3618_v47, 0.0  ;;  %v1790_v33 = vmax.f32 %v3622_v2, 0.0  ;;  %1844 = vst.msk [vmem:[%s4149_s3 + $0x8] sm:$0xff] %vm1299_vm0, %v1780_v38  ;;  %v1791_v53 = vmax.f32 %v3626_v5, 0.0 }
 0x1e3   :  { %1845 = vst.msk [vmem:[%s4149_s3 + $0x10] sm:$0xff] %vm1299_vm0, %v1781_v32  ;;  %1846 = vst.msk [vmem:[%s4149_s3 + $0x18] sm:$0xff] %vm1299_vm0, %v1782_v42  ;;  %v1792_v61 = vmax.f32 %v3630_v8, 0.0  ;;  %v1793_v60 = vmax.f32 %v3634_v11, 0.0  ;;  %v1794_v43 = vmax.f32 %v3638_v15, 0.0  ;;  %v1795_v10 = vmax.f32 %v3642_v23, 0.0 }
 0x1e4   :  { %1847 = vst.msk [vmem:[%s4149_s3 + $0x20] sm:$0xff] %vm1299_vm0, %v1783_v63  ;;  %1848 = vst.msk [vmem:[%s4149_s3 + $0x28] sm:$0xff] %vm1299_vm0, %v1784_v13  ;;  %v1796_v25 = vmax.f32 %v3646_v41, 0.0  ;;  %v1797_v7 = vmax.f32 %v3650_v49, 0.0  ;;  %v1798_v12 = vmax.f32 %v3654_v3, 0.0  ;;  %v1799_v39 = vmax.f32 %v3658_v14, 0.0 }
 0x1e5   :  { %1849 = vst.msk [vmem:[%s4149_s3 + $0x30] sm:$0xff] %vm1299_vm0, %v1785_v21  ;;  %1850 = vst.msk [vmem:[%s4149_s3 + $0x38] sm:$0xff] %vm1299_vm0, %v1786_v9  ;;  %v1800_v47 = vmax.f32 %v3662_v35, 0.0  ;;  %v1801_v2 = vmax.f32 %v3666_v45, 0.0  ;;  %v1802_v5 = vmax.f32 %v3670_v0, 0.0  ;;  %v1803_v8 = vmax.f32 %v3674_v17, 0.0 }
 0x1e6   :  { %1851 = vst.msk [vmem:[%s4149_s3 + $0x40] sm:$0xff] %vm1299_vm0, %v1787_v19  ;;  %1852 = vst.msk [vmem:[%s4149_s3 + $0x48] sm:$0xff] %vm1299_vm0, %v1788_v30  ;;  %v1804_v11 = vmax.f32 %v3678_v37, 0.0  ;;  %v1805_v15 = vmax.f32 %v3682_v48, 0.0  ;;  %v1806_v23 = vmax.f32 %v3686_v24, 0.0  ;;  %v1807_v41 = vmax.f32 %v3690_v31, 0.0 }
 0x1e7   :  { %1853 = vst.msk [vmem:[%s4149_s3 + $0x50] sm:$0xff] %vm1299_vm0, %v1789_v40  ;;  %1854 = vst.msk [vmem:[%s4149_s3 + $0x58] sm:$0xff] %vm1299_vm0, %v1790_v33  ;;  %v1808_v49 = vmax.f32 %v3694_v50, 0.0  ;;  %v1809_v3 = vmax.f32 %v3698_v58, 0.0  ;;  %v1810_v14 = vmax.f32 %v3702_v16, 0.0  ;;  %v1811_v35 = vmax.f32 %v3706_v26, 0.0 }
 0x1e8   :  { %1855 = vst.msk [vmem:[%s4149_s3 + $0x60] sm:$0xff] %vm1299_vm0, %v1791_v53  ;;  %1856 = vst.msk [vmem:[%s4149_s3 + $0x68] sm:$0xff] %vm1299_vm0, %v1792_v61  ;;  %v1812_v45 = vmax.f32 %v3710_v46, 0.0  ;;  %v1813_v0 = vmax.f32 %v3714_v56, 0.0  ;;  %v1814_v17 = vmax.f32 %v3718_v18, 0.0  ;;  %v1815_v37 = vmax.f32 %v3722_v29, 0.0 }
 0x1e9   :  { %1857 = vst.msk [vmem:[%s4149_s3 + $0x70] sm:$0xff] %vm1299_vm0, %v1793_v60  ;;  %1858 = vst.msk [vmem:[%s4149_s3 + $0x78] sm:$0xff] %vm1299_vm0, %v1794_v43  ;;  %v1816_v48 = vmax.f32 %v3726_v51, 0.0  ;;  %v1817_v24 = vmax.f32 %v3730_v1, 0.0  ;;  %v1818_v31 = vmax.f32 %v3734_v44, 0.0  ;;  %v1819_v50 = vmax.f32 %v3738_v55, 0.0 }
 0x1ea   :  { %1859 = vst.msk [vmem:[%s4149_s3 + $0x80] sm:$0xff] %vm1299_vm0, %v1795_v10  ;;  %1860 = vst.msk [vmem:[%s4149_s3 + $0x88] sm:$0xff] %vm1299_vm0, %v1796_v25  ;;  %v1820_v58 = vmax.f32 %v3742_v36, 0.0  ;;  %v1821_v16 = vmax.f32 %v3746_v59, 0.0  ;;  %v1822_v26 = vmax.f32 %v3750_v6, 0.0  ;;  %v1823_v46 = vmax.f32 %v3754_v27, 0.0 }
 0x1eb   :  { %1861 = vst.msk [vmem:[%s4149_s3 + $0x90] sm:$0xff] %vm1299_vm0, %v1797_v7  ;;  %1862 = vst.msk [vmem:[%s4149_s3 + $0x98] sm:$0xff] %vm1299_vm0, %v1798_v12  ;;  %v4255_v56 = vld [vmem:[#allocation16_spill] sm:$0xff]  ;;  %v4256_v29 = vld [vmem:[#allocation17_spill] sm:$0xff]  ;;  %v1827_v55 = vmax.f32 %v3770_v62, 0.0  ;;  %v1828_v36 = vmax.f32 %v3774_v34, 0.0 }
 0x1ec   :  { %1863 = vst.msk [vmem:[%s4149_s3 + $0xa0] sm:$0xff] %vm1299_vm0, %v1799_v39  ;;  %1864 = vst.msk [vmem:[%s4149_s3 + $0xa8] sm:$0xff] %vm1299_vm0, %v1800_v47  ;;  %v1824_v18 = vmax.f32 %v4255_v56, 0.0  ;;  %v1825_v51 = vmax.f32 %v4256_v29, 0.0  ;;  %v4257_v1 = vld [vmem:[#allocation20_spill] sm:$0xff]  ;;  %v1830_v27 = vmax.f32 %v3782_v54, 0.0 }
 0x1ed   :  { %1865 = vst.msk [vmem:[%s4149_s3 + $0xb0] sm:$0xff] %vm1299_vm0, %v1801_v2  ;;  %1866 = vst.msk [vmem:[%s4149_s3 + $0xb8] sm:$0xff] %vm1299_vm0, %v1802_v5  ;;  %v1826_v44 = vmax.f32 %v4257_v1, 0.0  ;;  %v4258_v59 = vld [vmem:[#allocation8_spill] sm:$0xff]  ;;  %v4259_v62 = vld [vmem:[#allocation9_spill] sm:$0xff]  ;;  %v1832_v54 = vmax.f32 %v3789_v20, 0.0 }
 0x1ee   :  { %1867 = vst.msk [vmem:[%s4149_s3 + $0xc0] sm:$0xff] %vm1299_vm0, %v1803_v8  ;;  %1868 = vst.msk [vmem:[%s4149_s3 + $0xc8] sm:$0xff] %vm1299_vm0, %v1804_v11  ;;  %v1829_v6 = vmax.f32 %v4258_v59, 0.0  ;;  %v1831_v34 = vmax.f32 %v4259_v62, 0.0  ;;  %v4260_v32 = vld [vmem:[#allocation12_spill] sm:$0xff]  ;;  %v1834_v63 = vmax.f32 %v3795_v57, 0.0 }
 0x1ef   :  { %1869 = vst.msk [vmem:[%s4149_s3 + $0xd0] sm:$0xff] %vm1299_vm0, %v1805_v15  ;;  %1870 = vst.msk [vmem:[%s4149_s3 + $0xd8] sm:$0xff] %vm1299_vm0, %v1806_v23  ;;  %v1833_v19 = vmax.f32 %v4260_v32, 0.0  ;;  %v4261_v20 = vld [vmem:[#allocation24_spill] sm:$0xff]  ;;  %v1836_v21 = vmax.f32 %v3801_v52, 0.0  ;;  %v1837_v28 = vmax.f32 %v3804_v4, 0.0 }
 0x1f0   :  { %1871 = vst.msk [vmem:[%s4149_s3 + $0xe0] sm:$0xff] %vm1299_vm0, %v1807_v41  ;;  %1872 = vst.msk [vmem:[%s4149_s3 + $0xe8] sm:$0xff] %vm1299_vm0, %v1808_v49  ;;  %v1835_v57 = vmax.f32 %v4261_v20, 0.0  ;;  %v4262_v38 = vld [vmem:[#allocation15_spill] sm:$0xff]  ;;  %v4263_v52 = vld [vmem:[#allocation18_spill] sm:$0xff]  ;;  %v1842_v33 = vmax.f32 %v3824_v22, 0.0 }
 0x1f1   :  { %1873 = vst.msk [vmem:[%s4149_s3 + $0xf0] sm:$0xff] %vm1299_vm0, %v1809_v3  ;;  %1874 = vst.msk [vmem:[%s4149_s3 + $0xf8] sm:$0xff] %vm1299_vm0, %v1810_v14  ;;  %v1838_v42 = vmax.f32 %v4262_v38, 0.0  ;;  %v1839_v4 = vmax.f32 %v4263_v52, 0.0  ;;  %v4264_v13 = vld [vmem:[#allocation25_spill] sm:$0xff]  ;;  %v4265_v30 = vld [vmem:[#allocation19_spill] sm:$0xff] }
 0x1f2   :  { %1875 = vst.msk [vmem:[%s4149_s3 + $0x100] sm:$0xff] %vm1299_vm0, %v1811_v35  ;;  %1876 = vst.msk [vmem:[%s4149_s3 + $0x108] sm:$0xff] %vm1299_vm0, %v1812_v45  ;;  %v1840_v9 = vmax.f32 %v4264_v13, 0.0  ;;  %v1841_v40 = vmax.f32 %v4265_v30, 0.0 }
 0x1f3   :  { %1877 = vst.msk [vmem:[%s4149_s3 + $0x110] sm:$0xff] %vm1299_vm0, %v1813_v0  ;;  %1878 = vst.msk [vmem:[%s4149_s3 + $0x118] sm:$0xff] %vm1299_vm0, %v1814_v17 }
 0x1f4   :  { %1879 = vst.msk [vmem:[%s4149_s3 + $0x120] sm:$0xff] %vm1299_vm0, %v1815_v37  ;;  %1880 = vst.msk [vmem:[%s4149_s3 + $0x128] sm:$0xff] %vm1299_vm0, %v1816_v48 }
 0x1f5   :  { %1881 = vst.msk [vmem:[%s4149_s3 + $0x130] sm:$0xff] %vm1299_vm0, %v1817_v24  ;;  %1882 = vst.msk [vmem:[%s4149_s3 + $0x138] sm:$0xff] %vm1299_vm0, %v1818_v31 }
 0x1f6   :  { %1883 = vst.msk [vmem:[%s4149_s3 + $0x140] sm:$0xff] %vm1299_vm0, %v1819_v50  ;;  %1884 = vst.msk [vmem:[%s4149_s3 + $0x148] sm:$0xff] %vm1299_vm0, %v1820_v58 }
 0x1f7   :  { %1885 = vst.msk [vmem:[%s4149_s3 + $0x150] sm:$0xff] %vm1299_vm0, %v1821_v16  ;;  %1886 = vst.msk [vmem:[%s4149_s3 + $0x158] sm:$0xff] %vm1299_vm0, %v1822_v26 }
 0x1f8   :  { %1887 = vst.msk [vmem:[%s4149_s3 + $0x160] sm:$0xff] %vm1299_vm0, %v1823_v46  ;;  %1888 = vst.msk [vmem:[%s4149_s3 + $0x168] sm:$0xff] %vm1299_vm0, %v1824_v18 }
 0x1f9   :  { %1889 = vst.msk [vmem:[%s4149_s3 + $0x170] sm:$0xff] %vm1299_vm0, %v1825_v51  ;;  %1890 = vst.msk [vmem:[%s4149_s3 + $0x178] sm:$0xff] %vm1299_vm0, %v1826_v44 }
 0x1fa   :  { %1891 = vst.msk [vmem:[%s4149_s3 + $0x180] sm:$0xff] %vm1299_vm0, %v1827_v55  ;;  %1892 = vst.msk [vmem:[%s4149_s3 + $0x188] sm:$0xff] %vm1299_vm0, %v1828_v36 }
 0x1fb   :  { %1893 = vst.msk [vmem:[%s4149_s3 + $0x190] sm:$0xff] %vm1299_vm0, %v1829_v6  ;;  %1894 = vst.msk [vmem:[%s4149_s3 + $0x198] sm:$0xff] %vm1299_vm0, %v1830_v27 }
 0x1fc   :  { %1895 = vst.msk [vmem:[%s4149_s3 + $0x1a0] sm:$0xff] %vm1299_vm0, %v1831_v34  ;;  %1896 = vst.msk [vmem:[%s4149_s3 + $0x1a8] sm:$0xff] %vm1299_vm0, %v1832_v54 }
 0x1fd   :  { %1897 = vst.msk [vmem:[%s4149_s3 + $0x1b0] sm:$0xff] %vm1299_vm0, %v1833_v19  ;;  %1898 = vst.msk [vmem:[%s4149_s3 + $0x1b8] sm:$0xff] %vm1299_vm0, %v1834_v63 }
 0x1fe   :  { %1899 = vst.msk [vmem:[%s4149_s3 + $0x1c0] sm:$0xff] %vm1299_vm0, %v1835_v57  ;;  %1900 = vst.msk [vmem:[%s4149_s3 + $0x1c8] sm:$0xff] %vm1299_vm0, %v1836_v21 }
 0x1ff   :  { %1901 = vst.msk [vmem:[%s4149_s3 + $0x1d0] sm:$0xff] %vm1299_vm0, %v1837_v28  ;;  %1902 = vst.msk [vmem:[%s4149_s3 + $0x1d8] sm:$0xff] %vm1299_vm0, %v1838_v42 }
 0x200   :  { %1903 = vst.msk [vmem:[%s4149_s3 + $0x1e0] sm:$0xff] %vm1299_vm0, %v1839_v4  ;;  %1904 = vst.msk [vmem:[%s4149_s3 + $0x1e8] sm:$0xff] %vm1299_vm0, %v1840_v9 }
 0x201   :  { %1905 = vst.msk [vmem:[%s4149_s3 + $0x1f0] sm:$0xff] %vm1299_vm0, %v1841_v40  ;;  %1906 = vst.msk [vmem:[%s4149_s3 + $0x1f8] sm:$0xff] %vm1299_vm0, %v1842_v33 }

// kernel: gen_nn_ske_to_image.8
= control target key start
LH: loop header
LB: loop body
LE: loop exit
PB: predicated region body
PF: predicated region fallthrough
CT: control target
= control target key end

     0   :  { %vm2451_vm0 = vcmask 130048   ;;  %s11239_s1 = inlined_call_operand.vmem [shape: bf16[4,128,16], index: 1, kind: input, shape index: {}]   ;;  %s11240_s0 = inlined_call_operand.vmem [shape: bf16[4,512,128], index: 0, kind: input, shape index: {}]   ;;  %s11241_s2 = inlined_call_operand.vmem [shape: f32[2,16], index: 2, kind: input, shape index: {}]   ;;  %s11242_s3 = inlined_call_operand.vmem [shape: f32[4,512,16], index: 3, kind: output, shape index: {}]  }
   0x1   :  { %v5431_v0 = vld [vmem:[%s11239_s1] sm:$0xff]   ;;  %v5432_v1 = vld [vmem:[%s11239_s1 + $0x8] sm:$0xff]   ;;  %v5433_v2 = vld [vmem:[%s11239_s1 + $0x10] sm:$0xff]  }
   0x2   :  { %5111 = vmatprep.subr.bf16.mxu0 %v5431_v0  ;;  %v5434_v3 = vld [vmem:[%s11239_s1 + $0x18] sm:$0xff]   ;;  %v5439_v4 = vld [vmem:[%s11240_s0] sm:$0xff]   ;;  %v5436_v6 = vld [vmem:[%s11239_s1 + $0x28] sm:$0xff]  }
   0x3   :  { %5112 = vmatpush3.bf16.msra.mxu0 %v5431_v0  ;;  %5127 = vmatprep.mubr.bf16.mxu0 %v5439_v4  ;;  %v5435_v5 = vld [vmem:[%s11239_s1 + $0x20] sm:$0xff]   ;;  %v5437_v7 = vld [vmem:[%s11239_s1 + $0x30] sm:$0xff]   ;;  %v5438_v8 = vld [vmem:[%s11239_s1 + $0x38] sm:$0xff]  }
   0x4   :  { %5113 = vmatprep.subr.bf16.mxu0 %v5432_v1  ;;  %v5440_v9 = vld [vmem:[%s11240_s0 + $0x8] sm:$0xff]   ;;  %v5441_v10 = vld [vmem:[%s11240_s0 + $0x10] sm:$0xff]   ;;  %v5463_v11 = vld [vmem:[%s11239_s1 + $0x40] sm:$0xff]  }
   0x5   :  { %5191 = vmatprep.subr.bf16.mxu1 %v5463_v11  ;;  %v5466_v12 = vld [vmem:[%s11239_s1 + $0x48] sm:$0xff]   ;;  %v5467_v13 = vld [vmem:[%s11239_s1 + $0x50] sm:$0xff]   ;;  %v5442_v14 = vld [vmem:[%s11240_s0 + $0x18] sm:$0xff]  }
   0x6   :  { %5192 = vmatpush3.bf16.msra.mxu1 %v5463_v11  ;;  %v5443_v15 = vld [vmem:[%s11240_s0 + $0x20] sm:$0xff]   ;;  %v5470_v16 = vld [vmem:[%s11239_s1 + $0x58] sm:$0xff]   ;;  %v5444_v18 = vld [vmem:[%s11240_s0 + $0x28] sm:$0xff]  }
   0x7   :  { %5114 = vmatpush3.bf16.msra.mxu0 %v5432_v1  ;;  %5193 = vmatprep.subr.bf16.mxu1 %v5466_v12  ;;  %v5471_v17 = vld [vmem:[%s11239_s1 + $0x60] sm:$0xff]   ;;  %v5445_v19 = vld [vmem:[%s11240_s0 + $0x30] sm:$0xff]   ;;  %v5474_v20 = vld [vmem:[%s11239_s1 + $0x68] sm:$0xff]  }
   0x8   :  { %5115 = vmatprep.subr.bf16.mxu0 %v5433_v2  ;;  %v5479_v21 = vld [vmem:[%s11240_s0 + $0x100] sm:$0xff]   ;;  %v5475_v23 = vld [vmem:[%s11239_s1 + $0x70] sm:$0xff]   ;;  %v5446_v24 = vld [vmem:[%s11240_s0 + $0x38] sm:$0xff]  }
   0x9   :  { %5207 = vmatprep.mubr.bf16.mxu1 %v5479_v21  ;;  %v5481_v22 = vld [vmem:[%s11239_s1 + $0x80] sm:$0xff]   ;;  %v5486_v26 = vld [vmem:[%s11239_s1 + $0x88] sm:$0xff]   ;;  %v5478_v27 = vld [vmem:[%s11239_s1 + $0x78] sm:$0xff]  }
   0xa   :  { %5194 = vmatpush3.bf16.msra.mxu1 %v5466_v12  ;;  %v5447_v25 = vld [vmem:[%s11240_s0 + $0x40] sm:$0xff]   ;;  %v5448_v28 = vld [vmem:[%s11240_s0 + $0x48] sm:$0xff]   ;;  %v5491_v29 = vld [vmem:[%s11239_s1 + $0x90] sm:$0xff]  }
   0xb   :  { %5116 = vmatpush3.bf16.msra.mxu0 %v5433_v2  ;;  %5195 = vmatprep.subr.bf16.mxu1 %v5467_v13  ;;  %v5449_v30 = vld [vmem:[%s11240_s0 + $0x50] sm:$0xff]   ;;  %v5480_v31 = vld [vmem:[%s11240_s0 + $0x108] sm:$0xff]   ;;  %v5496_v33 = vld [vmem:[%s11239_s1 + $0x98] sm:$0xff]  }
   0xc   :  { %5117 = vmatprep.subr.bf16.mxu0 %v5434_v3  ;;  %v5482_v32 = vld [vmem:[%s11240_s0 + $0x110] sm:$0xff]   ;;  %v5450_v34 = vld [vmem:[%s11240_s0 + $0x58] sm:$0xff]   ;;  %v5451_v35 = vld [vmem:[%s11240_s0 + $0x60] sm:$0xff]  }
   0xd   :  { %v5483_v36 = vld [vmem:[%s11240_s0 + $0x118] sm:$0xff]   ;;  %v5501_v37 = vld [vmem:[%s11239_s1 + $0xa0] sm:$0xff]   ;;  %v5506_v39 = vld [vmem:[%s11239_s1 + $0xa8] sm:$0xff]  }
   0xe   :  { %5196 = vmatpush3.bf16.msra.mxu1 %v5467_v13  ;;  %v5484_v38 = vld [vmem:[%s11240_s0 + $0x120] sm:$0xff]   ;;  %v5452_v40 = vld [vmem:[%s11240_s0 + $0x68] sm:$0xff]   ;;  %v5453_v42 = vld [vmem:[%s11240_s0 + $0x70] sm:$0xff]  }
   0xf   :  { %5118 = vmatpush3.bf16.msra.mxu0 %v5434_v3  ;;  %5197 = vmatprep.subr.bf16.mxu1 %v5470_v16  ;;  %v5485_v41 = vld [vmem:[%s11240_s0 + $0x128] sm:$0xff]   ;;  %v5487_v43 = vld [vmem:[%s11240_s0 + $0x130] sm:$0xff]   ;;  %v5454_v44 = vld [vmem:[%s11240_s0 + $0x78] sm:$0xff]  }
  0x10   :  { %5119 = vmatprep.subr.bf16.mxu0 %v5435_v5  ;;  %v5488_v45 = vld [vmem:[%s11240_s0 + $0x138] sm:$0xff]   ;;  %v5455_v46 = vld [vmem:[%s11240_s0 + $0x80] sm:$0xff]   ;;  %v5456_v48 = vld [vmem:[%s11240_s0 + $0x88] sm:$0xff]  }
  0x11   :  { %v5489_v47 = vld [vmem:[%s11240_s0 + $0x140] sm:$0xff]   ;;  %v5490_v49 = vld [vmem:[%s11240_s0 + $0x148] sm:$0xff]   ;;  %v5457_v50 = vld [vmem:[%s11240_s0 + $0x90] sm:$0xff]  }
  0x12   :  { %5198 = vmatpush3.bf16.msra.mxu1 %v5470_v16  ;;  %v5492_v51 = vld [vmem:[%s11240_s0 + $0x150] sm:$0xff]   ;;  %v5458_v52 = vld [vmem:[%s11240_s0 + $0x98] sm:$0xff]   ;;  %v5459_v54 = vld [vmem:[%s11240_s0 + $0xa0] sm:$0xff]  }
  0x13   :  { %5120 = vmatpush3.bf16.msra.mxu0 %v5435_v5  ;;  %5199 = vmatprep.subr.bf16.mxu1 %v5471_v17  ;;  %v5493_v53 = vld [vmem:[%s11240_s0 + $0x158] sm:$0xff]   ;;  %v5494_v55 = vld [vmem:[%s11240_s0 + $0x160] sm:$0xff]   ;;  %v5460_v56 = vld [vmem:[%s11240_s0 + $0xa8] sm:$0xff]  }
  0x14   :  { %5121 = vmatprep.subr.bf16.mxu0 %v5436_v6  ;;  %v5495_v57 = vld [vmem:[%s11240_s0 + $0x168] sm:$0xff]   ;;  %v5461_v58 = vld [vmem:[%s11240_s0 + $0xb0] sm:$0xff]   ;;  %v5462_v60 = vld [vmem:[%s11240_s0 + $0xb8] sm:$0xff]  }
  0x15   :  { %v5497_v59 = vld [vmem:[%s11240_s0 + $0x170] sm:$0xff]   ;;  %v5498_v61 = vld [vmem:[%s11240_s0 + $0x178] sm:$0xff]   ;;  %v5464_v62 = vld [vmem:[%s11240_s0 + $0xc0] sm:$0xff]  }
  0x16   :  { %5200 = vmatpush3.bf16.msra.mxu1 %v5471_v17  ;;  %v5499_v63 = vld [vmem:[%s11240_s0 + $0x180] sm:$0xff]   ;;  %v5465_v0 = vld [vmem:[%s11240_s0 + $0xc8] sm:$0xff]   ;;  %v5468_v2 = vld [vmem:[%s11240_s0 + $0xd0] sm:$0xff]  }
  0x17   :  { %5122 = vmatpush3.bf16.msra.mxu0 %v5436_v6  ;;  %5201 = vmatprep.subr.bf16.mxu1 %v5474_v20  ;;  %v5500_v1 = vld [vmem:[%s11240_s0 + $0x188] sm:$0xff]   ;;  %v5502_v3 = vld [vmem:[%s11240_s0 + $0x190] sm:$0xff]   ;;  %v5469_v4 = vld [vmem:[%s11240_s0 + $0xd8] sm:$0xff]  }
  0x18   :  { %5123 = vmatprep.subr.bf16.mxu0 %v5437_v7  ;;  %v5503_v5 = vld [vmem:[%s11240_s0 + $0x198] sm:$0xff]   ;;  %v5472_v6 = vld [vmem:[%s11240_s0 + $0xe0] sm:$0xff]   ;;  %v5476_v11 = vld [vmem:[%s11240_s0 + $0xf0] sm:$0xff]  }
  0x19   :  { %v5507_v12 = vld [vmem:[%s11240_s0 + $0x1b0] sm:$0xff]   ;;  %v5477_v13 = vld [vmem:[%s11240_s0 + $0xf8] sm:$0xff]   ;;  %v5519_v17 = vld [vmem:[%s11240_s0 + $0x200] sm:$0xff]  }
  0x1a   :  { %5202 = vmatpush3.bf16.msra.mxu1 %v5474_v20  ;;  %v5516_v16 = vld [vmem:[%s11239_s1 + $0xb8] sm:$0xff]   ;;  %v5512_v20 = vld [vmem:[%s11240_s0 + $0x1d0] sm:$0xff]  }
  0x1b   :  { %5124 = vmatpush3.bf16.msra.mxu0 %v5437_v7  ;;  %5203 = vmatprep.subr.bf16.mxu1 %v5475_v23  ;;  %v5504_v7 = vld [vmem:[%s11240_s0 + $0x1a0] sm:$0xff]   ;;  %v5522_v21 = vld [vmem:[%s11240_s0 + $0x210] sm:$0xff]  }
  0x1c   :  { %5125 = vmatprep.subr.bf16.mxu0 %v5438_v8 }
  0x1e   :  { %5204 = vmatpush3.bf16.msra.mxu1 %v5475_v23  ;;  %v5514_v23 = vld [vmem:[%s11240_s0 + $0x1e0] sm:$0xff]  }
  0x1f   :  { %5126 = vmatpush3.bf16.msra.mxu0 %v5438_v8  ;;  %5205 = vmatprep.subr.bf16.mxu1 %v5478_v27  ;;  %v5511_v8 = vld [vmem:[%s11239_s1 + $0xb0] sm:$0xff]  }
  0x20   :  { %5271 = vmatprep.subr.bf16.mxu0 %v5481_v22 }
  0x22   :  { %5128 = vmatmul.mubr.bf16.vlgmr.msra.gmra.mrb[0].mxu0 %v5440_v9  ;;  %5206 = vmatpush3.bf16.msra.mxu1 %v5478_v27  ;;  %v5473_v9 = vld [vmem:[%s11240_s0 + $0xe8] sm:$0xff]  }
  0x23   :  { %5131 = vmatprep.mubr.bf16.mxu0 %v5441_v10  ;;  %5272 = vmatpush3.bf16.msra.mxu0 %v5481_v22  ;;  %v5505_v10 = vld [vmem:[%s11240_s0 + $0x1a8] sm:$0xff]   ;;  %v5513_v22 = vld [vmem:[%s11240_s0 + $0x1d8] sm:$0xff]  }
  0x24   :  { %5273 = vmatprep.subr.bf16.mxu0 %v5486_v26  ;;  %v5515_v27 = vld [vmem:[%s11240_s0 + $0x1e8] sm:$0xff]  }
  0x25   :  { %5208 = vmatmul.mubr.bf16.vlgmr.msra.gmra.mrb[0].mxu1 %v5480_v31  ;;  %v5518_v31 = vld [vmem:[%s11240_s0 + $0x1f8] sm:$0xff]  }
  0x26   :  { %5211 = vmatprep.mubr.bf16.mxu1 %v5482_v32  ;;  %v5526_v32 = vld [vmem:[%s11239_s1 + $0xc8] sm:$0xff]  }
  0x27   :  { %5274 = vmatpush3.bf16.msra.mxu0 %v5486_v26  ;;  %v5524_v26 = vld [vmem:[%s11240_s0 + $0x220] sm:$0xff]  }
  0x28   :  { %5275 = vmatprep.subr.bf16.mxu0 %v5491_v29 }
  0x2a   :  { %5132 = vmatmul.mubr.bf16.gmra.mrb[4].mxu0 %v5442_v14  ;;  %v5508_v14 = vld [vmem:[%s11240_s0 + $0x1b8] sm:$0xff]  }
  0x2b   :  { %5135 = vmatprep.mubr.bf16.mxu0 %v5443_v15  ;;  %5276 = vmatpush3.bf16.msra.mxu0 %v5491_v29  ;;  %v5509_v15 = vld [vmem:[%s11240_s0 + $0x1c0] sm:$0xff]   ;;  %v5525_v29 = vld [vmem:[%s11240_s0 + $0x228] sm:$0xff]  }
  0x2c   :  { %5277 = vmatprep.subr.bf16.mxu0 %v5496_v33 }
  0x2d   :  { %5212 = vmatmul.mubr.bf16.gmra.mrb[4].mxu1 %v5483_v36  ;;  %v5532_v36 = vld [vmem:[%s11240_s0 + $0x250] sm:$0xff]  }
  0x2e   :  { %5215 = vmatprep.mubr.bf16.mxu1 %v5484_v38  ;;  %v5533_v38 = vld [vmem:[%s11240_s0 + $0x258] sm:$0xff]  }
  0x2f   :  { %5278 = vmatpush3.bf16.msra.mxu0 %v5496_v33  ;;  %v5528_v33 = vld [vmem:[%s11240_s0 + $0x238] sm:$0xff]  }
  0x30   :  { %5279 = vmatprep.subr.bf16.mxu0 %v5501_v37 }
  0x32   :  { %5136 = vmatmul.mubr.bf16.gmra.mrb[8].mxu0 %v5444_v18  ;;  %v5510_v18 = vld [vmem:[%s11240_s0 + $0x1c8] sm:$0xff]  }
  0x33   :  { %5139 = vmatprep.mubr.bf16.mxu0 %v5445_v19  ;;  %5280 = vmatpush3.bf16.msra.mxu0 %v5501_v37  ;;  %v5520_v19 = vld [vmem:[%s11240_s0 + $0x208] sm:$0xff]   ;;  %v5531_v37 = vld [vmem:[%s11239_s1 + $0xd0] sm:$0xff]  }
  0x34   :  { %5281 = vmatprep.subr.bf16.mxu0 %v5506_v39 }
  0x35   :  { %5216 = vmatmul.mubr.bf16.gmra.mrb[8].mxu1 %v5485_v41  ;;  %v5537_v41 = vld [vmem:[%s11240_s0 + $0x270] sm:$0xff]  }
  0x36   :  { %5219 = vmatprep.mubr.bf16.mxu1 %v5487_v43  ;;  %v5538_v43 = vld [vmem:[%s11240_s0 + $0x278] sm:$0xff]  }
  0x37   :  { %5282 = vmatpush3.bf16.msra.mxu0 %v5506_v39  ;;  %v5534_v39 = vld [vmem:[%s11240_s0 + $0x260] sm:$0xff]  }
  0x38   :  { %5283 = vmatprep.subr.bf16.mxu0 %v5511_v8 }
  0x3a   :  { %5140 = vmatmul.mubr.bf16.gmra.mrb[12].mxu0 %v5446_v24  ;;  %v5521_v24 = vld [vmem:[%s11239_s1 + $0xc0] sm:$0xff]  }
  0x3b   :  { %5143 = vmatprep.mubr.bf16.mxu0 %v5447_v25  ;;  %5284 = vmatpush3.bf16.msra.mxu0 %v5511_v8  ;;  %v5523_v25 = vld [vmem:[%s11240_s0 + $0x218] sm:$0xff]  }
  0x3c   :  { %5285 = vmatprep.subr.bf16.mxu0 %v5516_v16  ;;  %5351 = vmatprep.subr.bf16.mxu1 %v5521_v24 }
  0x3d   :  { %5220 = vmatmul.mubr.bf16.gmra.mrb[12].mxu1 %v5488_v45  ;;  %v5540_v45 = vld [vmem:[%s11240_s0 + $0x288] sm:$0xff]  }
  0x3e   :  { %5223 = vmatprep.mubr.bf16.mxu1 %v5489_v47  ;;  %5352 = vmatpush3.bf16.msra.mxu1 %v5521_v24  ;;  %v5541_v47 = vld [vmem:[%s11239_s1 + $0xe0] sm:$0xff]  }
  0x3f   :  { %5286 = vmatpush3.bf16.msra.mxu0 %v5516_v16  ;;  %5353 = vmatprep.subr.bf16.mxu1 %v5526_v32 }
  0x42   :  { %5144 = vmatmul.mubr.bf16.gmra.mrb[16].mxu0 %v5448_v28  ;;  %v5517_v28 = vld [vmem:[%s11240_s0 + $0x1f0] sm:$0xff]   ;;  %5354 = vmatpush3.bf16.msra.mxu1 %v5526_v32 }
  0x43   :  { %5147 = vmatprep.mubr.bf16.mxu0 %v5449_v30  ;;  %v5527_v30 = vld [vmem:[%s11240_s0 + $0x230] sm:$0xff]   ;;  %5355 = vmatprep.subr.bf16.mxu1 %v5531_v37 }
  0x45   :  { %5224 = vmatmul.mubr.bf16.gmra.mrb[16].mxu1 %v5490_v49  ;;  %v5544_v49 = vld [vmem:[%s11240_s0 + $0x2a0] sm:$0xff]  }
  0x46   :  { %5227 = vmatprep.mubr.bf16.mxu1 %v5492_v51  ;;  %5356 = vmatpush3.bf16.msra.mxu1 %v5531_v37 }
  0x4a   :  { %5148 = vmatmul.mubr.bf16.gmra.mrb[20].mxu0 %v5450_v34  ;;  %v5529_v34 = vld [vmem:[%s11240_s0 + $0x240] sm:$0xff]  }
  0x4b   :  { %5151 = vmatprep.mubr.bf16.mxu0 %v5451_v35  ;;  %v5530_v35 = vld [vmem:[%s11240_s0 + $0x248] sm:$0xff]  }
  0x4d   :  { %5228 = vmatmul.mubr.bf16.gmra.mrb[20].mxu1 %v5493_v53 }
  0x4e   :  { %5231 = vmatprep.mubr.bf16.mxu1 %v5494_v55 }
  0x52   :  { %5152 = vmatmul.mubr.bf16.gmra.mrb[24].mxu0 %v5452_v40  ;;  %v5535_v40 = vld [vmem:[%s11240_s0 + $0x268] sm:$0xff]  }
  0x53   :  { %5155 = vmatprep.mubr.bf16.mxu0 %v5453_v42  ;;  %v5536_v42 = vld [vmem:[%s11239_s1 + $0xd8] sm:$0xff]  }
  0x54   :  { %5357 = vmatprep.subr.bf16.mxu1 %v5536_v42 }
  0x55   :  { %5232 = vmatmul.mubr.bf16.gmra.mrb[24].mxu1 %v5495_v57  ;;  %v5546_v57 = vld [vmem:[%s11239_s1 + $0xe8] sm:$0xff]  }
  0x56   :  { %5235 = vmatprep.mubr.bf16.mxu1 %v5497_v59  ;;  %5358 = vmatpush3.bf16.msra.mxu1 %v5536_v42 }
  0x57   :  { %5359 = vmatprep.subr.bf16.mxu1 %v5541_v47 }
  0x5a   :  { %5156 = vmatmul.mubr.bf16.gmra.mrb[28].mxu0 %v5454_v44  ;;  %v5539_v44 = vld [vmem:[%s11240_s0 + $0x280] sm:$0xff]   ;;  %5360 = vmatpush3.bf16.msra.mxu1 %v5541_v47  ;;  %v5553_v47 = vld [vmem:[%s11240_s0 + $0x2d8] sm:$0xff]  }
  0x5b   :  { %5159 = vmatprep.mubr.bf16.mxu0 %v5455_v46  ;;  %v5542_v46 = vld [vmem:[%s11240_s0 + $0x290] sm:$0xff]   ;;  %5361 = vmatprep.subr.bf16.mxu1 %v5546_v57 }
  0x5d   :  { %5236 = vmatmul.mubr.bf16.gmra.mrb[28].mxu1 %v5498_v61 }
  0x5e   :  { %5239 = vmatprep.mubr.bf16.mxu1 %v5499_v63  ;;  %5362 = vmatpush3.bf16.msra.mxu1 %v5546_v57 }
  0x62   :  { %5160 = vmatmul.mubr.bf16.gmra.mrb[32].mxu0 %v5456_v48  ;;  %v5543_v48 = vld [vmem:[%s11240_s0 + $0x298] sm:$0xff]  }
  0x63   :  { %5163 = vmatprep.mubr.bf16.mxu0 %v5457_v50  ;;  %v5545_v50 = vld [vmem:[%s11240_s0 + $0x2a8] sm:$0xff]  }
  0x65   :  { %5240 = vmatmul.mubr.bf16.gmra.mrb[32].mxu1 %v5500_v1 }
  0x66   :  { %5243 = vmatprep.mubr.bf16.mxu1 %v5502_v3 }
  0x6a   :  { %5164 = vmatmul.mubr.bf16.gmra.mrb[36].mxu0 %v5458_v52  ;;  %v5547_v52 = vld [vmem:[%s11240_s0 + $0x2b0] sm:$0xff]  }
  0x6b   :  { %5167 = vmatprep.mubr.bf16.mxu0 %v5459_v54 }
  0x6d   :  { %5244 = vmatmul.mubr.bf16.gmra.mrb[36].mxu1 %v5503_v5 }
  0x6e   :  { %5247 = vmatprep.mubr.bf16.mxu1 %v5504_v7 }
  0x72   :  { %5168 = vmatmul.mubr.bf16.gmra.mrb[40].mxu0 %v5460_v56 }
  0x73   :  { %5171 = vmatprep.mubr.bf16.mxu0 %v5461_v58  ;;  %v5548_v58 = vld [vmem:[%s11240_s0 + $0x2b8] sm:$0xff]  }
  0x75   :  { %5248 = vmatmul.mubr.bf16.gmra.mrb[40].mxu1 %v5505_v10 }
  0x76   :  { %5251 = vmatprep.mubr.bf16.mxu1 %v5507_v12 }
  0x7a   :  { %5172 = vmatmul.mubr.bf16.gmra.mrb[44].mxu0 %v5462_v60 }
  0x7b   :  { %5175 = vmatprep.mubr.bf16.mxu0 %v5464_v62 }
  0x7d   :  { %5252 = vmatmul.mubr.bf16.gmra.mrb[44].mxu1 %v5508_v14 }
  0x7e   :  { %5255 = vmatprep.mubr.bf16.mxu1 %v5509_v15 }
  0x82   :  { %5176 = vmatmul.mubr.bf16.gmra.mrb[48].mxu0 %v5465_v0 }
  0x83   :  { %5179 = vmatprep.mubr.bf16.mxu0 %v5468_v2 }
  0x85   :  { %5256 = vmatmul.mubr.bf16.gmra.mrb[48].mxu1 %v5510_v18 }
  0x86   :  { %5259 = vmatprep.mubr.bf16.mxu1 %v5512_v20  ;;  %v5550_v20 = vld [vmem:[%s11240_s0 + $0x2c8] sm:$0xff]  }
  0x8a   :  { %5180 = vmatmul.mubr.bf16.gmra.mrb[52].mxu0 %v5469_v4 }
  0x8b   :  { %5183 = vmatprep.mubr.bf16.mxu0 %v5472_v6 }
  0x8d   :  { %5260 = vmatmul.mubr.bf16.gmra.mrb[52].mxu1 %v5513_v22 }
  0x8e   :  { %5263 = vmatprep.mubr.bf16.mxu1 %v5514_v23 }
  0x92   :  { %5184 = vmatmul.mubr.bf16.gmra.mrb[56].mxu0 %v5473_v9  ;;  %v5549_v9 = vld [vmem:[%s11240_s0 + $0x2c0] sm:$0xff]  }
  0x93   :  { %5187 = vmatprep.mubr.bf16.mxu0 %v5476_v11 }
  0x95   :  { %5264 = vmatmul.mubr.bf16.gmra.mrb[56].mxu1 %v5515_v27 }
  0x96   :  { %5267 = vmatprep.mubr.bf16.mxu1 %v5517_v28 }
  0x9a   :  { %5188 = vmatmul.mubr.bf16.gmra.mrb[60].mxu0 %v5477_v13 }
  0x9b   :  { %5287 = vmatprep.mubr.bf16.mxu0 %v5519_v17 }
  0x9d   :  { %5268 = vmatmul.mubr.bf16.gmra.mrb[60].mxu1 %v5518_v31 }
  0xa2   :  { %5288 = vmatmul.mubr.bf16.vlgmr.msra.gmra.mrb[64].mxu0 %v5520_v19 }
  0xa3   :  { %5291 = vmatprep.mubr.bf16.mxu0 %v5522_v21 }
  0xaa   :  { %5292 = vmatmul.mubr.bf16.gmra.mrb[68].mxu0 %v5523_v25 }
  0xab   :  { %5295 = vmatprep.mubr.bf16.mxu0 %v5524_v26 }
  0xb2   :  { %5296 = vmatmul.mubr.bf16.gmra.mrb[72].mxu0 %v5525_v29 }
  0xb3   :  { %5299 = vmatprep.mubr.bf16.mxu0 %v5527_v30 }
  0xba   :  { %5300 = vmatmul.mubr.bf16.gmra.mrb[76].mxu0 %v5528_v33 }
  0xbb   :  { %5303 = vmatprep.mubr.bf16.mxu0 %v5529_v34 }
  0xc2   :  { %5304 = vmatmul.mubr.bf16.gmra.mrb[80].mxu0 %v5530_v35  ;;  %v5552_v35 = vld [vmem:[%s11240_s0 + $0x2d0] sm:$0xff]  }
  0xc3   :  { %5307 = vmatprep.mubr.bf16.mxu0 %v5532_v36 }
  0xca   :  { %5308 = vmatmul.mubr.bf16.gmra.mrb[84].mxu0 %v5533_v38 }
  0xcb   :  { %5311 = vmatprep.mubr.bf16.mxu0 %v5534_v39 }
  0xd2   :  { %5312 = vmatmul.mubr.bf16.gmra.mrb[88].mxu0 %v5535_v40 }
  0xd3   :  { %5315 = vmatprep.mubr.bf16.mxu0 %v5537_v41 }
  0xda   :  { %5316 = vmatmul.mubr.bf16.gmra.mrb[92].mxu0 %v5538_v43 }
  0xdb   :  { %5319 = vmatprep.mubr.bf16.mxu0 %v5539_v44 }
  0xe2   :  { %5320 = vmatmul.mubr.bf16.gmra.mrb[96].mxu0 %v5540_v45 }
  0xe3   :  { %5323 = vmatprep.mubr.bf16.mxu0 %v5542_v46  ;;  %v5551_v46 = vld [vmem:[%s11239_s1 + $0xf0] sm:$0xff]  }
  0xe4   :  { %5363 = vmatprep.subr.bf16.mxu1 %v5551_v46 }
  0xe5   :  { %5364 = vmatpush3.bf16.msra.mxu1 %v5551_v46 }
  0xea   :  { %5324 = vmatmul.mubr.bf16.gmra.mrb[100].mxu0 %v5543_v48 }
  0xeb   :  { %5327 = vmatprep.mubr.bf16.mxu0 %v5544_v49 }
  0xf2   :  { %5328 = vmatmul.mubr.bf16.gmra.mrb[104].mxu0 %v5545_v50 }
  0xf3   :  { %5331 = vmatprep.mubr.bf16.mxu0 %v5547_v52 }
  0xf5   :  { %v5958_v51 = vpop.f32.mrb[0].mxu0 }
  0xf6   :  { %11506 = vst [vmem:[#allocation2_spill] sm:$0xff] %v5958_v51  ;;  %v5963_v53 = vpop.f32.mrb[1].mxu0  ;;  %v2973_v59 = vmul.f32 %v5958_v51, %v5958_v51  ;;  %v2455_v0 = vsel %vm2451_vm0, %v5958_v51, 0.0 }
  0xf7   :  { %11507 = vst [vmem:[#allocation3_spill] sm:$0xff] %v5963_v53  ;;  %v2971_v54 = vmul.f32 %v5963_v53, %v5963_v53  ;;  %v5967_v55 = vpop.f32.mrb[2].mxu0  ;;  %v2452_v60 = vsel %vm2451_vm0, %v5963_v53, 0.0 }
  0xf8   :  { %11508 = vst [vmem:[#allocation4_spill] sm:$0xff] %v5967_v55  ;;  %v5969_v56 = vpop.f32.mrb[3].mxu0  ;;  %v2974_v2 = vmul.f32 %v5967_v55, %v5967_v55  ;;  %v3230_v6 = vsel %vm2451_vm0, %v2973_v59, 0.0  ;;  %v2457_v7 = vsel %vm2451_vm0, %v5967_v55, 0.0 }
  0xf9   :  { %11509 = vst [vmem:[#allocation5_spill] sm:$0xff] %v5969_v56  ;;  %v2453_v61 = vsel %vm2451_vm0, %v5969_v56, 0.0  ;;  %v2972_v62 = vmul.f32 %v5969_v56, %v5969_v56  ;;  %v3227_v1 = vsel %vm2451_vm0, %v2971_v54, 0.0 }
  0xfa   :  { %v2454_v63 = vadd.f32 %v2453_v61, %v2452_v60  ;;  %5332 = vmatmul.mubr.bf16.gmra.mrb[108].mxu0 %v5548_v58  ;;  %v3232_v13 = vsel %vm2451_vm0, %v2974_v2, 0.0  ;;  %v5554_v2 = vld [vmem:[%s11240_s0 + $0x2e0] sm:$0xff]  }
  0xfb   :  { %v3228_v3 = vsel %vm2451_vm0, %v2972_v62, 0.0  ;;  %5335 = vmatprep.mubr.bf16.mxu0 %v5549_v9 }
  0xfc   :  { %v2456_v4 = vadd.f32 %v2455_v0, %v2454_v63  ;;  %v3229_v5 = vadd.f32 %v3228_v3, %v3227_v1 }
  0xfd   :  { %v5994_v8 = vpop.f32.mrb[4].mxu0 }
  0xfe   :  { %11510 = vst [vmem:[#allocation6_spill] sm:$0xff] %v5994_v8  ;;  %v2458_v10 = vadd.f32 %v2457_v7, %v2456_v4  ;;  %v3231_v11 = vadd.f32 %v3230_v6, %v3229_v5  ;;  %v5999_v12 = vpop.f32.mrb[5].mxu0  ;;  %v2977_v21 = vmul.f32 %v5994_v8, %v5994_v8  ;;  %v2463_v27 = vsel %vm2451_vm0, %v5994_v8, 0.0 }
  0xff   :  { %11511 = vst [vmem:[#allocation7_spill] sm:$0xff] %v5999_v12  ;;  %v2459_v14 = vsel %vm2451_vm0, %v5999_v12, 0.0  ;;  %v2975_v15 = vmul.f32 %v5999_v12, %v5999_v12  ;;  %v6006_v16 = vpop.f32.mrb[6].mxu0 }
 0x100   :  { %11512 = vst [vmem:[#allocation8_spill] sm:$0xff] %v6006_v16  ;;  %v3233_v17 = vadd.f32 %v3232_v13, %v3231_v11  ;;  %v2460_v18 = vadd.f32 %v2459_v14, %v2458_v10  ;;  %v6008_v19 = vpop.f32.mrb[7].mxu0  ;;  %v2978_v28 = vmul.f32 %v6006_v16, %v6006_v16  ;;  %v3238_v32 = vsel %vm2451_vm0, %v2977_v21, 0.0 }
 0x101   :  { %11513 = vst [vmem:[#allocation9_spill] sm:$0xff] %v6008_v19  ;;  %v3234_v22 = vsel %vm2451_vm0, %v2975_v15, 0.0  ;;  %v2461_v23 = vsel %vm2451_vm0, %v6008_v19, 0.0  ;;  %v2976_v24 = vmul.f32 %v6008_v19, %v6008_v19  ;;  %v2465_v33 = vsel %vm2451_vm0, %v6006_v16, 0.0  ;;  %v5555_v15 = vld [vmem:[%s11240_s0 + $0x2e8] sm:$0xff]  }
 0x102   :  { %v3235_v25 = vadd.f32 %v3234_v22, %v3233_v17  ;;  %v2462_v26 = vadd.f32 %v2461_v23, %v2460_v18  ;;  %5336 = vmatmul.mubr.bf16.gmra.mrb[112].mxu0 %v5550_v20  ;;  %v3240_v39 = vsel %vm2451_vm0, %v2978_v28, 0.0 }
 0x103   :  { %v3236_v29 = vsel %vm2451_vm0, %v2976_v24, 0.0  ;;  %5339 = vmatprep.mubr.bf16.mxu0 %v5552_v35 }
 0x104   :  { %v2464_v30 = vadd.f32 %v2463_v27, %v2462_v26  ;;  %v3237_v31 = vadd.f32 %v3236_v29, %v3235_v25 }
 0x105   :  { %v6028_v34 = vpop.f32.mrb[8].mxu0 }
 0x106   :  { %11514 = vst [vmem:[#allocation10_spill] sm:$0xff] %v6028_v34  ;;  %v2466_v36 = vadd.f32 %v2465_v33, %v2464_v30  ;;  %v3239_v37 = vadd.f32 %v3238_v32, %v3237_v31  ;;  %v6033_v38 = vpop.f32.mrb[9].mxu0  ;;  %v2981_v48 = vmul.f32 %v6028_v34, %v6028_v34  ;;  %v2471_v58 = vsel %vm2451_vm0, %v6028_v34, 0.0  ;;  %v6101_v32 = vpop.f32.mrb[0].mxu1  ;;  %v5557_v33 = vld [vmem:[%s11240_s0 + $0x2f0] sm:$0xff]  }
 0x107   :  { %11515 = vst [vmem:[#allocation11_spill] sm:$0xff] %v6033_v38  ;;  %v2467_v40 = vsel %vm2451_vm0, %v6033_v38, 0.0  ;;  %v2979_v41 = vmul.f32 %v6033_v38, %v6033_v38  ;;  %v6040_v42 = vpop.f32.mrb[10].mxu0  ;;  %11523 = vst [vmem:[#allocation19_spill] sm:$0xff] %v6101_v32 }
 0x108   :  { %11516 = vst [vmem:[#allocation12_spill] sm:$0xff] %v6040_v42  ;;  %v3241_v43 = vadd.f32 %v3240_v39, %v3239_v37  ;;  %v2468_v44 = vadd.f32 %v2467_v40, %v2466_v36  ;;  %v6042_v45 = vpop.f32.mrb[11].mxu0  ;;  %v2982_v59 = vmul.f32 %v6040_v42, %v6040_v42  ;;  %v3246_v63 = vsel %vm2451_vm0, %v2981_v48, 0.0  ;;  %v6108_v39 = vpop.f32.mrb[1].mxu1 }
 0x109   :  { %11517 = vst [vmem:[#allocation13_spill] sm:$0xff] %v6042_v45  ;;  %v3242_v49 = vsel %vm2451_vm0, %v2979_v41, 0.0  ;;  %v2469_v50 = vsel %vm2451_vm0, %v6042_v45, 0.0  ;;  %v2980_v52 = vmul.f32 %v6042_v45, %v6042_v45  ;;  %v2473_v0 = vsel %vm2451_vm0, %v6040_v42, 0.0  ;;  %11525 = vst [vmem:[#allocation21_spill] sm:$0xff] %v6108_v39  ;;  %v6117_v46 = vpop.f32.mrb[2].mxu1 }
 0x10a   :  { %v3243_v54 = vadd.f32 %v3242_v49, %v3241_v43  ;;  %v2470_v57 = vadd.f32 %v2469_v50, %v2468_v44  ;;  %5340 = vmatmul.mubr.bf16.gmra.mrb[116].mxu0 %v5553_v47  ;;  %v3248_v6 = vsel %vm2451_vm0, %v2982_v59, 0.0  ;;  %11527 = vst [vmem:[#allocation23_spill] sm:$0xff] %v6117_v46  ;;  %v6121_v50 = vpop.f32.mrb[3].mxu1 }
 0x10b   :  { %v3244_v60 = vsel %vm2451_vm0, %v2980_v52, 0.0  ;;  %5343 = vmatprep.mubr.bf16.mxu0 %v5554_v2  ;;  %11529 = vst [vmem:[#allocation25_spill] sm:$0xff] %v6121_v50  ;;  %v5556_v52 = vld [vmem:[%s11239_s1 + $0xf8] sm:$0xff]  }
 0x10c   :  { %v2472_v61 = vadd.f32 %v2471_v58, %v2470_v57  ;;  %v3245_v62 = vadd.f32 %v3244_v60, %v3243_v54  ;;  %v5558_v54 = vld [vmem:[%s11240_s0 + $0x2f8] sm:$0xff]   ;;  %5365 = vmatprep.subr.bf16.mxu1 %v5556_v52 }
 0x10d   :  { %v6065_v1 = vpop.f32.mrb[12].mxu0  ;;  %5366 = vmatpush3.bf16.msra.mxu1 %v5556_v52 }
 0x10e   :  { %11518 = vst [vmem:[#allocation14_spill] sm:$0xff] %v6065_v1  ;;  %v2474_v3 = vadd.f32 %v2473_v0, %v2472_v61  ;;  %v3247_v4 = vadd.f32 %v3246_v63, %v3245_v62  ;;  %v6070_v5 = vpop.f32.mrb[13].mxu0  ;;  %v2985_v17 = vmul.f32 %v6065_v1, %v6065_v1  ;;  %v2479_v24 = vsel %vm2451_vm0, %v6065_v1, 0.0 }
 0x10f   :  { %11519 = vst [vmem:[#allocation15_spill] sm:$0xff] %v6070_v5  ;;  %v2475_v7 = vsel %vm2451_vm0, %v6070_v5, 0.0  ;;  %v2983_v9 = vmul.f32 %v6070_v5, %v6070_v5  ;;  %v6077_v10 = vpop.f32.mrb[14].mxu0 }
 0x110   :  { %11520 = vst [vmem:[#allocation16_spill] sm:$0xff] %v6077_v10  ;;  %v3249_v11 = vadd.f32 %v3248_v6, %v3247_v4  ;;  %v2476_v13 = vadd.f32 %v2475_v7, %v2474_v3  ;;  %v6079_v14 = vpop.f32.mrb[15].mxu0  ;;  %v2986_v25 = vmul.f32 %v6077_v10, %v6077_v10  ;;  %v3254_v29 = vsel %vm2451_vm0, %v2985_v17, 0.0 }
 0x111   :  { %11521 = vst [vmem:[#allocation17_spill] sm:$0xff] %v6079_v14  ;;  %v3250_v18 = vsel %vm2451_vm0, %v2983_v9, 0.0  ;;  %v2477_v20 = vsel %vm2451_vm0, %v6079_v14, 0.0  ;;  %v2984_v21 = vmul.f32 %v6079_v14, %v6079_v14  ;;  %v2481_v30 = vsel %vm2451_vm0, %v6077_v10, 0.0 }
 0x112   :  { %v3251_v22 = vadd.f32 %v3250_v18, %v3249_v11  ;;  %v2478_v23 = vadd.f32 %v2477_v20, %v2476_v13  ;;  %5344 = vmatmul.mubr.bf16.gmra.mrb[120].mxu0 %v5555_v15  ;;  %v3256_v40 = vsel %vm2451_vm0, %v2986_v25, 0.0  ;;  %v6146_v11 = vpop.f32.mrb[4].mxu1  ;;  %v5559_v13 = vld [vmem:[%s11240_s0 + $0x300] sm:$0xff]  }
 0x113   :  { %v3252_v26 = vsel %vm2451_vm0, %v2984_v21, 0.0  ;;  %5347 = vmatprep.mubr.bf16.mxu0 %v5557_v33  ;;  %11531 = vst [vmem:[#allocation27_spill] sm:$0xff] %v6146_v11  ;;  %v6153_v20 = vpop.f32.mrb[5].mxu1  ;;  %v5560_v21 = vld [vmem:[%s11240_s0 + $0x308] sm:$0xff]   ;;  %5367 = vmatprep.mubr.bf16.mxu1 %v5559_v13 }
 0x114   :  { %v2480_v27 = vadd.f32 %v2479_v24, %v2478_v23  ;;  %v3253_v28 = vadd.f32 %v3252_v26, %v3251_v22  ;;  %11533 = vst [vmem:[#allocation29_spill] sm:$0xff] %v6153_v20  ;;  %v6165_v26 = vpop.f32.mrb[6].mxu1  ;;  %5368 = vmatmul.mubr.bf16.vlgmr.msra.gmra.mrb[64].mxu1 %v5560_v21 }
 0x115   :  { %v6099_v31 = vpop.f32.mrb[16].mxu0  ;;  %11535 = vst [vmem:[#allocation31_spill] sm:$0xff] %v6165_v26 }
 0x116   :  { %11522 = vst [vmem:[#allocation18_spill] sm:$0xff] %v6099_v31  ;;  %v2482_v35 = vadd.f32 %v2481_v30, %v2480_v27  ;;  %v3255_v36 = vadd.f32 %v3254_v29, %v3253_v28  ;;  %v6106_v37 = vpop.f32.mrb[17].mxu0  ;;  %v2989_v57 = vmul.f32 %v6099_v31, %v6099_v31  ;;  %v2487_v63 = vsel %vm2451_vm0, %v6099_v31, 0.0  ;;  %v6169_v30 = vpop.f32.mrb[7].mxu1 }
 0x117   :  { %11524 = vst [vmem:[#allocation20_spill] sm:$0xff] %v6106_v37  ;;  %v2483_v41 = vsel %vm2451_vm0, %v6106_v37, 0.0  ;;  %v2987_v43 = vmul.f32 %v6106_v37, %v6106_v37  ;;  %v6115_v44 = vpop.f32.mrb[18].mxu0  ;;  %11537 = vst [vmem:[#allocation33_spill] sm:$0xff] %v6169_v30 }
 0x118   :  { %11526 = vst [vmem:[#allocation22_spill] sm:$0xff] %v6115_v44  ;;  %v3257_v47 = vadd.f32 %v3256_v40, %v3255_v36  ;;  %v2484_v48 = vadd.f32 %v2483_v41, %v2482_v35  ;;  %v6119_v49 = vpop.f32.mrb[19].mxu0  ;;  %v2990_v0 = vmul.f32 %v6115_v44, %v6115_v44  ;;  %v3262_v6 = vsel %vm2451_vm0, %v2989_v57, 0.0 }
 0x119   :  { %11528 = vst [vmem:[#allocation24_spill] sm:$0xff] %v6119_v49  ;;  %v3258_v58 = vsel %vm2451_vm0, %v2987_v43, 0.0  ;;  %v2485_v59 = vsel %vm2451_vm0, %v6119_v49, 0.0  ;;  %v2988_v60 = vmul.f32 %v6119_v49, %v6119_v49  ;;  %v2489_v7 = vsel %vm2451_vm0, %v6115_v44, 0.0 }
 0x11a   :  { %v3259_v61 = vadd.f32 %v3258_v58, %v3257_v47  ;;  %v2486_v62 = vadd.f32 %v2485_v59, %v2484_v48  ;;  %5348 = vmatmul.mubr.bf16.gmra.mrb[124].mxu0 %v5558_v54  ;;  %v3264_v22 = vsel %vm2451_vm0, %v2990_v0, 0.0 }
 0x11b   :  { %v3260_v2 = vsel %vm2451_vm0, %v2988_v60, 0.0 }
 0x11c   :  { %v2488_v3 = vadd.f32 %v2487_v63, %v2486_v62  ;;  %v3261_v4 = vadd.f32 %v3260_v2, %v3259_v61  ;;  %v6188_v61 = vpop.f32.mrb[8].mxu1  ;;  %v5561_v62 = vld [vmem:[%s11240_s0 + $0x310] sm:$0xff]  }
 0x11d   :  { %v6144_v9 = vpop.f32.mrb[20].mxu0  ;;  %11539 = vst [vmem:[#allocation35_spill] sm:$0xff] %v6188_v61  ;;  %5371 = vmatprep.mubr.bf16.mxu1 %v5561_v62  ;;  %v5563_v62 = vld [vmem:[%s11240_s0 + $0x320] sm:$0xff]  }
 0x11e   :  { %11530 = vst [vmem:[#allocation26_spill] sm:$0xff] %v6144_v9  ;;  %v2490_v15 = vadd.f32 %v2489_v7, %v2488_v3  ;;  %v3263_v17 = vadd.f32 %v3262_v6, %v3261_v4  ;;  %v6151_v18 = vpop.f32.mrb[21].mxu0  ;;  %v2993_v33 = vmul.f32 %v6144_v9, %v6144_v9  ;;  %v2495_v47 = vsel %vm2451_vm0, %v6144_v9, 0.0  ;;  %v6195_v3 = vpop.f32.mrb[9].mxu1  ;;  %v5562_v4 = vld [vmem:[%s11240_s0 + $0x318] sm:$0xff]  }
 0x11f   :  { %11532 = vst [vmem:[#allocation28_spill] sm:$0xff] %v6151_v18  ;;  %v2491_v23 = vsel %vm2451_vm0, %v6151_v18, 0.0  ;;  %v2991_v24 = vmul.f32 %v6151_v18, %v6151_v18  ;;  %v6163_v25 = vpop.f32.mrb[22].mxu0  ;;  %11541 = vst [vmem:[#allocation37_spill] sm:$0xff] %v6195_v3  ;;  %5372 = vmatmul.mubr.bf16.gmra.mrb[68].mxu1 %v5562_v4 }
 0x120   :  { %11534 = vst [vmem:[#allocation30_spill] sm:$0xff] %v6163_v25  ;;  %v3265_v27 = vadd.f32 %v3264_v22, %v3263_v17  ;;  %v2492_v28 = vadd.f32 %v2491_v23, %v2490_v15  ;;  %v6167_v29 = vpop.f32.mrb[23].mxu0  ;;  %v2994_v48 = vmul.f32 %v6163_v25, %v6163_v25  ;;  %v3270_v58 = vsel %vm2451_vm0, %v2993_v33, 0.0  ;;  %v6207_v17 = vpop.f32.mrb[10].mxu1  ;;  %5375 = vmatprep.mubr.bf16.mxu1 %v5563_v62 }
 0x121   :  { %11536 = vst [vmem:[#allocation32_spill] sm:$0xff] %v6167_v29  ;;  %v3266_v35 = vsel %vm2451_vm0, %v2991_v24, 0.0  ;;  %v2493_v36 = vsel %vm2451_vm0, %v6167_v29, 0.0  ;;  %v2992_v40 = vmul.f32 %v6167_v29, %v6167_v29  ;;  %v2497_v59 = vsel %vm2451_vm0, %v6163_v25, 0.0  ;;  %11543 = vst [vmem:[#allocation39_spill] sm:$0xff] %v6207_v17  ;;  %v6211_v24 = vpop.f32.mrb[11].mxu1 }
 0x122   :  { %v3267_v41 = vadd.f32 %v3266_v35, %v3265_v27  ;;  %v2494_v43 = vadd.f32 %v2493_v36, %v2492_v28  ;;  %v3272_v6 = vsel %vm2451_vm0, %v2994_v48, 0.0  ;;  %11545 = vst [vmem:[#allocation41_spill] sm:$0xff] %v6211_v24 }
 0x123   :  { %v3268_v52 = vsel %vm2451_vm0, %v2992_v40, 0.0 }
 0x124   :  { %v2496_v54 = vadd.f32 %v2495_v47, %v2494_v43  ;;  %v3269_v57 = vadd.f32 %v3268_v52, %v3267_v41 }
 0x125   :  { %v6186_v60 = vpop.f32.mrb[24].mxu0 }
 0x126   :  { %11538 = vst [vmem:[#allocation34_spill] sm:$0xff] %v6186_v60  ;;  %v2498_v63 = vadd.f32 %v2497_v59, %v2496_v54  ;;  %v3271_v0 = vadd.f32 %v3270_v58, %v3269_v57  ;;  %v6193_v2 = vpop.f32.mrb[25].mxu0  ;;  %v2997_v27 = vmul.f32 %v6186_v60, %v6186_v60  ;;  %v2503_v41 = vsel %vm2451_vm0, %v6186_v60, 0.0  ;;  %v6230_v59 = vpop.f32.mrb[12].mxu1 }
 0x127   :  { %11540 = vst [vmem:[#allocation36_spill] sm:$0xff] %v6193_v2  ;;  %v2499_v7 = vsel %vm2451_vm0, %v6193_v2, 0.0  ;;  %v2995_v13 = vmul.f32 %v6193_v2, %v6193_v2  ;;  %v6205_v15 = vpop.f32.mrb[26].mxu0  ;;  %11547 = vst [vmem:[#allocation43_spill] sm:$0xff] %v6230_v59 }
 0x128   :  { %11542 = vst [vmem:[#allocation38_spill] sm:$0xff] %v6205_v15  ;;  %v3273_v21 = vadd.f32 %v3272_v6, %v3271_v0  ;;  %v2500_v22 = vadd.f32 %v2499_v7, %v2498_v63  ;;  %v6209_v23 = vpop.f32.mrb[27].mxu0  ;;  %v2998_v43 = vmul.f32 %v6205_v15, %v6205_v15  ;;  %v3278_v54 = vsel %vm2451_vm0, %v2997_v27, 0.0  ;;  %v6237_v6 = vpop.f32.mrb[13].mxu1  ;;  %v5564_v7 = vld [vmem:[%s11240_s0 + $0x328] sm:$0xff]  }
 0x129   :  { %11544 = vst [vmem:[#allocation40_spill] sm:$0xff] %v6209_v23  ;;  %v3274_v28 = vsel %vm2451_vm0, %v2995_v13, 0.0  ;;  %v2501_v33 = vsel %vm2451_vm0, %v6209_v23, 0.0  ;;  %v2996_v35 = vmul.f32 %v6209_v23, %v6209_v23  ;;  %v2505_v57 = vsel %vm2451_vm0, %v6205_v15, 0.0  ;;  %11549 = vst [vmem:[#allocation45_spill] sm:$0xff] %v6237_v6  ;;  %5376 = vmatmul.mubr.bf16.gmra.mrb[72].mxu1 %v5564_v7 }
 0x12a   :  { %v3275_v36 = vadd.f32 %v3274_v28, %v3273_v21  ;;  %v2502_v40 = vadd.f32 %v2501_v33, %v2500_v22  ;;  %v3280_v13 = vsel %vm2451_vm0, %v2998_v43, 0.0  ;;  %v6249_v28 = vpop.f32.mrb[14].mxu1 }
 0x12b   :  { %v3276_v47 = vsel %vm2451_vm0, %v2996_v35, 0.0  ;;  %11551 = vst [vmem:[#allocation47_spill] sm:$0xff] %v6249_v28 }
 0x12c   :  { %v2504_v48 = vadd.f32 %v2503_v41, %v2502_v40  ;;  %v3277_v52 = vadd.f32 %v3276_v47, %v3275_v36  ;;  %v6253_v40 = vpop.f32.mrb[15].mxu1 }
 0x12d   :  { %v6228_v58 = vpop.f32.mrb[28].mxu0  ;;  %11553 = vst [vmem:[#allocation49_spill] sm:$0xff] %v6253_v40 }
 0x12e   :  { %11546 = vst [vmem:[#allocation42_spill] sm:$0xff] %v6228_v58  ;;  %v2506_v63 = vadd.f32 %v2505_v57, %v2504_v48  ;;  %v3279_v0 = vadd.f32 %v3278_v54, %v3277_v52  ;;  %v6235_v4 = vpop.f32.mrb[29].mxu0  ;;  %v3001_v41 = vmul.f32 %v6228_v58, %v6228_v58  ;;  %v2511_v57 = vsel %vm2451_vm0, %v6228_v58, 0.0 }
 0x12f   :  { %11548 = vst [vmem:[#allocation44_spill] sm:$0xff] %v6235_v4  ;;  %v2507_v21 = vsel %vm2451_vm0, %v6235_v4, 0.0  ;;  %v2999_v22 = vmul.f32 %v6235_v4, %v6235_v4  ;;  %v6247_v27 = vpop.f32.mrb[30].mxu0 }
 0x130   :  { %11550 = vst [vmem:[#allocation46_spill] sm:$0xff] %v6247_v27  ;;  %v3281_v33 = vadd.f32 %v3280_v13, %v3279_v0  ;;  %v2508_v35 = vadd.f32 %v2507_v21, %v2506_v63  ;;  %v6251_v36 = vpop.f32.mrb[31].mxu0  ;;  %v3002_v62 = vmul.f32 %v6247_v27, %v6247_v27  ;;  %v3286_v13 = vsel %vm2451_vm0, %v3001_v41, 0.0  ;;  %v5566_v41 = vld [vmem:[%s11240_s0 + $0x338] sm:$0xff]  }
 0x131   :  { %11552 = vst [vmem:[#allocation48_spill] sm:$0xff] %v6251_v36  ;;  %v3282_v43 = vsel %vm2451_vm0, %v2999_v22, 0.0  ;;  %v2509_v47 = vsel %vm2451_vm0, %v6251_v36, 0.0  ;;  %v3000_v48 = vmul.f32 %v6251_v36, %v6251_v36  ;;  %v2513_v21 = vsel %vm2451_vm0, %v6247_v27, 0.0  ;;  %v6272_v36 = vpop.f32.mrb[16].mxu1 }
 0x132   :  { %v3283_v52 = vadd.f32 %v3282_v43, %v3281_v33  ;;  %v2510_v54 = vadd.f32 %v2509_v47, %v2508_v35  ;;  %11555 = vst [vmem:[#allocation51_spill] sm:$0xff] %v6272_v36  ;;  %v5565_v33 = vld [vmem:[%s11240_s0 + $0x330] sm:$0xff]  }
 0x133   :  { %v3284_v63 = vsel %vm2451_vm0, %v3000_v48, 0.0  ;;  %v6279_v48 = vpop.f32.mrb[17].mxu1  ;;  %5379 = vmatprep.mubr.bf16.mxu1 %v5565_v33 }
 0x134   :  { %v2512_v0 = vadd.f32 %v2511_v57, %v2510_v54  ;;  %v3285_v7 = vadd.f32 %v3284_v63, %v3283_v52  ;;  %11557 = vst [vmem:[#allocation53_spill] sm:$0xff] %v6279_v48  ;;  %v3288_v52 = vsel %vm2451_vm0, %v3002_v62, 0.0  ;;  %5380 = vmatmul.mubr.bf16.gmra.mrb[76].mxu1 %v5566_v41 }
 0x135   :  { %v6270_v22 = vpop.f32.mrb[32].mxu0 }
 0x136   :  { %11554 = vst [vmem:[#allocation50_spill] sm:$0xff] %v6270_v22  ;;  %v2514_v35 = vadd.f32 %v2513_v21, %v2512_v0  ;;  %v3287_v43 = vadd.f32 %v3286_v13, %v3285_v7  ;;  %v6277_v47 = vpop.f32.mrb[33].mxu0  ;;  %v6291_v0 = vpop.f32.mrb[18].mxu1  ;;  %v3005_v62 = vmul.f32 %v6270_v22, %v6270_v22 }
 0x137   :  { %11556 = vst [vmem:[#allocation52_spill] sm:$0xff] %v6277_v47  ;;  %v2515_v54 = vsel %vm2451_vm0, %v6277_v47, 0.0  ;;  %v3003_v57 = vmul.f32 %v6277_v47, %v6277_v47  ;;  %v6289_v63 = vpop.f32.mrb[34].mxu0  ;;  %11559 = vst [vmem:[#allocation55_spill] sm:$0xff] %v6291_v0  ;;  %v6295_v27 = vpop.f32.mrb[19].mxu1 }
 0x138   :  { %11558 = vst [vmem:[#allocation54_spill] sm:$0xff] %v6289_v63  ;;  %v3289_v7 = vadd.f32 %v3288_v52, %v3287_v43  ;;  %v2516_v13 = vadd.f32 %v2515_v54, %v2514_v35  ;;  %v6293_v21 = vpop.f32.mrb[35].mxu0  ;;  %11561 = vst [vmem:[#allocation57_spill] sm:$0xff] %v6295_v27  ;;  %v2519_v35 = vsel %vm2451_vm0, %v6270_v22, 0.0  ;;  %v3006_v43 = vmul.f32 %v6289_v63, %v6289_v63 }
 0x139   :  { %11560 = vst [vmem:[#allocation56_spill] sm:$0xff] %v6293_v21  ;;  %v3290_v58 = vsel %vm2451_vm0, %v3003_v57, 0.0  ;;  %v2517_v47 = vsel %vm2451_vm0, %v6293_v21, 0.0  ;;  %v3004_v4 = vmul.f32 %v6293_v21, %v6293_v21  ;;  %v3294_v57 = vsel %vm2451_vm0, %v3005_v62, 0.0  ;;  %v6314_v21 = vpop.f32.mrb[20].mxu1 }
 0x13a   :  { %v3291_v15 = vadd.f32 %v3290_v58, %v3289_v7  ;;  %v2518_v33 = vadd.f32 %v2517_v47, %v2516_v13  ;;  %v2521_v60 = vsel %vm2451_vm0, %v6289_v63, 0.0  ;;  %11563 = vst [vmem:[#allocation59_spill] sm:$0xff] %v6314_v21  ;;  %v5567_v58 = vld [vmem:[%s11240_s0 + $0x340] sm:$0xff]   ;;  %v3296_v62 = vsel %vm2451_vm0, %v3006_v43, 0.0 }
 0x13b   :  { %v3292_v41 = vsel %vm2451_vm0, %v3004_v4, 0.0  ;;  %v6321_v4 = vpop.f32.mrb[21].mxu1  ;;  %5383 = vmatprep.mubr.bf16.mxu1 %v5567_v58 }
 0x13c   :  { %v2520_v52 = vadd.f32 %v2519_v35, %v2518_v33  ;;  %v3293_v54 = vadd.f32 %v3292_v41, %v3291_v15  ;;  %11565 = vst [vmem:[#allocation61_spill] sm:$0xff] %v6321_v4  ;;  %v5568_v15 = vld [vmem:[%s11240_s0 + $0x348] sm:$0xff]  }
 0x13d   :  { %v6312_v23 = vpop.f32.mrb[36].mxu0  ;;  %5384 = vmatmul.mubr.bf16.gmra.mrb[80].mxu1 %v5568_v15 }
 0x13e   :  { %11562 = vst [vmem:[#allocation58_spill] sm:$0xff] %v6312_v23  ;;  %v2522_v47 = vadd.f32 %v2521_v60, %v2520_v52  ;;  %v3295_v7 = vadd.f32 %v3294_v57, %v3293_v54  ;;  %v6319_v13 = vpop.f32.mrb[37].mxu0  ;;  %v6333_v60 = vpop.f32.mrb[22].mxu1  ;;  %v3009_v43 = vmul.f32 %v6312_v23, %v6312_v23 }
 0x13f   :  { %11564 = vst [vmem:[#allocation60_spill] sm:$0xff] %v6319_v13  ;;  %v2523_v33 = vsel %vm2451_vm0, %v6319_v13, 0.0  ;;  %v3007_v35 = vmul.f32 %v6319_v13, %v6319_v13  ;;  %v6331_v41 = vpop.f32.mrb[38].mxu0  ;;  %11567 = vst [vmem:[#allocation63_spill] sm:$0xff] %v6333_v60  ;;  %v6337_v63 = vpop.f32.mrb[23].mxu1 }
 0x140   :  { %11566 = vst [vmem:[#allocation62_spill] sm:$0xff] %v6331_v41  ;;  %v3297_v52 = vadd.f32 %v3296_v62, %v3295_v7  ;;  %v2524_v54 = vadd.f32 %v2523_v33, %v2522_v47  ;;  %v6335_v57 = vpop.f32.mrb[39].mxu0  ;;  %11569 = vst [vmem:[#allocation65_spill] sm:$0xff] %v6337_v63  ;;  %v2527_v47 = vsel %vm2451_vm0, %v6312_v23, 0.0  ;;  %v3010_v7 = vmul.f32 %v6331_v41, %v6331_v41 }
 0x141   :  { %11568 = vst [vmem:[#allocation64_spill] sm:$0xff] %v6335_v57  ;;  %v3298_v22 = vsel %vm2451_vm0, %v3007_v35, 0.0  ;;  %v2525_v13 = vsel %vm2451_vm0, %v6335_v57, 0.0  ;;  %v3008_v2 = vmul.f32 %v6335_v57, %v6335_v57  ;;  %v3302_v35 = vsel %vm2451_vm0, %v3009_v43, 0.0  ;;  %v6356_v57 = vpop.f32.mrb[24].mxu1 }
 0x142   :  { %v3299_v25 = vadd.f32 %v3298_v22, %v3297_v52  ;;  %v2526_v58 = vadd.f32 %v2525_v13, %v2524_v54  ;;  %v2529_v9 = vsel %vm2451_vm0, %v6331_v41, 0.0  ;;  %11571 = vst [vmem:[#allocation67_spill] sm:$0xff] %v6356_v57  ;;  %v5569_v22 = vld [vmem:[%s11240_s0 + $0x350] sm:$0xff]   ;;  %v3304_v43 = vsel %vm2451_vm0, %v3010_v7, 0.0 }
 0x143   :  { %v3300_v15 = vsel %vm2451_vm0, %v3008_v2, 0.0  ;;  %v6363_v2 = vpop.f32.mrb[25].mxu1  ;;  %5387 = vmatprep.mubr.bf16.mxu1 %v5569_v22 }
 0x144   :  { %v2528_v62 = vadd.f32 %v2527_v47, %v2526_v58  ;;  %v3301_v33 = vadd.f32 %v3300_v15, %v3299_v25  ;;  %11573 = vst [vmem:[#allocation69_spill] sm:$0xff] %v6363_v2  ;;  %v5570_v25 = vld [vmem:[%s11240_s0 + $0x358] sm:$0xff]  }
 0x145   :  { %v6354_v29 = vpop.f32.mrb[40].mxu0  ;;  %5388 = vmatmul.mubr.bf16.gmra.mrb[84].mxu1 %v5570_v25 }
 0x146   :  { %11570 = vst [vmem:[#allocation66_spill] sm:$0xff] %v6354_v29  ;;  %v2530_v13 = vadd.f32 %v2529_v9, %v2528_v62  ;;  %v3303_v52 = vadd.f32 %v3302_v35, %v3301_v33  ;;  %v6361_v54 = vpop.f32.mrb[41].mxu0  ;;  %v6375_v9 = vpop.f32.mrb[26].mxu1  ;;  %v3013_v7 = vmul.f32 %v6354_v29, %v6354_v29 }
 0x147   :  { %11572 = vst [vmem:[#allocation68_spill] sm:$0xff] %v6361_v54  ;;  %v2531_v58 = vsel %vm2451_vm0, %v6361_v54, 0.0  ;;  %v3011_v47 = vmul.f32 %v6361_v54, %v6361_v54  ;;  %v6373_v15 = vpop.f32.mrb[42].mxu0  ;;  %11575 = vst [vmem:[#allocation71_spill] sm:$0xff] %v6375_v9  ;;  %v6379_v41 = vpop.f32.mrb[27].mxu1 }
 0x148   :  { %11574 = vst [vmem:[#allocation70_spill] sm:$0xff] %v6373_v15  ;;  %v3305_v62 = vadd.f32 %v3304_v43, %v3303_v52  ;;  %v2532_v33 = vadd.f32 %v2531_v58, %v2530_v13  ;;  %v6377_v35 = vpop.f32.mrb[43].mxu0  ;;  %11577 = vst [vmem:[#allocation73_spill] sm:$0xff] %v6379_v41  ;;  %v2535_v13 = vsel %vm2451_vm0, %v6354_v29, 0.0  ;;  %v3014_v52 = vmul.f32 %v6373_v15, %v6373_v15 }
 0x149   :  { %11576 = vst [vmem:[#allocation72_spill] sm:$0xff] %v6377_v35  ;;  %v3306_v23 = vsel %vm2451_vm0, %v3011_v47, 0.0  ;;  %v2533_v54 = vsel %vm2451_vm0, %v6377_v35, 0.0  ;;  %v3012_v18 = vmul.f32 %v6377_v35, %v6377_v35  ;;  %v3310_v47 = vsel %vm2451_vm0, %v3013_v7, 0.0  ;;  %v6398_v35 = vpop.f32.mrb[28].mxu1 }
 0x14a   :  { %v3307_v44 = vadd.f32 %v3306_v23, %v3305_v62  ;;  %v2534_v22 = vadd.f32 %v2533_v54, %v2532_v33  ;;  %v2537_v31 = vsel %vm2451_vm0, %v6373_v15, 0.0  ;;  %11579 = vst [vmem:[#allocation75_spill] sm:$0xff] %v6398_v35  ;;  %v5571_v23 = vld [vmem:[%s11240_s0 + $0x360] sm:$0xff]   ;;  %v3312_v7 = vsel %vm2451_vm0, %v3014_v52, 0.0 }
 0x14b   :  { %v3308_v25 = vsel %vm2451_vm0, %v3012_v18, 0.0  ;;  %v6405_v18 = vpop.f32.mrb[29].mxu1  ;;  %5391 = vmatprep.mubr.bf16.mxu1 %v5571_v23 }
 0x14c   :  { %v2536_v43 = vadd.f32 %v2535_v13, %v2534_v22  ;;  %v3309_v58 = vadd.f32 %v3308_v25, %v3307_v44  ;;  %11581 = vst [vmem:[#allocation77_spill] sm:$0xff] %v6405_v18  ;;  %v5572_v44 = vld [vmem:[%s11240_s0 + $0x368] sm:$0xff]  }
 0x14d   :  { %v6396_v49 = vpop.f32.mrb[44].mxu0  ;;  %5392 = vmatmul.mubr.bf16.gmra.mrb[88].mxu1 %v5572_v44 }
 0x14e   :  { %11578 = vst [vmem:[#allocation74_spill] sm:$0xff] %v6396_v49  ;;  %v2538_v54 = vadd.f32 %v2537_v31, %v2536_v43  ;;  %v3311_v62 = vadd.f32 %v3310_v47, %v3309_v58  ;;  %v6403_v33 = vpop.f32.mrb[45].mxu0  ;;  %v6417_v31 = vpop.f32.mrb[30].mxu1  ;;  %v3017_v52 = vmul.f32 %v6396_v49, %v6396_v49 }
 0x14f   :  { %11580 = vst [vmem:[#allocation76_spill] sm:$0xff] %v6403_v33  ;;  %v2539_v22 = vsel %vm2451_vm0, %v6403_v33, 0.0  ;;  %v3015_v13 = vmul.f32 %v6403_v33, %v6403_v33  ;;  %v6415_v25 = vpop.f32.mrb[46].mxu0  ;;  %11583 = vst [vmem:[#allocation79_spill] sm:$0xff] %v6417_v31  ;;  %v6421_v15 = vpop.f32.mrb[31].mxu1 }
 0x150   :  { %11582 = vst [vmem:[#allocation78_spill] sm:$0xff] %v6415_v25  ;;  %v3313_v43 = vadd.f32 %v3312_v7, %v3311_v62  ;;  %v2540_v58 = vadd.f32 %v2539_v22, %v2538_v54  ;;  %v6419_v47 = vpop.f32.mrb[47].mxu0  ;;  %11585 = vst [vmem:[#allocation81_spill] sm:$0xff] %v6421_v15  ;;  %v2543_v54 = vsel %vm2451_vm0, %v6396_v49, 0.0  ;;  %v3018_v62 = vmul.f32 %v6415_v25, %v6415_v25 }
 0x151   :  { %11584 = vst [vmem:[#allocation80_spill] sm:$0xff] %v6419_v47  ;;  %v3314_v29 = vsel %vm2451_vm0, %v3015_v13, 0.0  ;;  %v2541_v33 = vsel %vm2451_vm0, %v6419_v47, 0.0  ;;  %v3016_v37 = vmul.f32 %v6419_v47, %v6419_v47  ;;  %v3318_v13 = vsel %vm2451_vm0, %v3017_v52, 0.0  ;;  %v6440_v47 = vpop.f32.mrb[32].mxu1 }
 0x152   :  { %v3315_v10 = vadd.f32 %v3314_v29, %v3313_v43  ;;  %v2542_v23 = vadd.f32 %v2541_v33, %v2540_v58  ;;  %v2545_v1 = vsel %vm2451_vm0, %v6415_v25, 0.0  ;;  %11587 = vst [vmem:[#allocation83_spill] sm:$0xff] %v6440_v47  ;;  %v5573_v29 = vld [vmem:[%s11240_s0 + $0x370] sm:$0xff]   ;;  %v3320_v52 = vsel %vm2451_vm0, %v3018_v62, 0.0 }
 0x153   :  { %v3316_v44 = vsel %vm2451_vm0, %v3016_v37, 0.0  ;;  %v6447_v37 = vpop.f32.mrb[33].mxu1  ;;  %5395 = vmatprep.mubr.bf16.mxu1 %v5573_v29 }
 0x154   :  { %v2544_v7 = vadd.f32 %v2543_v54, %v2542_v23  ;;  %v3317_v22 = vadd.f32 %v3316_v44, %v3315_v10  ;;  %11589 = vst [vmem:[#allocation85_spill] sm:$0xff] %v6447_v37  ;;  %v5574_v10 = vld [vmem:[%s11240_s0 + $0x378] sm:$0xff]  }
 0x155   :  { %v6438_v14 = vpop.f32.mrb[48].mxu0  ;;  %5396 = vmatmul.mubr.bf16.gmra.mrb[92].mxu1 %v5574_v10 }
 0x156   :  { %11586 = vst [vmem:[#allocation82_spill] sm:$0xff] %v6438_v14  ;;  %v2546_v33 = vadd.f32 %v2545_v1, %v2544_v7  ;;  %v3319_v43 = vadd.f32 %v3318_v13, %v3317_v22  ;;  %v6445_v58 = vpop.f32.mrb[49].mxu0  ;;  %v6459_v1 = vpop.f32.mrb[34].mxu1  ;;  %v3021_v62 = vmul.f32 %v6438_v14, %v6438_v14 }
 0x157   :  { %11588 = vst [vmem:[#allocation84_spill] sm:$0xff] %v6445_v58  ;;  %v2547_v23 = vsel %vm2451_vm0, %v6445_v58, 0.0  ;;  %v3019_v54 = vmul.f32 %v6445_v58, %v6445_v58  ;;  %v6457_v44 = vpop.f32.mrb[50].mxu0  ;;  %11591 = vst [vmem:[#allocation87_spill] sm:$0xff] %v6459_v1  ;;  %v6463_v25 = vpop.f32.mrb[35].mxu1 }
 0x158   :  { %11590 = vst [vmem:[#allocation86_spill] sm:$0xff] %v6457_v44  ;;  %v3321_v7 = vadd.f32 %v3320_v52, %v3319_v43  ;;  %v2548_v22 = vadd.f32 %v2547_v23, %v2546_v33  ;;  %v6461_v13 = vpop.f32.mrb[51].mxu0  ;;  %11593 = vst [vmem:[#allocation89_spill] sm:$0xff] %v6463_v25  ;;  %v2551_v33 = vsel %vm2451_vm0, %v6438_v14, 0.0  ;;  %v3022_v43 = vmul.f32 %v6457_v44, %v6457_v44 }
 0x159   :  { %11592 = vst [vmem:[#allocation88_spill] sm:$0xff] %v6461_v13  ;;  %v3322_v49 = vsel %vm2451_vm0, %v3019_v54, 0.0  ;;  %v2549_v58 = vsel %vm2451_vm0, %v6461_v13, 0.0  ;;  %v3020_v5 = vmul.f32 %v6461_v13, %v6461_v13  ;;  %v3326_v54 = vsel %vm2451_vm0, %v3021_v62, 0.0  ;;  %v6482_v13 = vpop.f32.mrb[36].mxu1 }
 0x15a   :  { %v3323_v42 = vadd.f32 %v3322_v49, %v3321_v7  ;;  %v2550_v29 = vadd.f32 %v2549_v58, %v2548_v22  ;;  %v2553_v34 = vsel %vm2451_vm0, %v6457_v44, 0.0  ;;  %11595 = vst [vmem:[#allocation91_spill] sm:$0xff] %v6482_v13  ;;  %v5575_v49 = vld [vmem:[%s11240_s0 + $0x380] sm:$0xff]   ;;  %v3328_v62 = vsel %vm2451_vm0, %v3022_v43, 0.0 }
 0x15b   :  { %v3324_v10 = vsel %vm2451_vm0, %v3020_v5, 0.0  ;;  %v6489_v5 = vpop.f32.mrb[37].mxu1  ;;  %5399 = vmatprep.mubr.bf16.mxu1 %v5575_v49 }
 0x15c   :  { %v2552_v52 = vadd.f32 %v2551_v33, %v2550_v29  ;;  %v3325_v23 = vadd.f32 %v3324_v10, %v3323_v42  ;;  %11597 = vst [vmem:[#allocation93_spill] sm:$0xff] %v6489_v5  ;;  %v5576_v42 = vld [vmem:[%s11240_s0 + $0x388] sm:$0xff]  }
 0x15d   :  { %v6480_v45 = vpop.f32.mrb[52].mxu0  ;;  %5400 = vmatmul.mubr.bf16.gmra.mrb[96].mxu1 %v5576_v42 }
 0x15e   :  { %11594 = vst [vmem:[#allocation90_spill] sm:$0xff] %v6480_v45  ;;  %v2554_v58 = vadd.f32 %v2553_v34, %v2552_v52  ;;  %v3327_v7 = vadd.f32 %v3326_v54, %v3325_v23  ;;  %v6487_v22 = vpop.f32.mrb[53].mxu0  ;;  %v6501_v34 = vpop.f32.mrb[38].mxu1  ;;  %v3025_v43 = vmul.f32 %v6480_v45, %v6480_v45 }
 0x15f   :  { %11596 = vst [vmem:[#allocation92_spill] sm:$0xff] %v6487_v22  ;;  %v2555_v29 = vsel %vm2451_vm0, %v6487_v22, 0.0  ;;  %v3023_v33 = vmul.f32 %v6487_v22, %v6487_v22  ;;  %v6499_v10 = vpop.f32.mrb[54].mxu0  ;;  %11599 = vst [vmem:[#allocation95_spill] sm:$0xff] %v6501_v34  ;;  %v6505_v44 = vpop.f32.mrb[39].mxu1 }
 0x160   :  { %11598 = vst [vmem:[#allocation94_spill] sm:$0xff] %v6499_v10  ;;  %v3329_v52 = vadd.f32 %v3328_v62, %v3327_v7  ;;  %v2556_v23 = vadd.f32 %v2555_v29, %v2554_v58  ;;  %v6503_v54 = vpop.f32.mrb[55].mxu0  ;;  %11601 = vst [vmem:[#allocation97_spill] sm:$0xff] %v6505_v44  ;;  %v2559_v58 = vsel %vm2451_vm0, %v6480_v45, 0.0  ;;  %v3026_v7 = vmul.f32 %v6499_v10, %v6499_v10 }
 0x161   :  { %11600 = vst [vmem:[#allocation96_spill] sm:$0xff] %v6503_v54  ;;  %v3330_v14 = vsel %vm2451_vm0, %v3023_v33, 0.0  ;;  %v2557_v22 = vsel %vm2451_vm0, %v6503_v54, 0.0  ;;  %v3024_v38 = vmul.f32 %v6503_v54, %v6503_v54  ;;  %v3334_v33 = vsel %vm2451_vm0, %v3025_v43, 0.0  ;;  %v6524_v54 = vpop.f32.mrb[40].mxu1 }
 0x162   :  { %v3331_v16 = vadd.f32 %v3330_v14, %v3329_v52  ;;  %v2558_v49 = vadd.f32 %v2557_v22, %v2556_v23  ;;  %v2561_v8 = vsel %vm2451_vm0, %v6499_v10, 0.0  ;;  %11603 = vst [vmem:[#allocation99_spill] sm:$0xff] %v6524_v54  ;;  %v5577_v14 = vld [vmem:[%s11240_s0 + $0x390] sm:$0xff]   ;;  %v3336_v43 = vsel %vm2451_vm0, %v3026_v7, 0.0 }
 0x163   :  { %v3332_v42 = vsel %vm2451_vm0, %v3024_v38, 0.0  ;;  %v6531_v38 = vpop.f32.mrb[41].mxu1  ;;  %5403 = vmatprep.mubr.bf16.mxu1 %v5577_v14 }
 0x164   :  { %v2560_v62 = vadd.f32 %v2559_v58, %v2558_v49  ;;  %v3333_v29 = vadd.f32 %v3332_v42, %v3331_v16  ;;  %11605 = vst [vmem:[#allocation101_spill] sm:$0xff] %v6531_v38  ;;  %v5578_v16 = vld [vmem:[%s11240_s0 + $0x398] sm:$0xff]  }
 0x165   :  { %v6522_v19 = vpop.f32.mrb[56].mxu0  ;;  %5404 = vmatmul.mubr.bf16.gmra.mrb[100].mxu1 %v5578_v16 }
 0x166   :  { %11602 = vst [vmem:[#allocation98_spill] sm:$0xff] %v6522_v19  ;;  %v2562_v22 = vadd.f32 %v2561_v8, %v2560_v62  ;;  %v3335_v52 = vadd.f32 %v3334_v33, %v3333_v29  ;;  %v6529_v23 = vpop.f32.mrb[57].mxu0  ;;  %v6543_v8 = vpop.f32.mrb[42].mxu1  ;;  %v3029_v7 = vmul.f32 %v6522_v19, %v6522_v19 }
 0x167   :  { %11604 = vst [vmem:[#allocation100_spill] sm:$0xff] %v6529_v23  ;;  %v2563_v49 = vsel %vm2451_vm0, %v6529_v23, 0.0  ;;  %v3027_v58 = vmul.f32 %v6529_v23, %v6529_v23  ;;  %v6541_v42 = vpop.f32.mrb[58].mxu0  ;;  %11607 = vst [vmem:[#allocation103_spill] sm:$0xff] %v6543_v8  ;;  %v6547_v10 = vpop.f32.mrb[43].mxu1 }
 0x168   :  { %11606 = vst [vmem:[#allocation102_spill] sm:$0xff] %v6541_v42  ;;  %v3337_v62 = vadd.f32 %v3336_v43, %v3335_v52  ;;  %v2564_v29 = vadd.f32 %v2563_v49, %v2562_v22  ;;  %v6545_v33 = vpop.f32.mrb[59].mxu0  ;;  %11609 = vst [vmem:[#allocation105_spill] sm:$0xff] %v6547_v10  ;;  %v2567_v22 = vsel %vm2451_vm0, %v6522_v19, 0.0  ;;  %v3030_v52 = vmul.f32 %v6541_v42, %v6541_v42 }
 0x169   :  { %11608 = vst [vmem:[#allocation104_spill] sm:$0xff] %v6545_v33  ;;  %v3338_v45 = vsel %vm2451_vm0, %v3027_v58, 0.0  ;;  %v2565_v23 = vsel %vm2451_vm0, %v6545_v33, 0.0  ;;  %v3028_v12 = vmul.f32 %v6545_v33, %v6545_v33  ;;  %v3342_v58 = vsel %vm2451_vm0, %v3029_v7, 0.0  ;;  %v6566_v33 = vpop.f32.mrb[44].mxu1 }
 0x16a   :  { %v3339_v55 = vadd.f32 %v3338_v45, %v3337_v62  ;;  %v2566_v14 = vadd.f32 %v2565_v23, %v2564_v29  ;;  %v2569_v51 = vsel %vm2451_vm0, %v6541_v42, 0.0  ;;  %11611 = vst [vmem:[#allocation107_spill] sm:$0xff] %v6566_v33  ;;  %v5579_v45 = vld [vmem:[%s11240_s0 + $0x3a0] sm:$0xff]   ;;  %v3344_v7 = vsel %vm2451_vm0, %v3030_v52, 0.0 }
 0x16b   :  { %v3340_v16 = vsel %vm2451_vm0, %v3028_v12, 0.0  ;;  %v6573_v12 = vpop.f32.mrb[45].mxu1  ;;  %5407 = vmatprep.mubr.bf16.mxu1 %v5579_v45 }
 0x16c   :  { %v2568_v43 = vadd.f32 %v2567_v22, %v2566_v14  ;;  %v3341_v49 = vadd.f32 %v3340_v16, %v3339_v55  ;;  %11613 = vst [vmem:[#allocation109_spill] sm:$0xff] %v6573_v12  ;;  %v5580_v55 = vld [vmem:[%s11240_s0 + $0x3a8] sm:$0xff]  }
 0x16d   :  { %v6564_v56 = vpop.f32.mrb[60].mxu0  ;;  %5408 = vmatmul.mubr.bf16.gmra.mrb[104].mxu1 %v5580_v55 }
 0x16e   :  { %11610 = vst [vmem:[#allocation106_spill] sm:$0xff] %v6564_v56  ;;  %v2570_v23 = vadd.f32 %v2569_v51, %v2568_v43  ;;  %v3343_v62 = vadd.f32 %v3342_v58, %v3341_v49  ;;  %v6571_v29 = vpop.f32.mrb[61].mxu0  ;;  %v6585_v51 = vpop.f32.mrb[46].mxu1  ;;  %v3033_v52 = vmul.f32 %v6564_v56, %v6564_v56 }
 0x16f   :  { %11612 = vst [vmem:[#allocation108_spill] sm:$0xff] %v6571_v29  ;;  %v2571_v14 = vsel %vm2451_vm0, %v6571_v29, 0.0  ;;  %v3031_v22 = vmul.f32 %v6571_v29, %v6571_v29  ;;  %v6583_v16 = vpop.f32.mrb[62].mxu0  ;;  %11615 = vst [vmem:[#allocation111_spill] sm:$0xff] %v6585_v51  ;;  %v6589_v42 = vpop.f32.mrb[47].mxu1 }
 0x170   :  { %11614 = vst [vmem:[#allocation110_spill] sm:$0xff] %v6583_v16  ;;  %v3345_v43 = vadd.f32 %v3344_v7, %v3343_v62  ;;  %v2572_v49 = vadd.f32 %v2571_v14, %v2570_v23  ;;  %v6587_v58 = vpop.f32.mrb[63].mxu0  ;;  %11617 = vst [vmem:[#allocation113_spill] sm:$0xff] %v6589_v42  ;;  %v2575_v23 = vsel %vm2451_vm0, %v6564_v56, 0.0  ;;  %v3034_v62 = vmul.f32 %v6583_v16, %v6583_v16 }
 0x171   :  { %11616 = vst [vmem:[#allocation112_spill] sm:$0xff] %v6587_v58  ;;  %v3346_v19 = vsel %vm2451_vm0, %v3031_v22, 0.0  ;;  %v2573_v29 = vsel %vm2451_vm0, %v6587_v58, 0.0  ;;  %v3032_v53 = vmul.f32 %v6587_v58, %v6587_v58  ;;  %v3035_v7 = vmul.f32 %v6108_v39, %v6108_v39 }
 0x172   :  { %v3347_v51 = vadd.f32 %v3346_v19, %v3345_v43  ;;  %v2574_v45 = vadd.f32 %v2573_v29, %v2572_v49  ;;  %v3350_v33 = vsel %vm2451_vm0, %v3033_v52, 0.0  ;;  %v2577_v58 = vsel %vm2451_vm0, %v6583_v16, 0.0  ;;  %v6610_v29 = vpop.f32.mrb[48].mxu1  ;;  %v5582_v52 = vld [vmem:[%s11240_s0 + $0x3b8] sm:$0xff]  }
 0x173   :  { %v3348_v55 = vsel %vm2451_vm0, %v3032_v53, 0.0  ;;  %v2579_v19 = vsel %vm2451_vm0, %v6108_v39, 0.0  ;;  %11618 = vst [vmem:[#allocation114_spill] sm:$0xff] %v6610_v29  ;;  %v5581_v53 = vld [vmem:[%s11240_s0 + $0x3b0] sm:$0xff]   ;;  %v3036_v39 = vmul.f32 %v6121_v50, %v6121_v50 }
 0x174   :  { %v2576_v14 = vadd.f32 %v2575_v23, %v2574_v45  ;;  %v3349_v22 = vadd.f32 %v3348_v55, %v3347_v51  ;;  %v6617_v45 = vpop.f32.mrb[49].mxu1  ;;  %v3352_v23 = vsel %vm2451_vm0, %v3034_v62, 0.0  ;;  %v3354_v55 = vsel %vm2451_vm0, %v3035_v7, 0.0  ;;  %5411 = vmatprep.mubr.bf16.mxu1 %v5581_v53 }
 0x175   :  { %v6612_v43 = vpop.f32.mrb[64].mxu0  ;;  %11620 = vst [vmem:[#allocation116_spill] sm:$0xff] %v6617_v45  ;;  %v6628_v16 = vpop.f32.mrb[50].mxu1  ;;  %5412 = vmatmul.mubr.bf16.gmra.mrb[108].mxu1 %v5582_v52  ;;  %v3037_v62 = vmul.f32 %v6101_v32, %v6101_v32  ;;  %v2581_v7 = vsel %vm2451_vm0, %v6121_v50, 0.0  ;;  %v3039_v53 = vmul.f32 %v6153_v20, %v6153_v20  ;;  %v2585_v50 = vsel %vm2451_vm0, %v6117_v46, 0.0 }
 0x176   :  { %11619 = vst [vmem:[#allocation115_spill] sm:$0xff] %v6612_v43  ;;  %v2578_v49 = vadd.f32 %v2577_v58, %v2576_v14  ;;  %v3351_v56 = vadd.f32 %v3350_v33, %v3349_v22  ;;  %v6619_v51 = vpop.f32.mrb[65].mxu0  ;;  %11622 = vst [vmem:[#allocation118_spill] sm:$0xff] %v6628_v16  ;;  %v6632_v14 = vpop.f32.mrb[51].mxu1  ;;  %v2583_v16 = vsel %vm2451_vm0, %v6101_v32, 0.0 }
 0x177   :  { %11621 = vst [vmem:[#allocation117_spill] sm:$0xff] %v6619_v51  ;;  %v6630_v43 = vpop.f32.mrb[66].mxu0  ;;  %11624 = vst [vmem:[#allocation120_spill] sm:$0xff] %v6632_v14 }
 0x178   :  { %11623 = vst [vmem:[#allocation119_spill] sm:$0xff] %v6630_v43  ;;  %v3353_v33 = vadd.f32 %v3352_v23, %v3351_v56  ;;  %v2580_v58 = vadd.f32 %v2579_v19, %v2578_v49  ;;  %v6634_v22 = vpop.f32.mrb[67].mxu0  ;;  %v3038_v56 = vmul.f32 %v6117_v46, %v6117_v46  ;;  %v3356_v19 = vsel %vm2451_vm0, %v3036_v39, 0.0 }
 0x179   :  { %11625 = vst [vmem:[#allocation121_spill] sm:$0xff] %v6634_v22  ;;  %v3358_v23 = vsel %vm2451_vm0, %v3037_v62, 0.0  ;;  %v3040_v62 = vmul.f32 %v6169_v30, %v6169_v30 }
 0x17a   :  { %v3355_v51 = vadd.f32 %v3354_v55, %v3353_v33  ;;  %v2582_v29 = vadd.f32 %v2581_v7, %v2580_v58  ;;  %v2587_v55 = vsel %vm2451_vm0, %v6153_v20, 0.0  ;;  %v6652_v33 = vpop.f32.mrb[52].mxu1  ;;  %v5583_v58 = vld [vmem:[%s11240_s0 + $0x3c0] sm:$0xff]  }
 0x17b   :  { %11626 = vst [vmem:[#allocation122_spill] sm:$0xff] %v6652_v33  ;;  %v6657_v32 = vpop.f32.mrb[53].mxu1  ;;  %5415 = vmatprep.mubr.bf16.mxu1 %v5583_v58  ;;  %v3042_v58 = vmul.f32 %v6165_v26, %v6165_v26 }
 0x17c   :  { %v2584_v49 = vadd.f32 %v2583_v16, %v2582_v29  ;;  %v3357_v52 = vadd.f32 %v3356_v19, %v3355_v51  ;;  %11627 = vst [vmem:[#allocation123_spill] sm:$0xff] %v6657_v32  ;;  %v5584_v16 = vld [vmem:[%s11240_s0 + $0x3c8] sm:$0xff]   ;;  %v3360_v29 = vsel %vm2451_vm0, %v3038_v56, 0.0  ;;  %v3362_v51 = vsel %vm2451_vm0, %v3039_v53, 0.0  ;;  %v6666_v19 = vpop.f32.mrb[54].mxu1 }
 0x17d   :  { %11628 = vst [vmem:[#allocation124_spill] sm:$0xff] %v6666_v19  ;;  %v6668_v20 = vpop.f32.mrb[68].mxu0  ;;  %5416 = vmatmul.mubr.bf16.gmra.mrb[112].mxu1 %v5584_v16  ;;  %v3041_v56 = vmul.f32 %v6146_v11, %v6146_v11  ;;  %v2589_v53 = vsel %vm2451_vm0, %v6169_v30, 0.0 }
 0x17e   :  { %v2586_v39 = vadd.f32 %v2585_v50, %v2584_v49  ;;  %v3359_v7 = vadd.f32 %v3358_v23, %v3357_v52  ;;  %11629 = vst [vmem:[#allocation125_spill] sm:$0xff] %v6668_v20  ;;  %v6670_v52 = vpop.f32.mrb[55].mxu1  ;;  %v6672_v23 = vpop.f32.mrb[69].mxu0 }
 0x17f   :  { %11630 = vst [vmem:[#allocation126_spill] sm:$0xff] %v6670_v52  ;;  %11631 = vst [vmem:[#allocation127_spill] sm:$0xff] %v6672_v23  ;;  %v6678_v46 = vpop.f32.mrb[70].mxu0  ;;  %v3366_v30 = vsel %vm2451_vm0, %v3041_v56, 0.0 }
 0x180   :  { %v3361_v50 = vadd.f32 %v3360_v29, %v3359_v7  ;;  %v2588_v49 = vadd.f32 %v2587_v55, %v2586_v39  ;;  %11632 = vst [vmem:[#allocation128_spill] sm:$0xff] %v6678_v46  ;;  %v6680_v19 = vpop.f32.mrb[71].mxu0  ;;  %v2591_v55 = vsel %vm2451_vm0, %v6146_v11, 0.0  ;;  %v3364_v39 = vsel %vm2451_vm0, %v3040_v62, 0.0 }
 0x181   :  { %11633 = vst [vmem:[#allocation129_spill] sm:$0xff] %v6680_v19  ;;  %v3043_v7 = vmul.f32 %v6195_v3, %v6195_v3 }
 0x182   :  { %v3363_v43 = vadd.f32 %v3362_v51, %v3361_v50  ;;  %v2590_v22 = vadd.f32 %v2589_v53, %v2588_v49  ;;  %v2593_v51 = vsel %vm2451_vm0, %v6165_v26, 0.0  ;;  %v2595_v50 = vsel %vm2451_vm0, %v6195_v3, 0.0  ;;  %v6694_v49 = vpop.f32.mrb[56].mxu1  ;;  %v5585_v53 = vld [vmem:[%s11240_s0 + $0x3d0] sm:$0xff]  }
 0x183   :  { %11634 = vst [vmem:[#allocation130_spill] sm:$0xff] %v6694_v49  ;;  %v6699_v46 = vpop.f32.mrb[57].mxu1  ;;  %v3370_v56 = vsel %vm2451_vm0, %v3043_v7, 0.0  ;;  %5419 = vmatprep.mubr.bf16.mxu1 %v5585_v53  ;;  %v2597_v7 = vsel %vm2451_vm0, %v6211_v24, 0.0 }
 0x184   :  { %v2592_v16 = vadd.f32 %v2591_v55, %v2590_v22  ;;  %v3365_v29 = vadd.f32 %v3364_v39, %v3363_v43  ;;  %11635 = vst [vmem:[#allocation131_spill] sm:$0xff] %v6699_v46  ;;  %v5586_v43 = vld [vmem:[%s11240_s0 + $0x3d8] sm:$0xff]   ;;  %v3368_v22 = vsel %vm2451_vm0, %v3042_v58, 0.0  ;;  %v3044_v55 = vmul.f32 %v6211_v24, %v6211_v24  ;;  %v6708_v39 = vpop.f32.mrb[58].mxu1 }
 0x185   :  { %11636 = vst [vmem:[#allocation132_spill] sm:$0xff] %v6708_v39  ;;  %v6710_v3 = vpop.f32.mrb[72].mxu0  ;;  %5420 = vmatmul.mubr.bf16.gmra.mrb[116].mxu1 %v5586_v43  ;;  %v3045_v58 = vmul.f32 %v6188_v61, %v6188_v61 }
 0x186   :  { %v2594_v62 = vadd.f32 %v2593_v51, %v2592_v16  ;;  %v3367_v11 = vadd.f32 %v3366_v30, %v3365_v29  ;;  %11637 = vst [vmem:[#allocation133_spill] sm:$0xff] %v6710_v3  ;;  %v6712_v29 = vpop.f32.mrb[59].mxu1  ;;  %v6714_v51 = vpop.f32.mrb[73].mxu0  ;;  %v3372_v53 = vsel %vm2451_vm0, %v3044_v55, 0.0 }
 0x187   :  { %11638 = vst [vmem:[#allocation134_spill] sm:$0xff] %v6712_v29  ;;  %11639 = vst [vmem:[#allocation135_spill] sm:$0xff] %v6714_v51  ;;  %v6720_v26 = vpop.f32.mrb[74].mxu0  ;;  %v3374_v24 = vsel %vm2451_vm0, %v3045_v58, 0.0 }
 0x188   :  { %v3369_v16 = vadd.f32 %v3368_v22, %v3367_v11  ;;  %v2596_v30 = vadd.f32 %v2595_v50, %v2594_v62  ;;  %11640 = vst [vmem:[#allocation136_spill] sm:$0xff] %v6720_v26  ;;  %v6722_v23 = vpop.f32.mrb[75].mxu0  ;;  %v2599_v11 = vsel %vm2451_vm0, %v6188_v61, 0.0  ;;  %v3046_v50 = vmul.f32 %v6207_v17, %v6207_v17 }
 0x189   :  { %11641 = vst [vmem:[#allocation137_spill] sm:$0xff] %v6722_v23  ;;  %v3047_v62 = vmul.f32 %v6237_v6, %v6237_v6 }
 0x18a   :  { %v3371_v20 = vadd.f32 %v3370_v56, %v3369_v16  ;;  %v2598_v19 = vadd.f32 %v2597_v7, %v2596_v30  ;;  %v2601_v56 = vsel %vm2451_vm0, %v6207_v17, 0.0  ;;  %v2603_v16 = vsel %vm2451_vm0, %v6237_v6, 0.0  ;;  %v6736_v30 = vpop.f32.mrb[60].mxu1  ;;  %v5587_v7 = vld [vmem:[%s11240_s0 + $0x3e0] sm:$0xff]  }
 0x18b   :  { %11642 = vst [vmem:[#allocation138_spill] sm:$0xff] %v6736_v30  ;;  %v6741_v26 = vpop.f32.mrb[61].mxu1  ;;  %v3378_v58 = vsel %vm2451_vm0, %v3047_v62, 0.0  ;;  %5423 = vmatprep.mubr.bf16.mxu1 %v5587_v7  ;;  %v2605_v62 = vsel %vm2451_vm0, %v6253_v40, 0.0 }
 0x18c   :  { %v2600_v43 = vadd.f32 %v2599_v11, %v2598_v19  ;;  %v3373_v22 = vadd.f32 %v3372_v53, %v3371_v20  ;;  %11643 = vst [vmem:[#allocation139_spill] sm:$0xff] %v6741_v26  ;;  %v5588_v20 = vld [vmem:[%s11240_s0 + $0x3e8] sm:$0xff]   ;;  %v3376_v19 = vsel %vm2451_vm0, %v3046_v50, 0.0  ;;  %v3048_v11 = vmul.f32 %v6253_v40, %v6253_v40  ;;  %v6750_v53 = vpop.f32.mrb[62].mxu1 }
 0x18d   :  { %11644 = vst [vmem:[#allocation140_spill] sm:$0xff] %v6750_v53  ;;  %v6752_v6 = vpop.f32.mrb[76].mxu0  ;;  %5424 = vmatmul.mubr.bf16.gmra.mrb[120].mxu1 %v5588_v20  ;;  %v3049_v50 = vmul.f32 %v6230_v59, %v6230_v59 }
 0x18e   :  { %v2602_v55 = vadd.f32 %v2601_v56, %v2600_v43  ;;  %v3375_v61 = vadd.f32 %v3374_v24, %v3373_v22  ;;  %11645 = vst [vmem:[#allocation141_spill] sm:$0xff] %v6752_v6  ;;  %v6754_v22 = vpop.f32.mrb[63].mxu1  ;;  %v6756_v56 = vpop.f32.mrb[77].mxu0  ;;  %v3380_v7 = vsel %vm2451_vm0, %v3048_v11, 0.0  ;;  %v5590_v11 = vld [vmem:[%s11240_s0 + $0x3f8] sm:$0xff]  }
 0x18f   :  { %11646 = vst [vmem:[#allocation142_spill] sm:$0xff] %v6754_v22  ;;  %11647 = vst [vmem:[#allocation143_spill] sm:$0xff] %v6756_v56  ;;  %v6762_v17 = vpop.f32.mrb[78].mxu0  ;;  %v3382_v40 = vsel %vm2451_vm0, %v3049_v50, 0.0  ;;  %v3052_v50 = vmul.f32 %v6295_v27, %v6295_v27 }
 0x190   :  { %v3377_v43 = vadd.f32 %v3376_v19, %v3375_v61  ;;  %v2604_v24 = vadd.f32 %v2603_v16, %v2602_v55  ;;  %11648 = vst [vmem:[#allocation144_spill] sm:$0xff] %v6762_v17  ;;  %v6764_v51 = vpop.f32.mrb[79].mxu0  ;;  %v2607_v61 = vsel %vm2451_vm0, %v6230_v59, 0.0  ;;  %v3050_v16 = vmul.f32 %v6249_v28, %v6249_v28 }
 0x191   :  { %11649 = vst [vmem:[#allocation145_spill] sm:$0xff] %v6764_v51  ;;  %v3051_v55 = vmul.f32 %v6279_v48, %v6279_v48 }
 0x192   :  { %v3379_v3 = vadd.f32 %v3378_v58, %v3377_v43  ;;  %v2606_v23 = vadd.f32 %v2605_v62, %v2604_v24  ;;  %v2609_v58 = vsel %vm2451_vm0, %v6249_v28, 0.0  ;;  %v2611_v43 = vsel %vm2451_vm0, %v6279_v48, 0.0  ;;  %v5589_v24 = vld [vmem:[%s11240_s0 + $0x3f0] sm:$0xff]  }
 0x193   :  { %5427 = vmatprep.mubr.bf16.mxu1 %v5589_v24  ;;  %v2615_v24 = vsel %vm2451_vm0, %v6272_v36, 0.0 }
 0x194   :  { %v2608_v20 = vadd.f32 %v2607_v61, %v2606_v23  ;;  %v3381_v19 = vadd.f32 %v3380_v7, %v3379_v3  ;;  %v3384_v3 = vsel %vm2451_vm0, %v3050_v16, 0.0  ;;  %v3386_v23 = vsel %vm2451_vm0, %v3051_v55, 0.0 }
 0x195   :  { %v6788_v61 = vpop.f32.mrb[80].mxu0  ;;  %5428 = vmatmul.mubr.bf16.gmra.mrb[124].mxu1 %v5590_v11 }
 0x196   :  { %v2610_v62 = vadd.f32 %v2609_v58, %v2608_v20  ;;  %v3383_v59 = vadd.f32 %v3382_v40, %v3381_v19  ;;  %11650 = vst [vmem:[#allocation146_spill] sm:$0xff] %v6788_v61  ;;  %v6790_v28 = vpop.f32.mrb[81].mxu0  ;;  %v3053_v40 = vmul.f32 %v6272_v36, %v6272_v36  ;;  %v2613_v20 = vsel %vm2451_vm0, %v6295_v27, 0.0 }
 0x197   :  { %11651 = vst [vmem:[#allocation147_spill] sm:$0xff] %v6790_v28  ;;  %v6796_v16 = vpop.f32.mrb[82].mxu0 }
 0x198   :  { %v3385_v7 = vadd.f32 %v3384_v3, %v3383_v59  ;;  %v2612_v48 = vadd.f32 %v2611_v43, %v2610_v62  ;;  %11652 = vst [vmem:[#allocation148_spill] sm:$0xff] %v6796_v16  ;;  %v6798_v58 = vpop.f32.mrb[83].mxu0  ;;  %v3054_v59 = vmul.f32 %v6291_v0, %v6291_v0  ;;  %v3388_v43 = vsel %vm2451_vm0, %v3052_v50, 0.0 }
 0x199   :  { %11653 = vst [vmem:[#allocation149_spill] sm:$0xff] %v6798_v58  ;;  %v3055_v62 = vmul.f32 %v6321_v4, %v6321_v4  ;;  %v3390_v27 = vsel %vm2451_vm0, %v3053_v40, 0.0  ;;  %v3056_v50 = vmul.f32 %v6337_v63, %v6337_v63 }
 0x19a   :  { %v3387_v55 = vadd.f32 %v3386_v23, %v3385_v7  ;;  %v2614_v19 = vadd.f32 %v2613_v20, %v2612_v48  ;;  %v2617_v48 = vsel %vm2451_vm0, %v6291_v0, 0.0  ;;  %v2619_v23 = vsel %vm2451_vm0, %v6321_v4, 0.0 }
 0x19b   :  { %v3392_v36 = vsel %vm2451_vm0, %v3054_v59, 0.0  ;;  %v3394_v16 = vsel %vm2451_vm0, %v3055_v62, 0.0 }
 0x19c   :  { %v2616_v11 = vadd.f32 %v2615_v24, %v2614_v19  ;;  %v3389_v3 = vadd.f32 %v3388_v43, %v3387_v55  ;;  %v3057_v24 = vmul.f32 %v6314_v21, %v6314_v21  ;;  %v2621_v43 = vsel %vm2451_vm0, %v6337_v63, 0.0 }
 0x19d   :  { %v6816_v61 = vpop.f32.mrb[84].mxu0 }
 0x19e   :  { %v2618_v7 = vadd.f32 %v2617_v48, %v2616_v11  ;;  %v3391_v20 = vadd.f32 %v3390_v27, %v3389_v3  ;;  %11654 = vst [vmem:[#allocation150_spill] sm:$0xff] %v6816_v61  ;;  %v6818_v40 = vpop.f32.mrb[85].mxu0  ;;  %v2623_v3 = vsel %vm2451_vm0, %v6314_v21, 0.0  ;;  %v3396_v48 = vsel %vm2451_vm0, %v3056_v50, 0.0 }
 0x19f   :  { %11655 = vst [vmem:[#allocation151_spill] sm:$0xff] %v6818_v40  ;;  %v6824_v27 = vpop.f32.mrb[86].mxu0  ;;  %v3398_v63 = vsel %vm2451_vm0, %v3057_v24, 0.0  ;;  %v3060_v50 = vmul.f32 %v6379_v41, %v6379_v41 }
 0x1a0   :  { %v3393_v55 = vadd.f32 %v3392_v36, %v3391_v20  ;;  %v2620_v19 = vadd.f32 %v2619_v23, %v2618_v7  ;;  %11656 = vst [vmem:[#allocation152_spill] sm:$0xff] %v6824_v27  ;;  %v6826_v62 = vpop.f32.mrb[87].mxu0  ;;  %v3058_v36 = vmul.f32 %v6333_v60, %v6333_v60  ;;  %v3059_v23 = vmul.f32 %v6363_v2, %v6363_v2 }
 0x1a1   :  { %11657 = vst [vmem:[#allocation153_spill] sm:$0xff] %v6826_v62 }
 0x1a2   :  { %v3395_v59 = vadd.f32 %v3394_v16, %v3393_v55  ;;  %v2622_v11 = vadd.f32 %v2621_v43, %v2620_v19  ;;  %v2625_v16 = vsel %vm2451_vm0, %v6333_v60, 0.0  ;;  %v2627_v55 = vsel %vm2451_vm0, %v6363_v2, 0.0 }
 0x1a3   :  { %v3400_v21 = vsel %vm2451_vm0, %v3058_v36, 0.0  ;;  %v3402_v4 = vsel %vm2451_vm0, %v3059_v23, 0.0 }
 0x1a4   :  { %v2624_v7 = vadd.f32 %v2623_v3, %v2622_v11  ;;  %v3397_v20 = vadd.f32 %v3396_v48, %v3395_v59  ;;  %v3061_v3 = vmul.f32 %v6356_v57, %v6356_v57  ;;  %v2629_v48 = vsel %vm2451_vm0, %v6379_v41, 0.0 }
 0x1a5   :  { %v6844_v0 = vpop.f32.mrb[88].mxu0 }
 0x1a6   :  { %v2626_v19 = vadd.f32 %v2625_v16, %v2624_v7  ;;  %v3399_v43 = vadd.f32 %v3398_v63, %v3397_v20  ;;  %11658 = vst [vmem:[#allocation154_spill] sm:$0xff] %v6844_v0  ;;  %v6846_v24 = vpop.f32.mrb[89].mxu0  ;;  %v2631_v20 = vsel %vm2451_vm0, %v6356_v57, 0.0  ;;  %v3404_v16 = vsel %vm2451_vm0, %v3060_v50, 0.0 }
 0x1a7   :  { %11659 = vst [vmem:[#allocation155_spill] sm:$0xff] %v6846_v24  ;;  %v6852_v63 = vpop.f32.mrb[90].mxu0  ;;  %v3406_v41 = vsel %vm2451_vm0, %v3061_v3, 0.0  ;;  %v3064_v50 = vmul.f32 %v6421_v15, %v6421_v15 }
 0x1a8   :  { %v3401_v59 = vadd.f32 %v3400_v21, %v3399_v43  ;;  %v2628_v11 = vadd.f32 %v2627_v55, %v2626_v19  ;;  %11660 = vst [vmem:[#allocation156_spill] sm:$0xff] %v6852_v63  ;;  %v6854_v23 = vpop.f32.mrb[91].mxu0  ;;  %v3062_v21 = vmul.f32 %v6375_v9, %v6375_v9  ;;  %v3063_v55 = vmul.f32 %v6405_v18, %v6405_v18 }
 0x1a9   :  { %11661 = vst [vmem:[#allocation157_spill] sm:$0xff] %v6854_v23 }
 0x1aa   :  { %v3403_v36 = vadd.f32 %v3402_v4, %v3401_v59  ;;  %v2630_v7 = vadd.f32 %v2629_v48, %v2628_v11  ;;  %v2633_v4 = vsel %vm2451_vm0, %v6375_v9, 0.0  ;;  %v2635_v59 = vsel %vm2451_vm0, %v6405_v18, 0.0 }
 0x1ab   :  { %v3408_v57 = vsel %vm2451_vm0, %v3062_v21, 0.0  ;;  %v3410_v2 = vsel %vm2451_vm0, %v3063_v55, 0.0 }
 0x1ac   :  { %v2632_v19 = vadd.f32 %v2631_v20, %v2630_v7  ;;  %v3405_v43 = vadd.f32 %v3404_v16, %v3403_v36  ;;  %v3065_v20 = vmul.f32 %v6398_v35, %v6398_v35  ;;  %v2637_v16 = vsel %vm2451_vm0, %v6421_v15, 0.0 }
 0x1ad   :  { %v6872_v60 = vpop.f32.mrb[92].mxu0 }
 0x1ae   :  { %v2634_v11 = vadd.f32 %v2633_v4, %v2632_v19  ;;  %v3407_v48 = vadd.f32 %v3406_v41, %v3405_v43  ;;  %11662 = vst [vmem:[#allocation158_spill] sm:$0xff] %v6872_v60  ;;  %v6874_v3 = vpop.f32.mrb[93].mxu0  ;;  %v2639_v43 = vsel %vm2451_vm0, %v6398_v35, 0.0  ;;  %v3412_v4 = vsel %vm2451_vm0, %v3064_v50, 0.0 }
 0x1af   :  { %11663 = vst [vmem:[#allocation159_spill] sm:$0xff] %v6874_v3  ;;  %v6880_v41 = vpop.f32.mrb[94].mxu0  ;;  %v3414_v15 = vsel %vm2451_vm0, %v3065_v20, 0.0  ;;  %v3068_v50 = vmul.f32 %v6463_v25, %v6463_v25 }
 0x1b0   :  { %v3409_v36 = vadd.f32 %v3408_v57, %v3407_v48  ;;  %v2636_v7 = vadd.f32 %v2635_v59, %v2634_v11  ;;  %11664 = vst [vmem:[#allocation160_spill] sm:$0xff] %v6880_v41  ;;  %v6882_v55 = vpop.f32.mrb[95].mxu0  ;;  %v3066_v57 = vmul.f32 %v6417_v31, %v6417_v31  ;;  %v3067_v59 = vmul.f32 %v6447_v37, %v6447_v37 }
 0x1b1   :  { %11665 = vst [vmem:[#allocation161_spill] sm:$0xff] %v6882_v55 }
 0x1b2   :  { %v3411_v21 = vadd.f32 %v3410_v2, %v3409_v36  ;;  %v2638_v19 = vadd.f32 %v2637_v16, %v2636_v7  ;;  %v2641_v2 = vsel %vm2451_vm0, %v6417_v31, 0.0  ;;  %v2643_v36 = vsel %vm2451_vm0, %v6447_v37, 0.0 }
 0x1b3   :  { %v3416_v35 = vsel %vm2451_vm0, %v3066_v57, 0.0  ;;  %v3418_v18 = vsel %vm2451_vm0, %v3067_v59, 0.0 }
 0x1b4   :  { %v2640_v11 = vadd.f32 %v2639_v43, %v2638_v19  ;;  %v3413_v48 = vadd.f32 %v3412_v4, %v3411_v21  ;;  %v3069_v43 = vmul.f32 %v6440_v47, %v6440_v47  ;;  %v2645_v4 = vsel %vm2451_vm0, %v6463_v25, 0.0 }
 0x1b5   :  { %v6900_v9 = vpop.f32.mrb[96].mxu0 }
 0x1b6   :  { %v2642_v7 = vadd.f32 %v2641_v2, %v2640_v11  ;;  %v3415_v16 = vadd.f32 %v3414_v15, %v3413_v48  ;;  %11666 = vst [vmem:[#allocation162_spill] sm:$0xff] %v6900_v9  ;;  %v6902_v20 = vpop.f32.mrb[97].mxu0  ;;  %v2647_v48 = vsel %vm2451_vm0, %v6440_v47, 0.0  ;;  %v3420_v2 = vsel %vm2451_vm0, %v3068_v50, 0.0 }
 0x1b7   :  { %11667 = vst [vmem:[#allocation163_spill] sm:$0xff] %v6902_v20  ;;  %v6908_v15 = vpop.f32.mrb[98].mxu0  ;;  %v3422_v25 = vsel %vm2451_vm0, %v3069_v43, 0.0  ;;  %v3072_v50 = vmul.f32 %v6505_v44, %v6505_v44 }
 0x1b8   :  { %v3417_v21 = vadd.f32 %v3416_v35, %v3415_v16  ;;  %v2644_v19 = vadd.f32 %v2643_v36, %v2642_v7  ;;  %11668 = vst [vmem:[#allocation164_spill] sm:$0xff] %v6908_v15  ;;  %v6910_v59 = vpop.f32.mrb[99].mxu0  ;;  %v3070_v35 = vmul.f32 %v6459_v1, %v6459_v1  ;;  %v3071_v36 = vmul.f32 %v6489_v5, %v6489_v5 }
 0x1b9   :  { %11669 = vst [vmem:[#allocation165_spill] sm:$0xff] %v6910_v59 }
 0x1ba   :  { %v3419_v57 = vadd.f32 %v3418_v18, %v3417_v21  ;;  %v2646_v11 = vadd.f32 %v2645_v4, %v2644_v19  ;;  %v2649_v18 = vsel %vm2451_vm0, %v6459_v1, 0.0  ;;  %v2651_v21 = vsel %vm2451_vm0, %v6489_v5, 0.0 }
 0x1bb   :  { %v3424_v47 = vsel %vm2451_vm0, %v3070_v35, 0.0  ;;  %v3426_v37 = vsel %vm2451_vm0, %v3071_v36, 0.0 }
 0x1bc   :  { %v2648_v7 = vadd.f32 %v2647_v48, %v2646_v11  ;;  %v3421_v16 = vadd.f32 %v3420_v2, %v3419_v57  ;;  %v3073_v48 = vmul.f32 %v6482_v13, %v6482_v13  ;;  %v2653_v2 = vsel %vm2451_vm0, %v6505_v44, 0.0 }
 0x1bd   :  { %v6928_v31 = vpop.f32.mrb[100].mxu0 }
 0x1be   :  { %v2650_v19 = vadd.f32 %v2649_v18, %v2648_v7  ;;  %v3423_v4 = vadd.f32 %v3422_v25, %v3421_v16  ;;  %11670 = vst [vmem:[#allocation166_spill] sm:$0xff] %v6928_v31  ;;  %v6930_v43 = vpop.f32.mrb[101].mxu0  ;;  %v2655_v16 = vsel %vm2451_vm0, %v6482_v13, 0.0  ;;  %v3428_v18 = vsel %vm2451_vm0, %v3072_v50, 0.0 }
 0x1bf   :  { %11671 = vst [vmem:[#allocation167_spill] sm:$0xff] %v6930_v43  ;;  %v6936_v25 = vpop.f32.mrb[102].mxu0  ;;  %v3430_v44 = vsel %vm2451_vm0, %v3073_v48, 0.0  ;;  %v3076_v50 = vmul.f32 %v6547_v10, %v6547_v10 }
 0x1c0   :  { %v3425_v57 = vadd.f32 %v3424_v47, %v3423_v4  ;;  %v2652_v11 = vadd.f32 %v2651_v21, %v2650_v19  ;;  %11672 = vst [vmem:[#allocation168_spill] sm:$0xff] %v6936_v25  ;;  %v6938_v36 = vpop.f32.mrb[103].mxu0  ;;  %v3074_v47 = vmul.f32 %v6501_v34, %v6501_v34  ;;  %v3075_v21 = vmul.f32 %v6531_v38, %v6531_v38 }
 0x1c1   :  { %11673 = vst [vmem:[#allocation169_spill] sm:$0xff] %v6938_v36 }
 0x1c2   :  { %v3427_v35 = vadd.f32 %v3426_v37, %v3425_v57  ;;  %v2654_v7 = vadd.f32 %v2653_v2, %v2652_v11  ;;  %v2657_v37 = vsel %vm2451_vm0, %v6501_v34, 0.0  ;;  %v2659_v57 = vsel %vm2451_vm0, %v6531_v38, 0.0 }
 0x1c3   :  { %v3432_v13 = vsel %vm2451_vm0, %v3074_v47, 0.0  ;;  %v3434_v5 = vsel %vm2451_vm0, %v3075_v21, 0.0 }
 0x1c4   :  { %v2656_v19 = vadd.f32 %v2655_v16, %v2654_v7  ;;  %v3429_v4 = vadd.f32 %v3428_v18, %v3427_v35  ;;  %v3077_v16 = vmul.f32 %v6524_v54, %v6524_v54  ;;  %v2661_v18 = vsel %vm2451_vm0, %v6547_v10, 0.0 }
 0x1c5   :  { %v6956_v1 = vpop.f32.mrb[104].mxu0 }
 0x1c6   :  { %v2658_v11 = vadd.f32 %v2657_v37, %v2656_v19  ;;  %v3431_v2 = vadd.f32 %v3430_v44, %v3429_v4  ;;  %11674 = vst [vmem:[#allocation170_spill] sm:$0xff] %v6956_v1  ;;  %v6958_v48 = vpop.f32.mrb[105].mxu0  ;;  %v2663_v4 = vsel %vm2451_vm0, %v6524_v54, 0.0  ;;  %v3436_v37 = vsel %vm2451_vm0, %v3076_v50, 0.0 }
 0x1c7   :  { %11675 = vst [vmem:[#allocation171_spill] sm:$0xff] %v6958_v48  ;;  %v6964_v44 = vpop.f32.mrb[106].mxu0  ;;  %v3438_v10 = vsel %vm2451_vm0, %v3077_v16, 0.0  ;;  %v3080_v50 = vmul.f32 %v6589_v42, %v6589_v42 }
 0x1c8   :  { %v3433_v35 = vadd.f32 %v3432_v13, %v3431_v2  ;;  %v2660_v7 = vadd.f32 %v2659_v57, %v2658_v11  ;;  %11676 = vst [vmem:[#allocation172_spill] sm:$0xff] %v6964_v44  ;;  %v6966_v21 = vpop.f32.mrb[107].mxu0  ;;  %v3078_v13 = vmul.f32 %v6543_v8, %v6543_v8  ;;  %v3079_v57 = vmul.f32 %v6573_v12, %v6573_v12 }
 0x1c9   :  { %11677 = vst [vmem:[#allocation173_spill] sm:$0xff] %v6966_v21 }
 0x1ca   :  { %v3435_v47 = vadd.f32 %v3434_v5, %v3433_v35  ;;  %v2662_v19 = vadd.f32 %v2661_v18, %v2660_v7  ;;  %v2665_v5 = vsel %vm2451_vm0, %v6543_v8, 0.0  ;;  %v2667_v35 = vsel %vm2451_vm0, %v6573_v12, 0.0  ;;  %v11683_v12 = vld [vmem:[#allocation111_spill] sm:$0xff] }
 0x1cb   :  { %v3440_v54 = vsel %vm2451_vm0, %v3078_v13, 0.0  ;;  %v3442_v38 = vsel %vm2451_vm0, %v3079_v57, 0.0 }
 0x1cc   :  { %v2664_v11 = vadd.f32 %v2663_v4, %v2662_v19  ;;  %v3437_v2 = vadd.f32 %v3436_v37, %v3435_v47  ;;  %v11680_v4 = vld [vmem:[#allocation107_spill] sm:$0xff] }
 0x1cd   :  { %v6984_v34 = vpop.f32.mrb[108].mxu0  ;;  %v3081_v37 = vmul.f32 %v11680_v4, %v11680_v4 }
 0x1ce   :  { %v2666_v7 = vadd.f32 %v2665_v5, %v2664_v11  ;;  %v3439_v18 = vadd.f32 %v3438_v10, %v3437_v2  ;;  %11678 = vst [vmem:[#allocation174_spill] sm:$0xff] %v6984_v34  ;;  %v6986_v16 = vpop.f32.mrb[109].mxu0  ;;  %v2669_v11 = vsel %vm2451_vm0, %v6589_v42, 0.0  ;;  %v2671_v5 = vsel %vm2451_vm0, %v11680_v4, 0.0 }
 0x1cf   :  { %11679 = vst [vmem:[#allocation175_spill] sm:$0xff] %v6986_v16  ;;  %v6992_v10 = vpop.f32.mrb[110].mxu0  ;;  %v3446_v42 = vsel %vm2451_vm0, %v3081_v37, 0.0 }
 0x1d0   :  { %v3441_v47 = vadd.f32 %v3440_v54, %v3439_v18  ;;  %v2668_v19 = vadd.f32 %v2667_v35, %v2666_v7  ;;  %11681 = vst [vmem:[#allocation176_spill] sm:$0xff] %v6992_v10  ;;  %v6994_v57 = vpop.f32.mrb[111].mxu0  ;;  %v3082_v54 = vmul.f32 %v11683_v12, %v11683_v12  ;;  %v3444_v35 = vsel %vm2451_vm0, %v3080_v50, 0.0 }
 0x1d1   :  { %11682 = vst [vmem:[#allocation177_spill] sm:$0xff] %v6994_v57  ;;  %v3083_v7 = vmul.f32 %v6617_v45, %v6617_v45  ;;  %v3084_v50 = vmul.f32 %v6632_v14, %v6632_v14 }
 0x1d2   :  { %v3443_v13 = vadd.f32 %v3442_v38, %v3441_v47  ;;  %v2670_v2 = vadd.f32 %v2669_v11, %v2668_v19  ;;  %v2673_v38 = vsel %vm2451_vm0, %v11683_v12, 0.0  ;;  %v2675_v47 = vsel %vm2451_vm0, %v6617_v45, 0.0  ;;  %v11689_v45 = vld [vmem:[#allocation118_spill] sm:$0xff] }
 0x1d3   :  { %v3448_v4 = vsel %vm2451_vm0, %v3082_v54, 0.0  ;;  %v3450_v10 = vsel %vm2451_vm0, %v3083_v7, 0.0 }
 0x1d4   :  { %v2672_v18 = vadd.f32 %v2671_v5, %v2670_v2  ;;  %v3445_v8 = vadd.f32 %v3444_v35, %v3443_v13  ;;  %v11686_v5 = vld [vmem:[#allocation114_spill] sm:$0xff] }
 0x1d5   :  { %v7012_v34 = vpop.f32.mrb[112].mxu0  ;;  %v3085_v35 = vmul.f32 %v11686_v5, %v11686_v5 }
 0x1d6   :  { %v2674_v19 = vadd.f32 %v2673_v38, %v2672_v18  ;;  %v3447_v11 = vadd.f32 %v3446_v42, %v3445_v8  ;;  %11684 = vst [vmem:[#allocation178_spill] sm:$0xff] %v7012_v34  ;;  %v7014_v37 = vpop.f32.mrb[113].mxu0  ;;  %v2677_v18 = vsel %vm2451_vm0, %v6632_v14, 0.0  ;;  %v2679_v38 = vsel %vm2451_vm0, %v11686_v5, 0.0 }
 0x1d7   :  { %11685 = vst [vmem:[#allocation179_spill] sm:$0xff] %v7014_v37  ;;  %v7020_v42 = vpop.f32.mrb[114].mxu0  ;;  %v3454_v14 = vsel %vm2451_vm0, %v3085_v35, 0.0 }
 0x1d8   :  { %v3449_v13 = vadd.f32 %v3448_v4, %v3447_v11  ;;  %v2676_v2 = vadd.f32 %v2675_v47, %v2674_v19  ;;  %11687 = vst [vmem:[#allocation180_spill] sm:$0xff] %v7020_v42  ;;  %v7022_v7 = vpop.f32.mrb[115].mxu0  ;;  %v3086_v4 = vmul.f32 %v11689_v45, %v11689_v45  ;;  %v3452_v47 = vsel %vm2451_vm0, %v3084_v50, 0.0 }
 0x1d9   :  { %11688 = vst [vmem:[#allocation181_spill] sm:$0xff] %v7022_v7  ;;  %v3087_v19 = vmul.f32 %v6657_v32, %v6657_v32  ;;  %v3088_v50 = vmul.f32 %v6670_v52, %v6670_v52 }
 0x1da   :  { %v3451_v8 = vadd.f32 %v3450_v10, %v3449_v13  ;;  %v2678_v54 = vadd.f32 %v2677_v18, %v2676_v2  ;;  %v2681_v10 = vsel %vm2451_vm0, %v11689_v45, 0.0  ;;  %v2683_v13 = vsel %vm2451_vm0, %v6657_v32, 0.0 }
 0x1db   :  { %v3456_v5 = vsel %vm2451_vm0, %v3086_v4, 0.0  ;;  %v3458_v42 = vsel %vm2451_vm0, %v3087_v19, 0.0 }
 0x1dc   :  { %v2680_v11 = vadd.f32 %v2679_v38, %v2678_v54  ;;  %v3453_v12 = vadd.f32 %v3452_v47, %v3451_v8  ;;  %v3089_v38 = vmul.f32 %v6652_v33, %v6652_v33  ;;  %v2685_v47 = vsel %vm2451_vm0, %v6670_v52, 0.0 }
 0x1dd   :  { %v7040_v34 = vpop.f32.mrb[116].mxu0 }
 0x1de   :  { %v2682_v2 = vadd.f32 %v2681_v10, %v2680_v11  ;;  %v3455_v18 = vadd.f32 %v3454_v14, %v3453_v12  ;;  %11690 = vst [vmem:[#allocation182_spill] sm:$0xff] %v7040_v34  ;;  %v7042_v35 = vpop.f32.mrb[117].mxu0  ;;  %v2687_v11 = vsel %vm2451_vm0, %v6652_v33, 0.0  ;;  %v11694_v10 = vld [vmem:[#allocation124_spill] sm:$0xff]  ;;  %v3462_v52 = vsel %vm2451_vm0, %v3089_v38, 0.0 }
 0x1df   :  { %11691 = vst [vmem:[#allocation183_spill] sm:$0xff] %v7042_v35  ;;  %v7048_v12 = vpop.f32.mrb[118].mxu0 }
 0x1e0   :  { %v3457_v8 = vadd.f32 %v3456_v5, %v3455_v18  ;;  %v2684_v54 = vadd.f32 %v2683_v13, %v2682_v2  ;;  %11692 = vst [vmem:[#allocation184_spill] sm:$0xff] %v7048_v12  ;;  %v7050_v19 = vpop.f32.mrb[119].mxu0  ;;  %v3090_v5 = vmul.f32 %v11694_v10, %v11694_v10  ;;  %v3460_v13 = vsel %vm2451_vm0, %v3088_v50, 0.0 }
 0x1e1   :  { %11693 = vst [vmem:[#allocation185_spill] sm:$0xff] %v7050_v19  ;;  %v3091_v2 = vmul.f32 %v6699_v46, %v6699_v46  ;;  %v3092_v50 = vmul.f32 %v6712_v29, %v6712_v29 }
 0x1e2   :  { %v3459_v14 = vadd.f32 %v3458_v42, %v3457_v8  ;;  %v2686_v4 = vadd.f32 %v2685_v47, %v2684_v54  ;;  %v2689_v42 = vsel %vm2451_vm0, %v11694_v10, 0.0  ;;  %v2691_v8 = vsel %vm2451_vm0, %v6699_v46, 0.0 }
 0x1e3   :  { %v3464_v33 = vsel %vm2451_vm0, %v3090_v5, 0.0  ;;  %v3466_v45 = vsel %vm2451_vm0, %v3091_v2, 0.0 }
 0x1e4   :  { %v2688_v18 = vadd.f32 %v2687_v11, %v2686_v4  ;;  %v3461_v32 = vadd.f32 %v3460_v13, %v3459_v14  ;;  %v3093_v11 = vmul.f32 %v6694_v49, %v6694_v49  ;;  %v2693_v13 = vsel %vm2451_vm0, %v6712_v29, 0.0 }
 0x1e5   :  { %v7068_v12 = vpop.f32.mrb[120].mxu0 }
 0x1e6   :  { %v2690_v54 = vadd.f32 %v2689_v42, %v2688_v18  ;;  %v3463_v47 = vadd.f32 %v3462_v52, %v3461_v32  ;;  %11695 = vst [vmem:[#allocation186_spill] sm:$0xff] %v7068_v12  ;;  %v7070_v38 = vpop.f32.mrb[121].mxu0  ;;  %v2695_v18 = vsel %vm2451_vm0, %v6694_v49, 0.0  ;;  %v3468_v42 = vsel %vm2451_vm0, %v3092_v50, 0.0 }
 0x1e7   :  { %11696 = vst [vmem:[#allocation187_spill] sm:$0xff] %v7070_v38  ;;  %v7076_v32 = vpop.f32.mrb[122].mxu0  ;;  %v3470_v29 = vsel %vm2451_vm0, %v3093_v11, 0.0  ;;  %v3096_v50 = vmul.f32 %v6754_v22, %v6754_v22 }
 0x1e8   :  { %v3465_v14 = vadd.f32 %v3464_v33, %v3463_v47  ;;  %v2692_v4 = vadd.f32 %v2691_v8, %v2690_v54  ;;  %11697 = vst [vmem:[#allocation188_spill] sm:$0xff] %v7076_v32  ;;  %v7078_v2 = vpop.f32.mrb[123].mxu0  ;;  %v3094_v33 = vmul.f32 %v6708_v39, %v6708_v39  ;;  %v3095_v8 = vmul.f32 %v6741_v26, %v6741_v26 }
 0x1e9   :  { %11698 = vst [vmem:[#allocation189_spill] sm:$0xff] %v7078_v2 }
 0x1ea   :  { %v3467_v52 = vadd.f32 %v3466_v45, %v3465_v14  ;;  %v2694_v5 = vadd.f32 %v2693_v13, %v2692_v4  ;;  %v2697_v45 = vsel %vm2451_vm0, %v6708_v39, 0.0  ;;  %v2699_v14 = vsel %vm2451_vm0, %v6741_v26, 0.0 }
 0x1eb   :  { %v3472_v49 = vsel %vm2451_vm0, %v3094_v33, 0.0  ;;  %v3474_v46 = vsel %vm2451_vm0, %v3095_v8, 0.0 }
 0x1ec   :  { %v2696_v54 = vadd.f32 %v2695_v18, %v2694_v5  ;;  %v3469_v47 = vadd.f32 %v3468_v42, %v3467_v52  ;;  %v3097_v18 = vmul.f32 %v6736_v30, %v6736_v30  ;;  %v2701_v42 = vsel %vm2451_vm0, %v6754_v22, 0.0 }
 0x1ed   :  { %v7096_v10 = vpop.f32.mrb[124].mxu0 }
 0x1ee   :  { %v2698_v4 = vadd.f32 %v2697_v45, %v2696_v54  ;;  %v3471_v13 = vadd.f32 %v3470_v29, %v3469_v47  ;;  %11699 = vst [vmem:[#allocation190_spill] sm:$0xff] %v7096_v10  ;;  %v7098_v11 = vpop.f32.mrb[125].mxu0  ;;  %v2703_v47 = vsel %vm2451_vm0, %v6736_v30, 0.0  ;;  %v3476_v45 = vsel %vm2451_vm0, %v3096_v50, 0.0 }
 0x1ef   :  { %11700 = vst [vmem:[#allocation191_spill] sm:$0xff] %v7098_v11  ;;  %v7104_v29 = vpop.f32.mrb[126].mxu0 }
 0x1f0   :  { %v3473_v52 = vadd.f32 %v3472_v49, %v3471_v13  ;;  %v2700_v5 = vadd.f32 %v2699_v14, %v2698_v4  ;;  %11701 = vst [vmem:[#allocation192_spill] sm:$0xff] %v7104_v29  ;;  %v7106_v8 = vpop.f32.mrb[127].mxu0  ;;  %v3098_v49 = vmul.f32 %v6750_v53, %v6750_v53  ;;  %v11703_v14 = vld [vmem:[#allocation117_spill] sm:$0xff]  ;;  %v7115_v13 = vpop.f32.mrb[64].mxu1 }
 0x1f1   :  { %11702 = vst [vmem:[#allocation193_spill] sm:$0xff] %v7106_v8  ;;  %v3099_v4 = vmul.f32 %v11703_v14, %v11703_v14  ;;  %11704 = vst [vmem:[#allocation194_spill] sm:$0xff] %v7115_v13  ;;  %v7117_v39 = vpop.f32.mrb[65].mxu1 }
 0x1f2   :  { %v3475_v33 = vadd.f32 %v3474_v46, %v3473_v52  ;;  %v2702_v54 = vadd.f32 %v2701_v42, %v2700_v5  ;;  %11705 = vst [vmem:[#allocation195_spill] sm:$0xff] %v7117_v39  ;;  %v3478_v46 = vsel %vm2451_vm0, %v3097_v18, 0.0  ;;  %v2705_v52 = vsel %vm2451_vm0, %v6750_v53, 0.0  ;;  %v7124_v42 = vpop.f32.mrb[66].mxu1  ;;  %v11709_v39 = vld [vmem:[#allocation115_spill] sm:$0xff] }
 0x1f3   :  { %v2707_v5 = vsel %vm2451_vm0, %v11703_v14, 0.0  ;;  %11706 = vst [vmem:[#allocation196_spill] sm:$0xff] %v7124_v42  ;;  %v7126_v29 = vpop.f32.mrb[67].mxu1  ;;  %v3480_v13 = vsel %vm2451_vm0, %v3098_v49, 0.0  ;;  %v3101_v53 = vmul.f32 %v11709_v39, %v11709_v39 }
 0x1f4   :  { %v2704_v22 = vadd.f32 %v2703_v47, %v2702_v54  ;;  %v3477_v26 = vadd.f32 %v3476_v45, %v3475_v33  ;;  %11707 = vst [vmem:[#allocation197_spill] sm:$0xff] %v7126_v29  ;;  %v3482_v33 = vsel %vm2451_vm0, %v3099_v4, 0.0  ;;  %v11708_v54 = vld [vmem:[#allocation121_spill] sm:$0xff] }
 0x1f5   :  { %v3100_v47 = vmul.f32 %v11708_v54, %v11708_v54  ;;  %v2709_v14 = vsel %vm2451_vm0, %v11708_v54, 0.0 }
 0x1f6   :  { %v2706_v50 = vadd.f32 %v2705_v52, %v2704_v22  ;;  %v3479_v30 = vadd.f32 %v3478_v46, %v3477_v26  ;;  %v2711_v26 = vsel %vm2451_vm0, %v11709_v39, 0.0  ;;  %v11710_v46 = vld [vmem:[#allocation119_spill] sm:$0xff] }
 0x1f7   :  { %v3102_v49 = vmul.f32 %v11710_v46, %v11710_v46  ;;  %v3484_v4 = vsel %vm2451_vm0, %v3100_v47, 0.0  ;;  %v11711_v52 = vld [vmem:[#allocation127_spill] sm:$0xff] }
 0x1f8   :  { %v3481_v18 = vadd.f32 %v3480_v13, %v3479_v30  ;;  %v2708_v45 = vadd.f32 %v2707_v5, %v2706_v50  ;;  %v3103_v30 = vmul.f32 %v11711_v52, %v11711_v52  ;;  %v7143_v13 = vpop.f32.mrb[68].mxu1 }
 0x1f9   :  { %11712 = vst [vmem:[#allocation198_spill] sm:$0xff] %v7143_v13  ;;  %v7145_v29 = vpop.f32.mrb[69].mxu1  ;;  %v3488_v13 = vsel %vm2451_vm0, %v3102_v49, 0.0 }
 0x1fa   :  { %v3483_v42 = vadd.f32 %v3482_v33, %v3481_v18  ;;  %v2710_v22 = vadd.f32 %v2709_v14, %v2708_v45  ;;  %11713 = vst [vmem:[#allocation199_spill] sm:$0xff] %v7145_v29  ;;  %v3486_v33 = vsel %vm2451_vm0, %v3101_v53, 0.0  ;;  %v2713_v14 = vsel %vm2451_vm0, %v11710_v46, 0.0  ;;  %v7152_v45 = vpop.f32.mrb[70].mxu1  ;;  %v11717_v29 = vld [vmem:[#allocation125_spill] sm:$0xff] }
 0x1fb   :  { %v2715_v18 = vsel %vm2451_vm0, %v11711_v52, 0.0  ;;  %11714 = vst [vmem:[#allocation200_spill] sm:$0xff] %v7152_v45  ;;  %v7154_v54 = vpop.f32.mrb[71].mxu1  ;;  %v3105_v46 = vmul.f32 %v11717_v29, %v11717_v29 }
 0x1fc   :  { %v2712_v5 = vadd.f32 %v2711_v26, %v2710_v22  ;;  %v3485_v50 = vadd.f32 %v3484_v4, %v3483_v42  ;;  %11715 = vst [vmem:[#allocation201_spill] sm:$0xff] %v7154_v54  ;;  %v3490_v42 = vsel %vm2451_vm0, %v3103_v30, 0.0  ;;  %v11716_v22 = vld [vmem:[#allocation129_spill] sm:$0xff] }
 0x1fd   :  { %v3104_v26 = vmul.f32 %v11716_v22, %v11716_v22  ;;  %v2717_v52 = vsel %vm2451_vm0, %v11716_v22, 0.0 }
 0x1fe   :  { %v2714_v47 = vadd.f32 %v2713_v14, %v2712_v5  ;;  %v3487_v39 = vadd.f32 %v3486_v33, %v3485_v50  ;;  %v2719_v50 = vsel %vm2451_vm0, %v11717_v29, 0.0  ;;  %v11718_v33 = vld [vmem:[#allocation128_spill] sm:$0xff]  ;;  %v11719_v14 = vld [vmem:[#allocation135_spill] sm:$0xff] }
 0x1ff   :  { %v3106_v49 = vmul.f32 %v11718_v33, %v11718_v33  ;;  %v3492_v30 = vsel %vm2451_vm0, %v3104_v26, 0.0 }
 0x200   :  { %v3489_v53 = vadd.f32 %v3488_v13, %v3487_v39  ;;  %v2716_v4 = vadd.f32 %v2715_v18, %v2714_v47  ;;  %v3107_v39 = vmul.f32 %v11719_v14, %v11719_v14  ;;  %v7171_v13 = vpop.f32.mrb[72].mxu1 }
 0x201   :  { %11720 = vst [vmem:[#allocation202_spill] sm:$0xff] %v7171_v13  ;;  %v7173_v54 = vpop.f32.mrb[73].mxu1  ;;  %v3496_v13 = vsel %vm2451_vm0, %v3106_v49, 0.0 }
 0x202   :  { %v3491_v45 = vadd.f32 %v3490_v42, %v3489_v53  ;;  %v2718_v5 = vadd.f32 %v2717_v52, %v2716_v4  ;;  %11721 = vst [vmem:[#allocation203_spill] sm:$0xff] %v7173_v54  ;;  %v3494_v42 = vsel %vm2451_vm0, %v3105_v46, 0.0  ;;  %v2721_v52 = vsel %vm2451_vm0, %v11718_v33, 0.0  ;;  %v7180_v4 = vpop.f32.mrb[74].mxu1  ;;  %v11724_v54 = vld [vmem:[#allocation133_spill] sm:$0xff] }
 0x203   :  { %v2723_v53 = vsel %vm2451_vm0, %v11719_v14, 0.0  ;;  %11722 = vst [vmem:[#allocation204_spill] sm:$0xff] %v7180_v4  ;;  %v7182_v22 = vpop.f32.mrb[75].mxu1  ;;  %v3109_v33 = vmul.f32 %v11724_v54, %v11724_v54 }
 0x204   :  { %v2720_v18 = vadd.f32 %v2719_v50, %v2718_v5  ;;  %v3493_v47 = vadd.f32 %v3492_v30, %v3491_v45  ;;  %v3498_v45 = vsel %vm2451_vm0, %v3107_v39, 0.0  ;;  %v11723_v5 = vld [vmem:[#allocation137_spill] sm:$0xff] }
 0x205   :  { %v3108_v50 = vmul.f32 %v11723_v5, %v11723_v5  ;;  %v2725_v14 = vsel %vm2451_vm0, %v11723_v5, 0.0 }
 0x206   :  { %v3495_v26 = vadd.f32 %v3494_v42, %v3493_v47  ;;  %v2722_v29 = vadd.f32 %v2721_v52, %v2720_v18  ;;  %v2727_v18 = vsel %vm2451_vm0, %v11724_v54, 0.0  ;;  %v11725_v42 = vld [vmem:[#allocation136_spill] sm:$0xff] }
 0x207   :  { %v3110_v49 = vmul.f32 %v11725_v42, %v11725_v42  ;;  %v3500_v39 = vsel %vm2451_vm0, %v3108_v50, 0.0 }
 0x208   :  { %v2724_v46 = vadd.f32 %v2723_v53, %v2722_v29  ;;  %v3497_v30 = vadd.f32 %v3496_v13, %v3495_v26  ;;  %v3111_v29 = vmul.f32 %v6756_v56, %v6756_v56  ;;  %v7199_v13 = vpop.f32.mrb[76].mxu1 }
 0x209   :  { %11726 = vst [vmem:[#allocation205_spill] sm:$0xff] %v7199_v13  ;;  %v7201_v26 = vpop.f32.mrb[77].mxu1  ;;  %v3504_v13 = vsel %vm2451_vm0, %v3110_v49, 0.0  ;;  %v3114_v49 = vmul.f32 %v6762_v17, %v6762_v17 }
 0x20a   :  { %v3499_v4 = vadd.f32 %v3498_v45, %v3497_v30  ;;  %v2726_v47 = vadd.f32 %v2725_v14, %v2724_v46  ;;  %v3502_v45 = vsel %vm2451_vm0, %v3109_v33, 0.0  ;;  %v2729_v14 = vsel %vm2451_vm0, %v11725_v42, 0.0  ;;  %v7208_v30 = vpop.f32.mrb[78].mxu1 }
 0x20b   :  { %v2731_v46 = vsel %vm2451_vm0, %v6756_v56, 0.0  ;;  %v7210_v5 = vpop.f32.mrb[79].mxu1  ;;  %v2733_v56 = vsel %vm2451_vm0, %v6764_v51, 0.0 }
 0x20c   :  { %v2728_v52 = vadd.f32 %v2727_v18, %v2726_v47  ;;  %v3501_v53 = vadd.f32 %v3500_v39, %v3499_v4  ;;  %v3506_v4 = vsel %vm2451_vm0, %v3111_v29, 0.0  ;;  %v3112_v47 = vmul.f32 %v6764_v51, %v6764_v51 }
 0x20d   :  { %v3113_v39 = vmul.f32 %v6752_v6, %v6752_v6  ;;  %v3512_v51 = vsel %vm2451_vm0, %v3114_v49, 0.0 }
 0x20e   :  { %v3503_v50 = vadd.f32 %v3502_v45, %v3501_v53  ;;  %v2730_v54 = vadd.f32 %v2729_v14, %v2728_v52  ;;  %v2735_v52 = vsel %vm2451_vm0, %v6752_v6, 0.0  ;;  %v3508_v29 = vsel %vm2451_vm0, %v3112_v47, 0.0 }
 0x210   :  { %v2732_v33 = vadd.f32 %v2731_v46, %v2730_v54  ;;  %v3505_v18 = vadd.f32 %v3504_v13, %v3503_v50  ;;  %v3115_v54 = vmul.f32 %v6790_v28, %v6790_v28  ;;  %v7227_v13 = vpop.f32.mrb[80].mxu1  ;;  %v3510_v50 = vsel %vm2451_vm0, %v3113_v39, 0.0 }
 0x211   :  { %11727 = vst [vmem:[#allocation206_spill] sm:$0xff] %v7227_v13  ;;  %v7229_v46 = vpop.f32.mrb[81].mxu1 }
 0x212   :  { %v3507_v42 = vadd.f32 %v3506_v4, %v3505_v18  ;;  %v2734_v53 = vadd.f32 %v2733_v56, %v2732_v33  ;;  %v2737_v56 = vsel %vm2451_vm0, %v6762_v17, 0.0  ;;  %v2739_v4 = vsel %vm2451_vm0, %v6790_v28, 0.0  ;;  %v7236_v33 = vpop.f32.mrb[82].mxu1 }
 0x213   :  { %11728 = vst [vmem:[#allocation207_spill] sm:$0xff] %v7236_v33  ;;  %v7238_v6 = vpop.f32.mrb[83].mxu1  ;;  %v2741_v28 = vsel %vm2451_vm0, %v6798_v58, 0.0 }
 0x214   :  { %v2736_v45 = vadd.f32 %v2735_v52, %v2734_v53  ;;  %v3509_v14 = vadd.f32 %v3508_v29, %v3507_v42  ;;  %v3514_v42 = vsel %vm2451_vm0, %v3115_v54, 0.0  ;;  %v3116_v53 = vmul.f32 %v6798_v58, %v6798_v58  ;;  %v11729_v29 = vld [vmem:[#allocation146_spill] sm:$0xff] }
 0x215   :  { %v3117_v17 = vmul.f32 %v11729_v29, %v11729_v29 }
 0x216   :  { %v3511_v47 = vadd.f32 %v3510_v50, %v3509_v14  ;;  %v2738_v18 = vadd.f32 %v2737_v56, %v2736_v45  ;;  %v2743_v45 = vsel %vm2451_vm0, %v11729_v29, 0.0  ;;  %v11730_v50 = vld [vmem:[#allocation148_spill] sm:$0xff]  ;;  %v3516_v54 = vsel %vm2451_vm0, %v3116_v53, 0.0 }
 0x217   :  { %v3118_v49 = vmul.f32 %v11730_v50, %v11730_v50  ;;  %v3119_v56 = vmul.f32 %v6818_v40, %v6818_v40 }
 0x218   :  { %v2740_v39 = vadd.f32 %v2739_v4, %v2738_v18  ;;  %v3513_v52 = vadd.f32 %v3512_v51, %v3511_v47  ;;  %v7255_v51 = vpop.f32.mrb[84].mxu1 }
 0x219   :  { %11731 = vst [vmem:[#allocation208_spill] sm:$0xff] %v7255_v51  ;;  %v7257_v18 = vpop.f32.mrb[85].mxu1  ;;  %v3520_v51 = vsel %vm2451_vm0, %v3118_v49, 0.0  ;;  %v3122_v49 = vmul.f32 %v6824_v27, %v6824_v27 }
 0x21a   :  { %v3515_v33 = vadd.f32 %v3514_v42, %v3513_v52  ;;  %v2742_v14 = vadd.f32 %v2741_v28, %v2740_v39  ;;  %v3518_v42 = vsel %vm2451_vm0, %v3117_v17, 0.0  ;;  %v2745_v28 = vsel %vm2451_vm0, %v11730_v50, 0.0  ;;  %v7264_v52 = vpop.f32.mrb[86].mxu1 }
 0x21b   :  { %v2747_v39 = vsel %vm2451_vm0, %v6818_v40, 0.0  ;;  %v7266_v58 = vpop.f32.mrb[87].mxu1  ;;  %v2749_v40 = vsel %vm2451_vm0, %v6826_v62, 0.0 }
 0x21c   :  { %v2744_v4 = vadd.f32 %v2743_v45, %v2742_v14  ;;  %v3517_v47 = vadd.f32 %v3516_v54, %v3515_v33  ;;  %v3522_v33 = vsel %vm2451_vm0, %v3119_v56, 0.0  ;;  %v3120_v14 = vmul.f32 %v6826_v62, %v6826_v62 }
 0x21d   :  { %v3121_v54 = vmul.f32 %v6816_v61, %v6816_v61  ;;  %v3528_v62 = vsel %vm2451_vm0, %v3122_v49, 0.0  ;;  %v3126_v49 = vmul.f32 %v6852_v63, %v6852_v63 }
 0x21e   :  { %v3519_v53 = vadd.f32 %v3518_v42, %v3517_v47  ;;  %v2746_v29 = vadd.f32 %v2745_v28, %v2744_v4  ;;  %v2751_v4 = vsel %vm2451_vm0, %v6816_v61, 0.0  ;;  %v3524_v56 = vsel %vm2451_vm0, %v3120_v14, 0.0 }
 0x220   :  { %v2748_v17 = vadd.f32 %v2747_v39, %v2746_v29  ;;  %v3521_v45 = vadd.f32 %v3520_v51, %v3519_v53  ;;  %v3123_v29 = vmul.f32 %v6846_v24, %v6846_v24  ;;  %v7283_v51 = vpop.f32.mrb[88].mxu1  ;;  %v3526_v53 = vsel %vm2451_vm0, %v3121_v54, 0.0 }
 0x221   :  { %v7285_v39 = vpop.f32.mrb[89].mxu1 }
 0x222   :  { %v3523_v50 = vadd.f32 %v3522_v33, %v3521_v45  ;;  %v2750_v47 = vadd.f32 %v2749_v40, %v2748_v17  ;;  %v2753_v40 = vsel %vm2451_vm0, %v6824_v27, 0.0  ;;  %v2755_v33 = vsel %vm2451_vm0, %v6846_v24, 0.0  ;;  %v7292_v17 = vpop.f32.mrb[90].mxu1 }
 0x223   :  { %v7294_v61 = vpop.f32.mrb[91].mxu1  ;;  %v2757_v24 = vsel %vm2451_vm0, %v6854_v23, 0.0 }
 0x224   :  { %v2752_v42 = vadd.f32 %v2751_v4, %v2750_v47  ;;  %v3525_v28 = vadd.f32 %v3524_v56, %v3523_v50  ;;  %v3530_v50 = vsel %vm2451_vm0, %v3123_v29, 0.0  ;;  %v3124_v47 = vmul.f32 %v6854_v23, %v6854_v23 }
 0x225   :  { %v3125_v56 = vmul.f32 %v6844_v0, %v6844_v0  ;;  %v3536_v23 = vsel %vm2451_vm0, %v3126_v49, 0.0  ;;  %v3130_v49 = vmul.f32 %v6880_v41, %v6880_v41 }
 0x226   :  { %v3527_v14 = vadd.f32 %v3526_v53, %v3525_v28  ;;  %v2754_v45 = vadd.f32 %v2753_v40, %v2752_v42  ;;  %v2759_v42 = vsel %vm2451_vm0, %v6844_v0, 0.0  ;;  %v3532_v29 = vsel %vm2451_vm0, %v3124_v47, 0.0 }
 0x227   :  { %v3127_v53 = vmul.f32 %v6874_v3, %v6874_v3 }
 0x228   :  { %v2756_v54 = vadd.f32 %v2755_v33, %v2754_v45  ;;  %v3529_v4 = vadd.f32 %v3528_v62, %v3527_v14  ;;  %v7311_v62 = vpop.f32.mrb[92].mxu1  ;;  %v3534_v45 = vsel %vm2451_vm0, %v3125_v56, 0.0 }
 0x229   :  { %v7313_v14 = vpop.f32.mrb[93].mxu1 }
 0x22a   :  { %v3531_v27 = vadd.f32 %v3530_v50, %v3529_v4  ;;  %v2758_v28 = vadd.f32 %v2757_v24, %v2756_v54  ;;  %v2761_v24 = vsel %vm2451_vm0, %v6852_v63, 0.0  ;;  %v2763_v50 = vsel %vm2451_vm0, %v6874_v3, 0.0  ;;  %v7320_v54 = vpop.f32.mrb[94].mxu1 }
 0x22b   :  { %v7322_v0 = vpop.f32.mrb[95].mxu1  ;;  %v2765_v3 = vsel %vm2451_vm0, %v6882_v55, 0.0 }
 0x22c   :  { %v2760_v40 = vadd.f32 %v2759_v42, %v2758_v28  ;;  %v3533_v33 = vadd.f32 %v3532_v29, %v3531_v27  ;;  %v3538_v27 = vsel %vm2451_vm0, %v3127_v53, 0.0  ;;  %v3128_v28 = vmul.f32 %v6882_v55, %v6882_v55 }
 0x22d   :  { %v3129_v29 = vmul.f32 %v6872_v60, %v6872_v60  ;;  %v3544_v55 = vsel %vm2451_vm0, %v3130_v49, 0.0  ;;  %v3134_v49 = vmul.f32 %v6908_v15, %v6908_v15 }
 0x22e   :  { %v3535_v47 = vadd.f32 %v3534_v45, %v3533_v33  ;;  %v2762_v4 = vadd.f32 %v2761_v24, %v2760_v40  ;;  %v2767_v40 = vsel %vm2451_vm0, %v6872_v60, 0.0  ;;  %v3540_v53 = vsel %vm2451_vm0, %v3128_v28, 0.0 }
 0x22f   :  { %v3131_v45 = vmul.f32 %v6902_v20, %v6902_v20 }
 0x230   :  { %v2764_v56 = vadd.f32 %v2763_v50, %v2762_v4  ;;  %v3537_v42 = vadd.f32 %v3536_v23, %v3535_v47  ;;  %v7339_v23 = vpop.f32.mrb[96].mxu1  ;;  %v3542_v4 = vsel %vm2451_vm0, %v3129_v29, 0.0 }
 0x231   :  { %v7341_v47 = vpop.f32.mrb[97].mxu1 }
 0x232   :  { %v3539_v63 = vadd.f32 %v3538_v27, %v3537_v42  ;;  %v2766_v33 = vadd.f32 %v2765_v3, %v2764_v56  ;;  %v2769_v3 = vsel %vm2451_vm0, %v6880_v41, 0.0  ;;  %v2771_v27 = vsel %vm2451_vm0, %v6902_v20, 0.0  ;;  %v7348_v56 = vpop.f32.mrb[98].mxu1 }
 0x233   :  { %v7350_v60 = vpop.f32.mrb[99].mxu1  ;;  %v2773_v20 = vsel %vm2451_vm0, %v6910_v59, 0.0 }
 0x234   :  { %v2768_v24 = vadd.f32 %v2767_v40, %v2766_v33  ;;  %v3541_v50 = vadd.f32 %v3540_v53, %v3539_v63  ;;  %v3546_v63 = vsel %vm2451_vm0, %v3131_v45, 0.0  ;;  %v3132_v33 = vmul.f32 %v6910_v59, %v6910_v59 }
 0x235   :  { %v3133_v53 = vmul.f32 %v6900_v9, %v6900_v9  ;;  %v3552_v59 = vsel %vm2451_vm0, %v3134_v49, 0.0  ;;  %v3138_v49 = vmul.f32 %v6936_v25, %v6936_v25 }
 0x236   :  { %v3543_v28 = vadd.f32 %v3542_v4, %v3541_v50  ;;  %v2770_v42 = vadd.f32 %v2769_v3, %v2768_v24  ;;  %v2775_v24 = vsel %vm2451_vm0, %v6900_v9, 0.0  ;;  %v3548_v45 = vsel %vm2451_vm0, %v3132_v33, 0.0 }
 0x237   :  { %v3135_v4 = vmul.f32 %v6930_v43, %v6930_v43 }
 0x238   :  { %v2772_v29 = vadd.f32 %v2771_v27, %v2770_v42  ;;  %v3545_v40 = vadd.f32 %v3544_v55, %v3543_v28  ;;  %v7367_v55 = vpop.f32.mrb[100].mxu1  ;;  %v3550_v42 = vsel %vm2451_vm0, %v3133_v53, 0.0 }
 0x239   :  { %v7369_v28 = vpop.f32.mrb[101].mxu1 }
 0x23a   :  { %v3547_v41 = vadd.f32 %v3546_v63, %v3545_v40  ;;  %v2774_v50 = vadd.f32 %v2773_v20, %v2772_v29  ;;  %v2777_v20 = vsel %vm2451_vm0, %v6908_v15, 0.0  ;;  %v2779_v63 = vsel %vm2451_vm0, %v6930_v43, 0.0  ;;  %v7376_v29 = vpop.f32.mrb[102].mxu1 }
 0x23b   :  { %v7378_v9 = vpop.f32.mrb[103].mxu1  ;;  %v2781_v43 = vsel %vm2451_vm0, %v6938_v36, 0.0 }
 0x23c   :  { %v2776_v3 = vadd.f32 %v2775_v24, %v2774_v50  ;;  %v3549_v27 = vadd.f32 %v3548_v45, %v3547_v41  ;;  %v3554_v41 = vsel %vm2451_vm0, %v3135_v4, 0.0  ;;  %v3136_v50 = vmul.f32 %v6938_v36, %v6938_v36 }
 0x23d   :  { %v3137_v45 = vmul.f32 %v6928_v31, %v6928_v31  ;;  %v3560_v36 = vsel %vm2451_vm0, %v3138_v49, 0.0  ;;  %v3142_v49 = vmul.f32 %v6964_v44, %v6964_v44 }
 0x23e   :  { %v3551_v33 = vadd.f32 %v3550_v42, %v3549_v27  ;;  %v2778_v40 = vadd.f32 %v2777_v20, %v2776_v3  ;;  %v2783_v3 = vsel %vm2451_vm0, %v6928_v31, 0.0  ;;  %v3556_v4 = vsel %vm2451_vm0, %v3136_v50, 0.0 }
 0x23f   :  { %v3139_v42 = vmul.f32 %v6958_v48, %v6958_v48 }
 0x240   :  { %v2780_v53 = vadd.f32 %v2779_v63, %v2778_v40  ;;  %v3553_v24 = vadd.f32 %v3552_v59, %v3551_v33  ;;  %v7395_v59 = vpop.f32.mrb[104].mxu1  ;;  %v3558_v40 = vsel %vm2451_vm0, %v3137_v45, 0.0 }
 0x241   :  { %v7397_v33 = vpop.f32.mrb[105].mxu1 }
 0x242   :  { %v3555_v15 = vadd.f32 %v3554_v41, %v3553_v24  ;;  %v2782_v27 = vadd.f32 %v2781_v43, %v2780_v53  ;;  %v2785_v43 = vsel %vm2451_vm0, %v6936_v25, 0.0  ;;  %v2787_v41 = vsel %vm2451_vm0, %v6958_v48, 0.0  ;;  %v7404_v53 = vpop.f32.mrb[106].mxu1 }
 0x243   :  { %v7406_v31 = vpop.f32.mrb[107].mxu1  ;;  %v2789_v48 = vsel %vm2451_vm0, %v6966_v21, 0.0 }
 0x244   :  { %v2784_v20 = vadd.f32 %v2783_v3, %v2782_v27  ;;  %v3557_v63 = vadd.f32 %v3556_v4, %v3555_v15  ;;  %v3562_v15 = vsel %vm2451_vm0, %v3139_v42, 0.0  ;;  %v3140_v27 = vmul.f32 %v6966_v21, %v6966_v21 }
 0x245   :  { %v3141_v4 = vmul.f32 %v6956_v1, %v6956_v1  ;;  %v3568_v21 = vsel %vm2451_vm0, %v3142_v49, 0.0 }
 0x246   :  { %v3559_v50 = vadd.f32 %v3558_v40, %v3557_v63  ;;  %v2786_v24 = vadd.f32 %v2785_v43, %v2784_v20  ;;  %v2791_v20 = vsel %vm2451_vm0, %v6956_v1, 0.0  ;;  %v3564_v42 = vsel %vm2451_vm0, %v3140_v27, 0.0 }
 0x247   :  { %v3143_v40 = vmul.f32 %v6986_v16, %v6986_v16 }
 0x248   :  { %v2788_v45 = vadd.f32 %v2787_v41, %v2786_v24  ;;  %v3561_v3 = vadd.f32 %v3560_v36, %v3559_v50  ;;  %v7423_v36 = vpop.f32.mrb[108].mxu1  ;;  %v3566_v24 = vsel %vm2451_vm0, %v3141_v4, 0.0 }
 0x249   :  { %11732 = vst [vmem:[#allocation209_spill] sm:$0xff] %v7423_v36  ;;  %v7425_v50 = vpop.f32.mrb[109].mxu1 }
 0x24a   :  { %v3563_v25 = vadd.f32 %v3562_v15, %v3561_v3  ;;  %v2790_v63 = vadd.f32 %v2789_v48, %v2788_v45  ;;  %v2793_v48 = vsel %vm2451_vm0, %v6964_v44, 0.0  ;;  %v2795_v15 = vsel %vm2451_vm0, %v6986_v16, 0.0  ;;  %v7432_v45 = vpop.f32.mrb[110].mxu1 }
 0x24b   :  { %11733 = vst [vmem:[#allocation210_spill] sm:$0xff] %v7432_v45  ;;  %v7434_v1 = vpop.f32.mrb[111].mxu1  ;;  %v2797_v16 = vsel %vm2451_vm0, %v6994_v57, 0.0 }
 0x24c   :  { %v2792_v43 = vadd.f32 %v2791_v20, %v2790_v63  ;;  %v3565_v41 = vadd.f32 %v3564_v42, %v3563_v25  ;;  %v3570_v25 = vsel %vm2451_vm0, %v3143_v40, 0.0  ;;  %v3144_v63 = vmul.f32 %v6994_v57, %v6994_v57  ;;  %v11734_v42 = vld [vmem:[#allocation174_spill] sm:$0xff] }
 0x24d   :  { %v3145_v44 = vmul.f32 %v11734_v42, %v11734_v42 }
 0x24e   :  { %v3567_v27 = vadd.f32 %v3566_v24, %v3565_v41  ;;  %v2794_v3 = vadd.f32 %v2793_v48, %v2792_v43  ;;  %v2799_v43 = vsel %vm2451_vm0, %v11734_v42, 0.0  ;;  %v11735_v24 = vld [vmem:[#allocation176_spill] sm:$0xff]  ;;  %v3572_v40 = vsel %vm2451_vm0, %v3144_v63, 0.0 }
 0x24f   :  { %v3146_v49 = vmul.f32 %v11735_v24, %v11735_v24  ;;  %v3147_v48 = vmul.f32 %v7014_v37, %v7014_v37 }
 0x250   :  { %v2796_v4 = vadd.f32 %v2795_v15, %v2794_v3  ;;  %v3569_v20 = vadd.f32 %v3568_v21, %v3567_v27  ;;  %v7451_v21 = vpop.f32.mrb[112].mxu1 }
 0x251   :  { %11736 = vst [vmem:[#allocation211_spill] sm:$0xff] %v7451_v21  ;;  %v7453_v3 = vpop.f32.mrb[113].mxu1  ;;  %v3576_v21 = vsel %vm2451_vm0, %v3146_v49, 0.0 }
 0x252   :  { %v3571_v45 = vadd.f32 %v3570_v25, %v3569_v20  ;;  %v2798_v41 = vadd.f32 %v2797_v16, %v2796_v4  ;;  %v3574_v25 = vsel %vm2451_vm0, %v3145_v44, 0.0  ;;  %v2801_v16 = vsel %vm2451_vm0, %v11735_v24, 0.0  ;;  %v7460_v20 = vpop.f32.mrb[114].mxu1 }
 0x253   :  { %v2803_v4 = vsel %vm2451_vm0, %v7014_v37, 0.0  ;;  %11737 = vst [vmem:[#allocation212_spill] sm:$0xff] %v7460_v20  ;;  %v7462_v57 = vpop.f32.mrb[115].mxu1  ;;  %v2805_v37 = vsel %vm2451_vm0, %v7022_v7, 0.0 }
 0x254   :  { %v2800_v15 = vadd.f32 %v2799_v43, %v2798_v41  ;;  %v3573_v27 = vadd.f32 %v3572_v40, %v3571_v45  ;;  %v3578_v45 = vsel %vm2451_vm0, %v3147_v48, 0.0  ;;  %v3148_v41 = vmul.f32 %v7022_v7, %v7022_v7  ;;  %v11738_v40 = vld [vmem:[#allocation178_spill] sm:$0xff] }
 0x255   :  { %v3149_v24 = vmul.f32 %v11738_v40, %v11738_v40 }
 0x256   :  { %v3575_v63 = vadd.f32 %v3574_v25, %v3573_v27  ;;  %v2802_v42 = vadd.f32 %v2801_v16, %v2800_v15  ;;  %v2807_v15 = vsel %vm2451_vm0, %v11738_v40, 0.0  ;;  %v11739_v25 = vld [vmem:[#allocation180_spill] sm:$0xff]  ;;  %v3580_v48 = vsel %vm2451_vm0, %v3148_v41, 0.0 }
 0x257   :  { %v3150_v49 = vmul.f32 %v11739_v25, %v11739_v25 }
 0x258   :  { %v2804_v44 = vadd.f32 %v2803_v4, %v2802_v42  ;;  %v3577_v43 = vadd.f32 %v3576_v21, %v3575_v63  ;;  %v3151_v42 = vmul.f32 %v7042_v35, %v7042_v35  ;;  %v7479_v21 = vpop.f32.mrb[116].mxu1 }
 0x259   :  { %11740 = vst [vmem:[#allocation213_spill] sm:$0xff] %v7479_v21  ;;  %v7481_v63 = vpop.f32.mrb[117].mxu1  ;;  %v3584_v21 = vsel %vm2451_vm0, %v3150_v49, 0.0 }
 0x25a   :  { %v3579_v20 = vadd.f32 %v3578_v45, %v3577_v43  ;;  %v2806_v27 = vadd.f32 %v2805_v37, %v2804_v44  ;;  %v3582_v45 = vsel %vm2451_vm0, %v3149_v24, 0.0  ;;  %v2809_v37 = vsel %vm2451_vm0, %v11739_v25, 0.0  ;;  %v7488_v43 = vpop.f32.mrb[118].mxu1 }
 0x25b   :  { %v2811_v44 = vsel %vm2451_vm0, %v7042_v35, 0.0  ;;  %11741 = vst [vmem:[#allocation214_spill] sm:$0xff] %v7488_v43  ;;  %v7490_v7 = vpop.f32.mrb[119].mxu1  ;;  %v2813_v35 = vsel %vm2451_vm0, %v7050_v19, 0.0 }
 0x25c   :  { %v2808_v16 = vadd.f32 %v2807_v15, %v2806_v27  ;;  %v3581_v4 = vadd.f32 %v3580_v48, %v3579_v20  ;;  %v3586_v20 = vsel %vm2451_vm0, %v3151_v42, 0.0  ;;  %v3152_v27 = vmul.f32 %v7050_v19, %v7050_v19 }
 0x25d   :  { %v3153_v48 = vmul.f32 %v7040_v34, %v7040_v34 }
 0x25e   :  { %v3583_v41 = vadd.f32 %v3582_v45, %v3581_v4  ;;  %v2810_v40 = vadd.f32 %v2809_v37, %v2808_v16  ;;  %v2815_v16 = vsel %vm2451_vm0, %v7040_v34, 0.0  ;;  %v11742_v45 = vld [vmem:[#allocation184_spill] sm:$0xff]  ;;  %v3588_v42 = vsel %vm2451_vm0, %v3152_v27, 0.0 }
 0x25f   :  { %v3154_v49 = vmul.f32 %v11742_v45, %v11742_v45 }
 0x260   :  { %v2812_v24 = vadd.f32 %v2811_v44, %v2810_v40  ;;  %v3585_v15 = vadd.f32 %v3584_v21, %v3583_v41  ;;  %v3155_v40 = vmul.f32 %v7070_v38, %v7070_v38  ;;  %v7507_v21 = vpop.f32.mrb[120].mxu1 }
 0x261   :  { %11743 = vst [vmem:[#allocation215_spill] sm:$0xff] %v7507_v21  ;;  %v7509_v41 = vpop.f32.mrb[121].mxu1  ;;  %v3592_v21 = vsel %vm2451_vm0, %v3154_v49, 0.0  ;;  %v3158_v49 = vmul.f32 %v7076_v32, %v7076_v32 }
 0x262   :  { %v3587_v25 = vadd.f32 %v3586_v20, %v3585_v15  ;;  %v2814_v4 = vadd.f32 %v2813_v35, %v2812_v24  ;;  %11744 = vst [vmem:[#allocation216_spill] sm:$0xff] %v7509_v41  ;;  %v3590_v20 = vsel %vm2451_vm0, %v3153_v48, 0.0  ;;  %v2817_v35 = vsel %vm2451_vm0, %v11742_v45, 0.0  ;;  %v7516_v15 = vpop.f32.mrb[122].mxu1 }
 0x263   :  { %v2819_v24 = vsel %vm2451_vm0, %v7070_v38, 0.0  ;;  %11745 = vst [vmem:[#allocation217_spill] sm:$0xff] %v7516_v15  ;;  %v7518_v19 = vpop.f32.mrb[123].mxu1  ;;  %v2821_v38 = vsel %vm2451_vm0, %v7078_v2, 0.0 }
 0x264   :  { %v2816_v37 = vadd.f32 %v2815_v16, %v2814_v4  ;;  %v3589_v44 = vadd.f32 %v3588_v42, %v3587_v25  ;;  %11746 = vst [vmem:[#allocation218_spill] sm:$0xff] %v7518_v19  ;;  %v3594_v25 = vsel %vm2451_vm0, %v3155_v40, 0.0  ;;  %v3156_v4 = vmul.f32 %v7078_v2, %v7078_v2 }
 0x265   :  { %v3157_v42 = vmul.f32 %v7068_v12, %v7068_v12  ;;  %v3600_v2 = vsel %vm2451_vm0, %v3158_v49, 0.0 }
 0x266   :  { %v3591_v27 = vadd.f32 %v3590_v20, %v3589_v44  ;;  %v2818_v34 = vadd.f32 %v2817_v35, %v2816_v37  ;;  %v2823_v37 = vsel %vm2451_vm0, %v7068_v12, 0.0  ;;  %v3596_v40 = vsel %vm2451_vm0, %v3156_v4, 0.0 }
 0x268   :  { %v2820_v48 = vadd.f32 %v2819_v24, %v2818_v34  ;;  %v3593_v16 = vadd.f32 %v3592_v21, %v3591_v27  ;;  %v3159_v34 = vmul.f32 %v7098_v11, %v7098_v11  ;;  %v7535_v21 = vpop.f32.mrb[124].mxu1  ;;  %v3598_v27 = vsel %vm2451_vm0, %v3157_v42, 0.0 }
 0x269   :  { %11747 = vst [vmem:[#allocation219_spill] sm:$0xff] %v7535_v21  ;;  %v7537_v24 = vpop.f32.mrb[125].mxu1 }
 0x26a   :  { %v3595_v45 = vadd.f32 %v3594_v25, %v3593_v16  ;;  %v2822_v44 = vadd.f32 %v2821_v38, %v2820_v48  ;;  %11748 = vst [vmem:[#allocation220_spill] sm:$0xff] %v7537_v24  ;;  %v2825_v38 = vsel %vm2451_vm0, %v7076_v32, 0.0  ;;  %v2827_v25 = vsel %vm2451_vm0, %v7098_v11, 0.0  ;;  %v7544_v48 = vpop.f32.mrb[126].mxu1 }
 0x26b   :  { %11749 = vst [vmem:[#allocation221_spill] sm:$0xff] %v7544_v48  ;;  %v7546_v12 = vpop.f32.mrb[127].mxu1  ;;  %v2829_v11 = vsel %vm2451_vm0, %v7106_v8, 0.0 }
 0x26c   :  { %v2824_v20 = vadd.f32 %v2823_v37, %v2822_v44  ;;  %v3597_v35 = vadd.f32 %v3596_v40, %v3595_v45  ;;  %11750 = vst [vmem:[#allocation222_spill] sm:$0xff] %v7546_v12  ;;  %v3602_v45 = vsel %vm2451_vm0, %v3159_v34, 0.0  ;;  %v3160_v44 = vmul.f32 %v7106_v8, %v7106_v8 }
 0x26d   :  { %v3161_v40 = vmul.f32 %v7096_v10, %v7096_v10 }
 0x26e   :  { %v3599_v4 = vadd.f32 %v3598_v27, %v3597_v35  ;;  %v2826_v16 = vadd.f32 %v2825_v38, %v2824_v20  ;;  %v2831_v20 = vsel %vm2451_vm0, %v7096_v10, 0.0  ;;  %v11751_v27 = vld [vmem:[#allocation192_spill] sm:$0xff]  ;;  %v3604_v34 = vsel %vm2451_vm0, %v3160_v44, 0.0  ;;  %v11752_v38 = vld [vmem:[#allocation195_spill] sm:$0xff]  ;;  %v11753_v44 = vld [vmem:[#allocation197_spill] sm:$0xff] }
 0x26f   :  { %v3162_v49 = vmul.f32 %v11751_v27, %v11751_v27  ;;  %v2833_v8 = vsel %vm2451_vm0, %v11751_v27, 0.0  ;;  %v3164_v48 = vmul.f32 %v11753_v44, %v11753_v44 }
 0x270   :  { %v2828_v42 = vadd.f32 %v2827_v25, %v2826_v16  ;;  %v3601_v37 = vadd.f32 %v3600_v2, %v3599_v4  ;;  %v3163_v25 = vmul.f32 %v11752_v38, %v11752_v38  ;;  %v3606_v16 = vsel %vm2451_vm0, %v3161_v40, 0.0 }
 0x272   :  { %v3603_v32 = vadd.f32 %v3602_v45, %v3601_v37  ;;  %v2830_v35 = vadd.f32 %v2829_v11, %v2828_v42  ;;  %v2835_v11 = vsel %vm2451_vm0, %v11752_v38, 0.0  ;;  %v3608_v37 = vsel %vm2451_vm0, %v3162_v49, 0.0 }
 0x273   :  { %v3610_v10 = vsel %vm2451_vm0, %v3163_v25, 0.0  ;;  %v3612_v25 = vsel %vm2451_vm0, %v3164_v48, 0.0  ;;  %v11757_v48 = vld [vmem:[#allocation201_spill] sm:$0xff] }
 0x274   :  { %v2832_v2 = vadd.f32 %v2831_v20, %v2830_v35  ;;  %v3605_v4 = vadd.f32 %v3604_v34, %v3603_v32  ;;  %v11754_v32 = vld [vmem:[#allocation194_spill] sm:$0xff]  ;;  %v2837_v20 = vsel %vm2451_vm0, %v11753_v44, 0.0  ;;  %v3168_v44 = vmul.f32 %v11757_v48, %v11757_v48 }
 0x275   :  { %v3165_v40 = vmul.f32 %v11754_v32, %v11754_v32 }
 0x276   :  { %v2834_v45 = vadd.f32 %v2833_v8, %v2832_v2  ;;  %v3607_v42 = vadd.f32 %v3606_v16, %v3605_v4  ;;  %v2839_v8 = vsel %vm2451_vm0, %v11754_v32, 0.0  ;;  %v11755_v2 = vld [vmem:[#allocation196_spill] sm:$0xff]  ;;  %v11756_v4 = vld [vmem:[#allocation199_spill] sm:$0xff] }
 0x277   :  { %v3166_v49 = vmul.f32 %v11755_v2, %v11755_v2  ;;  %v3167_v16 = vmul.f32 %v11756_v4, %v11756_v4 }
 0x278   :  { %v3609_v21 = vadd.f32 %v3608_v37, %v3607_v42  ;;  %v2836_v35 = vadd.f32 %v2835_v11, %v2834_v45  ;;  %v3614_v42 = vsel %vm2451_vm0, %v3165_v40, 0.0  ;;  %v2841_v37 = vsel %vm2451_vm0, %v11755_v2, 0.0 }
 0x279   :  { %v3618_v32 = vsel %vm2451_vm0, %v3167_v16, 0.0  ;;  %v3620_v16 = vsel %vm2451_vm0, %v3168_v44, 0.0  ;;  %v3172_v44 = vmul.f32 %v7182_v22, %v7182_v22 }
 0x27a   :  { %v3611_v34 = vadd.f32 %v3610_v10, %v3609_v21  ;;  %v2838_v27 = vadd.f32 %v2837_v20, %v2836_v35  ;;  %v2843_v10 = vsel %vm2451_vm0, %v11756_v4, 0.0  ;;  %v3616_v20 = vsel %vm2451_vm0, %v3166_v49, 0.0 }
 0x27c   :  { %v2840_v11 = vadd.f32 %v2839_v8, %v2838_v27  ;;  %v3613_v45 = vadd.f32 %v3612_v25, %v3611_v34  ;;  %v11758_v34 = vld [vmem:[#allocation198_spill] sm:$0xff]  ;;  %v2845_v8 = vsel %vm2451_vm0, %v11757_v48, 0.0 }
 0x27d   :  { %v3169_v40 = vmul.f32 %v11758_v34, %v11758_v34 }
 0x27e   :  { %v3615_v21 = vadd.f32 %v3614_v42, %v3613_v45  ;;  %v2842_v35 = vadd.f32 %v2841_v37, %v2840_v11  ;;  %v2847_v11 = vsel %vm2451_vm0, %v11758_v34, 0.0  ;;  %v11759_v45 = vld [vmem:[#allocation200_spill] sm:$0xff]  ;;  %v11760_v42 = vld [vmem:[#allocation203_spill] sm:$0xff] }
 0x27f   :  { %v3170_v49 = vmul.f32 %v11759_v45, %v11759_v45  ;;  %v3171_v37 = vmul.f32 %v11760_v42, %v11760_v42 }
 0x280   :  { %v2844_v38 = vadd.f32 %v2843_v10, %v2842_v35  ;;  %v3617_v27 = vadd.f32 %v3616_v20, %v3615_v21  ;;  %v3622_v35 = vsel %vm2451_vm0, %v3169_v40, 0.0  ;;  %v2849_v20 = vsel %vm2451_vm0, %v11759_v45, 0.0 }
 0x281   :  { %v3626_v34 = vsel %vm2451_vm0, %v3171_v37, 0.0  ;;  %v3628_v37 = vsel %vm2451_vm0, %v3172_v44, 0.0  ;;  %v3176_v44 = vmul.f32 %v7210_v5, %v7210_v5 }
 0x282   :  { %v3619_v25 = vadd.f32 %v3618_v32, %v3617_v27  ;;  %v2846_v2 = vadd.f32 %v2845_v8, %v2844_v38  ;;  %v2851_v38 = vsel %vm2451_vm0, %v11760_v42, 0.0  ;;  %v3624_v8 = vsel %vm2451_vm0, %v3170_v49, 0.0 }
 0x284   :  { %v2848_v10 = vadd.f32 %v2847_v11, %v2846_v2  ;;  %v3621_v21 = vadd.f32 %v3620_v16, %v3619_v25  ;;  %v11761_v25 = vld [vmem:[#allocation202_spill] sm:$0xff]  ;;  %v2853_v11 = vsel %vm2451_vm0, %v7182_v22, 0.0 }
 0x285   :  { %v3173_v40 = vmul.f32 %v11761_v25, %v11761_v25 }
 0x286   :  { %v3623_v32 = vadd.f32 %v3622_v35, %v3621_v21  ;;  %v2850_v27 = vadd.f32 %v2849_v20, %v2848_v10  ;;  %v2855_v10 = vsel %vm2451_vm0, %v11761_v25, 0.0  ;;  %v11762_v21 = vld [vmem:[#allocation204_spill] sm:$0xff]  ;;  %v3175_v35 = vmul.f32 %v7201_v26, %v7201_v26 }
 0x287   :  { %v3174_v49 = vmul.f32 %v11762_v21, %v11762_v21 }
 0x288   :  { %v2852_v48 = vadd.f32 %v2851_v38, %v2850_v27  ;;  %v3625_v2 = vadd.f32 %v3624_v8, %v3623_v32  ;;  %v3630_v32 = vsel %vm2451_vm0, %v3173_v40, 0.0  ;;  %v2857_v27 = vsel %vm2451_vm0, %v11762_v21, 0.0 }
 0x28a   :  { %v3627_v16 = vadd.f32 %v3626_v34, %v3625_v2  ;;  %v2854_v45 = vadd.f32 %v2853_v11, %v2852_v48  ;;  %v2859_v48 = vsel %vm2451_vm0, %v7201_v26, 0.0  ;;  %v3632_v2 = vsel %vm2451_vm0, %v3174_v49, 0.0 }
 0x28b   :  { %v3634_v11 = vsel %vm2451_vm0, %v3175_v35, 0.0  ;;  %v3178_v49 = vmul.f32 %v7208_v30, %v7208_v30  ;;  %v3636_v35 = vsel %vm2451_vm0, %v3176_v44, 0.0  ;;  %v3180_v44 = vmul.f32 %v7238_v6, %v7238_v6 }
 0x28c   :  { %v2856_v20 = vadd.f32 %v2855_v10, %v2854_v45  ;;  %v3629_v38 = vadd.f32 %v3628_v37, %v3627_v16  ;;  %v11763_v16 = vld [vmem:[#allocation205_spill] sm:$0xff]  ;;  %v2861_v10 = vsel %vm2451_vm0, %v7210_v5, 0.0 }
 0x28d   :  { %v3177_v40 = vmul.f32 %v11763_v16, %v11763_v16 }
 0x28e   :  { %v3631_v34 = vadd.f32 %v3630_v32, %v3629_v38  ;;  %v2858_v8 = vadd.f32 %v2857_v27, %v2856_v20  ;;  %v2863_v20 = vsel %vm2451_vm0, %v11763_v16, 0.0  ;;  %v3179_v38 = vmul.f32 %v7229_v46, %v7229_v46 }
 0x290   :  { %v2860_v25 = vadd.f32 %v2859_v48, %v2858_v8  ;;  %v3633_v45 = vadd.f32 %v3632_v2, %v3631_v34  ;;  %v3638_v48 = vsel %vm2451_vm0, %v3177_v40, 0.0  ;;  %v2865_v34 = vsel %vm2451_vm0, %v7208_v30, 0.0 }
 0x291   :  { %v3181_v40 = vmul.f32 %v7227_v13, %v7227_v13 }
 0x292   :  { %v3635_v37 = vadd.f32 %v3634_v11, %v3633_v45  ;;  %v2862_v21 = vadd.f32 %v2861_v10, %v2860_v25  ;;  %v2867_v25 = vsel %vm2451_vm0, %v7229_v46, 0.0  ;;  %v3640_v11 = vsel %vm2451_vm0, %v3178_v49, 0.0 }
 0x293   :  { %v3642_v45 = vsel %vm2451_vm0, %v3179_v38, 0.0  ;;  %v3644_v38 = vsel %vm2451_vm0, %v3180_v44, 0.0  ;;  %v3184_v44 = vmul.f32 %v7266_v58, %v7266_v58 }
 0x294   :  { %v2864_v32 = vadd.f32 %v2863_v20, %v2862_v21  ;;  %v3637_v27 = vadd.f32 %v3636_v35, %v3635_v37  ;;  %v2869_v37 = vsel %vm2451_vm0, %v7238_v6, 0.0 }
 0x296   :  { %v3639_v8 = vadd.f32 %v3638_v48, %v3637_v27  ;;  %v2866_v2 = vadd.f32 %v2865_v34, %v2864_v32  ;;  %v2871_v32 = vsel %vm2451_vm0, %v7227_v13, 0.0  ;;  %v11764_v27 = vld [vmem:[#allocation207_spill] sm:$0xff]  ;;  %v3183_v48 = vmul.f32 %v7257_v18, %v7257_v18 }
 0x297   :  { %v3182_v49 = vmul.f32 %v11764_v27, %v11764_v27 }
 0x298   :  { %v2868_v10 = vadd.f32 %v2867_v25, %v2866_v2  ;;  %v3641_v21 = vadd.f32 %v3640_v11, %v3639_v8  ;;  %v3646_v8 = vsel %vm2451_vm0, %v3181_v40, 0.0  ;;  %v2873_v2 = vsel %vm2451_vm0, %v11764_v27, 0.0 }
 0x299   :  { %v2875_v11 = vsel %vm2451_vm0, %v7257_v18, 0.0 }
 0x29a   :  { %v3643_v20 = vadd.f32 %v3642_v45, %v3641_v21  ;;  %v2870_v35 = vadd.f32 %v2869_v37, %v2868_v10  ;;  %v3648_v21 = vsel %vm2451_vm0, %v3182_v49, 0.0  ;;  %v3650_v37 = vsel %vm2451_vm0, %v3183_v48, 0.0 }
 0x29b   :  { %v3186_v49 = vmul.f32 %v7264_v52, %v7264_v52  ;;  %v3652_v48 = vsel %vm2451_vm0, %v3184_v44, 0.0  ;;  %v3188_v44 = vmul.f32 %v7294_v61, %v7294_v61 }
 0x29c   :  { %v2872_v34 = vadd.f32 %v2871_v32, %v2870_v35  ;;  %v3645_v25 = vadd.f32 %v3644_v38, %v3643_v20  ;;  %v11765_v20 = vld [vmem:[#allocation208_spill] sm:$0xff]  ;;  %v2877_v32 = vsel %vm2451_vm0, %v7266_v58, 0.0 }
 0x29d   :  { %v3185_v40 = vmul.f32 %v11765_v20, %v11765_v20 }
 0x29e   :  { %v3647_v45 = vadd.f32 %v3646_v8, %v3645_v25  ;;  %v2874_v10 = vadd.f32 %v2873_v2, %v2872_v34  ;;  %v2879_v34 = vsel %vm2451_vm0, %v11765_v20, 0.0  ;;  %v3187_v25 = vmul.f32 %v7285_v39, %v7285_v39 }
 0x2a0   :  { %v2876_v13 = vadd.f32 %v2875_v11, %v2874_v10  ;;  %v3649_v35 = vadd.f32 %v3648_v21, %v3647_v45  ;;  %v3654_v11 = vsel %vm2451_vm0, %v3185_v40, 0.0  ;;  %v2881_v45 = vsel %vm2451_vm0, %v7264_v52, 0.0 }
 0x2a1   :  { %v3189_v40 = vmul.f32 %v7283_v51, %v7283_v51 }
 0x2a2   :  { %v3651_v38 = vadd.f32 %v3650_v37, %v3649_v35  ;;  %v2878_v27 = vadd.f32 %v2877_v32, %v2876_v13  ;;  %v2883_v13 = vsel %vm2451_vm0, %v7285_v39, 0.0  ;;  %v3656_v37 = vsel %vm2451_vm0, %v3186_v49, 0.0 }
 0x2a3   :  { %v3658_v35 = vsel %vm2451_vm0, %v3187_v25, 0.0  ;;  %v3190_v49 = vmul.f32 %v7292_v17, %v7292_v17  ;;  %v3660_v25 = vsel %vm2451_vm0, %v3188_v44, 0.0  ;;  %v3192_v44 = vmul.f32 %v7322_v0, %v7322_v0 }
 0x2a4   :  { %v2880_v8 = vadd.f32 %v2879_v34, %v2878_v27  ;;  %v3653_v2 = vadd.f32 %v3652_v48, %v3651_v38  ;;  %v2885_v38 = vsel %vm2451_vm0, %v7294_v61, 0.0 }
 0x2a6   :  { %v3655_v10 = vadd.f32 %v3654_v11, %v3653_v2  ;;  %v2882_v21 = vadd.f32 %v2881_v45, %v2880_v8  ;;  %v2887_v8 = vsel %vm2451_vm0, %v7283_v51, 0.0  ;;  %v3191_v2 = vmul.f32 %v7313_v14, %v7313_v14 }
 0x2a8   :  { %v2884_v32 = vadd.f32 %v2883_v13, %v2882_v21  ;;  %v3657_v27 = vadd.f32 %v3656_v37, %v3655_v10  ;;  %v3662_v13 = vsel %vm2451_vm0, %v3189_v40, 0.0  ;;  %v2889_v10 = vsel %vm2451_vm0, %v7292_v17, 0.0 }
 0x2a9   :  { %v2891_v21 = vsel %vm2451_vm0, %v7313_v14, 0.0  ;;  %v3193_v40 = vmul.f32 %v7311_v62, %v7311_v62 }
 0x2aa   :  { %v3659_v34 = vadd.f32 %v3658_v35, %v3657_v27  ;;  %v2886_v48 = vadd.f32 %v2885_v38, %v2884_v32  ;;  %v3664_v32 = vsel %vm2451_vm0, %v3190_v49, 0.0  ;;  %v3666_v27 = vsel %vm2451_vm0, %v3191_v2, 0.0 }
 0x2ab   :  { %v3194_v49 = vmul.f32 %v7320_v54, %v7320_v54  ;;  %v3668_v2 = vsel %vm2451_vm0, %v3192_v44, 0.0  ;;  %v3196_v44 = vmul.f32 %v7350_v60, %v7350_v60 }
 0x2ac   :  { %v2888_v11 = vadd.f32 %v2887_v8, %v2886_v48  ;;  %v3661_v45 = vadd.f32 %v3660_v25, %v3659_v34  ;;  %v2893_v34 = vsel %vm2451_vm0, %v7322_v0, 0.0 }
 0x2ae   :  { %v3663_v37 = vadd.f32 %v3662_v13, %v3661_v45  ;;  %v2890_v35 = vadd.f32 %v2889_v10, %v2888_v11  ;;  %v2895_v11 = vsel %vm2451_vm0, %v7311_v62, 0.0  ;;  %v3195_v45 = vmul.f32 %v7341_v47, %v7341_v47 }
 0x2b0   :  { %v2892_v38 = vadd.f32 %v2891_v21, %v2890_v35  ;;  %v3665_v48 = vadd.f32 %v3664_v32, %v3663_v37  ;;  %v3670_v21 = vsel %vm2451_vm0, %v3193_v40, 0.0  ;;  %v2897_v37 = vsel %vm2451_vm0, %v7320_v54, 0.0 }
 0x2b1   :  { %v2899_v35 = vsel %vm2451_vm0, %v7341_v47, 0.0  ;;  %v3197_v40 = vmul.f32 %v7339_v23, %v7339_v23 }
 0x2b2   :  { %v3667_v8 = vadd.f32 %v3666_v27, %v3665_v48  ;;  %v2894_v25 = vadd.f32 %v2893_v34, %v2892_v38  ;;  %v3672_v38 = vsel %vm2451_vm0, %v3194_v49, 0.0  ;;  %v3674_v48 = vsel %vm2451_vm0, %v3195_v45, 0.0 }
 0x2b3   :  { %v3198_v49 = vmul.f32 %v7348_v56, %v7348_v56  ;;  %v3676_v45 = vsel %vm2451_vm0, %v3196_v44, 0.0  ;;  %v3200_v44 = vmul.f32 %v7378_v9, %v7378_v9 }
 0x2b4   :  { %v2896_v13 = vadd.f32 %v2895_v11, %v2894_v25  ;;  %v3669_v10 = vadd.f32 %v3668_v2, %v3667_v8  ;;  %v2901_v8 = vsel %vm2451_vm0, %v7350_v60, 0.0 }
 0x2b6   :  { %v3671_v32 = vadd.f32 %v3670_v21, %v3669_v10  ;;  %v2898_v27 = vadd.f32 %v2897_v37, %v2896_v13  ;;  %v2903_v13 = vsel %vm2451_vm0, %v7339_v23, 0.0  ;;  %v3199_v10 = vmul.f32 %v7369_v28, %v7369_v28 }
 0x2b8   :  { %v2900_v34 = vadd.f32 %v2899_v35, %v2898_v27  ;;  %v3673_v25 = vadd.f32 %v3672_v38, %v3671_v32  ;;  %v3678_v35 = vsel %vm2451_vm0, %v3197_v40, 0.0  ;;  %v2905_v32 = vsel %vm2451_vm0, %v7348_v56, 0.0 }
 0x2b9   :  { %v2907_v27 = vsel %vm2451_vm0, %v7369_v28, 0.0  ;;  %v3201_v40 = vmul.f32 %v7367_v55, %v7367_v55 }
 0x2ba   :  { %v3675_v11 = vadd.f32 %v3674_v48, %v3673_v25  ;;  %v2902_v2 = vadd.f32 %v2901_v8, %v2900_v34  ;;  %v3680_v34 = vsel %vm2451_vm0, %v3198_v49, 0.0  ;;  %v3682_v25 = vsel %vm2451_vm0, %v3199_v10, 0.0 }
 0x2bb   :  { %v3202_v49 = vmul.f32 %v7376_v29, %v7376_v29  ;;  %v3684_v10 = vsel %vm2451_vm0, %v3200_v44, 0.0  ;;  %v3204_v44 = vmul.f32 %v7406_v31, %v7406_v31 }
 0x2bc   :  { %v2904_v21 = vadd.f32 %v2903_v13, %v2902_v2  ;;  %v3677_v37 = vadd.f32 %v3676_v45, %v3675_v11  ;;  %v2909_v11 = vsel %vm2451_vm0, %v7378_v9, 0.0 }
 0x2be   :  { %v3679_v38 = vadd.f32 %v3678_v35, %v3677_v37  ;;  %v2906_v48 = vadd.f32 %v2905_v32, %v2904_v21  ;;  %v2911_v21 = vsel %vm2451_vm0, %v7367_v55, 0.0  ;;  %v3203_v37 = vmul.f32 %v7397_v33, %v7397_v33 }
 0x2c0   :  { %v2908_v8 = vadd.f32 %v2907_v27, %v2906_v48  ;;  %v3681_v2 = vadd.f32 %v3680_v34, %v3679_v38  ;;  %v3686_v27 = vsel %vm2451_vm0, %v3201_v40, 0.0  ;;  %v2913_v38 = vsel %vm2451_vm0, %v7376_v29, 0.0 }
 0x2c1   :  { %v2915_v48 = vsel %vm2451_vm0, %v7397_v33, 0.0  ;;  %v3205_v40 = vmul.f32 %v7395_v59, %v7395_v59 }
 0x2c2   :  { %v3683_v13 = vadd.f32 %v3682_v25, %v3681_v2  ;;  %v2910_v45 = vadd.f32 %v2909_v11, %v2908_v8  ;;  %v3688_v8 = vsel %vm2451_vm0, %v3202_v49, 0.0  ;;  %v3690_v2 = vsel %vm2451_vm0, %v3203_v37, 0.0 }
 0x2c3   :  { %v3206_v49 = vmul.f32 %v7404_v53, %v7404_v53  ;;  %v3692_v37 = vsel %vm2451_vm0, %v3204_v44, 0.0  ;;  %v3208_v44 = vmul.f32 %v7434_v1, %v7434_v1 }
 0x2c4   :  { %v2912_v35 = vadd.f32 %v2911_v21, %v2910_v45  ;;  %v3685_v32 = vadd.f32 %v3684_v10, %v3683_v13  ;;  %v2917_v13 = vsel %vm2451_vm0, %v7406_v31, 0.0 }
 0x2c6   :  { %v3687_v34 = vadd.f32 %v3686_v27, %v3685_v32  ;;  %v2914_v25 = vadd.f32 %v2913_v38, %v2912_v35  ;;  %v2919_v35 = vsel %vm2451_vm0, %v7395_v59, 0.0  ;;  %v3207_v32 = vmul.f32 %v7425_v50, %v7425_v50 }
 0x2c8   :  { %v2916_v11 = vadd.f32 %v2915_v48, %v2914_v25  ;;  %v3689_v45 = vadd.f32 %v3688_v8, %v3687_v34  ;;  %v3694_v48 = vsel %vm2451_vm0, %v3205_v40, 0.0  ;;  %v2921_v34 = vsel %vm2451_vm0, %v7404_v53, 0.0 }
 0x2c9   :  { %v2923_v25 = vsel %vm2451_vm0, %v7425_v50, 0.0  ;;  %v3209_v40 = vmul.f32 %v7423_v36, %v7423_v36 }
 0x2ca   :  { %v3691_v21 = vadd.f32 %v3690_v2, %v3689_v45  ;;  %v2918_v10 = vadd.f32 %v2917_v13, %v2916_v11  ;;  %v3696_v11 = vsel %vm2451_vm0, %v3206_v49, 0.0  ;;  %v3698_v45 = vsel %vm2451_vm0, %v3207_v32, 0.0 }
 0x2cb   :  { %v3700_v32 = vsel %vm2451_vm0, %v3208_v44, 0.0  ;;  %v3212_v44 = vmul.f32 %v7462_v57, %v7462_v57 }
 0x2cc   :  { %v2920_v27 = vadd.f32 %v2919_v35, %v2918_v10  ;;  %v3693_v38 = vadd.f32 %v3692_v37, %v3691_v21  ;;  %v2925_v21 = vsel %vm2451_vm0, %v7434_v1, 0.0 }
 0x2ce   :  { %v3695_v8 = vadd.f32 %v3694_v48, %v3693_v38  ;;  %v2922_v2 = vadd.f32 %v2921_v34, %v2920_v27  ;;  %v2927_v27 = vsel %vm2451_vm0, %v7423_v36, 0.0  ;;  %v11766_v38 = vld [vmem:[#allocation210_spill] sm:$0xff]  ;;  %v3211_v48 = vmul.f32 %v7453_v3, %v7453_v3 }
 0x2cf   :  { %v3210_v49 = vmul.f32 %v11766_v38, %v11766_v38 }
 0x2d0   :  { %v2924_v13 = vadd.f32 %v2923_v25, %v2922_v2  ;;  %v3697_v10 = vadd.f32 %v3696_v11, %v3695_v8  ;;  %v3702_v8 = vsel %vm2451_vm0, %v3209_v40, 0.0  ;;  %v2929_v2 = vsel %vm2451_vm0, %v11766_v38, 0.0 }
 0x2d1   :  { %v2931_v11 = vsel %vm2451_vm0, %v7453_v3, 0.0 }
 0x2d2   :  { %v3699_v35 = vadd.f32 %v3698_v45, %v3697_v10  ;;  %v2926_v37 = vadd.f32 %v2925_v21, %v2924_v13  ;;  %v3704_v10 = vsel %vm2451_vm0, %v3210_v49, 0.0  ;;  %v3706_v21 = vsel %vm2451_vm0, %v3211_v48, 0.0 }
 0x2d3   :  { %v3708_v48 = vsel %vm2451_vm0, %v3212_v44, 0.0  ;;  %v3216_v44 = vmul.f32 %v7490_v7, %v7490_v7 }
 0x2d4   :  { %v2928_v34 = vadd.f32 %v2927_v27, %v2926_v37  ;;  %v3701_v25 = vadd.f32 %v3700_v32, %v3699_v35  ;;  %v11767_v35 = vld [vmem:[#allocation211_spill] sm:$0xff]  ;;  %v2933_v27 = vsel %vm2451_vm0, %v7462_v57, 0.0 }
 0x2d5   :  { %v3213_v40 = vmul.f32 %v11767_v35, %v11767_v35 }
 0x2d6   :  { %v3703_v45 = vadd.f32 %v3702_v8, %v3701_v25  ;;  %v2930_v13 = vadd.f32 %v2929_v2, %v2928_v34  ;;  %v2935_v34 = vsel %vm2451_vm0, %v11767_v35, 0.0  ;;  %v11768_v25 = vld [vmem:[#allocation212_spill] sm:$0xff]  ;;  %v3215_v8 = vmul.f32 %v7481_v63, %v7481_v63 }
 0x2d7   :  { %v3214_v49 = vmul.f32 %v11768_v25, %v11768_v25 }
 0x2d8   :  { %v2932_v36 = vadd.f32 %v2931_v11, %v2930_v13  ;;  %v3705_v37 = vadd.f32 %v3704_v10, %v3703_v45  ;;  %v3710_v45 = vsel %vm2451_vm0, %v3213_v40, 0.0  ;;  %v2937_v13 = vsel %vm2451_vm0, %v11768_v25, 0.0 }
 0x2da   :  { %v3707_v32 = vadd.f32 %v3706_v21, %v3705_v37  ;;  %v2934_v38 = vadd.f32 %v2933_v27, %v2932_v36  ;;  %v2939_v36 = vsel %vm2451_vm0, %v7481_v63, 0.0  ;;  %v3712_v37 = vsel %vm2451_vm0, %v3214_v49, 0.0 }
 0x2db   :  { %v3714_v27 = vsel %vm2451_vm0, %v3215_v8, 0.0  ;;  %v3218_v49 = vmul.f32 %v7488_v43, %v7488_v43  ;;  %v3716_v8 = vsel %vm2451_vm0, %v3216_v44, 0.0  ;;  %v3220_v44 = vmul.f32 %v7518_v19, %v7518_v19 }
 0x2dc   :  { %v2936_v2 = vadd.f32 %v2935_v34, %v2934_v38  ;;  %v3709_v11 = vadd.f32 %v3708_v48, %v3707_v32  ;;  %v11769_v32 = vld [vmem:[#allocation213_spill] sm:$0xff]  ;;  %v2941_v34 = vsel %vm2451_vm0, %v7490_v7, 0.0 }
 0x2dd   :  { %v3217_v40 = vmul.f32 %v11769_v32, %v11769_v32 }
 0x2de   :  { %v3711_v10 = vadd.f32 %v3710_v45, %v3709_v11  ;;  %v2938_v21 = vadd.f32 %v2937_v13, %v2936_v2  ;;  %v2943_v2 = vsel %vm2451_vm0, %v11769_v32, 0.0  ;;  %v3219_v11 = vmul.f32 %v7509_v41, %v7509_v41 }
 0x2e0   :  { %v2940_v35 = vadd.f32 %v2939_v36, %v2938_v21  ;;  %v3713_v38 = vadd.f32 %v3712_v37, %v3711_v10  ;;  %v3718_v36 = vsel %vm2451_vm0, %v3217_v40, 0.0  ;;  %v2945_v10 = vsel %vm2451_vm0, %v7488_v43, 0.0 }
 0x2e2   :  { %v3715_v48 = vadd.f32 %v3714_v27, %v3713_v38  ;;  %v2942_v25 = vadd.f32 %v2941_v34, %v2940_v35  ;;  %v2947_v35 = vsel %vm2451_vm0, %v7509_v41, 0.0  ;;  %v3720_v27 = vsel %vm2451_vm0, %v3218_v49, 0.0 }
 0x2e3   :  { %v3722_v38 = vsel %vm2451_vm0, %v3219_v11, 0.0  ;;  %v3222_v49 = vmul.f32 %v7516_v15, %v7516_v15  ;;  %v3724_v11 = vsel %vm2451_vm0, %v3220_v44, 0.0  ;;  %v3224_v44 = vmul.f32 %v7546_v12, %v7546_v12 }
 0x2e4   :  { %v2944_v45 = vadd.f32 %v2943_v2, %v2942_v25  ;;  %v3717_v13 = vadd.f32 %v3716_v8, %v3715_v48  ;;  %v11770_v48 = vld [vmem:[#allocation215_spill] sm:$0xff]  ;;  %v2949_v2 = vsel %vm2451_vm0, %v7518_v19, 0.0 }
 0x2e5   :  { %v3221_v40 = vmul.f32 %v11770_v48, %v11770_v48 }
 0x2e6   :  { %v3719_v21 = vadd.f32 %v3718_v36, %v3717_v13  ;;  %v2946_v37 = vadd.f32 %v2945_v10, %v2944_v45  ;;  %v2951_v45 = vsel %vm2451_vm0, %v11770_v48, 0.0  ;;  %v3223_v13 = vmul.f32 %v7537_v24, %v7537_v24 }
 0x2e8   :  { %v2948_v34 = vadd.f32 %v2947_v35, %v2946_v37  ;;  %v3721_v25 = vadd.f32 %v3720_v27, %v3719_v21  ;;  %v3726_v35 = vsel %vm2451_vm0, %v3221_v40, 0.0  ;;  %v2953_v21 = vsel %vm2451_vm0, %v7516_v15, 0.0 }
 0x2e9   :  { %v2955_v37 = vsel %vm2451_vm0, %v7537_v24, 0.0 }
 0x2ea   :  { %v3723_v8 = vadd.f32 %v3722_v38, %v3721_v25  ;;  %v2950_v43 = vadd.f32 %v2949_v2, %v2948_v34  ;;  %v3728_v34 = vsel %vm2451_vm0, %v3222_v49, 0.0  ;;  %v3730_v25 = vsel %vm2451_vm0, %v3223_v13, 0.0 }
 0x2eb   :  { %v3732_v13 = vsel %vm2451_vm0, %v3224_v44, 0.0 }
 0x2ec   :  { %v2952_v36 = vadd.f32 %v2951_v45, %v2950_v43  ;;  %v3725_v10 = vadd.f32 %v3724_v11, %v3723_v8  ;;  %v11771_v8 = vld [vmem:[#allocation219_spill] sm:$0xff]  ;;  %v2957_v45 = vsel %vm2451_vm0, %v7546_v12, 0.0 }
 0x2ed   :  { %v3225_v40 = vmul.f32 %v11771_v8, %v11771_v8 }
 0x2ee   :  { %v3727_v27 = vadd.f32 %v3726_v35, %v3725_v10  ;;  %v2954_v38 = vadd.f32 %v2953_v21, %v2952_v36  ;;  %v2959_v36 = vsel %vm2451_vm0, %v11771_v8, 0.0  ;;  %v11772_v10 = vld [vmem:[#allocation221_spill] sm:$0xff] }
 0x2ef   :  { %v3226_v49 = vmul.f32 %v11772_v10, %v11772_v10 }
 0x2f0   :  { %v2956_v2 = vadd.f32 %v2955_v37, %v2954_v38  ;;  %v3729_v43 = vadd.f32 %v3728_v34, %v3727_v27  ;;  %v3734_v37 = vsel %vm2451_vm0, %v3225_v40, 0.0  ;;  %v2961_v27 = vsel %vm2451_vm0, %v11772_v10, 0.0 }
 0x2f2   :  { %v3731_v11 = vadd.f32 %v3730_v25, %v3729_v43  ;;  %v2958_v15 = vadd.f32 %v2957_v45, %v2956_v2  ;;  %v3736_v25 = vsel %vm2451_vm0, %v3226_v49, 0.0  ;;  %v3755_v49 = vlaneseq }
 0x2f4   :  { %v2960_v35 = vadd.f32 %v2959_v36, %v2958_v15  ;;  %v3733_v21 = vadd.f32 %v3732_v13, %v3731_v11 }
 0x2f6   :  { %v2962_v38 = vadd.f32 %v2961_v27, %v2960_v35  ;;  %v3735_v34 = vadd.f32 %v3734_v37, %v3733_v21  ;;  %v7885_v27 = vshrl.u32 %v3755_v49, 7  ;;  %v11780_v49 = vld [vmem:[#allocation8_spill] sm:$0xff] }
 0x2f8   :  { %v2963_v2 = vrot.slane %v2962_v38, 4  ;;  %v3737_v43 = vadd.f32 %v3736_v25, %v3735_v34  ;;  %v11773_v34 = vld [vmem:[#allocation3_spill] sm:$0xff] }
 0x2fa   :  { %v2964_v45 = vadd.f32 %v2963_v2, %v2962_v38  ;;  %v3738_v8 = vrot.slane %v3737_v43, 4  ;;  %v11774_v2 = vld [vmem:[#allocation5_spill] sm:$0xff] }
 0x2fb   :  { %v11790_v38 = vld [vmem:[#allocation17_spill] sm:$0xff] }
 0x2fc   :  { %v2965_v12 = vrot.slane %v2964_v45, 2  ;;  %v3739_v24 = vadd.f32 %v3738_v8, %v3737_v43  ;;  %v11505_v8 = vsub.s32 0, %v7885_v27 }
 0x2fe   :  { %v2966_v48 = vadd.f32 %v2965_v12, %v2964_v45  ;;  %v3740_v19 = vrot.slane %v3739_v24, 2  ;;  %v3748_v12 = vld [vmem:[%s11241_s2] sm:$0x1] }
 0x2ff   :  { %v11775_v45 = vld [vmem:[#allocation2_spill] sm:$0xff] }
 0x300   :  { %v2967_v44 = vrot.slane %v2966_v48, 1  ;;  %v3741_v15 = vadd.f32 %v3740_v19, %v3739_v24 }
 0x302   :  { %v2968_v11 = vadd.f32 %v2967_v44, %v2966_v48  ;;  %v3742_v36 = vrot.slane %v3741_v15, 1  ;;  %v7894_v48 = vld [vmem:[%s11241_s2 + $0x1] sm:$0x1] }
 0x304   :  { %v2970_v40 = vmul.f32 0.00048828125, %v2968_v11  ;;  %v3743_v13 = vadd.f32 %v3742_v36, %v3741_v15  ;;  %v11776_v15 = vld [vmem:[#allocation4_spill] sm:$0xff]  ;;  %v11777_v36 = vld [vmem:[#allocation7_spill] sm:$0xff] }
 0x306   :  { %v3744_v41 = vmul.f32 0.00048828125, %v3743_v13  ;;  %v3745_v10 = vmul.f32 %v2970_v40, %v2970_v40  ;;  %v11778_v13 = vld [vmem:[#allocation9_spill] sm:$0xff] }
 0x308   :  { %v3746_v35 = vsub.f32 %v3744_v41, %v3745_v10 }
 0x30a   :  { %v3747_v21 = vmax.f32 %v3746_v35, 0.0 }
 0x30c   :  { %v3749_v37 = vadd.f32 1e-05, %v3747_v21  ;;  %v11779_v21 = vld [vmem:[#allocation6_spill] sm:$0xff] }
 0x30e   :  { %5591 = vrsqrt.f32 %v3749_v37 }
 0x318   :  { %v5592_v19 = vpop.eup %5591 }
 0x319   :  { %v3751_v24 = vmul.f32 %v5592_v19, %v3748_v12  ;;  %v11781_v19 = vld [vmem:[#allocation11_spill] sm:$0xff] }
 0x31b   :  { %v7896_v41 = vmul.f32 %v3751_v24, %v2970_v40  ;;  %v7900_v10 = vrot.slane %v3751_v24, %v11505_v8  ;;  %v11792_v8 = vld [vmem:[#allocation14_spill] sm:$0xff] }
 0x31d   :  { %v7906_v25 = vmul.f32 %v7900_v10, %v11773_v34  ;;  %v7910_v43 = vmul.f32 %v7900_v10, %v11774_v2  ;;  %v7914_v44 = vmul.f32 %v11775_v45, %v7900_v10  ;;  %v7918_v11 = vmul.f32 %v11776_v15, %v7900_v10  ;;  %v11782_v34 = vld [vmem:[#allocation13_spill] sm:$0xff]  ;;  %v11784_v45 = vld [vmem:[#allocation10_spill] sm:$0xff] }
 0x31e   :  { %v7922_v40 = vmul.f32 %v7900_v10, %v11777_v36  ;;  %v7926_v35 = vmul.f32 %v7900_v10, %v11778_v13  ;;  %v7930_v37 = vmul.f32 %v11779_v21, %v7900_v10  ;;  %v7934_v12 = vmul.f32 %v11780_v49, %v7900_v10  ;;  %v11786_v36 = vld [vmem:[#allocation12_spill] sm:$0xff]  ;;  %v11788_v21 = vld [vmem:[#allocation15_spill] sm:$0xff] }
 0x31f   :  { %v7938_v24 = vmul.f32 %v7900_v10, %v11781_v19  ;;  %v7942_v2 = vmul.f32 %v7900_v10, %v11782_v34  ;;  %v7946_v15 = vmul.f32 %v11784_v45, %v7900_v10  ;;  %v7950_v13 = vmul.f32 %v11786_v36, %v7900_v10 }
 0x320   :  { %v7954_v49 = vmul.f32 %v7900_v10, %v11788_v21  ;;  %v7958_v19 = vmul.f32 %v7900_v10, %v11790_v38  ;;  %v7962_v34 = vmul.f32 %v11792_v8, %v7900_v10 }
 0x321   :  { %11783 = vst [vmem:[#allocation199_spill] sm:$0xff] %v7942_v2  ;;  %11785 = vst [vmem:[#allocation203_spill] sm:$0xff] %v7946_v15  ;;  %v11794_v2 = vld [vmem:[#allocation16_spill] sm:$0xff] }
 0x322   :  { %11787 = vst [vmem:[#allocation205_spill] sm:$0xff] %v7950_v13  ;;  %11789 = vst [vmem:[#allocation208_spill] sm:$0xff] %v7954_v49  ;;  %v7966_v45 = vmul.f32 %v11794_v2, %v7900_v10  ;;  %v11796_v15 = vld [vmem:[#allocation20_spill] sm:$0xff]  ;;  %v11800_v49 = vld [vmem:[#allocation18_spill] sm:$0xff] }
 0x323   :  { %11791 = vst [vmem:[#allocation213_spill] sm:$0xff] %v7958_v19  ;;  %11793 = vst [vmem:[#allocation3_spill] sm:$0xff] %v7962_v34  ;;  %v7970_v36 = vmul.f32 %v7900_v10, %v11796_v15  ;;  %v11798_v13 = vld [vmem:[#allocation24_spill] sm:$0xff]  ;;  %v7978_v38 = vmul.f32 %v11800_v49, %v7900_v10  ;;  %v11802_v19 = vld [vmem:[#allocation22_spill] sm:$0xff] }
 0x324   :  { %11795 = vst [vmem:[#allocation5_spill] sm:$0xff] %v7966_v45  ;;  %v7974_v21 = vmul.f32 %v7900_v10, %v11798_v13  ;;  %v7982_v8 = vmul.f32 %v11802_v19, %v7900_v10  ;;  %v11804_v34 = vld [vmem:[#allocation28_spill] sm:$0xff] }
 0x325   :  { %11797 = vst [vmem:[#allocation2_spill] sm:$0xff] %v7970_v36  ;;  %11801 = vst [vmem:[#allocation7_spill] sm:$0xff] %v7978_v38  ;;  %v7986_v2 = vmul.f32 %v7900_v10, %v11804_v34  ;;  %v11806_v45 = vld [vmem:[#allocation32_spill] sm:$0xff]  ;;  %v11808_v36 = vld [vmem:[#allocation26_spill] sm:$0xff] }
 0x326   :  { %11799 = vst [vmem:[#allocation4_spill] sm:$0xff] %v7974_v21  ;;  %11803 = vst [vmem:[#allocation9_spill] sm:$0xff] %v7982_v8  ;;  %v7990_v15 = vmul.f32 %v7900_v10, %v11806_v45  ;;  %v7994_v13 = vmul.f32 %v11808_v36, %v7900_v10  ;;  %v11810_v21 = vld [vmem:[#allocation30_spill] sm:$0xff]  ;;  %v11812_v38 = vld [vmem:[#allocation36_spill] sm:$0xff] }
 0x327   :  { %11805 = vst [vmem:[#allocation6_spill] sm:$0xff] %v7986_v2  ;;  %v7998_v49 = vmul.f32 %v11810_v21, %v7900_v10  ;;  %v8002_v19 = vmul.f32 %v7900_v10, %v11812_v38  ;;  %v11814_v8 = vld [vmem:[#allocation40_spill] sm:$0xff]  ;;  %v11816_v2 = vld [vmem:[#allocation34_spill] sm:$0xff] }
 0x328   :  { %11807 = vst [vmem:[#allocation8_spill] sm:$0xff] %v7990_v15  ;;  %11809 = vst [vmem:[#allocation11_spill] sm:$0xff] %v7994_v13  ;;  %v8006_v34 = vmul.f32 %v7900_v10, %v11814_v8  ;;  %v8010_v45 = vmul.f32 %v11816_v2, %v7900_v10  ;;  %v11818_v15 = vld [vmem:[#allocation38_spill] sm:$0xff]  ;;  %v11820_v13 = vld [vmem:[#allocation44_spill] sm:$0xff] }
 0x329   :  { %11811 = vst [vmem:[#allocation13_spill] sm:$0xff] %v7998_v49  ;;  %11813 = vst [vmem:[#allocation10_spill] sm:$0xff] %v8002_v19  ;;  %v8014_v36 = vmul.f32 %v11818_v15, %v7900_v10  ;;  %v8018_v21 = vmul.f32 %v7900_v10, %v11820_v13  ;;  %v11822_v49 = vld [vmem:[#allocation48_spill] sm:$0xff]  ;;  %v11824_v19 = vld [vmem:[#allocation42_spill] sm:$0xff] }
 0x32a   :  { %11815 = vst [vmem:[#allocation12_spill] sm:$0xff] %v8006_v34  ;;  %11817 = vst [vmem:[#allocation15_spill] sm:$0xff] %v8010_v45  ;;  %v8022_v38 = vmul.f32 %v7900_v10, %v11822_v49  ;;  %v8026_v8 = vmul.f32 %v11824_v19, %v7900_v10  ;;  %v11826_v34 = vld [vmem:[#allocation46_spill] sm:$0xff]  ;;  %v11828_v45 = vld [vmem:[#allocation52_spill] sm:$0xff] }
 0x32b   :  { %11819 = vst [vmem:[#allocation17_spill] sm:$0xff] %v8014_v36  ;;  %11821 = vst [vmem:[#allocation14_spill] sm:$0xff] %v8018_v21  ;;  %v8030_v2 = vmul.f32 %v11826_v34, %v7900_v10  ;;  %v8034_v15 = vmul.f32 %v7900_v10, %v11828_v45  ;;  %v11830_v36 = vld [vmem:[#allocation56_spill] sm:$0xff]  ;;  %v11832_v21 = vld [vmem:[#allocation50_spill] sm:$0xff] }
 0x32c   :  { %11823 = vst [vmem:[#allocation16_spill] sm:$0xff] %v8022_v38  ;;  %11825 = vst [vmem:[#allocation20_spill] sm:$0xff] %v8026_v8  ;;  %v8038_v13 = vmul.f32 %v7900_v10, %v11830_v36  ;;  %v8042_v49 = vmul.f32 %v11832_v21, %v7900_v10  ;;  %v11834_v38 = vld [vmem:[#allocation54_spill] sm:$0xff]  ;;  %v11836_v8 = vld [vmem:[#allocation60_spill] sm:$0xff] }
 0x32d   :  { %11827 = vst [vmem:[#allocation24_spill] sm:$0xff] %v8030_v2  ;;  %11829 = vst [vmem:[#allocation18_spill] sm:$0xff] %v8034_v15  ;;  %v8046_v19 = vmul.f32 %v11834_v38, %v7900_v10  ;;  %v8050_v34 = vmul.f32 %v7900_v10, %v11836_v8  ;;  %v11838_v2 = vld [vmem:[#allocation64_spill] sm:$0xff]  ;;  %v11840_v15 = vld [vmem:[#allocation58_spill] sm:$0xff] }
 0x32e   :  { %11831 = vst [vmem:[#allocation22_spill] sm:$0xff] %v8038_v13  ;;  %11833 = vst [vmem:[#allocation28_spill] sm:$0xff] %v8042_v49  ;;  %v8054_v45 = vmul.f32 %v7900_v10, %v11838_v2  ;;  %v8058_v36 = vmul.f32 %v11840_v15, %v7900_v10  ;;  %v11842_v13 = vld [vmem:[#allocation62_spill] sm:$0xff]  ;;  %v11844_v49 = vld [vmem:[#allocation68_spill] sm:$0xff] }
 0x32f   :  { %11835 = vst [vmem:[#allocation32_spill] sm:$0xff] %v8046_v19  ;;  %11837 = vst [vmem:[#allocation26_spill] sm:$0xff] %v8050_v34  ;;  %v8062_v21 = vmul.f32 %v11842_v13, %v7900_v10  ;;  %v8066_v38 = vmul.f32 %v7900_v10, %v11844_v49  ;;  %v11846_v19 = vld [vmem:[#allocation72_spill] sm:$0xff]  ;;  %v11848_v34 = vld [vmem:[#allocation66_spill] sm:$0xff] }
 0x330   :  { %11839 = vst [vmem:[#allocation30_spill] sm:$0xff] %v8054_v45  ;;  %11841 = vst [vmem:[#allocation36_spill] sm:$0xff] %v8058_v36  ;;  %v8070_v8 = vmul.f32 %v7900_v10, %v11846_v19  ;;  %v8074_v2 = vmul.f32 %v11848_v34, %v7900_v10  ;;  %v11850_v45 = vld [vmem:[#allocation70_spill] sm:$0xff]  ;;  %v11852_v36 = vld [vmem:[#allocation76_spill] sm:$0xff] }
 0x331   :  { %11843 = vst [vmem:[#allocation40_spill] sm:$0xff] %v8062_v21  ;;  %11845 = vst [vmem:[#allocation34_spill] sm:$0xff] %v8066_v38  ;;  %v8078_v15 = vmul.f32 %v11850_v45, %v7900_v10  ;;  %v8082_v13 = vmul.f32 %v7900_v10, %v11852_v36  ;;  %v11854_v21 = vld [vmem:[#allocation80_spill] sm:$0xff]  ;;  %v11856_v38 = vld [vmem:[#allocation74_spill] sm:$0xff] }
 0x332   :  { %11847 = vst [vmem:[#allocation38_spill] sm:$0xff] %v8070_v8  ;;  %11849 = vst [vmem:[#allocation44_spill] sm:$0xff] %v8074_v2  ;;  %v8086_v49 = vmul.f32 %v7900_v10, %v11854_v21  ;;  %v8090_v19 = vmul.f32 %v11856_v38, %v7900_v10  ;;  %v11858_v8 = vld [vmem:[#allocation78_spill] sm:$0xff]  ;;  %v11860_v2 = vld [vmem:[#allocation84_spill] sm:$0xff] }
 0x333   :  { %11851 = vst [vmem:[#allocation48_spill] sm:$0xff] %v8078_v15  ;;  %11853 = vst [vmem:[#allocation42_spill] sm:$0xff] %v8082_v13  ;;  %v8094_v34 = vmul.f32 %v11858_v8, %v7900_v10  ;;  %v8098_v45 = vmul.f32 %v7900_v10, %v11860_v2  ;;  %v11862_v15 = vld [vmem:[#allocation88_spill] sm:$0xff]  ;;  %v11864_v13 = vld [vmem:[#allocation82_spill] sm:$0xff] }
 0x334   :  { %11855 = vst [vmem:[#allocation46_spill] sm:$0xff] %v8086_v49  ;;  %11857 = vst [vmem:[#allocation52_spill] sm:$0xff] %v8090_v19  ;;  %v8102_v36 = vmul.f32 %v7900_v10, %v11862_v15  ;;  %v8106_v21 = vmul.f32 %v11864_v13, %v7900_v10  ;;  %v11866_v49 = vld [vmem:[#allocation86_spill] sm:$0xff]  ;;  %v11868_v19 = vld [vmem:[#allocation92_spill] sm:$0xff] }
 0x335   :  { %11859 = vst [vmem:[#allocation56_spill] sm:$0xff] %v8094_v34  ;;  %11861 = vst [vmem:[#allocation50_spill] sm:$0xff] %v8098_v45  ;;  %v8110_v38 = vmul.f32 %v11866_v49, %v7900_v10  ;;  %v8114_v8 = vmul.f32 %v7900_v10, %v11868_v19  ;;  %v11870_v34 = vld [vmem:[#allocation96_spill] sm:$0xff]  ;;  %v11872_v45 = vld [vmem:[#allocation90_spill] sm:$0xff] }
 0x336   :  { %11863 = vst [vmem:[#allocation54_spill] sm:$0xff] %v8102_v36  ;;  %11865 = vst [vmem:[#allocation60_spill] sm:$0xff] %v8106_v21  ;;  %v8118_v2 = vmul.f32 %v7900_v10, %v11870_v34  ;;  %v8122_v15 = vmul.f32 %v11872_v45, %v7900_v10  ;;  %v11874_v36 = vld [vmem:[#allocation94_spill] sm:$0xff]  ;;  %v11876_v21 = vld [vmem:[#allocation100_spill] sm:$0xff] }
 0x337   :  { %11867 = vst [vmem:[#allocation64_spill] sm:$0xff] %v8110_v38  ;;  %11869 = vst [vmem:[#allocation58_spill] sm:$0xff] %v8114_v8  ;;  %v8126_v13 = vmul.f32 %v11874_v36, %v7900_v10  ;;  %v8130_v49 = vmul.f32 %v7900_v10, %v11876_v21  ;;  %v11878_v38 = vld [vmem:[#allocation104_spill] sm:$0xff]  ;;  %v11880_v8 = vld [vmem:[#allocation98_spill] sm:$0xff] }
 0x338   :  { %11871 = vst [vmem:[#allocation62_spill] sm:$0xff] %v8118_v2  ;;  %11873 = vst [vmem:[#allocation68_spill] sm:$0xff] %v8122_v15  ;;  %v8134_v19 = vmul.f32 %v7900_v10, %v11878_v38  ;;  %v8138_v34 = vmul.f32 %v11880_v8, %v7900_v10  ;;  %v11882_v2 = vld [vmem:[#allocation102_spill] sm:$0xff]  ;;  %v11884_v15 = vld [vmem:[#allocation108_spill] sm:$0xff] }
 0x339   :  { %11875 = vst [vmem:[#allocation72_spill] sm:$0xff] %v8126_v13  ;;  %11877 = vst [vmem:[#allocation66_spill] sm:$0xff] %v8130_v49  ;;  %v8142_v45 = vmul.f32 %v11882_v2, %v7900_v10  ;;  %v8146_v36 = vmul.f32 %v7900_v10, %v11884_v15  ;;  %v11886_v13 = vld [vmem:[#allocation112_spill] sm:$0xff]  ;;  %v11888_v49 = vld [vmem:[#allocation106_spill] sm:$0xff] }
 0x33a   :  { %11879 = vst [vmem:[#allocation70_spill] sm:$0xff] %v8134_v19  ;;  %11881 = vst [vmem:[#allocation76_spill] sm:$0xff] %v8138_v34  ;;  %v8150_v21 = vmul.f32 %v7900_v10, %v11886_v13  ;;  %v8154_v38 = vmul.f32 %v11888_v49, %v7900_v10  ;;  %v11890_v19 = vld [vmem:[#allocation110_spill] sm:$0xff]  ;;  %v11892_v34 = vld [vmem:[#allocation21_spill] sm:$0xff] }
 0x33b   :  { %11883 = vst [vmem:[#allocation80_spill] sm:$0xff] %v8142_v45  ;;  %11885 = vst [vmem:[#allocation74_spill] sm:$0xff] %v8146_v36  ;;  %v8158_v8 = vmul.f32 %v11890_v19, %v7900_v10  ;;  %v8162_v2 = vmul.f32 %v7900_v10, %v11892_v34  ;;  %v11894_v45 = vld [vmem:[#allocation25_spill] sm:$0xff]  ;;  %v11896_v36 = vld [vmem:[#allocation19_spill] sm:$0xff] }
 0x33c   :  { %11887 = vst [vmem:[#allocation78_spill] sm:$0xff] %v8150_v21  ;;  %11889 = vst [vmem:[#allocation84_spill] sm:$0xff] %v8154_v38  ;;  %v8166_v15 = vmul.f32 %v7900_v10, %v11894_v45  ;;  %v8170_v13 = vmul.f32 %v11896_v36, %v7900_v10  ;;  %v11898_v21 = vld [vmem:[#allocation23_spill] sm:$0xff]  ;;  %v11900_v38 = vld [vmem:[#allocation29_spill] sm:$0xff] }
 0x33d   :  { %11891 = vst [vmem:[#allocation88_spill] sm:$0xff] %v8158_v8  ;;  %11893 = vst [vmem:[#allocation82_spill] sm:$0xff] %v8162_v2  ;;  %v8174_v49 = vmul.f32 %v11898_v21, %v7900_v10  ;;  %v8178_v19 = vmul.f32 %v7900_v10, %v11900_v38  ;;  %v11902_v8 = vld [vmem:[#allocation33_spill] sm:$0xff]  ;;  %v11904_v2 = vld [vmem:[#allocation27_spill] sm:$0xff] }
 0x33e   :  { %11895 = vst [vmem:[#allocation86_spill] sm:$0xff] %v8166_v15  ;;  %11897 = vst [vmem:[#allocation92_spill] sm:$0xff] %v8170_v13  ;;  %v8182_v34 = vmul.f32 %v7900_v10, %v11902_v8  ;;  %v8186_v45 = vmul.f32 %v11904_v2, %v7900_v10  ;;  %v11906_v15 = vld [vmem:[#allocation31_spill] sm:$0xff]  ;;  %v11908_v13 = vld [vmem:[#allocation37_spill] sm:$0xff] }
 0x33f   :  { %11899 = vst [vmem:[#allocation96_spill] sm:$0xff] %v8174_v49  ;;  %11901 = vst [vmem:[#allocation90_spill] sm:$0xff] %v8178_v19  ;;  %v8190_v36 = vmul.f32 %v11906_v15, %v7900_v10  ;;  %v8194_v21 = vmul.f32 %v7900_v10, %v11908_v13  ;;  %v11910_v49 = vld [vmem:[#allocation41_spill] sm:$0xff]  ;;  %v11912_v19 = vld [vmem:[#allocation35_spill] sm:$0xff] }
 0x340   :  { %11903 = vst [vmem:[#allocation94_spill] sm:$0xff] %v8182_v34  ;;  %11905 = vst [vmem:[#allocation100_spill] sm:$0xff] %v8186_v45  ;;  %v8198_v38 = vmul.f32 %v7900_v10, %v11910_v49  ;;  %v8202_v8 = vmul.f32 %v11912_v19, %v7900_v10  ;;  %v11914_v34 = vld [vmem:[#allocation39_spill] sm:$0xff]  ;;  %v11916_v45 = vld [vmem:[#allocation45_spill] sm:$0xff] }
 0x341   :  { %11907 = vst [vmem:[#allocation104_spill] sm:$0xff] %v8190_v36  ;;  %11909 = vst [vmem:[#allocation98_spill] sm:$0xff] %v8194_v21  ;;  %v8206_v2 = vmul.f32 %v11914_v34, %v7900_v10  ;;  %v8210_v15 = vmul.f32 %v7900_v10, %v11916_v45  ;;  %v11918_v36 = vld [vmem:[#allocation49_spill] sm:$0xff]  ;;  %v11920_v21 = vld [vmem:[#allocation43_spill] sm:$0xff] }
 0x342   :  { %11911 = vst [vmem:[#allocation102_spill] sm:$0xff] %v8198_v38  ;;  %11913 = vst [vmem:[#allocation108_spill] sm:$0xff] %v8202_v8  ;;  %v8214_v13 = vmul.f32 %v7900_v10, %v11918_v36  ;;  %v8218_v49 = vmul.f32 %v11920_v21, %v7900_v10  ;;  %v11922_v38 = vld [vmem:[#allocation47_spill] sm:$0xff]  ;;  %v11924_v8 = vld [vmem:[#allocation53_spill] sm:$0xff] }
 0x343   :  { %11915 = vst [vmem:[#allocation112_spill] sm:$0xff] %v8206_v2  ;;  %11917 = vst [vmem:[#allocation106_spill] sm:$0xff] %v8210_v15  ;;  %v8222_v19 = vmul.f32 %v11922_v38, %v7900_v10  ;;  %v8226_v34 = vmul.f32 %v7900_v10, %v11924_v8  ;;  %v11926_v2 = vld [vmem:[#allocation57_spill] sm:$0xff]  ;;  %v11928_v15 = vld [vmem:[#allocation51_spill] sm:$0xff] }
 0x344   :  { %11919 = vst [vmem:[#allocation110_spill] sm:$0xff] %v8214_v13  ;;  %11921 = vst [vmem:[#allocation21_spill] sm:$0xff] %v8218_v49  ;;  %v8230_v45 = vmul.f32 %v7900_v10, %v11926_v2  ;;  %v8234_v36 = vmul.f32 %v11928_v15, %v7900_v10  ;;  %v11930_v13 = vld [vmem:[#allocation55_spill] sm:$0xff]  ;;  %v11932_v49 = vld [vmem:[#allocation61_spill] sm:$0xff] }
 0x345   :  { %11923 = vst [vmem:[#allocation25_spill] sm:$0xff] %v8222_v19  ;;  %11925 = vst [vmem:[#allocation19_spill] sm:$0xff] %v8226_v34  ;;  %v8238_v21 = vmul.f32 %v11930_v13, %v7900_v10  ;;  %v8242_v38 = vmul.f32 %v7900_v10, %v11932_v49  ;;  %v11934_v19 = vld [vmem:[#allocation65_spill] sm:$0xff]  ;;  %v11936_v34 = vld [vmem:[#allocation59_spill] sm:$0xff] }
 0x346   :  { %11927 = vst [vmem:[#allocation23_spill] sm:$0xff] %v8230_v45  ;;  %11929 = vst [vmem:[#allocation29_spill] sm:$0xff] %v8234_v36  ;;  %v8246_v8 = vmul.f32 %v7900_v10, %v11934_v19  ;;  %v8250_v2 = vmul.f32 %v11936_v34, %v7900_v10  ;;  %v11938_v45 = vld [vmem:[#allocation63_spill] sm:$0xff]  ;;  %v11940_v36 = vld [vmem:[#allocation69_spill] sm:$0xff] }
 0x347   :  { %11931 = vst [vmem:[#allocation33_spill] sm:$0xff] %v8238_v21  ;;  %11933 = vst [vmem:[#allocation27_spill] sm:$0xff] %v8242_v38  ;;  %v8254_v15 = vmul.f32 %v11938_v45, %v7900_v10  ;;  %v8258_v13 = vmul.f32 %v7900_v10, %v11940_v36  ;;  %v11942_v21 = vld [vmem:[#allocation73_spill] sm:$0xff]  ;;  %v11944_v38 = vld [vmem:[#allocation67_spill] sm:$0xff] }
 0x348   :  { %11935 = vst [vmem:[#allocation31_spill] sm:$0xff] %v8246_v8  ;;  %11937 = vst [vmem:[#allocation37_spill] sm:$0xff] %v8250_v2  ;;  %v8262_v49 = vmul.f32 %v7900_v10, %v11942_v21  ;;  %v8266_v19 = vmul.f32 %v11944_v38, %v7900_v10  ;;  %v11946_v8 = vld [vmem:[#allocation71_spill] sm:$0xff]  ;;  %v11948_v2 = vld [vmem:[#allocation77_spill] sm:$0xff] }
 0x349   :  { %11939 = vst [vmem:[#allocation41_spill] sm:$0xff] %v8254_v15  ;;  %11941 = vst [vmem:[#allocation35_spill] sm:$0xff] %v8258_v13  ;;  %v8270_v34 = vmul.f32 %v11946_v8, %v7900_v10  ;;  %v8274_v45 = vmul.f32 %v7900_v10, %v11948_v2  ;;  %v11950_v15 = vld [vmem:[#allocation81_spill] sm:$0xff]  ;;  %v11952_v13 = vld [vmem:[#allocation75_spill] sm:$0xff] }
 0x34a   :  { %11943 = vst [vmem:[#allocation39_spill] sm:$0xff] %v8262_v49  ;;  %11945 = vst [vmem:[#allocation45_spill] sm:$0xff] %v8266_v19  ;;  %v8278_v36 = vmul.f32 %v7900_v10, %v11950_v15  ;;  %v8282_v21 = vmul.f32 %v11952_v13, %v7900_v10  ;;  %v11954_v49 = vld [vmem:[#allocation79_spill] sm:$0xff]  ;;  %v11956_v19 = vld [vmem:[#allocation85_spill] sm:$0xff] }
 0x34b   :  { %11947 = vst [vmem:[#allocation49_spill] sm:$0xff] %v8270_v34  ;;  %11949 = vst [vmem:[#allocation43_spill] sm:$0xff] %v8274_v45  ;;  %v8286_v38 = vmul.f32 %v11954_v49, %v7900_v10  ;;  %v8290_v8 = vmul.f32 %v7900_v10, %v11956_v19  ;;  %v11958_v34 = vld [vmem:[#allocation89_spill] sm:$0xff]  ;;  %v11960_v45 = vld [vmem:[#allocation83_spill] sm:$0xff] }
 0x34c   :  { %11951 = vst [vmem:[#allocation47_spill] sm:$0xff] %v8278_v36  ;;  %11953 = vst [vmem:[#allocation53_spill] sm:$0xff] %v8282_v21  ;;  %v8294_v2 = vmul.f32 %v7900_v10, %v11958_v34  ;;  %v8298_v15 = vmul.f32 %v11960_v45, %v7900_v10  ;;  %v11962_v36 = vld [vmem:[#allocation87_spill] sm:$0xff]  ;;  %v11964_v21 = vld [vmem:[#allocation93_spill] sm:$0xff] }
 0x34d   :  { %11955 = vst [vmem:[#allocation57_spill] sm:$0xff] %v8286_v38  ;;  %11957 = vst [vmem:[#allocation51_spill] sm:$0xff] %v8290_v8  ;;  %v8302_v13 = vmul.f32 %v11962_v36, %v7900_v10  ;;  %v8306_v49 = vmul.f32 %v7900_v10, %v11964_v21  ;;  %v11966_v38 = vld [vmem:[#allocation97_spill] sm:$0xff]  ;;  %v11968_v8 = vld [vmem:[#allocation91_spill] sm:$0xff] }
 0x34e   :  { %11959 = vst [vmem:[#allocation55_spill] sm:$0xff] %v8294_v2  ;;  %11961 = vst [vmem:[#allocation61_spill] sm:$0xff] %v8298_v15  ;;  %v8310_v19 = vmul.f32 %v7900_v10, %v11966_v38  ;;  %v8314_v34 = vmul.f32 %v11968_v8, %v7900_v10  ;;  %v11970_v2 = vld [vmem:[#allocation95_spill] sm:$0xff]  ;;  %v11972_v15 = vld [vmem:[#allocation101_spill] sm:$0xff] }
 0x34f   :  { %11963 = vst [vmem:[#allocation65_spill] sm:$0xff] %v8302_v13  ;;  %11965 = vst [vmem:[#allocation59_spill] sm:$0xff] %v8306_v49  ;;  %v8318_v45 = vmul.f32 %v11970_v2, %v7900_v10  ;;  %v8322_v36 = vmul.f32 %v7900_v10, %v11972_v15  ;;  %v11974_v13 = vld [vmem:[#allocation105_spill] sm:$0xff]  ;;  %v11976_v49 = vld [vmem:[#allocation99_spill] sm:$0xff] }
 0x350   :  { %11967 = vst [vmem:[#allocation63_spill] sm:$0xff] %v8310_v19  ;;  %11969 = vst [vmem:[#allocation69_spill] sm:$0xff] %v8314_v34  ;;  %v8326_v21 = vmul.f32 %v7900_v10, %v11974_v13  ;;  %v8330_v38 = vmul.f32 %v11976_v49, %v7900_v10  ;;  %v11978_v19 = vld [vmem:[#allocation103_spill] sm:$0xff]  ;;  %v11980_v34 = vld [vmem:[#allocation109_spill] sm:$0xff] }
 0x351   :  { %11971 = vst [vmem:[#allocation73_spill] sm:$0xff] %v8318_v45  ;;  %11973 = vst [vmem:[#allocation67_spill] sm:$0xff] %v8322_v36  ;;  %v8334_v8 = vmul.f32 %v11978_v19, %v7900_v10  ;;  %v8338_v2 = vmul.f32 %v7900_v10, %v11980_v34  ;;  %v11982_v45 = vld [vmem:[#allocation113_spill] sm:$0xff]  ;;  %v11984_v36 = vld [vmem:[#allocation107_spill] sm:$0xff] }
 0x352   :  { %11975 = vst [vmem:[#allocation71_spill] sm:$0xff] %v8326_v21  ;;  %11977 = vst [vmem:[#allocation77_spill] sm:$0xff] %v8330_v38  ;;  %v8342_v15 = vmul.f32 %v7900_v10, %v11982_v45  ;;  %v8346_v13 = vmul.f32 %v11984_v36, %v7900_v10  ;;  %v11986_v21 = vld [vmem:[#allocation111_spill] sm:$0xff]  ;;  %v11988_v38 = vld [vmem:[#allocation116_spill] sm:$0xff] }
 0x353   :  { %11979 = vst [vmem:[#allocation81_spill] sm:$0xff] %v8334_v8  ;;  %11981 = vst [vmem:[#allocation75_spill] sm:$0xff] %v8338_v2  ;;  %v8350_v49 = vmul.f32 %v11986_v21, %v7900_v10  ;;  %v8354_v19 = vmul.f32 %v7900_v10, %v11988_v38  ;;  %v11990_v8 = vld [vmem:[#allocation120_spill] sm:$0xff]  ;;  %v11992_v2 = vld [vmem:[#allocation114_spill] sm:$0xff] }
 0x354   :  { %11983 = vst [vmem:[#allocation79_spill] sm:$0xff] %v8342_v15  ;;  %11985 = vst [vmem:[#allocation85_spill] sm:$0xff] %v8346_v13  ;;  %v8358_v34 = vmul.f32 %v7900_v10, %v11990_v8  ;;  %v8362_v45 = vmul.f32 %v11992_v2, %v7900_v10  ;;  %v11994_v15 = vld [vmem:[#allocation118_spill] sm:$0xff]  ;;  %v11996_v13 = vld [vmem:[#allocation123_spill] sm:$0xff] }
 0x355   :  { %11987 = vst [vmem:[#allocation89_spill] sm:$0xff] %v8350_v49  ;;  %11989 = vst [vmem:[#allocation83_spill] sm:$0xff] %v8354_v19  ;;  %v8366_v36 = vmul.f32 %v11994_v15, %v7900_v10  ;;  %v8370_v21 = vmul.f32 %v7900_v10, %v11996_v13  ;;  %v11998_v49 = vld [vmem:[#allocation126_spill] sm:$0xff] }
 0x356   :  { %11991 = vst [vmem:[#allocation87_spill] sm:$0xff] %v8358_v34  ;;  %11993 = vst [vmem:[#allocation93_spill] sm:$0xff] %v8362_v45  ;;  %v8374_v38 = vmul.f32 %v7900_v10, %v11998_v49  ;;  %v12000_v19 = vld [vmem:[#allocation122_spill] sm:$0xff]  ;;  %v12002_v34 = vld [vmem:[#allocation124_spill] sm:$0xff] }
 0x357   :  { %11995 = vst [vmem:[#allocation97_spill] sm:$0xff] %v8366_v36  ;;  %11997 = vst [vmem:[#allocation91_spill] sm:$0xff] %v8370_v21  ;;  %v8378_v8 = vmul.f32 %v12000_v19, %v7900_v10  ;;  %v8382_v2 = vmul.f32 %v12002_v34, %v7900_v10  ;;  %v12004_v45 = vld [vmem:[#allocation131_spill] sm:$0xff]  ;;  %v12006_v36 = vld [vmem:[#allocation134_spill] sm:$0xff] }
 0x358   :  { %11999 = vst [vmem:[#allocation95_spill] sm:$0xff] %v8374_v38  ;;  %v8386_v15 = vmul.f32 %v7900_v10, %v12004_v45  ;;  %v8390_v13 = vmul.f32 %v7900_v10, %v12006_v36  ;;  %v12008_v21 = vld [vmem:[#allocation130_spill] sm:$0xff]  ;;  %v12010_v38 = vld [vmem:[#allocation132_spill] sm:$0xff] }
 0x359   :  { %12001 = vst [vmem:[#allocation101_spill] sm:$0xff] %v8378_v8  ;;  %12003 = vst [vmem:[#allocation105_spill] sm:$0xff] %v8382_v2  ;;  %v8394_v49 = vmul.f32 %v12008_v21, %v7900_v10  ;;  %v8398_v19 = vmul.f32 %v12010_v38, %v7900_v10  ;;  %v12012_v8 = vld [vmem:[#allocation139_spill] sm:$0xff]  ;;  %v12014_v2 = vld [vmem:[#allocation142_spill] sm:$0xff] }
 0x35a   :  { %12005 = vst [vmem:[#allocation99_spill] sm:$0xff] %v8386_v15  ;;  %12007 = vst [vmem:[#allocation103_spill] sm:$0xff] %v8390_v13  ;;  %v8402_v34 = vmul.f32 %v7900_v10, %v12012_v8  ;;  %v8406_v45 = vmul.f32 %v7900_v10, %v12014_v2  ;;  %v12016_v15 = vld [vmem:[#allocation138_spill] sm:$0xff]  ;;  %v12018_v13 = vld [vmem:[#allocation140_spill] sm:$0xff] }
 0x35b   :  { %12009 = vst [vmem:[#allocation109_spill] sm:$0xff] %v8394_v49  ;;  %12011 = vst [vmem:[#allocation113_spill] sm:$0xff] %v8398_v19  ;;  %v8410_v36 = vmul.f32 %v12016_v15, %v7900_v10  ;;  %v8414_v21 = vmul.f32 %v12018_v13, %v7900_v10  ;;  %v12020_v49 = vld [vmem:[#allocation117_spill] sm:$0xff] }
 0x35c   :  { %12013 = vst [vmem:[#allocation107_spill] sm:$0xff] %v8402_v34  ;;  %12015 = vst [vmem:[#allocation111_spill] sm:$0xff] %v8406_v45  ;;  %v8418_v38 = vmul.f32 %v7900_v10, %v12020_v49  ;;  %v12022_v19 = vld [vmem:[#allocation121_spill] sm:$0xff]  ;;  %v12024_v34 = vld [vmem:[#allocation115_spill] sm:$0xff] }
 0x35d   :  { %12017 = vst [vmem:[#allocation116_spill] sm:$0xff] %v8410_v36  ;;  %12019 = vst [vmem:[#allocation120_spill] sm:$0xff] %v8414_v21  ;;  %v8422_v8 = vmul.f32 %v7900_v10, %v12022_v19  ;;  %v8426_v2 = vmul.f32 %v12024_v34, %v7900_v10  ;;  %v12026_v45 = vld [vmem:[#allocation119_spill] sm:$0xff]  ;;  %v12030_v21 = vld [vmem:[#allocation129_spill] sm:$0xff] }
 0x35e   :  { %12021 = vst [vmem:[#allocation114_spill] sm:$0xff] %v8418_v38  ;;  %v8430_v15 = vmul.f32 %v12026_v45, %v7900_v10  ;;  %v12028_v36 = vld [vmem:[#allocation127_spill] sm:$0xff]  ;;  %v8438_v49 = vmul.f32 %v7900_v10, %v12030_v21  ;;  %v12032_v38 = vld [vmem:[#allocation125_spill] sm:$0xff] }
 0x35f   :  { %12023 = vst [vmem:[#allocation118_spill] sm:$0xff] %v8422_v8  ;;  %12025 = vst [vmem:[#allocation123_spill] sm:$0xff] %v8426_v2  ;;  %v8434_v13 = vmul.f32 %v7900_v10, %v12028_v36  ;;  %v8442_v19 = vmul.f32 %v12032_v38, %v7900_v10  ;;  %v12034_v8 = vld [vmem:[#allocation128_spill] sm:$0xff]  ;;  %v12036_v2 = vld [vmem:[#allocation135_spill] sm:$0xff] }
 0x360   :  { %12027 = vst [vmem:[#allocation126_spill] sm:$0xff] %v8430_v15  ;;  %12031 = vst [vmem:[#allocation124_spill] sm:$0xff] %v8438_v49  ;;  %v8446_v34 = vmul.f32 %v12034_v8, %v7900_v10  ;;  %v8450_v45 = vmul.f32 %v7900_v10, %v12036_v2  ;;  %v12038_v15 = vld [vmem:[#allocation137_spill] sm:$0xff]  ;;  %v12042_v49 = vld [vmem:[#allocation136_spill] sm:$0xff] }
 0x361   :  { %12029 = vst [vmem:[#allocation122_spill] sm:$0xff] %v8434_v13  ;;  %12033 = vst [vmem:[#allocation131_spill] sm:$0xff] %v8442_v19  ;;  %v8454_v36 = vmul.f32 %v7900_v10, %v12038_v15  ;;  %v12040_v13 = vld [vmem:[#allocation133_spill] sm:$0xff]  ;;  %v8462_v38 = vmul.f32 %v12042_v49, %v7900_v10  ;;  %v12044_v19 = vld [vmem:[#allocation143_spill] sm:$0xff] }
 0x362   :  { %12035 = vst [vmem:[#allocation134_spill] sm:$0xff] %v8446_v34  ;;  %12037 = vst [vmem:[#allocation130_spill] sm:$0xff] %v8450_v45  ;;  %v8458_v21 = vmul.f32 %v12040_v13, %v7900_v10  ;;  %v8466_v8 = vmul.f32 %v7900_v10, %v12044_v19  ;;  %v12046_v34 = vld [vmem:[#allocation145_spill] sm:$0xff] }
 0x363   :  { %12039 = vst [vmem:[#allocation132_spill] sm:$0xff] %v8454_v36  ;;  %12043 = vst [vmem:[#allocation142_spill] sm:$0xff] %v8462_v38  ;;  %v8470_v2 = vmul.f32 %v7900_v10, %v12046_v34  ;;  %v12048_v45 = vld [vmem:[#allocation141_spill] sm:$0xff]  ;;  %v12050_v36 = vld [vmem:[#allocation144_spill] sm:$0xff] }
 0x364   :  { %12041 = vst [vmem:[#allocation139_spill] sm:$0xff] %v8458_v21  ;;  %12045 = vst [vmem:[#allocation138_spill] sm:$0xff] %v8466_v8  ;;  %v8474_v15 = vmul.f32 %v12048_v45, %v7900_v10  ;;  %v8478_v13 = vmul.f32 %v12050_v36, %v7900_v10  ;;  %v12052_v21 = vld [vmem:[#allocation147_spill] sm:$0xff]  ;;  %v12054_v38 = vld [vmem:[#allocation149_spill] sm:$0xff] }
 0x365   :  { %12047 = vst [vmem:[#allocation140_spill] sm:$0xff] %v8470_v2  ;;  %v8482_v49 = vmul.f32 %v7900_v10, %v12052_v21  ;;  %v8486_v19 = vmul.f32 %v7900_v10, %v12054_v38  ;;  %v12056_v8 = vld [vmem:[#allocation146_spill] sm:$0xff]  ;;  %v12058_v2 = vld [vmem:[#allocation148_spill] sm:$0xff] }
 0x366   :  { %12049 = vst [vmem:[#allocation117_spill] sm:$0xff] %v8474_v15  ;;  %12051 = vst [vmem:[#allocation121_spill] sm:$0xff] %v8478_v13  ;;  %v8490_v34 = vmul.f32 %v12056_v8, %v7900_v10  ;;  %v8494_v45 = vmul.f32 %v12058_v2, %v7900_v10  ;;  %v12060_v15 = vld [vmem:[#allocation151_spill] sm:$0xff]  ;;  %v12062_v13 = vld [vmem:[#allocation153_spill] sm:$0xff] }
 0x367   :  { %12053 = vst [vmem:[#allocation115_spill] sm:$0xff] %v8482_v49  ;;  %12055 = vst [vmem:[#allocation119_spill] sm:$0xff] %v8486_v19  ;;  %v8498_v36 = vmul.f32 %v7900_v10, %v12060_v15  ;;  %v8502_v21 = vmul.f32 %v7900_v10, %v12062_v13  ;;  %v12064_v49 = vld [vmem:[#allocation150_spill] sm:$0xff]  ;;  %v12066_v19 = vld [vmem:[#allocation152_spill] sm:$0xff] }
 0x368   :  { %12057 = vst [vmem:[#allocation127_spill] sm:$0xff] %v8490_v34  ;;  %12059 = vst [vmem:[#allocation129_spill] sm:$0xff] %v8494_v45  ;;  %v8506_v38 = vmul.f32 %v12064_v49, %v7900_v10  ;;  %v8510_v8 = vmul.f32 %v12066_v19, %v7900_v10  ;;  %v12068_v34 = vld [vmem:[#allocation155_spill] sm:$0xff]  ;;  %v12070_v45 = vld [vmem:[#allocation157_spill] sm:$0xff] }
 0x369   :  { %12061 = vst [vmem:[#allocation125_spill] sm:$0xff] %v8498_v36  ;;  %12063 = vst [vmem:[#allocation128_spill] sm:$0xff] %v8502_v21  ;;  %v8514_v2 = vmul.f32 %v7900_v10, %v12068_v34  ;;  %v8518_v15 = vmul.f32 %v7900_v10, %v12070_v45  ;;  %v12072_v36 = vld [vmem:[#allocation154_spill] sm:$0xff]  ;;  %v12074_v21 = vld [vmem:[#allocation156_spill] sm:$0xff] }
 0x36a   :  { %12065 = vst [vmem:[#allocation135_spill] sm:$0xff] %v8506_v38  ;;  %12067 = vst [vmem:[#allocation137_spill] sm:$0xff] %v8510_v8  ;;  %v8522_v13 = vmul.f32 %v12072_v36, %v7900_v10  ;;  %v8526_v49 = vmul.f32 %v12074_v21, %v7900_v10  ;;  %v12076_v38 = vld [vmem:[#allocation159_spill] sm:$0xff]  ;;  %v12078_v8 = vld [vmem:[#allocation161_spill] sm:$0xff] }
 0x36b   :  { %12069 = vst [vmem:[#allocation133_spill] sm:$0xff] %v8514_v2  ;;  %12071 = vst [vmem:[#allocation136_spill] sm:$0xff] %v8518_v15  ;;  %v8530_v19 = vmul.f32 %v7900_v10, %v12076_v38  ;;  %v8534_v34 = vmul.f32 %v7900_v10, %v12078_v8  ;;  %v12080_v2 = vld [vmem:[#allocation158_spill] sm:$0xff]  ;;  %v12082_v15 = vld [vmem:[#allocation160_spill] sm:$0xff] }
 0x36c   :  { %12073 = vst [vmem:[#allocation143_spill] sm:$0xff] %v8522_v13  ;;  %12075 = vst [vmem:[#allocation145_spill] sm:$0xff] %v8526_v49  ;;  %v8538_v45 = vmul.f32 %v12080_v2, %v7900_v10  ;;  %v8542_v36 = vmul.f32 %v12082_v15, %v7900_v10  ;;  %v12084_v13 = vld [vmem:[#allocation163_spill] sm:$0xff]  ;;  %v12086_v49 = vld [vmem:[#allocation165_spill] sm:$0xff] }
 0x36d   :  { %12077 = vst [vmem:[#allocation141_spill] sm:$0xff] %v8530_v19  ;;  %12079 = vst [vmem:[#allocation144_spill] sm:$0xff] %v8534_v34  ;;  %v8546_v21 = vmul.f32 %v7900_v10, %v12084_v13  ;;  %v8550_v38 = vmul.f32 %v7900_v10, %v12086_v49  ;;  %v12088_v19 = vld [vmem:[#allocation162_spill] sm:$0xff]  ;;  %v12090_v34 = vld [vmem:[#allocation164_spill] sm:$0xff] }
 0x36e   :  { %12081 = vst [vmem:[#allocation147_spill] sm:$0xff] %v8538_v45  ;;  %12083 = vst [vmem:[#allocation149_spill] sm:$0xff] %v8542_v36  ;;  %v8554_v8 = vmul.f32 %v12088_v19, %v7900_v10  ;;  %v8558_v2 = vmul.f32 %v12090_v34, %v7900_v10  ;;  %v12092_v45 = vld [vmem:[#allocation167_spill] sm:$0xff]  ;;  %v12094_v36 = vld [vmem:[#allocation169_spill] sm:$0xff] }
 0x36f   :  { %12085 = vst [vmem:[#allocation146_spill] sm:$0xff] %v8546_v21  ;;  %12087 = vst [vmem:[#allocation148_spill] sm:$0xff] %v8550_v38  ;;  %v8562_v15 = vmul.f32 %v7900_v10, %v12092_v45  ;;  %v8566_v13 = vmul.f32 %v7900_v10, %v12094_v36  ;;  %v12096_v21 = vld [vmem:[#allocation166_spill] sm:$0xff]  ;;  %v12098_v38 = vld [vmem:[#allocation168_spill] sm:$0xff] }
 0x370   :  { %12089 = vst [vmem:[#allocation151_spill] sm:$0xff] %v8554_v8  ;;  %12091 = vst [vmem:[#allocation153_spill] sm:$0xff] %v8558_v2  ;;  %v8570_v49 = vmul.f32 %v12096_v21, %v7900_v10  ;;  %v8574_v19 = vmul.f32 %v12098_v38, %v7900_v10  ;;  %v12100_v8 = vld [vmem:[#allocation171_spill] sm:$0xff]  ;;  %v12102_v2 = vld [vmem:[#allocation173_spill] sm:$0xff] }
 0x371   :  { %12093 = vst [vmem:[#allocation150_spill] sm:$0xff] %v8562_v15  ;;  %12095 = vst [vmem:[#allocation152_spill] sm:$0xff] %v8566_v13  ;;  %v8578_v34 = vmul.f32 %v7900_v10, %v12100_v8  ;;  %v8582_v45 = vmul.f32 %v7900_v10, %v12102_v2  ;;  %v12104_v15 = vld [vmem:[#allocation170_spill] sm:$0xff]  ;;  %v12106_v13 = vld [vmem:[#allocation172_spill] sm:$0xff] }
 0x372   :  { %12097 = vst [vmem:[#allocation155_spill] sm:$0xff] %v8570_v49  ;;  %12099 = vst [vmem:[#allocation157_spill] sm:$0xff] %v8574_v19  ;;  %v8586_v36 = vmul.f32 %v12104_v15, %v7900_v10  ;;  %v8590_v21 = vmul.f32 %v12106_v13, %v7900_v10  ;;  %v12108_v49 = vld [vmem:[#allocation175_spill] sm:$0xff]  ;;  %v12110_v19 = vld [vmem:[#allocation177_spill] sm:$0xff] }
 0x373   :  { %12101 = vst [vmem:[#allocation154_spill] sm:$0xff] %v8578_v34  ;;  %12103 = vst [vmem:[#allocation156_spill] sm:$0xff] %v8582_v45  ;;  %v8594_v38 = vmul.f32 %v7900_v10, %v12108_v49  ;;  %v8598_v8 = vmul.f32 %v7900_v10, %v12110_v19  ;;  %v12112_v34 = vld [vmem:[#allocation174_spill] sm:$0xff]  ;;  %v12114_v45 = vld [vmem:[#allocation176_spill] sm:$0xff] }
 0x374   :  { %12105 = vst [vmem:[#allocation159_spill] sm:$0xff] %v8586_v36  ;;  %12107 = vst [vmem:[#allocation161_spill] sm:$0xff] %v8590_v21  ;;  %v8602_v2 = vmul.f32 %v12112_v34, %v7900_v10  ;;  %v8606_v15 = vmul.f32 %v12114_v45, %v7900_v10  ;;  %v12116_v36 = vld [vmem:[#allocation179_spill] sm:$0xff]  ;;  %v12118_v21 = vld [vmem:[#allocation181_spill] sm:$0xff] }
 0x375   :  { %12109 = vst [vmem:[#allocation158_spill] sm:$0xff] %v8594_v38  ;;  %12111 = vst [vmem:[#allocation160_spill] sm:$0xff] %v8598_v8  ;;  %v8610_v13 = vmul.f32 %v7900_v10, %v12116_v36  ;;  %v8614_v49 = vmul.f32 %v7900_v10, %v12118_v21  ;;  %v12120_v38 = vld [vmem:[#allocation178_spill] sm:$0xff]  ;;  %v12122_v8 = vld [vmem:[#allocation180_spill] sm:$0xff] }
 0x376   :  { %12113 = vst [vmem:[#allocation163_spill] sm:$0xff] %v8602_v2  ;;  %12115 = vst [vmem:[#allocation165_spill] sm:$0xff] %v8606_v15  ;;  %v8618_v19 = vmul.f32 %v12120_v38, %v7900_v10  ;;  %v8622_v34 = vmul.f32 %v12122_v8, %v7900_v10  ;;  %v12124_v2 = vld [vmem:[#allocation183_spill] sm:$0xff]  ;;  %v12126_v15 = vld [vmem:[#allocation185_spill] sm:$0xff] }
 0x377   :  { %12117 = vst [vmem:[#allocation162_spill] sm:$0xff] %v8610_v13  ;;  %12119 = vst [vmem:[#allocation164_spill] sm:$0xff] %v8614_v49  ;;  %v8626_v45 = vmul.f32 %v7900_v10, %v12124_v2  ;;  %v8630_v36 = vmul.f32 %v7900_v10, %v12126_v15  ;;  %v12128_v13 = vld [vmem:[#allocation182_spill] sm:$0xff]  ;;  %v12130_v49 = vld [vmem:[#allocation184_spill] sm:$0xff] }
 0x378   :  { %12121 = vst [vmem:[#allocation167_spill] sm:$0xff] %v8618_v19  ;;  %12123 = vst [vmem:[#allocation169_spill] sm:$0xff] %v8622_v34  ;;  %v8634_v21 = vmul.f32 %v12128_v13, %v7900_v10  ;;  %v8638_v38 = vmul.f32 %v12130_v49, %v7900_v10  ;;  %v12132_v19 = vld [vmem:[#allocation187_spill] sm:$0xff]  ;;  %v12134_v34 = vld [vmem:[#allocation189_spill] sm:$0xff] }
 0x379   :  { %12125 = vst [vmem:[#allocation166_spill] sm:$0xff] %v8626_v45  ;;  %12127 = vst [vmem:[#allocation168_spill] sm:$0xff] %v8630_v36  ;;  %v8642_v8 = vmul.f32 %v7900_v10, %v12132_v19  ;;  %v8646_v2 = vmul.f32 %v7900_v10, %v12134_v34  ;;  %v12136_v45 = vld [vmem:[#allocation186_spill] sm:$0xff]  ;;  %v12138_v36 = vld [vmem:[#allocation188_spill] sm:$0xff] }
 0x37a   :  { %12129 = vst [vmem:[#allocation171_spill] sm:$0xff] %v8634_v21  ;;  %12131 = vst [vmem:[#allocation173_spill] sm:$0xff] %v8638_v38  ;;  %v8650_v15 = vmul.f32 %v12136_v45, %v7900_v10  ;;  %v8654_v13 = vmul.f32 %v12138_v36, %v7900_v10  ;;  %v12140_v21 = vld [vmem:[#allocation191_spill] sm:$0xff]  ;;  %v12142_v38 = vld [vmem:[#allocation193_spill] sm:$0xff] }
 0x37b   :  { %12133 = vst [vmem:[#allocation170_spill] sm:$0xff] %v8642_v8  ;;  %12135 = vst [vmem:[#allocation172_spill] sm:$0xff] %v8646_v2  ;;  %v8658_v49 = vmul.f32 %v7900_v10, %v12140_v21  ;;  %v8662_v19 = vmul.f32 %v7900_v10, %v12142_v38  ;;  %v12144_v8 = vld [vmem:[#allocation190_spill] sm:$0xff]  ;;  %v12145_v2 = vld [vmem:[#allocation192_spill] sm:$0xff] }
 0x37c   :  { %12137 = vst [vmem:[#allocation175_spill] sm:$0xff] %v8650_v15  ;;  %12139 = vst [vmem:[#allocation177_spill] sm:$0xff] %v8654_v13  ;;  %v8666_v34 = vmul.f32 %v12144_v8, %v7900_v10  ;;  %v8670_v45 = vmul.f32 %v12145_v2, %v7900_v10  ;;  %v12147_v15 = vld [vmem:[#allocation195_spill] sm:$0xff]  ;;  %v12149_v13 = vld [vmem:[#allocation197_spill] sm:$0xff]  ;;  %v8690_v2 = vmul.f32 %v7900_v10, %v11756_v4 }
 0x37d   :  { %12141 = vst [vmem:[#allocation174_spill] sm:$0xff] %v8658_v49  ;;  %12143 = vst [vmem:[#allocation176_spill] sm:$0xff] %v8662_v19  ;;  %v8674_v36 = vmul.f32 %v7900_v10, %v12147_v15  ;;  %v8678_v21 = vmul.f32 %v7900_v10, %v12149_v13  ;;  %v12151_v49 = vld [vmem:[#allocation194_spill] sm:$0xff]  ;;  %v12152_v19 = vld [vmem:[#allocation196_spill] sm:$0xff]  ;;  %v8710_v4 = vmul.f32 %v7900_v10, %v7182_v22 }
 0x37e   :  { %12146 = vst [vmem:[#allocation179_spill] sm:$0xff] %v8670_v45  ;;  %v8682_v38 = vmul.f32 %v12151_v49, %v7900_v10  ;;  %v8686_v8 = vmul.f32 %v12152_v19, %v7900_v10  ;;  %12153 = vst [vmem:[#allocation180_spill] sm:$0xff] %v8690_v2  ;;  %v12154_v45 = vld [vmem:[#allocation201_spill] sm:$0xff]  ;;  %v8706_v19 = vmul.f32 %v7900_v10, %v11760_v42  ;;  %v12158_v2 = vld [vmem:[#allocation202_spill] sm:$0xff] }
 0x37f   :  { %12148 = vst [vmem:[#allocation181_spill] sm:$0xff] %v8674_v36  ;;  %12150 = vst [vmem:[#allocation178_spill] sm:$0xff] %v8678_v21  ;;  %v8694_v15 = vmul.f32 %v7900_v10, %v12154_v45  ;;  %v12156_v36 = vld [vmem:[#allocation198_spill] sm:$0xff]  ;;  %v12157_v21 = vld [vmem:[#allocation200_spill] sm:$0xff]  ;;  %v8714_v45 = vmul.f32 %v12158_v2, %v7900_v10  ;;  %v8726_v42 = vmul.f32 %v7900_v10, %v7210_v5 }
 0x380   :  { %v8698_v13 = vmul.f32 %v12156_v36, %v7900_v10  ;;  %v8702_v49 = vmul.f32 %v12157_v21, %v7900_v10  ;;  %v8722_v21 = vmul.f32 %v7900_v10, %v7201_v26  ;;  %v8730_v22 = vmul.f32 %v11763_v16, %v7900_v10 }
 0x381   :  { %12155 = vst [vmem:[#allocation183_spill] sm:$0xff] %v8694_v15  ;;  %v12159_v15 = vld [vmem:[#allocation204_spill] sm:$0xff]  ;;  %12161 = vst [vmem:[#allocation182_spill] sm:$0xff] %v8726_v42  ;;  %v8734_v2 = vmul.f32 %v7208_v30, %v7900_v10  ;;  %v8742_v26 = vmul.f32 %v7900_v10, %v7238_v6  ;;  %v12163_v42 = vld [vmem:[#allocation207_spill] sm:$0xff]  ;;  %v8754_v30 = vmul.f32 %v7900_v10, %v7257_v18 }
 0x382   :  { %v8718_v36 = vmul.f32 %v12159_v15, %v7900_v10  ;;  %12160 = vst [vmem:[#allocation185_spill] sm:$0xff] %v8722_v21  ;;  %v8738_v15 = vmul.f32 %v7900_v10, %v7229_v46  ;;  %v12162_v21 = vld [vmem:[#allocation206_spill] sm:$0xff]  ;;  %v8750_v16 = vmul.f32 %v12163_v42, %v7900_v10  ;;  %v8758_v46 = vmul.f32 %v7900_v10, %v7266_v58 }
 0x383   :  { %v8746_v5 = vmul.f32 %v12162_v21, %v7900_v10  ;;  %v8762_v6 = vmul.f32 %v11765_v20, %v7900_v10  ;;  %v8766_v21 = vmul.f32 %v7264_v52, %v7900_v10  ;;  %v8770_v42 = vmul.f32 %v7900_v10, %v7285_v39 }
 0x384   :  { %v8774_v18 = vmul.f32 %v7900_v10, %v7294_v61  ;;  %v8778_v58 = vmul.f32 %v7283_v51, %v7900_v10  ;;  %v8782_v20 = vmul.f32 %v7292_v17, %v7900_v10  ;;  %v8786_v52 = vmul.f32 %v7900_v10, %v7313_v14 }
 0x385   :  { %v8790_v39 = vmul.f32 %v7900_v10, %v7322_v0  ;;  %v8794_v61 = vmul.f32 %v7311_v62, %v7900_v10  ;;  %v8798_v51 = vmul.f32 %v7320_v54, %v7900_v10  ;;  %v8802_v17 = vmul.f32 %v7900_v10, %v7341_v47 }
 0x386   :  { %v8806_v14 = vmul.f32 %v7900_v10, %v7350_v60  ;;  %v8810_v0 = vmul.f32 %v7339_v23, %v7900_v10  ;;  %v8814_v62 = vmul.f32 %v7348_v56, %v7900_v10  ;;  %v8818_v54 = vmul.f32 %v7900_v10, %v7369_v28 }
 0x387   :  { %v8822_v47 = vmul.f32 %v7900_v10, %v7378_v9  ;;  %v8826_v60 = vmul.f32 %v7367_v55, %v7900_v10  ;;  %v8830_v23 = vmul.f32 %v7376_v29, %v7900_v10  ;;  %v8834_v56 = vmul.f32 %v7900_v10, %v7397_v33 }
 0x388   :  { %v8838_v28 = vmul.f32 %v7900_v10, %v7406_v31  ;;  %v8842_v9 = vmul.f32 %v7395_v59, %v7900_v10  ;;  %v8846_v55 = vmul.f32 %v7404_v53, %v7900_v10  ;;  %v8850_v29 = vmul.f32 %v7900_v10, %v7425_v50 }
 0x389   :  { %12164 = vst [vmem:[#allocation184_spill] sm:$0xff] %v8834_v56  ;;  %v8854_v33 = vmul.f32 %v7900_v10, %v7434_v1  ;;  %v12168_v56 = vld [vmem:[#allocation209_spill] sm:$0xff]  ;;  %v8866_v53 = vmul.f32 %v7900_v10, %v7453_v3  ;;  %v8870_v50 = vmul.f32 %v7900_v10, %v7462_v57  ;;  %v8886_v3 = vmul.f32 %v7900_v10, %v7490_v7 }
 0x38a   :  { %12165 = vst [vmem:[#allocation187_spill] sm:$0xff] %v8838_v28  ;;  %12166 = vst [vmem:[#allocation189_spill] sm:$0xff] %v8850_v29  ;;  %v8858_v31 = vmul.f32 %v12168_v56, %v7900_v10  ;;  %v12169_v28 = vld [vmem:[#allocation210_spill] sm:$0xff]  ;;  %v12171_v29 = vld [vmem:[#allocation211_spill] sm:$0xff]  ;;  %v8890_v57 = vmul.f32 %v11769_v32, %v7900_v10 }
 0x38b   :  { %12167 = vst [vmem:[#allocation186_spill] sm:$0xff] %v8854_v33  ;;  %v8862_v59 = vmul.f32 %v12169_v28, %v7900_v10  ;;  %12170 = vst [vmem:[#allocation188_spill] sm:$0xff] %v8870_v50  ;;  %v8874_v1 = vmul.f32 %v12171_v29, %v7900_v10  ;;  %v12173_v33 = vld [vmem:[#allocation212_spill] sm:$0xff]  ;;  %v8882_v28 = vmul.f32 %v7900_v10, %v7481_v63  ;;  %v12178_v50 = vld [vmem:[#allocation214_spill] sm:$0xff] }
 0x38c   :  { %v8878_v56 = vmul.f32 %v12173_v33, %v7900_v10  ;;  %12176 = vst [vmem:[#allocation192_spill] sm:$0xff] %v8886_v3  ;;  %12177 = vst [vmem:[#allocation195_spill] sm:$0xff] %v8890_v57  ;;  %v8894_v29 = vmul.f32 %v12178_v50, %v7900_v10  ;;  %v12186_v3 = vld [vmem:[#allocation217_spill] sm:$0xff]  ;;  %v12188_v57 = vld [vmem:[#allocation220_spill] sm:$0xff] }
 0x38d   :  { %12172 = vst [vmem:[#allocation191_spill] sm:$0xff] %v8874_v1  ;;  %12175 = vst [vmem:[#allocation190_spill] sm:$0xff] %v8882_v28  ;;  %v12180_v1 = vld [vmem:[#allocation216_spill] sm:$0xff]  ;;  %v12184_v28 = vld [vmem:[#allocation215_spill] sm:$0xff]  ;;  %v8910_v32 = vmul.f32 %v12186_v3, %v7900_v10  ;;  %v8914_v50 = vmul.f32 %v7900_v10, %v12188_v57  ;;  %v12193_v3 = vsub.f32 %v7894_v48, %v7896_v41 }
 0x38e   :  { %12174 = vst [vmem:[#allocation193_spill] sm:$0xff] %v8878_v56  ;;  %12179 = vst [vmem:[#allocation197_spill] sm:$0xff] %v8894_v29  ;;  %v8898_v33 = vmul.f32 %v7900_v10, %v12180_v1  ;;  %v12182_v56 = vld [vmem:[#allocation218_spill] sm:$0xff]  ;;  %v8906_v7 = vmul.f32 %v12184_v28, %v7900_v10 }
 0x38f   :  { %v8902_v63 = vmul.f32 %v7900_v10, %v12182_v56  ;;  %12187 = vst [vmem:[#allocation198_spill] sm:$0xff] %v8910_v32  ;;  %v12189_v29 = vld [vmem:[#allocation222_spill] sm:$0xff] }
 0x390   :  { %12181 = vst [vmem:[#allocation194_spill] sm:$0xff] %v8898_v33  ;;  %12185 = vst [vmem:[#allocation201_spill] sm:$0xff] %v8906_v7  ;;  %v8918_v1 = vmul.f32 %v7900_v10, %v12189_v29  ;;  %v12190_v33 = vld [vmem:[#allocation219_spill] sm:$0xff]  ;;  %v12192_v7 = vsub.s32 0, %v7885_v27 }
 0x391   :  { %12183 = vst [vmem:[#allocation196_spill] sm:$0xff] %v8902_v63  ;;  %v8922_v56 = vmul.f32 %v12190_v33, %v7900_v10  ;;  %v12191_v63 = vld [vmem:[#allocation221_spill] sm:$0xff] }
 0x392   :  { %v8926_v28 = vmul.f32 %v12191_v63, %v7900_v10  ;;  %v8933_v32 = vrot.slane %v12193_v3, %v12192_v7  ;;  %v12199_v63 = vld [vmem:[#allocation205_spill] sm:$0xff]  ;;  %v12201_v7 = vld [vmem:[#allocation208_spill] sm:$0xff] }
 0x393   :  { %v12203_v3 = vld [vmem:[#allocation213_spill] sm:$0xff] }
 0x394   :  { %v8937_v57 = vadd.f32 %v8933_v32, %v7906_v25  ;;  %v8941_v29 = vadd.f32 %v8933_v32, %v7910_v43  ;;  %v8945_v33 = vadd.f32 %v8933_v32, %v7914_v44  ;;  %v8949_v27 = vadd.f32 %v8933_v32, %v7918_v11  ;;  %v12195_v44 = vld [vmem:[#allocation199_spill] sm:$0xff] }
 0x395   :  { %v8953_v48 = vadd.f32 %v8933_v32, %v7922_v40  ;;  %v8957_v41 = vadd.f32 %v8933_v32, %v7926_v35  ;;  %v8961_v10 = vadd.f32 %v8933_v32, %v7930_v37  ;;  %v8965_v25 = vadd.f32 %v8933_v32, %v7934_v12  ;;  %v12197_v40 = vld [vmem:[#allocation203_spill] sm:$0xff] }
 0x396   :  { %v8969_v43 = vadd.f32 %v8933_v32, %v7938_v24  ;;  %v8973_v11 = vadd.f32 %v8933_v32, %v12195_v44  ;;  %v8977_v35 = vadd.f32 %v8933_v32, %v12197_v40  ;;  %v8981_v37 = vadd.f32 %v8933_v32, %v12199_v63 }
 0x397   :  { %v8985_v12 = vadd.f32 %v8933_v32, %v12201_v7  ;;  %v8989_v24 = vadd.f32 %v8933_v32, %v12203_v3 }
 0x398   :  { %12194 = vst [vmem:[#allocation200_spill] sm:$0xff] %v8969_v43  ;;  %12196 = vst [vmem:[#allocation202_spill] sm:$0xff] %v8973_v11  ;;  %v12205_v43 = vld [vmem:[#allocation3_spill] sm:$0xff]  ;;  %v12207_v11 = vld [vmem:[#allocation5_spill] sm:$0xff] }
 0x399   :  { %12198 = vst [vmem:[#allocation204_spill] sm:$0xff] %v8977_v35  ;;  %12200 = vst [vmem:[#allocation206_spill] sm:$0xff] %v8981_v37  ;;  %v8993_v44 = vadd.f32 %v8933_v32, %v12205_v43  ;;  %v8997_v40 = vadd.f32 %v8933_v32, %v12207_v11  ;;  %v12209_v35 = vld [vmem:[#allocation2_spill] sm:$0xff]  ;;  %v12211_v37 = vld [vmem:[#allocation4_spill] sm:$0xff] }
 0x39a   :  { %12202 = vst [vmem:[#allocation207_spill] sm:$0xff] %v8985_v12  ;;  %12204 = vst [vmem:[#allocation209_spill] sm:$0xff] %v8989_v24  ;;  %v9001_v63 = vadd.f32 %v8933_v32, %v12209_v35  ;;  %v9005_v7 = vadd.f32 %v8933_v32, %v12211_v37  ;;  %v12213_v12 = vld [vmem:[#allocation7_spill] sm:$0xff]  ;;  %v12215_v24 = vld [vmem:[#allocation9_spill] sm:$0xff] }
 0x39b   :  { %12206 = vst [vmem:[#allocation210_spill] sm:$0xff] %v8993_v44  ;;  %12208 = vst [vmem:[#allocation211_spill] sm:$0xff] %v8997_v40  ;;  %v9009_v3 = vadd.f32 %v8933_v32, %v12213_v12  ;;  %v9013_v43 = vadd.f32 %v8933_v32, %v12215_v24  ;;  %v12217_v44 = vld [vmem:[#allocation6_spill] sm:$0xff]  ;;  %v12219_v40 = vld [vmem:[#allocation8_spill] sm:$0xff] }
 0x39c   :  { %12210 = vst [vmem:[#allocation212_spill] sm:$0xff] %v9001_v63  ;;  %12212 = vst [vmem:[#allocation214_spill] sm:$0xff] %v9005_v7  ;;  %v9017_v11 = vadd.f32 %v8933_v32, %v12217_v44  ;;  %v9021_v35 = vadd.f32 %v8933_v32, %v12219_v40  ;;  %v12221_v63 = vld [vmem:[#allocation11_spill] sm:$0xff]  ;;  %v12223_v7 = vld [vmem:[#allocation13_spill] sm:$0xff] }
 0x39d   :  { %12214 = vst [vmem:[#allocation216_spill] sm:$0xff] %v9009_v3  ;;  %12216 = vst [vmem:[#allocation218_spill] sm:$0xff] %v9013_v43  ;;  %v9025_v37 = vadd.f32 %v8933_v32, %v12221_v63  ;;  %v9029_v12 = vadd.f32 %v8933_v32, %v12223_v7  ;;  %v12225_v3 = vld [vmem:[#allocation10_spill] sm:$0xff]  ;;  %v12227_v43 = vld [vmem:[#allocation12_spill] sm:$0xff] }
 0x39e   :  { %12218 = vst [vmem:[#allocation215_spill] sm:$0xff] %v9017_v11  ;;  %12220 = vst [vmem:[#allocation217_spill] sm:$0xff] %v9021_v35  ;;  %v9033_v24 = vadd.f32 %v8933_v32, %v12225_v3  ;;  %v9037_v44 = vadd.f32 %v8933_v32, %v12227_v43  ;;  %v12229_v11 = vld [vmem:[#allocation15_spill] sm:$0xff]  ;;  %v12231_v35 = vld [vmem:[#allocation17_spill] sm:$0xff] }
 0x39f   :  { %12222 = vst [vmem:[#allocation220_spill] sm:$0xff] %v9025_v37  ;;  %12224 = vst [vmem:[#allocation222_spill] sm:$0xff] %v9029_v12  ;;  %v9041_v40 = vadd.f32 %v8933_v32, %v12229_v11  ;;  %v9045_v63 = vadd.f32 %v8933_v32, %v12231_v35  ;;  %v12233_v37 = vld [vmem:[#allocation14_spill] sm:$0xff]  ;;  %v12235_v12 = vld [vmem:[#allocation16_spill] sm:$0xff] }
 0x3a0   :  { %12226 = vst [vmem:[#allocation219_spill] sm:$0xff] %v9033_v24  ;;  %12228 = vst [vmem:[#allocation221_spill] sm:$0xff] %v9037_v44  ;;  %v9049_v7 = vadd.f32 %v8933_v32, %v12233_v37  ;;  %v9053_v3 = vadd.f32 %v8933_v32, %v12235_v12  ;;  %v12237_v24 = vld [vmem:[#allocation20_spill] sm:$0xff] }
 0x3a1   :  { %12230 = vst [vmem:[#allocation199_spill] sm:$0xff] %v9041_v40  ;;  %12232 = vst [vmem:[#allocation203_spill] sm:$0xff] %v9045_v63  ;;  %v9057_v43 = vadd.f32 %v8933_v32, %v12237_v24  ;;  %v12239_v44 = vld [vmem:[#allocation24_spill] sm:$0xff]  ;;  %v12241_v40 = vld [vmem:[#allocation18_spill] sm:$0xff] }
 0x3a2   :  { %12234 = vst [vmem:[#allocation205_spill] sm:$0xff] %v9049_v7  ;;  %12236 = vst [vmem:[#allocation208_spill] sm:$0xff] %v9053_v3  ;;  %v9061_v11 = vadd.f32 %v8933_v32, %v12239_v44  ;;  %v9065_v35 = vadd.f32 %v8933_v32, %v12241_v40  ;;  %v12243_v63 = vld [vmem:[#allocation22_spill] sm:$0xff]  ;;  %v12245_v7 = vld [vmem:[#allocation28_spill] sm:$0xff] }
 0x3a3   :  { %12238 = vst [vmem:[#allocation213_spill] sm:$0xff] %v9057_v43  ;;  %v9069_v37 = vadd.f32 %v8933_v32, %v12243_v63  ;;  %v9073_v12 = vadd.f32 %v8933_v32, %v12245_v7  ;;  %v12247_v3 = vld [vmem:[#allocation32_spill] sm:$0xff]  ;;  %v12249_v43 = vld [vmem:[#allocation26_spill] sm:$0xff] }
 0x3a4   :  { %12240 = vst [vmem:[#allocation3_spill] sm:$0xff] %v9061_v11  ;;  %12242 = vst [vmem:[#allocation5_spill] sm:$0xff] %v9065_v35  ;;  %v9077_v24 = vadd.f32 %v8933_v32, %v12247_v3  ;;  %v9081_v44 = vadd.f32 %v8933_v32, %v12249_v43  ;;  %v12251_v11 = vld [vmem:[#allocation30_spill] sm:$0xff]  ;;  %v12253_v35 = vld [vmem:[#allocation36_spill] sm:$0xff] }
 0x3a5   :  { %12244 = vst [vmem:[#allocation2_spill] sm:$0xff] %v9069_v37  ;;  %12246 = vst [vmem:[#allocation4_spill] sm:$0xff] %v9073_v12  ;;  %v9085_v40 = vadd.f32 %v8933_v32, %v12251_v11  ;;  %v9089_v63 = vadd.f32 %v8933_v32, %v12253_v35  ;;  %v12255_v37 = vld [vmem:[#allocation40_spill] sm:$0xff]  ;;  %v12257_v12 = vld [vmem:[#allocation34_spill] sm:$0xff] }
 0x3a6   :  { %12248 = vst [vmem:[#allocation7_spill] sm:$0xff] %v9077_v24  ;;  %12250 = vst [vmem:[#allocation9_spill] sm:$0xff] %v9081_v44  ;;  %v9093_v7 = vadd.f32 %v8933_v32, %v12255_v37  ;;  %v9097_v3 = vadd.f32 %v8933_v32, %v12257_v12  ;;  %v12259_v24 = vld [vmem:[#allocation38_spill] sm:$0xff]  ;;  %v12261_v44 = vld [vmem:[#allocation44_spill] sm:$0xff] }
 0x3a7   :  { %12252 = vst [vmem:[#allocation6_spill] sm:$0xff] %v9085_v40  ;;  %12254 = vst [vmem:[#allocation8_spill] sm:$0xff] %v9089_v63  ;;  %v9101_v43 = vadd.f32 %v8933_v32, %v12259_v24  ;;  %v9105_v11 = vadd.f32 %v8933_v32, %v12261_v44  ;;  %v12263_v40 = vld [vmem:[#allocation48_spill] sm:$0xff]  ;;  %v12265_v63 = vld [vmem:[#allocation42_spill] sm:$0xff] }
 0x3a8   :  { %12256 = vst [vmem:[#allocation11_spill] sm:$0xff] %v9093_v7  ;;  %12258 = vst [vmem:[#allocation13_spill] sm:$0xff] %v9097_v3  ;;  %v9109_v35 = vadd.f32 %v8933_v32, %v12263_v40  ;;  %v9113_v37 = vadd.f32 %v8933_v32, %v12265_v63  ;;  %v12267_v7 = vld [vmem:[#allocation46_spill] sm:$0xff]  ;;  %v12269_v3 = vld [vmem:[#allocation52_spill] sm:$0xff] }
 0x3a9   :  { %12260 = vst [vmem:[#allocation10_spill] sm:$0xff] %v9101_v43  ;;  %12262 = vst [vmem:[#allocation12_spill] sm:$0xff] %v9105_v11  ;;  %v9117_v12 = vadd.f32 %v8933_v32, %v12267_v7  ;;  %v9121_v24 = vadd.f32 %v8933_v32, %v12269_v3  ;;  %v12271_v43 = vld [vmem:[#allocation56_spill] sm:$0xff]  ;;  %v12273_v11 = vld [vmem:[#allocation50_spill] sm:$0xff] }
 0x3aa   :  { %12264 = vst [vmem:[#allocation15_spill] sm:$0xff] %v9109_v35  ;;  %12266 = vst [vmem:[#allocation17_spill] sm:$0xff] %v9113_v37  ;;  %v9125_v44 = vadd.f32 %v8933_v32, %v12271_v43  ;;  %v9129_v40 = vadd.f32 %v8933_v32, %v12273_v11  ;;  %v12275_v35 = vld [vmem:[#allocation54_spill] sm:$0xff]  ;;  %v12277_v37 = vld [vmem:[#allocation60_spill] sm:$0xff] }
 0x3ab   :  { %12268 = vst [vmem:[#allocation14_spill] sm:$0xff] %v9117_v12  ;;  %12270 = vst [vmem:[#allocation16_spill] sm:$0xff] %v9121_v24  ;;  %v9133_v63 = vadd.f32 %v8933_v32, %v12275_v35  ;;  %v9137_v7 = vadd.f32 %v8933_v32, %v12277_v37  ;;  %v12279_v12 = vld [vmem:[#allocation64_spill] sm:$0xff]  ;;  %v12281_v24 = vld [vmem:[#allocation58_spill] sm:$0xff] }
 0x3ac   :  { %12272 = vst [vmem:[#allocation20_spill] sm:$0xff] %v9125_v44  ;;  %12274 = vst [vmem:[#allocation24_spill] sm:$0xff] %v9129_v40  ;;  %v9141_v3 = vadd.f32 %v8933_v32, %v12279_v12  ;;  %v9145_v43 = vadd.f32 %v8933_v32, %v12281_v24  ;;  %v12283_v44 = vld [vmem:[#allocation62_spill] sm:$0xff]  ;;  %v12285_v40 = vld [vmem:[#allocation68_spill] sm:$0xff] }
 0x3ad   :  { %12276 = vst [vmem:[#allocation18_spill] sm:$0xff] %v9133_v63  ;;  %12278 = vst [vmem:[#allocation22_spill] sm:$0xff] %v9137_v7  ;;  %v9149_v11 = vadd.f32 %v8933_v32, %v12283_v44  ;;  %v9153_v35 = vadd.f32 %v8933_v32, %v12285_v40  ;;  %v12287_v63 = vld [vmem:[#allocation72_spill] sm:$0xff]  ;;  %v12289_v7 = vld [vmem:[#allocation66_spill] sm:$0xff] }
 0x3ae   :  { %12280 = vst [vmem:[#allocation28_spill] sm:$0xff] %v9141_v3  ;;  %12282 = vst [vmem:[#allocation32_spill] sm:$0xff] %v9145_v43  ;;  %v9157_v37 = vadd.f32 %v8933_v32, %v12287_v63  ;;  %v9161_v12 = vadd.f32 %v8933_v32, %v12289_v7  ;;  %v12291_v3 = vld [vmem:[#allocation70_spill] sm:$0xff]  ;;  %v12293_v43 = vld [vmem:[#allocation76_spill] sm:$0xff] }
 0x3af   :  { %12284 = vst [vmem:[#allocation26_spill] sm:$0xff] %v9149_v11  ;;  %12286 = vst [vmem:[#allocation30_spill] sm:$0xff] %v9153_v35  ;;  %v9165_v24 = vadd.f32 %v8933_v32, %v12291_v3  ;;  %v9169_v44 = vadd.f32 %v8933_v32, %v12293_v43  ;;  %v12295_v11 = vld [vmem:[#allocation80_spill] sm:$0xff]  ;;  %v12297_v35 = vld [vmem:[#allocation74_spill] sm:$0xff] }
 0x3b0   :  { %12288 = vst [vmem:[#allocation36_spill] sm:$0xff] %v9157_v37  ;;  %12290 = vst [vmem:[#allocation40_spill] sm:$0xff] %v9161_v12  ;;  %v9173_v40 = vadd.f32 %v8933_v32, %v12295_v11  ;;  %v9177_v63 = vadd.f32 %v8933_v32, %v12297_v35  ;;  %v12299_v37 = vld [vmem:[#allocation78_spill] sm:$0xff]  ;;  %v12301_v12 = vld [vmem:[#allocation84_spill] sm:$0xff] }
 0x3b1   :  { %12292 = vst [vmem:[#allocation34_spill] sm:$0xff] %v9165_v24  ;;  %12294 = vst [vmem:[#allocation38_spill] sm:$0xff] %v9169_v44  ;;  %v9181_v7 = vadd.f32 %v8933_v32, %v12299_v37  ;;  %v9185_v3 = vadd.f32 %v8933_v32, %v12301_v12  ;;  %v12303_v24 = vld [vmem:[#allocation88_spill] sm:$0xff]  ;;  %v12305_v44 = vld [vmem:[#allocation82_spill] sm:$0xff] }
 0x3b2   :  { %12296 = vst [vmem:[#allocation44_spill] sm:$0xff] %v9173_v40  ;;  %12298 = vst [vmem:[#allocation48_spill] sm:$0xff] %v9177_v63  ;;  %v9189_v43 = vadd.f32 %v8933_v32, %v12303_v24  ;;  %v9193_v11 = vadd.f32 %v8933_v32, %v12305_v44  ;;  %v12307_v40 = vld [vmem:[#allocation86_spill] sm:$0xff]  ;;  %v12309_v63 = vld [vmem:[#allocation92_spill] sm:$0xff] }
 0x3b3   :  { %12300 = vst [vmem:[#allocation42_spill] sm:$0xff] %v9181_v7  ;;  %12302 = vst [vmem:[#allocation46_spill] sm:$0xff] %v9185_v3  ;;  %v9197_v35 = vadd.f32 %v8933_v32, %v12307_v40  ;;  %v9201_v37 = vadd.f32 %v8933_v32, %v12309_v63  ;;  %v12311_v7 = vld [vmem:[#allocation96_spill] sm:$0xff]  ;;  %v12313_v3 = vld [vmem:[#allocation90_spill] sm:$0xff] }
 0x3b4   :  { %12304 = vst [vmem:[#allocation52_spill] sm:$0xff] %v9189_v43  ;;  %12306 = vst [vmem:[#allocation56_spill] sm:$0xff] %v9193_v11  ;;  %v9205_v12 = vadd.f32 %v8933_v32, %v12311_v7  ;;  %v9209_v24 = vadd.f32 %v8933_v32, %v12313_v3  ;;  %v12315_v43 = vld [vmem:[#allocation94_spill] sm:$0xff]  ;;  %v12317_v11 = vld [vmem:[#allocation100_spill] sm:$0xff] }
 0x3b5   :  { %12308 = vst [vmem:[#allocation50_spill] sm:$0xff] %v9197_v35  ;;  %12310 = vst [vmem:[#allocation54_spill] sm:$0xff] %v9201_v37  ;;  %v9213_v44 = vadd.f32 %v8933_v32, %v12315_v43  ;;  %v9217_v40 = vadd.f32 %v8933_v32, %v12317_v11  ;;  %v12319_v35 = vld [vmem:[#allocation104_spill] sm:$0xff]  ;;  %v12321_v37 = vld [vmem:[#allocation98_spill] sm:$0xff] }
 0x3b6   :  { %12312 = vst [vmem:[#allocation60_spill] sm:$0xff] %v9205_v12  ;;  %12314 = vst [vmem:[#allocation64_spill] sm:$0xff] %v9209_v24  ;;  %v9221_v63 = vadd.f32 %v8933_v32, %v12319_v35  ;;  %v9225_v7 = vadd.f32 %v8933_v32, %v12321_v37  ;;  %v12323_v12 = vld [vmem:[#allocation102_spill] sm:$0xff]  ;;  %v12325_v24 = vld [vmem:[#allocation108_spill] sm:$0xff] }
 0x3b7   :  { %12316 = vst [vmem:[#allocation58_spill] sm:$0xff] %v9213_v44  ;;  %12318 = vst [vmem:[#allocation62_spill] sm:$0xff] %v9217_v40  ;;  %v9229_v3 = vadd.f32 %v8933_v32, %v12323_v12  ;;  %v9233_v43 = vadd.f32 %v8933_v32, %v12325_v24  ;;  %v12327_v44 = vld [vmem:[#allocation112_spill] sm:$0xff]  ;;  %v12329_v40 = vld [vmem:[#allocation106_spill] sm:$0xff] }
 0x3b8   :  { %12320 = vst [vmem:[#allocation68_spill] sm:$0xff] %v9221_v63  ;;  %12322 = vst [vmem:[#allocation72_spill] sm:$0xff] %v9225_v7  ;;  %v9237_v11 = vadd.f32 %v8933_v32, %v12327_v44  ;;  %v9241_v35 = vadd.f32 %v8933_v32, %v12329_v40  ;;  %v12331_v63 = vld [vmem:[#allocation110_spill] sm:$0xff]  ;;  %v12333_v7 = vld [vmem:[#allocation21_spill] sm:$0xff] }
 0x3b9   :  { %12324 = vst [vmem:[#allocation66_spill] sm:$0xff] %v9229_v3  ;;  %12326 = vst [vmem:[#allocation70_spill] sm:$0xff] %v9233_v43  ;;  %v9245_v37 = vadd.f32 %v8933_v32, %v12331_v63  ;;  %v9249_v12 = vadd.f32 %v8933_v32, %v12333_v7  ;;  %v12335_v3 = vld [vmem:[#allocation25_spill] sm:$0xff]  ;;  %v12337_v43 = vld [vmem:[#allocation19_spill] sm:$0xff] }
 0x3ba   :  { %12328 = vst [vmem:[#allocation76_spill] sm:$0xff] %v9237_v11  ;;  %12330 = vst [vmem:[#allocation80_spill] sm:$0xff] %v9241_v35  ;;  %v9253_v24 = vadd.f32 %v8933_v32, %v12335_v3  ;;  %v9257_v44 = vadd.f32 %v8933_v32, %v12337_v43  ;;  %v12339_v11 = vld [vmem:[#allocation23_spill] sm:$0xff]  ;;  %v12341_v35 = vld [vmem:[#allocation29_spill] sm:$0xff] }
 0x3bb   :  { %12332 = vst [vmem:[#allocation74_spill] sm:$0xff] %v9245_v37  ;;  %12334 = vst [vmem:[#allocation78_spill] sm:$0xff] %v9249_v12  ;;  %v9261_v40 = vadd.f32 %v8933_v32, %v12339_v11  ;;  %v9265_v63 = vadd.f32 %v8933_v32, %v12341_v35  ;;  %v12343_v37 = vld [vmem:[#allocation33_spill] sm:$0xff]  ;;  %v12345_v12 = vld [vmem:[#allocation27_spill] sm:$0xff] }
 0x3bc   :  { %12336 = vst [vmem:[#allocation84_spill] sm:$0xff] %v9253_v24  ;;  %12338 = vst [vmem:[#allocation88_spill] sm:$0xff] %v9257_v44  ;;  %v9269_v7 = vadd.f32 %v8933_v32, %v12343_v37  ;;  %v9273_v3 = vadd.f32 %v8933_v32, %v12345_v12  ;;  %v12347_v24 = vld [vmem:[#allocation31_spill] sm:$0xff]  ;;  %v12349_v44 = vld [vmem:[#allocation37_spill] sm:$0xff] }
 0x3bd   :  { %12340 = vst [vmem:[#allocation82_spill] sm:$0xff] %v9261_v40  ;;  %12342 = vst [vmem:[#allocation86_spill] sm:$0xff] %v9265_v63  ;;  %v9277_v43 = vadd.f32 %v8933_v32, %v12347_v24  ;;  %v9281_v11 = vadd.f32 %v8933_v32, %v12349_v44  ;;  %v12351_v40 = vld [vmem:[#allocation41_spill] sm:$0xff]  ;;  %v12353_v63 = vld [vmem:[#allocation35_spill] sm:$0xff] }
 0x3be   :  { %12344 = vst [vmem:[#allocation92_spill] sm:$0xff] %v9269_v7  ;;  %12346 = vst [vmem:[#allocation96_spill] sm:$0xff] %v9273_v3  ;;  %v9285_v35 = vadd.f32 %v8933_v32, %v12351_v40  ;;  %v9289_v37 = vadd.f32 %v8933_v32, %v12353_v63  ;;  %v12355_v7 = vld [vmem:[#allocation39_spill] sm:$0xff]  ;;  %v12357_v3 = vld [vmem:[#allocation45_spill] sm:$0xff] }
 0x3bf   :  { %12348 = vst [vmem:[#allocation90_spill] sm:$0xff] %v9277_v43  ;;  %12350 = vst [vmem:[#allocation94_spill] sm:$0xff] %v9281_v11  ;;  %v9293_v12 = vadd.f32 %v8933_v32, %v12355_v7  ;;  %v9297_v24 = vadd.f32 %v8933_v32, %v12357_v3  ;;  %v12359_v43 = vld [vmem:[#allocation49_spill] sm:$0xff]  ;;  %v12361_v11 = vld [vmem:[#allocation43_spill] sm:$0xff] }
 0x3c0   :  { %12352 = vst [vmem:[#allocation100_spill] sm:$0xff] %v9285_v35  ;;  %12354 = vst [vmem:[#allocation104_spill] sm:$0xff] %v9289_v37  ;;  %v9301_v44 = vadd.f32 %v8933_v32, %v12359_v43  ;;  %v9305_v40 = vadd.f32 %v8933_v32, %v12361_v11  ;;  %v12363_v35 = vld [vmem:[#allocation47_spill] sm:$0xff]  ;;  %v12365_v37 = vld [vmem:[#allocation53_spill] sm:$0xff] }
 0x3c1   :  { %12356 = vst [vmem:[#allocation98_spill] sm:$0xff] %v9293_v12  ;;  %12358 = vst [vmem:[#allocation102_spill] sm:$0xff] %v9297_v24  ;;  %v9309_v63 = vadd.f32 %v8933_v32, %v12363_v35  ;;  %v9313_v7 = vadd.f32 %v8933_v32, %v12365_v37  ;;  %v12367_v12 = vld [vmem:[#allocation57_spill] sm:$0xff]  ;;  %v12369_v24 = vld [vmem:[#allocation51_spill] sm:$0xff] }
 0x3c2   :  { %12360 = vst [vmem:[#allocation108_spill] sm:$0xff] %v9301_v44  ;;  %12362 = vst [vmem:[#allocation112_spill] sm:$0xff] %v9305_v40  ;;  %v9317_v3 = vadd.f32 %v8933_v32, %v12367_v12  ;;  %v9321_v43 = vadd.f32 %v8933_v32, %v12369_v24  ;;  %v12371_v44 = vld [vmem:[#allocation55_spill] sm:$0xff]  ;;  %v12373_v40 = vld [vmem:[#allocation61_spill] sm:$0xff] }
 0x3c3   :  { %12364 = vst [vmem:[#allocation106_spill] sm:$0xff] %v9309_v63  ;;  %12366 = vst [vmem:[#allocation110_spill] sm:$0xff] %v9313_v7  ;;  %v9325_v11 = vadd.f32 %v8933_v32, %v12371_v44  ;;  %v9329_v35 = vadd.f32 %v8933_v32, %v12373_v40  ;;  %v12375_v63 = vld [vmem:[#allocation65_spill] sm:$0xff]  ;;  %v12377_v7 = vld [vmem:[#allocation59_spill] sm:$0xff] }
 0x3c4   :  { %12368 = vst [vmem:[#allocation21_spill] sm:$0xff] %v9317_v3  ;;  %12370 = vst [vmem:[#allocation25_spill] sm:$0xff] %v9321_v43  ;;  %v9333_v37 = vadd.f32 %v8933_v32, %v12375_v63  ;;  %v9337_v12 = vadd.f32 %v8933_v32, %v12377_v7  ;;  %v12379_v3 = vld [vmem:[#allocation63_spill] sm:$0xff]  ;;  %v12381_v43 = vld [vmem:[#allocation69_spill] sm:$0xff] }
 0x3c5   :  { %12372 = vst [vmem:[#allocation19_spill] sm:$0xff] %v9325_v11  ;;  %12374 = vst [vmem:[#allocation23_spill] sm:$0xff] %v9329_v35  ;;  %v9341_v24 = vadd.f32 %v8933_v32, %v12379_v3  ;;  %v9345_v44 = vadd.f32 %v8933_v32, %v12381_v43  ;;  %v12383_v11 = vld [vmem:[#allocation73_spill] sm:$0xff]  ;;  %v12385_v35 = vld [vmem:[#allocation67_spill] sm:$0xff] }
 0x3c6   :  { %12376 = vst [vmem:[#allocation29_spill] sm:$0xff] %v9333_v37  ;;  %12378 = vst [vmem:[#allocation33_spill] sm:$0xff] %v9337_v12  ;;  %v9349_v40 = vadd.f32 %v8933_v32, %v12383_v11  ;;  %v9353_v63 = vadd.f32 %v8933_v32, %v12385_v35  ;;  %v12387_v37 = vld [vmem:[#allocation71_spill] sm:$0xff]  ;;  %v12389_v12 = vld [vmem:[#allocation77_spill] sm:$0xff] }
 0x3c7   :  { %12380 = vst [vmem:[#allocation27_spill] sm:$0xff] %v9341_v24  ;;  %12382 = vst [vmem:[#allocation31_spill] sm:$0xff] %v9345_v44  ;;  %v9357_v7 = vadd.f32 %v8933_v32, %v12387_v37  ;;  %v9361_v3 = vadd.f32 %v8933_v32, %v12389_v12  ;;  %v12391_v24 = vld [vmem:[#allocation81_spill] sm:$0xff]  ;;  %v12393_v44 = vld [vmem:[#allocation75_spill] sm:$0xff] }
 0x3c8   :  { %12384 = vst [vmem:[#allocation37_spill] sm:$0xff] %v9349_v40  ;;  %12386 = vst [vmem:[#allocation41_spill] sm:$0xff] %v9353_v63  ;;  %v9365_v43 = vadd.f32 %v8933_v32, %v12391_v24  ;;  %v9369_v11 = vadd.f32 %v8933_v32, %v12393_v44  ;;  %v12395_v40 = vld [vmem:[#allocation79_spill] sm:$0xff]  ;;  %v12397_v63 = vld [vmem:[#allocation85_spill] sm:$0xff] }
 0x3c9   :  { %12388 = vst [vmem:[#allocation35_spill] sm:$0xff] %v9357_v7  ;;  %12390 = vst [vmem:[#allocation39_spill] sm:$0xff] %v9361_v3  ;;  %v9373_v35 = vadd.f32 %v8933_v32, %v12395_v40  ;;  %v9377_v37 = vadd.f32 %v8933_v32, %v12397_v63  ;;  %v12399_v7 = vld [vmem:[#allocation89_spill] sm:$0xff]  ;;  %v12401_v3 = vld [vmem:[#allocation83_spill] sm:$0xff] }
 0x3ca   :  { %12392 = vst [vmem:[#allocation45_spill] sm:$0xff] %v9365_v43  ;;  %12394 = vst [vmem:[#allocation49_spill] sm:$0xff] %v9369_v11  ;;  %v9381_v12 = vadd.f32 %v8933_v32, %v12399_v7  ;;  %v9385_v24 = vadd.f32 %v8933_v32, %v12401_v3  ;;  %v12403_v43 = vld [vmem:[#allocation87_spill] sm:$0xff]  ;;  %v12405_v11 = vld [vmem:[#allocation93_spill] sm:$0xff] }
 0x3cb   :  { %12396 = vst [vmem:[#allocation43_spill] sm:$0xff] %v9373_v35  ;;  %12398 = vst [vmem:[#allocation47_spill] sm:$0xff] %v9377_v37  ;;  %v9389_v44 = vadd.f32 %v8933_v32, %v12403_v43  ;;  %v9393_v40 = vadd.f32 %v8933_v32, %v12405_v11  ;;  %v12407_v35 = vld [vmem:[#allocation97_spill] sm:$0xff]  ;;  %v12409_v37 = vld [vmem:[#allocation91_spill] sm:$0xff] }
 0x3cc   :  { %12400 = vst [vmem:[#allocation53_spill] sm:$0xff] %v9381_v12  ;;  %12402 = vst [vmem:[#allocation57_spill] sm:$0xff] %v9385_v24  ;;  %v9397_v63 = vadd.f32 %v8933_v32, %v12407_v35  ;;  %v9401_v7 = vadd.f32 %v8933_v32, %v12409_v37  ;;  %v12411_v12 = vld [vmem:[#allocation95_spill] sm:$0xff]  ;;  %v12413_v24 = vld [vmem:[#allocation101_spill] sm:$0xff] }
 0x3cd   :  { %12404 = vst [vmem:[#allocation51_spill] sm:$0xff] %v9389_v44  ;;  %12406 = vst [vmem:[#allocation55_spill] sm:$0xff] %v9393_v40  ;;  %v9405_v3 = vadd.f32 %v8933_v32, %v12411_v12  ;;  %v9409_v43 = vadd.f32 %v8933_v32, %v12413_v24  ;;  %v12415_v44 = vld [vmem:[#allocation105_spill] sm:$0xff]  ;;  %v12417_v40 = vld [vmem:[#allocation99_spill] sm:$0xff] }
 0x3ce   :  { %12408 = vst [vmem:[#allocation61_spill] sm:$0xff] %v9397_v63  ;;  %12410 = vst [vmem:[#allocation65_spill] sm:$0xff] %v9401_v7  ;;  %v9413_v11 = vadd.f32 %v8933_v32, %v12415_v44  ;;  %v9417_v35 = vadd.f32 %v8933_v32, %v12417_v40  ;;  %v12419_v63 = vld [vmem:[#allocation103_spill] sm:$0xff]  ;;  %v12421_v7 = vld [vmem:[#allocation109_spill] sm:$0xff] }
 0x3cf   :  { %12412 = vst [vmem:[#allocation59_spill] sm:$0xff] %v9405_v3  ;;  %12414 = vst [vmem:[#allocation63_spill] sm:$0xff] %v9409_v43  ;;  %v9421_v37 = vadd.f32 %v8933_v32, %v12419_v63  ;;  %v9425_v12 = vadd.f32 %v8933_v32, %v12421_v7  ;;  %v12423_v3 = vld [vmem:[#allocation113_spill] sm:$0xff]  ;;  %v12425_v43 = vld [vmem:[#allocation107_spill] sm:$0xff] }
 0x3d0   :  { %12416 = vst [vmem:[#allocation69_spill] sm:$0xff] %v9413_v11  ;;  %12418 = vst [vmem:[#allocation73_spill] sm:$0xff] %v9417_v35  ;;  %v9429_v24 = vadd.f32 %v8933_v32, %v12423_v3  ;;  %v9433_v44 = vadd.f32 %v8933_v32, %v12425_v43  ;;  %v12427_v11 = vld [vmem:[#allocation111_spill] sm:$0xff]  ;;  %v12429_v35 = vld [vmem:[#allocation116_spill] sm:$0xff] }
 0x3d1   :  { %12420 = vst [vmem:[#allocation67_spill] sm:$0xff] %v9421_v37  ;;  %12422 = vst [vmem:[#allocation71_spill] sm:$0xff] %v9425_v12  ;;  %v9437_v40 = vadd.f32 %v8933_v32, %v12427_v11  ;;  %v9441_v63 = vadd.f32 %v8933_v32, %v12429_v35  ;;  %v12431_v37 = vld [vmem:[#allocation120_spill] sm:$0xff]  ;;  %v12433_v12 = vld [vmem:[#allocation114_spill] sm:$0xff] }
 0x3d2   :  { %12424 = vst [vmem:[#allocation77_spill] sm:$0xff] %v9429_v24  ;;  %12426 = vst [vmem:[#allocation81_spill] sm:$0xff] %v9433_v44  ;;  %v9445_v7 = vadd.f32 %v8933_v32, %v12431_v37  ;;  %v9449_v3 = vadd.f32 %v8933_v32, %v12433_v12  ;;  %v12435_v24 = vld [vmem:[#allocation118_spill] sm:$0xff]  ;;  %v12437_v44 = vld [vmem:[#allocation123_spill] sm:$0xff] }
 0x3d3   :  { %12428 = vst [vmem:[#allocation75_spill] sm:$0xff] %v9437_v40  ;;  %12430 = vst [vmem:[#allocation79_spill] sm:$0xff] %v9441_v63  ;;  %v9453_v43 = vadd.f32 %v8933_v32, %v12435_v24  ;;  %v9457_v11 = vadd.f32 %v8933_v32, %v12437_v44  ;;  %v12439_v40 = vld [vmem:[#allocation126_spill] sm:$0xff] }
 0x3d4   :  { %12432 = vst [vmem:[#allocation85_spill] sm:$0xff] %v9445_v7  ;;  %12434 = vst [vmem:[#allocation89_spill] sm:$0xff] %v9449_v3  ;;  %v9461_v35 = vadd.f32 %v8933_v32, %v12439_v40  ;;  %v12441_v63 = vld [vmem:[#allocation122_spill] sm:$0xff]  ;;  %v12443_v7 = vld [vmem:[#allocation124_spill] sm:$0xff] }
 0x3d5   :  { %12436 = vst [vmem:[#allocation83_spill] sm:$0xff] %v9453_v43  ;;  %12438 = vst [vmem:[#allocation87_spill] sm:$0xff] %v9457_v11  ;;  %v9465_v37 = vadd.f32 %v8933_v32, %v12441_v63  ;;  %v9469_v12 = vadd.f32 %v8933_v32, %v12443_v7  ;;  %v12445_v3 = vld [vmem:[#allocation131_spill] sm:$0xff]  ;;  %v12447_v43 = vld [vmem:[#allocation134_spill] sm:$0xff] }
 0x3d6   :  { %12440 = vst [vmem:[#allocation93_spill] sm:$0xff] %v9461_v35  ;;  %v9473_v24 = vadd.f32 %v8933_v32, %v12445_v3  ;;  %v9477_v44 = vadd.f32 %v8933_v32, %v12447_v43  ;;  %v12449_v11 = vld [vmem:[#allocation130_spill] sm:$0xff]  ;;  %v12451_v35 = vld [vmem:[#allocation132_spill] sm:$0xff] }
 0x3d7   :  { %12442 = vst [vmem:[#allocation97_spill] sm:$0xff] %v9465_v37  ;;  %12444 = vst [vmem:[#allocation91_spill] sm:$0xff] %v9469_v12  ;;  %v9481_v40 = vadd.f32 %v8933_v32, %v12449_v11  ;;  %v9485_v63 = vadd.f32 %v8933_v32, %v12451_v35  ;;  %v12453_v37 = vld [vmem:[#allocation139_spill] sm:$0xff]  ;;  %v12455_v12 = vld [vmem:[#allocation142_spill] sm:$0xff] }
 0x3d8   :  { %12446 = vst [vmem:[#allocation95_spill] sm:$0xff] %v9473_v24  ;;  %12448 = vst [vmem:[#allocation101_spill] sm:$0xff] %v9477_v44  ;;  %v9489_v7 = vadd.f32 %v8933_v32, %v12453_v37  ;;  %v9493_v3 = vadd.f32 %v8933_v32, %v12455_v12  ;;  %v12457_v24 = vld [vmem:[#allocation138_spill] sm:$0xff]  ;;  %v12459_v44 = vld [vmem:[#allocation140_spill] sm:$0xff] }
 0x3d9   :  { %12450 = vst [vmem:[#allocation105_spill] sm:$0xff] %v9481_v40  ;;  %12452 = vst [vmem:[#allocation99_spill] sm:$0xff] %v9485_v63  ;;  %v9497_v43 = vadd.f32 %v8933_v32, %v12457_v24  ;;  %v9501_v11 = vadd.f32 %v8933_v32, %v12459_v44  ;;  %v12461_v40 = vld [vmem:[#allocation117_spill] sm:$0xff] }
 0x3da   :  { %12454 = vst [vmem:[#allocation103_spill] sm:$0xff] %v9489_v7  ;;  %12456 = vst [vmem:[#allocation109_spill] sm:$0xff] %v9493_v3  ;;  %v9505_v35 = vadd.f32 %v8933_v32, %v12461_v40  ;;  %v12463_v63 = vld [vmem:[#allocation121_spill] sm:$0xff]  ;;  %v12465_v7 = vld [vmem:[#allocation115_spill] sm:$0xff] }
 0x3db   :  { %12458 = vst [vmem:[#allocation113_spill] sm:$0xff] %v9497_v43  ;;  %12460 = vst [vmem:[#allocation107_spill] sm:$0xff] %v9501_v11  ;;  %v9509_v37 = vadd.f32 %v8933_v32, %v12463_v63  ;;  %v9513_v12 = vadd.f32 %v8933_v32, %v12465_v7  ;;  %v12467_v3 = vld [vmem:[#allocation119_spill] sm:$0xff]  ;;  %v12471_v11 = vld [vmem:[#allocation129_spill] sm:$0xff] }
 0x3dc   :  { %12462 = vst [vmem:[#allocation111_spill] sm:$0xff] %v9505_v35  ;;  %v9517_v24 = vadd.f32 %v8933_v32, %v12467_v3  ;;  %v12469_v43 = vld [vmem:[#allocation127_spill] sm:$0xff]  ;;  %v9525_v40 = vadd.f32 %v8933_v32, %v12471_v11  ;;  %v12473_v35 = vld [vmem:[#allocation125_spill] sm:$0xff] }
 0x3dd   :  { %12464 = vst [vmem:[#allocation116_spill] sm:$0xff] %v9509_v37  ;;  %12466 = vst [vmem:[#allocation120_spill] sm:$0xff] %v9513_v12  ;;  %v9521_v44 = vadd.f32 %v8933_v32, %v12469_v43  ;;  %v9529_v63 = vadd.f32 %v8933_v32, %v12473_v35  ;;  %v12475_v37 = vld [vmem:[#allocation128_spill] sm:$0xff]  ;;  %v12477_v12 = vld [vmem:[#allocation135_spill] sm:$0xff] }
 0x3de   :  { %12468 = vst [vmem:[#allocation114_spill] sm:$0xff] %v9517_v24  ;;  %12472 = vst [vmem:[#allocation123_spill] sm:$0xff] %v9525_v40  ;;  %v9533_v7 = vadd.f32 %v8933_v32, %v12475_v37  ;;  %v9537_v3 = vadd.f32 %v8933_v32, %v12477_v12  ;;  %v12479_v24 = vld [vmem:[#allocation137_spill] sm:$0xff]  ;;  %v12483_v40 = vld [vmem:[#allocation136_spill] sm:$0xff] }
 0x3df   :  { %12470 = vst [vmem:[#allocation118_spill] sm:$0xff] %v9521_v44  ;;  %12474 = vst [vmem:[#allocation126_spill] sm:$0xff] %v9529_v63  ;;  %v9541_v43 = vadd.f32 %v8933_v32, %v12479_v24  ;;  %v12481_v44 = vld [vmem:[#allocation133_spill] sm:$0xff]  ;;  %v9549_v35 = vadd.f32 %v8933_v32, %v12483_v40  ;;  %v12485_v63 = vld [vmem:[#allocation143_spill] sm:$0xff] }
 0x3e0   :  { %12476 = vst [vmem:[#allocation122_spill] sm:$0xff] %v9533_v7  ;;  %12478 = vst [vmem:[#allocation124_spill] sm:$0xff] %v9537_v3  ;;  %v9545_v11 = vadd.f32 %v8933_v32, %v12481_v44  ;;  %v9553_v37 = vadd.f32 %v8933_v32, %v12485_v63  ;;  %v12487_v7 = vld [vmem:[#allocation145_spill] sm:$0xff] }
 0x3e1   :  { %12480 = vst [vmem:[#allocation131_spill] sm:$0xff] %v9541_v43  ;;  %12484 = vst [vmem:[#allocation130_spill] sm:$0xff] %v9549_v35  ;;  %v9557_v12 = vadd.f32 %v8933_v32, %v12487_v7  ;;  %v12489_v3 = vld [vmem:[#allocation141_spill] sm:$0xff]  ;;  %v12491_v43 = vld [vmem:[#allocation144_spill] sm:$0xff] }
 0x3e2   :  { %12482 = vst [vmem:[#allocation134_spill] sm:$0xff] %v9545_v11  ;;  %12486 = vst [vmem:[#allocation132_spill] sm:$0xff] %v9553_v37  ;;  %v9561_v24 = vadd.f32 %v8933_v32, %v12489_v3  ;;  %v9565_v44 = vadd.f32 %v8933_v32, %v12491_v43  ;;  %v12493_v11 = vld [vmem:[#allocation147_spill] sm:$0xff]  ;;  %v12495_v35 = vld [vmem:[#allocation149_spill] sm:$0xff] }
 0x3e3   :  { %12488 = vst [vmem:[#allocation139_spill] sm:$0xff] %v9557_v12  ;;  %v9569_v40 = vadd.f32 %v8933_v32, %v12493_v11  ;;  %v9573_v63 = vadd.f32 %v8933_v32, %v12495_v35  ;;  %v12497_v37 = vld [vmem:[#allocation146_spill] sm:$0xff]  ;;  %v12499_v12 = vld [vmem:[#allocation148_spill] sm:$0xff] }
 0x3e4   :  { %12490 = vst [vmem:[#allocation142_spill] sm:$0xff] %v9561_v24  ;;  %12492 = vst [vmem:[#allocation138_spill] sm:$0xff] %v9565_v44  ;;  %v9577_v7 = vadd.f32 %v8933_v32, %v12497_v37  ;;  %v9581_v3 = vadd.f32 %v8933_v32, %v12499_v12  ;;  %v12501_v24 = vld [vmem:[#allocation151_spill] sm:$0xff]  ;;  %v12503_v44 = vld [vmem:[#allocation153_spill] sm:$0xff] }
 0x3e5   :  { %12494 = vst [vmem:[#allocation140_spill] sm:$0xff] %v9569_v40  ;;  %12496 = vst [vmem:[#allocation117_spill] sm:$0xff] %v9573_v63  ;;  %v9585_v43 = vadd.f32 %v8933_v32, %v12501_v24  ;;  %v9589_v11 = vadd.f32 %v8933_v32, %v12503_v44  ;;  %v12505_v40 = vld [vmem:[#allocation150_spill] sm:$0xff]  ;;  %v12507_v63 = vld [vmem:[#allocation152_spill] sm:$0xff] }
 0x3e6   :  { %12498 = vst [vmem:[#allocation121_spill] sm:$0xff] %v9577_v7  ;;  %12500 = vst [vmem:[#allocation115_spill] sm:$0xff] %v9581_v3  ;;  %v9593_v35 = vadd.f32 %v8933_v32, %v12505_v40  ;;  %v9597_v37 = vadd.f32 %v8933_v32, %v12507_v63  ;;  %v12509_v7 = vld [vmem:[#allocation155_spill] sm:$0xff]  ;;  %v12511_v3 = vld [vmem:[#allocation157_spill] sm:$0xff] }
 0x3e7   :  { %12502 = vst [vmem:[#allocation119_spill] sm:$0xff] %v9585_v43  ;;  %12504 = vst [vmem:[#allocation127_spill] sm:$0xff] %v9589_v11  ;;  %v9601_v12 = vadd.f32 %v8933_v32, %v12509_v7  ;;  %v9605_v24 = vadd.f32 %v8933_v32, %v12511_v3  ;;  %v12513_v43 = vld [vmem:[#allocation154_spill] sm:$0xff]  ;;  %v12515_v11 = vld [vmem:[#allocation156_spill] sm:$0xff] }
 0x3e8   :  { %12506 = vst [vmem:[#allocation129_spill] sm:$0xff] %v9593_v35  ;;  %12508 = vst [vmem:[#allocation125_spill] sm:$0xff] %v9597_v37  ;;  %v9609_v44 = vadd.f32 %v8933_v32, %v12513_v43  ;;  %v9613_v40 = vadd.f32 %v8933_v32, %v12515_v11  ;;  %v12517_v35 = vld [vmem:[#allocation159_spill] sm:$0xff]  ;;  %v12519_v37 = vld [vmem:[#allocation161_spill] sm:$0xff] }
 0x3e9   :  { %12510 = vst [vmem:[#allocation128_spill] sm:$0xff] %v9601_v12  ;;  %12512 = vst [vmem:[#allocation135_spill] sm:$0xff] %v9605_v24  ;;  %v9617_v63 = vadd.f32 %v8933_v32, %v12517_v35  ;;  %v9621_v7 = vadd.f32 %v8933_v32, %v12519_v37  ;;  %v12521_v12 = vld [vmem:[#allocation158_spill] sm:$0xff]  ;;  %v12523_v24 = vld [vmem:[#allocation160_spill] sm:$0xff] }
 0x3ea   :  { %12514 = vst [vmem:[#allocation137_spill] sm:$0xff] %v9609_v44  ;;  %12516 = vst [vmem:[#allocation133_spill] sm:$0xff] %v9613_v40  ;;  %v9625_v3 = vadd.f32 %v8933_v32, %v12521_v12  ;;  %v9629_v43 = vadd.f32 %v8933_v32, %v12523_v24  ;;  %v12525_v44 = vld [vmem:[#allocation163_spill] sm:$0xff]  ;;  %v12527_v40 = vld [vmem:[#allocation165_spill] sm:$0xff] }
 0x3eb   :  { %12518 = vst [vmem:[#allocation136_spill] sm:$0xff] %v9617_v63  ;;  %12520 = vst [vmem:[#allocation143_spill] sm:$0xff] %v9621_v7  ;;  %v9633_v11 = vadd.f32 %v8933_v32, %v12525_v44  ;;  %v9637_v35 = vadd.f32 %v8933_v32, %v12527_v40  ;;  %v12529_v63 = vld [vmem:[#allocation162_spill] sm:$0xff]  ;;  %v12531_v7 = vld [vmem:[#allocation164_spill] sm:$0xff] }
 0x3ec   :  { %12522 = vst [vmem:[#allocation145_spill] sm:$0xff] %v9625_v3  ;;  %12524 = vst [vmem:[#allocation141_spill] sm:$0xff] %v9629_v43  ;;  %v9641_v37 = vadd.f32 %v8933_v32, %v12529_v63  ;;  %v9645_v12 = vadd.f32 %v8933_v32, %v12531_v7  ;;  %v12533_v3 = vld [vmem:[#allocation167_spill] sm:$0xff]  ;;  %v12535_v43 = vld [vmem:[#allocation169_spill] sm:$0xff] }
 0x3ed   :  { %12526 = vst [vmem:[#allocation144_spill] sm:$0xff] %v9633_v11  ;;  %12528 = vst [vmem:[#allocation147_spill] sm:$0xff] %v9637_v35  ;;  %v9649_v24 = vadd.f32 %v8933_v32, %v12533_v3  ;;  %v9653_v44 = vadd.f32 %v8933_v32, %v12535_v43  ;;  %v12537_v11 = vld [vmem:[#allocation166_spill] sm:$0xff]  ;;  %v12539_v35 = vld [vmem:[#allocation168_spill] sm:$0xff] }
 0x3ee   :  { %12530 = vst [vmem:[#allocation149_spill] sm:$0xff] %v9641_v37  ;;  %12532 = vst [vmem:[#allocation146_spill] sm:$0xff] %v9645_v12  ;;  %v9657_v40 = vadd.f32 %v8933_v32, %v12537_v11  ;;  %v9661_v63 = vadd.f32 %v8933_v32, %v12539_v35  ;;  %v12541_v37 = vld [vmem:[#allocation171_spill] sm:$0xff]  ;;  %v12543_v12 = vld [vmem:[#allocation173_spill] sm:$0xff] }
 0x3ef   :  { %12534 = vst [vmem:[#allocation148_spill] sm:$0xff] %v9649_v24  ;;  %12536 = vst [vmem:[#allocation151_spill] sm:$0xff] %v9653_v44  ;;  %v9665_v7 = vadd.f32 %v8933_v32, %v12541_v37  ;;  %v9669_v3 = vadd.f32 %v8933_v32, %v12543_v12  ;;  %v12545_v24 = vld [vmem:[#allocation170_spill] sm:$0xff]  ;;  %v12546_v44 = vld [vmem:[#allocation172_spill] sm:$0xff] }
 0x3f0   :  { %12538 = vst [vmem:[#allocation153_spill] sm:$0xff] %v9657_v40  ;;  %12540 = vst [vmem:[#allocation150_spill] sm:$0xff] %v9661_v63  ;;  %v9673_v43 = vadd.f32 %v8933_v32, %v12545_v24  ;;  %v9677_v11 = vadd.f32 %v8933_v32, %v12546_v44  ;;  %v12548_v40 = vld [vmem:[#allocation175_spill] sm:$0xff]  ;;  %v12550_v63 = vld [vmem:[#allocation177_spill] sm:$0xff]  ;;  %v9697_v44 = vadd.f32 %v8933_v32, %v8666_v34 }
 0x3f1   :  { %12542 = vst [vmem:[#allocation152_spill] sm:$0xff] %v9665_v7  ;;  %12544 = vst [vmem:[#allocation155_spill] sm:$0xff] %v9669_v3  ;;  %v9681_v35 = vadd.f32 %v8933_v32, %v12548_v40  ;;  %v9685_v37 = vadd.f32 %v8933_v32, %v12550_v63  ;;  %v12552_v7 = vld [vmem:[#allocation174_spill] sm:$0xff]  ;;  %v12553_v3 = vld [vmem:[#allocation176_spill] sm:$0xff]  ;;  %v9717_v34 = vadd.f32 %v8933_v32, %v8686_v8 }
 0x3f2   :  { %12547 = vst [vmem:[#allocation157_spill] sm:$0xff] %v9677_v11  ;;  %v9689_v12 = vadd.f32 %v8933_v32, %v12552_v7  ;;  %v9693_v24 = vadd.f32 %v8933_v32, %v12553_v3  ;;  %12554 = vst [vmem:[#allocation159_spill] sm:$0xff] %v9697_v44  ;;  %v12555_v11 = vld [vmem:[#allocation179_spill] sm:$0xff]  ;;  %v9713_v3 = vadd.f32 %v8933_v32, %v8682_v38  ;;  %v12559_v44 = vld [vmem:[#allocation180_spill] sm:$0xff] }
 0x3f3   :  { %12549 = vst [vmem:[#allocation154_spill] sm:$0xff] %v9681_v35  ;;  %12551 = vst [vmem:[#allocation156_spill] sm:$0xff] %v9685_v37  ;;  %v9701_v40 = vadd.f32 %v8933_v32, %v12555_v11  ;;  %v12557_v35 = vld [vmem:[#allocation181_spill] sm:$0xff]  ;;  %v12558_v37 = vld [vmem:[#allocation178_spill] sm:$0xff]  ;;  %v9721_v11 = vadd.f32 %v8933_v32, %v12559_v44  ;;  %v9733_v38 = vadd.f32 %v8933_v32, %v8702_v49 }
 0x3f4   :  { %v9705_v63 = vadd.f32 %v8933_v32, %v12557_v35  ;;  %v9709_v7 = vadd.f32 %v8933_v32, %v12558_v37  ;;  %v9729_v37 = vadd.f32 %v8933_v32, %v8698_v13  ;;  %v9737_v8 = vadd.f32 %v8933_v32, %v8706_v19 }
 0x3f5   :  { %12556 = vst [vmem:[#allocation161_spill] sm:$0xff] %v9701_v40  ;;  %v12560_v40 = vld [vmem:[#allocation183_spill] sm:$0xff]  ;;  %12562 = vst [vmem:[#allocation160_spill] sm:$0xff] %v9733_v38  ;;  %v9741_v44 = vadd.f32 %v8933_v32, %v8710_v4  ;;  %v9749_v13 = vadd.f32 %v8933_v32, %v8718_v36  ;;  %v12564_v38 = vld [vmem:[#allocation182_spill] sm:$0xff]  ;;  %v9761_v4 = vadd.f32 %v8933_v32, %v8730_v22 }
 0x3f6   :  { %v9725_v35 = vadd.f32 %v8933_v32, %v12560_v40  ;;  %12561 = vst [vmem:[#allocation158_spill] sm:$0xff] %v9729_v37  ;;  %v9745_v40 = vadd.f32 %v8933_v32, %v8714_v45  ;;  %v12563_v37 = vld [vmem:[#allocation185_spill] sm:$0xff]  ;;  %v9757_v19 = vadd.f32 %v8933_v32, %v12564_v38  ;;  %v9765_v45 = vadd.f32 %v8933_v32, %v8734_v2 }
 0x3f7   :  { %v9753_v49 = vadd.f32 %v8933_v32, %v12563_v37  ;;  %v9769_v36 = vadd.f32 %v8933_v32, %v8738_v15  ;;  %v9773_v37 = vadd.f32 %v8933_v32, %v8742_v26  ;;  %v9777_v38 = vadd.f32 %v8933_v32, %v8746_v5 }
 0x3f8   :  { %v9781_v22 = vadd.f32 %v8933_v32, %v8750_v16  ;;  %v9785_v2 = vadd.f32 %v8933_v32, %v8754_v30  ;;  %v9789_v15 = vadd.f32 %v8933_v32, %v8758_v46  ;;  %v9793_v26 = vadd.f32 %v8933_v32, %v8762_v6 }
 0x3f9   :  { %v9797_v5 = vadd.f32 %v8933_v32, %v8766_v21  ;;  %v9801_v16 = vadd.f32 %v8933_v32, %v8770_v42  ;;  %v9805_v30 = vadd.f32 %v8933_v32, %v8774_v18  ;;  %v9809_v46 = vadd.f32 %v8933_v32, %v8778_v58 }
 0x3fa   :  { %v9813_v6 = vadd.f32 %v8933_v32, %v8782_v20  ;;  %v9817_v21 = vadd.f32 %v8933_v32, %v8786_v52  ;;  %v9821_v42 = vadd.f32 %v8933_v32, %v8790_v39  ;;  %v9825_v18 = vadd.f32 %v8933_v32, %v8794_v61 }
 0x3fb   :  { %v9829_v58 = vadd.f32 %v8933_v32, %v8798_v51  ;;  %v9833_v20 = vadd.f32 %v8933_v32, %v8802_v17  ;;  %v9837_v52 = vadd.f32 %v8933_v32, %v8806_v14  ;;  %v9841_v39 = vadd.f32 %v8933_v32, %v8810_v0 }
 0x3fc   :  { %v9845_v61 = vadd.f32 %v8933_v32, %v8814_v62  ;;  %v9849_v51 = vadd.f32 %v8933_v32, %v8818_v54  ;;  %v9853_v17 = vadd.f32 %v8933_v32, %v8822_v47  ;;  %v9857_v14 = vadd.f32 %v8933_v32, %v8826_v60 }
 0x3fd   :  { %12565 = vst [vmem:[#allocation163_spill] sm:$0xff] %v9841_v39  ;;  %v9861_v0 = vadd.f32 %v8933_v32, %v8830_v23  ;;  %v12569_v39 = vld [vmem:[#allocation184_spill] sm:$0xff]  ;;  %v9873_v47 = vadd.f32 %v8933_v32, %v8842_v9  ;;  %v9877_v60 = vadd.f32 %v8933_v32, %v8846_v55  ;;  %v9893_v9 = vadd.f32 %v8933_v32, %v8862_v59 }
 0x3fe   :  { %12566 = vst [vmem:[#allocation165_spill] sm:$0xff] %v9845_v61  ;;  %12567 = vst [vmem:[#allocation162_spill] sm:$0xff] %v9857_v14  ;;  %v9865_v62 = vadd.f32 %v8933_v32, %v12569_v39  ;;  %v12570_v61 = vld [vmem:[#allocation187_spill] sm:$0xff]  ;;  %v12572_v14 = vld [vmem:[#allocation189_spill] sm:$0xff]  ;;  %v9897_v55 = vadd.f32 %v8933_v32, %v8866_v53 }
 0x3ff   :  { %12568 = vst [vmem:[#allocation164_spill] sm:$0xff] %v9861_v0  ;;  %v9869_v54 = vadd.f32 %v8933_v32, %v12570_v61  ;;  %12571 = vst [vmem:[#allocation167_spill] sm:$0xff] %v9877_v60  ;;  %v9881_v23 = vadd.f32 %v8933_v32, %v12572_v14  ;;  %v12574_v0 = vld [vmem:[#allocation186_spill] sm:$0xff]  ;;  %v9889_v61 = vadd.f32 %v8933_v32, %v8858_v31  ;;  %v12579_v60 = vld [vmem:[#allocation188_spill] sm:$0xff] }
 0x400   :  { %v9885_v39 = vadd.f32 %v8933_v32, %v12574_v0  ;;  %12577 = vst [vmem:[#allocation171_spill] sm:$0xff] %v9893_v9  ;;  %12578 = vst [vmem:[#allocation173_spill] sm:$0xff] %v9897_v55  ;;  %v9901_v14 = vadd.f32 %v8933_v32, %v12579_v60  ;;  %v12587_v9 = vld [vmem:[#allocation192_spill] sm:$0xff]  ;;  %v12589_v55 = vld [vmem:[#allocation195_spill] sm:$0xff] }
 0x401   :  { %12573 = vst [vmem:[#allocation169_spill] sm:$0xff] %v9881_v23  ;;  %12576 = vst [vmem:[#allocation168_spill] sm:$0xff] %v9889_v61  ;;  %v12581_v23 = vld [vmem:[#allocation191_spill] sm:$0xff]  ;;  %v12585_v61 = vld [vmem:[#allocation190_spill] sm:$0xff]  ;;  %v9917_v53 = vadd.f32 %v8933_v32, %v12587_v9  ;;  %v9921_v60 = vadd.f32 %v8933_v32, %v12589_v55 }
 0x402   :  { %12575 = vst [vmem:[#allocation166_spill] sm:$0xff] %v9885_v39  ;;  %12580 = vst [vmem:[#allocation170_spill] sm:$0xff] %v9901_v14  ;;  %v9905_v0 = vadd.f32 %v8933_v32, %v12581_v23  ;;  %v12583_v39 = vld [vmem:[#allocation193_spill] sm:$0xff]  ;;  %v9913_v59 = vadd.f32 %v8933_v32, %v12585_v61 }
 0x403   :  { %v9909_v31 = vadd.f32 %v8933_v32, %v12583_v39  ;;  %12588 = vst [vmem:[#allocation174_spill] sm:$0xff] %v9917_v53  ;;  %v12590_v14 = vld [vmem:[#allocation197_spill] sm:$0xff]  ;;  %v12597_v53 = vld [vmem:[#allocation198_spill] sm:$0xff] }
 0x404   :  { %12582 = vst [vmem:[#allocation172_spill] sm:$0xff] %v9905_v0  ;;  %12586 = vst [vmem:[#allocation177_spill] sm:$0xff] %v9913_v59  ;;  %v9925_v23 = vadd.f32 %v8933_v32, %v12590_v14  ;;  %v12591_v0 = vld [vmem:[#allocation194_spill] sm:$0xff]  ;;  %v12595_v59 = vld [vmem:[#allocation201_spill] sm:$0xff]  ;;  %v9941_v55 = vadd.f32 %v8933_v32, %v12597_v53  ;;  %v9945_v14 = vadd.f32 %v8933_v32, %v8914_v50  ;;  %v4276_v53 = vmax.f32 %v8941_v29, 0.0 }
 0x405   :  { %12584 = vst [vmem:[#allocation175_spill] sm:$0xff] %v9909_v31  ;;  %v9929_v39 = vadd.f32 %v8933_v32, %v12591_v0  ;;  %v12593_v31 = vld [vmem:[#allocation196_spill] sm:$0xff]  ;;  %v9937_v9 = vadd.f32 %v8933_v32, %v12595_v59  ;;  %v9949_v0 = vadd.f32 %v8933_v32, %v8918_v1  ;;  %v9957_v59 = vadd.f32 %v8933_v32, %v8926_v28 }
 0x406   :  { %v9933_v61 = vadd.f32 %v8933_v32, %v12593_v31  ;;  %12598 = vst [vmem:[#allocation178_spill] sm:$0xff] %v9941_v55  ;;  %12599 = vst [vmem:[#allocation180_spill] sm:$0xff] %v9945_v14  ;;  %v9953_v31 = vadd.f32 %v8933_v32, %v8922_v56  ;;  %v4277_v55 = vmax.f32 %v8945_v33, 0.0  ;;  %v4278_v50 = vmax.f32 %v8949_v27, 0.0  ;;  %v12604_v32 = vld [vmem:[#allocation202_spill] sm:$0xff]  ;;  %v12607_v33 = vld [vmem:[#allocation207_spill] sm:$0xff] }
 0x407   :  { %12592 = vst [vmem:[#allocation176_spill] sm:$0xff] %v9929_v39  ;;  %12596 = vst [vmem:[#allocation181_spill] sm:$0xff] %v9937_v9  ;;  %v4275_v9 = vmax.f32 %v8937_v57, 0.0  ;;  %v4279_v14 = vmax.f32 %v8953_v48, 0.0  ;;  %v4280_v1 = vmax.f32 %v8957_v41, 0.0  ;;  %v4282_v56 = vmax.f32 %v8965_v25, 0.0 }
 0x408   :  { %12594 = vst [vmem:[#allocation179_spill] sm:$0xff] %v9933_v61  ;;  %12600 = vst [vmem:[#allocation183_spill] sm:$0xff] %v9949_v0  ;;  %v4281_v0 = vmax.f32 %v8961_v10, 0.0  ;;  %v4284_v28 = vmax.f32 %v12604_v32, 0.0  ;;  %v12606_v39 = vld [vmem:[#allocation206_spill] sm:$0xff]  ;;  %v4287_v27 = vmax.f32 %v12607_v33, 0.0 }
 0x409   :  { %12601 = vst [vmem:[#allocation185_spill] sm:$0xff] %v9953_v31  ;;  %12602 = vst [vmem:[#allocation182_spill] sm:$0xff] %v9957_v59  ;;  %v12603_v31 = vld [vmem:[#allocation200_spill] sm:$0xff]  ;;  %v4286_v29 = vmax.f32 %v12606_v39, 0.0  ;;  %v12608_v48 = vld [vmem:[#allocation209_spill] sm:$0xff] }
 0x40a   :  { %v4283_v61 = vmax.f32 %v12603_v31, 0.0  ;;  %v12605_v59 = vld [vmem:[#allocation204_spill] sm:$0xff]  ;;  %4531 = vst.msk [vmem:[%s11242_s3] sm:$0xff] %vm2451_vm0, %v4275_v9  ;;  %4532 = vst.msk [vmem:[%s11242_s3 + $0x8] sm:$0xff] %vm2451_vm0, %v4276_v53  ;;  %v4288_v41 = vmax.f32 %v12608_v48, 0.0  ;;  %v12609_v10 = vld [vmem:[#allocation210_spill] sm:$0xff] }
 0x40b   :  { %v4285_v57 = vmax.f32 %v12605_v59, 0.0  ;;  %4533 = vst.msk [vmem:[%s11242_s3 + $0x10] sm:$0xff] %vm2451_vm0, %v4277_v55  ;;  %4534 = vst.msk [vmem:[%s11242_s3 + $0x18] sm:$0xff] %vm2451_vm0, %v4278_v50  ;;  %v4289_v25 = vmax.f32 %v12609_v10, 0.0  ;;  %v12610_v39 = vld [vmem:[#allocation211_spill] sm:$0xff]  ;;  %v12611_v55 = vld [vmem:[#allocation212_spill] sm:$0xff] }
 0x40c   :  { %v4290_v9 = vmax.f32 %v12610_v39, 0.0  ;;  %4535 = vst.msk [vmem:[%s11242_s3 + $0x20] sm:$0xff] %vm2451_vm0, %v4279_v14  ;;  %4536 = vst.msk [vmem:[%s11242_s3 + $0x28] sm:$0xff] %vm2451_vm0, %v4280_v1  ;;  %v4291_v31 = vmax.f32 %v12611_v55, 0.0  ;;  %v12612_v59 = vld [vmem:[#allocation214_spill] sm:$0xff]  ;;  %v12613_v14 = vld [vmem:[#allocation216_spill] sm:$0xff] }
 0x40d   :  { %4537 = vst.msk [vmem:[%s11242_s3 + $0x30] sm:$0xff] %vm2451_vm0, %v4281_v0  ;;  %4538 = vst.msk [vmem:[%s11242_s3 + $0x38] sm:$0xff] %vm2451_vm0, %v4282_v56  ;;  %v4292_v53 = vmax.f32 %v12612_v59, 0.0  ;;  %v4293_v50 = vmax.f32 %v12613_v14, 0.0  ;;  %v12614_v32 = vld [vmem:[#allocation218_spill] sm:$0xff]  ;;  %v12615_v0 = vld [vmem:[#allocation215_spill] sm:$0xff] }
 0x40e   :  { %v4294_v33 = vmax.f32 %v12614_v32, 0.0  ;;  %4539 = vst.msk [vmem:[%s11242_s3 + $0x40] sm:$0xff] %vm2451_vm0, %v4283_v61  ;;  %4540 = vst.msk [vmem:[%s11242_s3 + $0x48] sm:$0xff] %vm2451_vm0, %v4284_v28  ;;  %v4295_v1 = vmax.f32 %v12615_v0, 0.0  ;;  %v12616_v56 = vld [vmem:[#allocation217_spill] sm:$0xff]  ;;  %v12617_v61 = vld [vmem:[#allocation220_spill] sm:$0xff] }
 0x40f   :  { %4541 = vst.msk [vmem:[%s11242_s3 + $0x50] sm:$0xff] %vm2451_vm0, %v4285_v57  ;;  %4542 = vst.msk [vmem:[%s11242_s3 + $0x58] sm:$0xff] %vm2451_vm0, %v4286_v29  ;;  %v4296_v48 = vmax.f32 %v12616_v56, 0.0  ;;  %v4297_v10 = vmax.f32 %v12617_v61, 0.0  ;;  %v12618_v39 = vld [vmem:[#allocation222_spill] sm:$0xff]  ;;  %v12619_v28 = vld [vmem:[#allocation219_spill] sm:$0xff] }
 0x410   :  { %v4298_v55 = vmax.f32 %v12618_v39, 0.0  ;;  %4543 = vst.msk [vmem:[%s11242_s3 + $0x60] sm:$0xff] %vm2451_vm0, %v4287_v27  ;;  %4544 = vst.msk [vmem:[%s11242_s3 + $0x68] sm:$0xff] %vm2451_vm0, %v4288_v41  ;;  %v4299_v57 = vmax.f32 %v12619_v28, 0.0  ;;  %v12620_v29 = vld [vmem:[#allocation221_spill] sm:$0xff]  ;;  %v12621_v27 = vld [vmem:[#allocation199_spill] sm:$0xff] }
 0x411   :  { %4545 = vst.msk [vmem:[%s11242_s3 + $0x70] sm:$0xff] %vm2451_vm0, %v4289_v25  ;;  %4546 = vst.msk [vmem:[%s11242_s3 + $0x78] sm:$0xff] %vm2451_vm0, %v4290_v9  ;;  %v4300_v59 = vmax.f32 %v12620_v29, 0.0  ;;  %v4301_v14 = vmax.f32 %v12621_v27, 0.0  ;;  %v12622_v32 = vld [vmem:[#allocation203_spill] sm:$0xff]  ;;  %v12623_v41 = vld [vmem:[#allocation205_spill] sm:$0xff] }
 0x412   :  { %v4302_v0 = vmax.f32 %v12622_v32, 0.0  ;;  %4547 = vst.msk [vmem:[%s11242_s3 + $0x80] sm:$0xff] %vm2451_vm0, %v4291_v31  ;;  %4548 = vst.msk [vmem:[%s11242_s3 + $0x88] sm:$0xff] %vm2451_vm0, %v4292_v53  ;;  %v4303_v25 = vmax.f32 %v12623_v41, 0.0  ;;  %v12624_v9 = vld [vmem:[#allocation208_spill] sm:$0xff]  ;;  %v12625_v31 = vld [vmem:[#allocation213_spill] sm:$0xff] }
 0x413   :  { %4549 = vst.msk [vmem:[%s11242_s3 + $0x90] sm:$0xff] %vm2451_vm0, %v4293_v50  ;;  %4550 = vst.msk [vmem:[%s11242_s3 + $0x98] sm:$0xff] %vm2451_vm0, %v4294_v33  ;;  %v4304_v56 = vmax.f32 %v12624_v9, 0.0  ;;  %v4305_v61 = vmax.f32 %v12625_v31, 0.0  ;;  %v12626_v39 = vld [vmem:[#allocation3_spill] sm:$0xff]  ;;  %v12627_v53 = vld [vmem:[#allocation5_spill] sm:$0xff] }
 0x414   :  { %v4306_v28 = vmax.f32 %v12626_v39, 0.0  ;;  %4551 = vst.msk [vmem:[%s11242_s3 + $0xa0] sm:$0xff] %vm2451_vm0, %v4295_v1  ;;  %4552 = vst.msk [vmem:[%s11242_s3 + $0xa8] sm:$0xff] %vm2451_vm0, %v4296_v48  ;;  %v4307_v50 = vmax.f32 %v12627_v53, 0.0  ;;  %v12628_v33 = vld [vmem:[#allocation2_spill] sm:$0xff]  ;;  %v12629_v1 = vld [vmem:[#allocation4_spill] sm:$0xff] }
 0x415   :  { %4553 = vst.msk [vmem:[%s11242_s3 + $0xb0] sm:$0xff] %vm2451_vm0, %v4297_v10  ;;  %4554 = vst.msk [vmem:[%s11242_s3 + $0xb8] sm:$0xff] %vm2451_vm0, %v4298_v55  ;;  %v4308_v29 = vmax.f32 %v12628_v33, 0.0  ;;  %v4309_v27 = vmax.f32 %v12629_v1, 0.0  ;;  %v12630_v32 = vld [vmem:[#allocation7_spill] sm:$0xff]  ;;  %v12631_v48 = vld [vmem:[#allocation9_spill] sm:$0xff] }
 0x416   :  { %v4310_v41 = vmax.f32 %v12630_v32, 0.0  ;;  %4555 = vst.msk [vmem:[%s11242_s3 + $0xc0] sm:$0xff] %vm2451_vm0, %v4299_v57  ;;  %4556 = vst.msk [vmem:[%s11242_s3 + $0xc8] sm:$0xff] %vm2451_vm0, %v4300_v59  ;;  %v4311_v10 = vmax.f32 %v12631_v48, 0.0  ;;  %v12632_v55 = vld [vmem:[#allocation6_spill] sm:$0xff]  ;;  %v12633_v57 = vld [vmem:[#allocation8_spill] sm:$0xff] }
 0x417   :  { %4557 = vst.msk [vmem:[%s11242_s3 + $0xd0] sm:$0xff] %vm2451_vm0, %v4301_v14  ;;  %4558 = vst.msk [vmem:[%s11242_s3 + $0xd8] sm:$0xff] %vm2451_vm0, %v4302_v0  ;;  %v4312_v9 = vmax.f32 %v12632_v55, 0.0  ;;  %v4313_v31 = vmax.f32 %v12633_v57, 0.0  ;;  %v12634_v39 = vld [vmem:[#allocation11_spill] sm:$0xff]  ;;  %v12635_v59 = vld [vmem:[#allocation13_spill] sm:$0xff] }
 0x418   :  { %v4314_v53 = vmax.f32 %v12634_v39, 0.0  ;;  %4559 = vst.msk [vmem:[%s11242_s3 + $0xe0] sm:$0xff] %vm2451_vm0, %v4303_v25  ;;  %4560 = vst.msk [vmem:[%s11242_s3 + $0xe8] sm:$0xff] %vm2451_vm0, %v4304_v56  ;;  %v4315_v14 = vmax.f32 %v12635_v59, 0.0  ;;  %v12636_v0 = vld [vmem:[#allocation10_spill] sm:$0xff]  ;;  %v12637_v25 = vld [vmem:[#allocation12_spill] sm:$0xff] }
 0x419   :  { %4561 = vst.msk [vmem:[%s11242_s3 + $0xf0] sm:$0xff] %vm2451_vm0, %v4305_v61  ;;  %4562 = vst.msk [vmem:[%s11242_s3 + $0xf8] sm:$0xff] %vm2451_vm0, %v4306_v28  ;;  %v4316_v33 = vmax.f32 %v12636_v0, 0.0  ;;  %v4317_v1 = vmax.f32 %v12637_v25, 0.0  ;;  %v12638_v32 = vld [vmem:[#allocation15_spill] sm:$0xff]  ;;  %v12639_v56 = vld [vmem:[#allocation17_spill] sm:$0xff] }
 0x41a   :  { %v4318_v48 = vmax.f32 %v12638_v32, 0.0  ;;  %4563 = vst.msk [vmem:[%s11242_s3 + $0x100] sm:$0xff] %vm2451_vm0, %v4307_v50  ;;  %4564 = vst.msk [vmem:[%s11242_s3 + $0x108] sm:$0xff] %vm2451_vm0, %v4308_v29  ;;  %v4319_v61 = vmax.f32 %v12639_v56, 0.0  ;;  %v12640_v28 = vld [vmem:[#allocation14_spill] sm:$0xff]  ;;  %v12641_v50 = vld [vmem:[#allocation16_spill] sm:$0xff] }
 0x41b   :  { %4565 = vst.msk [vmem:[%s11242_s3 + $0x110] sm:$0xff] %vm2451_vm0, %v4309_v27  ;;  %4566 = vst.msk [vmem:[%s11242_s3 + $0x118] sm:$0xff] %vm2451_vm0, %v4310_v41  ;;  %v4320_v55 = vmax.f32 %v12640_v28, 0.0  ;;  %v4321_v57 = vmax.f32 %v12641_v50, 0.0  ;;  %v12642_v39 = vld [vmem:[#allocation20_spill] sm:$0xff]  ;;  %v12644_v41 = vld [vmem:[#allocation18_spill] sm:$0xff] }
 0x41c   :  { %v4322_v59 = vmax.f32 %v12642_v39, 0.0  ;;  %4567 = vst.msk [vmem:[%s11242_s3 + $0x120] sm:$0xff] %vm2451_vm0, %v4311_v10  ;;  %4568 = vst.msk [vmem:[%s11242_s3 + $0x128] sm:$0xff] %vm2451_vm0, %v4312_v9  ;;  %v12643_v29 = vld [vmem:[#allocation24_spill] sm:$0xff]  ;;  %v4324_v0 = vmax.f32 %v12644_v41, 0.0  ;;  %v12645_v10 = vld [vmem:[#allocation22_spill] sm:$0xff] }
 0x41d   :  { %4569 = vst.msk [vmem:[%s11242_s3 + $0x130] sm:$0xff] %vm2451_vm0, %v4313_v31  ;;  %4570 = vst.msk [vmem:[%s11242_s3 + $0x138] sm:$0xff] %vm2451_vm0, %v4314_v53  ;;  %v4323_v27 = vmax.f32 %v12643_v29, 0.0  ;;  %v4325_v25 = vmax.f32 %v12645_v10, 0.0  ;;  %v12646_v32 = vld [vmem:[#allocation28_spill] sm:$0xff]  ;;  %v12648_v53 = vld [vmem:[#allocation26_spill] sm:$0xff] }
 0x41e   :  { %v4326_v56 = vmax.f32 %v12646_v32, 0.0  ;;  %4571 = vst.msk [vmem:[%s11242_s3 + $0x140] sm:$0xff] %vm2451_vm0, %v4315_v14  ;;  %4572 = vst.msk [vmem:[%s11242_s3 + $0x148] sm:$0xff] %vm2451_vm0, %v4316_v33  ;;  %v12647_v9 = vld [vmem:[#allocation32_spill] sm:$0xff]  ;;  %v4328_v28 = vmax.f32 %v12648_v53, 0.0  ;;  %v12649_v14 = vld [vmem:[#allocation30_spill] sm:$0xff] }
 0x41f   :  { %4573 = vst.msk [vmem:[%s11242_s3 + $0x150] sm:$0xff] %vm2451_vm0, %v4317_v1  ;;  %4574 = vst.msk [vmem:[%s11242_s3 + $0x158] sm:$0xff] %vm2451_vm0, %v4318_v48  ;;  %v4327_v31 = vmax.f32 %v12647_v9, 0.0  ;;  %v4329_v50 = vmax.f32 %v12649_v14, 0.0  ;;  %v12650_v39 = vld [vmem:[#allocation36_spill] sm:$0xff]  ;;  %v12652_v48 = vld [vmem:[#allocation34_spill] sm:$0xff] }
 0x420   :  { %v4330_v29 = vmax.f32 %v12650_v39, 0.0  ;;  %4575 = vst.msk [vmem:[%s11242_s3 + $0x160] sm:$0xff] %vm2451_vm0, %v4319_v61  ;;  %4576 = vst.msk [vmem:[%s11242_s3 + $0x168] sm:$0xff] %vm2451_vm0, %v4320_v55  ;;  %v12651_v33 = vld [vmem:[#allocation40_spill] sm:$0xff]  ;;  %v4332_v41 = vmax.f32 %v12652_v48, 0.0  ;;  %v12653_v61 = vld [vmem:[#allocation38_spill] sm:$0xff] }
 0x421   :  { %4577 = vst.msk [vmem:[%s11242_s3 + $0x170] sm:$0xff] %vm2451_vm0, %v4321_v57  ;;  %4578 = vst.msk [vmem:[%s11242_s3 + $0x178] sm:$0xff] %vm2451_vm0, %v4322_v59  ;;  %v4331_v1 = vmax.f32 %v12651_v33, 0.0  ;;  %v4333_v10 = vmax.f32 %v12653_v61, 0.0  ;;  %v12654_v32 = vld [vmem:[#allocation44_spill] sm:$0xff]  ;;  %v12656_v59 = vld [vmem:[#allocation42_spill] sm:$0xff] }
 0x422   :  { %v4334_v9 = vmax.f32 %v12654_v32, 0.0  ;;  %4579 = vst.msk [vmem:[%s11242_s3 + $0x180] sm:$0xff] %vm2451_vm0, %v4323_v27  ;;  %4580 = vst.msk [vmem:[%s11242_s3 + $0x188] sm:$0xff] %vm2451_vm0, %v4324_v0  ;;  %v12655_v55 = vld [vmem:[#allocation48_spill] sm:$0xff]  ;;  %v4336_v53 = vmax.f32 %v12656_v59, 0.0  ;;  %v12657_v27 = vld [vmem:[#allocation46_spill] sm:$0xff] }
 0x423   :  { %4581 = vst.msk [vmem:[%s11242_s3 + $0x190] sm:$0xff] %vm2451_vm0, %v4325_v25  ;;  %4582 = vst.msk [vmem:[%s11242_s3 + $0x198] sm:$0xff] %vm2451_vm0, %v4326_v56  ;;  %v4335_v57 = vmax.f32 %v12655_v55, 0.0  ;;  %v4337_v14 = vmax.f32 %v12657_v27, 0.0  ;;  %v12658_v39 = vld [vmem:[#allocation52_spill] sm:$0xff]  ;;  %v12660_v56 = vld [vmem:[#allocation50_spill] sm:$0xff] }
 0x424   :  { %v4338_v33 = vmax.f32 %v12658_v39, 0.0  ;;  %4583 = vst.msk [vmem:[%s11242_s3 + $0x1a0] sm:$0xff] %vm2451_vm0, %v4327_v31  ;;  %4584 = vst.msk [vmem:[%s11242_s3 + $0x1a8] sm:$0xff] %vm2451_vm0, %v4328_v28  ;;  %v12659_v0 = vld [vmem:[#allocation56_spill] sm:$0xff]  ;;  %v4340_v48 = vmax.f32 %v12660_v56, 0.0  ;;  %v12661_v31 = vld [vmem:[#allocation54_spill] sm:$0xff] }
 0x425   :  { %4585 = vst.msk [vmem:[%s11242_s3 + $0x1b0] sm:$0xff] %vm2451_vm0, %v4329_v50  ;;  %4586 = vst.msk [vmem:[%s11242_s3 + $0x1b8] sm:$0xff] %vm2451_vm0, %v4330_v29  ;;  %v4339_v25 = vmax.f32 %v12659_v0, 0.0  ;;  %v4341_v61 = vmax.f32 %v12661_v31, 0.0  ;;  %v12662_v32 = vld [vmem:[#allocation60_spill] sm:$0xff]  ;;  %v12664_v29 = vld [vmem:[#allocation58_spill] sm:$0xff] }
 0x426   :  { %v4342_v55 = vmax.f32 %v12662_v32, 0.0  ;;  %4587 = vst.msk [vmem:[%s11242_s3 + $0x1c0] sm:$0xff] %vm2451_vm0, %v4331_v1  ;;  %4588 = vst.msk [vmem:[%s11242_s3 + $0x1c8] sm:$0xff] %vm2451_vm0, %v4332_v41  ;;  %v12663_v28 = vld [vmem:[#allocation64_spill] sm:$0xff]  ;;  %v4344_v59 = vmax.f32 %v12664_v29, 0.0  ;;  %v12665_v1 = vld [vmem:[#allocation62_spill] sm:$0xff] }
 0x427   :  { %4589 = vst.msk [vmem:[%s11242_s3 + $0x1d0] sm:$0xff] %vm2451_vm0, %v4333_v10  ;;  %4590 = vst.msk [vmem:[%s11242_s3 + $0x1d8] sm:$0xff] %vm2451_vm0, %v4334_v9  ;;  %v4343_v50 = vmax.f32 %v12663_v28, 0.0  ;;  %v4345_v27 = vmax.f32 %v12665_v1, 0.0  ;;  %v12666_v39 = vld [vmem:[#allocation68_spill] sm:$0xff]  ;;  %v12668_v9 = vld [vmem:[#allocation66_spill] sm:$0xff] }
 0x428   :  { %v4346_v0 = vmax.f32 %v12666_v39, 0.0  ;;  %4591 = vst.msk [vmem:[%s11242_s3 + $0x1e0] sm:$0xff] %vm2451_vm0, %v4335_v57  ;;  %4592 = vst.msk [vmem:[%s11242_s3 + $0x1e8] sm:$0xff] %vm2451_vm0, %v4336_v53  ;;  %v12667_v41 = vld [vmem:[#allocation72_spill] sm:$0xff]  ;;  %v4348_v56 = vmax.f32 %v12668_v9, 0.0  ;;  %v12669_v57 = vld [vmem:[#allocation70_spill] sm:$0xff] }
 0x429   :  { %4593 = vst.msk [vmem:[%s11242_s3 + $0x1f0] sm:$0xff] %vm2451_vm0, %v4337_v14  ;;  %4594 = vst.msk [vmem:[%s11242_s3 + $0x1f8] sm:$0xff] %vm2451_vm0, %v4338_v33  ;;  %v4347_v10 = vmax.f32 %v12667_v41, 0.0  ;;  %v4349_v31 = vmax.f32 %v12669_v57, 0.0  ;;  %v12670_v32 = vld [vmem:[#allocation76_spill] sm:$0xff]  ;;  %v12672_v33 = vld [vmem:[#allocation74_spill] sm:$0xff] }
 0x42a   :  { %v4350_v28 = vmax.f32 %v12670_v32, 0.0  ;;  %4595 = vst.msk [vmem:[%s11242_s3 + $0x200] sm:$0xff] %vm2451_vm0, %v4339_v25  ;;  %4596 = vst.msk [vmem:[%s11242_s3 + $0x208] sm:$0xff] %vm2451_vm0, %v4340_v48  ;;  %v12671_v53 = vld [vmem:[#allocation80_spill] sm:$0xff]  ;;  %v4352_v29 = vmax.f32 %v12672_v33, 0.0  ;;  %v12673_v25 = vld [vmem:[#allocation78_spill] sm:$0xff] }
 0x42b   :  { %4597 = vst.msk [vmem:[%s11242_s3 + $0x210] sm:$0xff] %vm2451_vm0, %v4341_v61  ;;  %4598 = vst.msk [vmem:[%s11242_s3 + $0x218] sm:$0xff] %vm2451_vm0, %v4342_v55  ;;  %v4351_v14 = vmax.f32 %v12671_v53, 0.0  ;;  %v4353_v1 = vmax.f32 %v12673_v25, 0.0  ;;  %v12674_v39 = vld [vmem:[#allocation84_spill] sm:$0xff]  ;;  %v12676_v55 = vld [vmem:[#allocation82_spill] sm:$0xff] }
 0x42c   :  { %v4354_v41 = vmax.f32 %v12674_v39, 0.0  ;;  %4599 = vst.msk [vmem:[%s11242_s3 + $0x220] sm:$0xff] %vm2451_vm0, %v4343_v50  ;;  %4600 = vst.msk [vmem:[%s11242_s3 + $0x228] sm:$0xff] %vm2451_vm0, %v4344_v59  ;;  %v12675_v48 = vld [vmem:[#allocation88_spill] sm:$0xff]  ;;  %v4356_v9 = vmax.f32 %v12676_v55, 0.0  ;;  %v12677_v50 = vld [vmem:[#allocation86_spill] sm:$0xff] }
 0x42d   :  { %4601 = vst.msk [vmem:[%s11242_s3 + $0x230] sm:$0xff] %vm2451_vm0, %v4345_v27  ;;  %4602 = vst.msk [vmem:[%s11242_s3 + $0x238] sm:$0xff] %vm2451_vm0, %v4346_v0  ;;  %v4355_v61 = vmax.f32 %v12675_v48, 0.0  ;;  %v4357_v57 = vmax.f32 %v12677_v50, 0.0  ;;  %v12678_v32 = vld [vmem:[#allocation92_spill] sm:$0xff]  ;;  %v12680_v0 = vld [vmem:[#allocation90_spill] sm:$0xff] }
 0x42e   :  { %v4358_v53 = vmax.f32 %v12678_v32, 0.0  ;;  %4603 = vst.msk [vmem:[%s11242_s3 + $0x240] sm:$0xff] %vm2451_vm0, %v4347_v10  ;;  %4604 = vst.msk [vmem:[%s11242_s3 + $0x248] sm:$0xff] %vm2451_vm0, %v4348_v56  ;;  %v12679_v59 = vld [vmem:[#allocation96_spill] sm:$0xff]  ;;  %v4360_v33 = vmax.f32 %v12680_v0, 0.0  ;;  %v12681_v10 = vld [vmem:[#allocation94_spill] sm:$0xff] }
 0x42f   :  { %4605 = vst.msk [vmem:[%s11242_s3 + $0x250] sm:$0xff] %vm2451_vm0, %v4349_v31  ;;  %4606 = vst.msk [vmem:[%s11242_s3 + $0x258] sm:$0xff] %vm2451_vm0, %v4350_v28  ;;  %v4359_v27 = vmax.f32 %v12679_v59, 0.0  ;;  %v4361_v25 = vmax.f32 %v12681_v10, 0.0  ;;  %v12682_v39 = vld [vmem:[#allocation100_spill] sm:$0xff]  ;;  %v12684_v28 = vld [vmem:[#allocation98_spill] sm:$0xff] }
 0x430   :  { %v4362_v48 = vmax.f32 %v12682_v39, 0.0  ;;  %4607 = vst.msk [vmem:[%s11242_s3 + $0x260] sm:$0xff] %vm2451_vm0, %v4351_v14  ;;  %4608 = vst.msk [vmem:[%s11242_s3 + $0x268] sm:$0xff] %vm2451_vm0, %v4352_v29  ;;  %v12683_v56 = vld [vmem:[#allocation104_spill] sm:$0xff]  ;;  %v4364_v55 = vmax.f32 %v12684_v28, 0.0  ;;  %v12685_v14 = vld [vmem:[#allocation102_spill] sm:$0xff] }
 0x431   :  { %4609 = vst.msk [vmem:[%s11242_s3 + $0x270] sm:$0xff] %vm2451_vm0, %v4353_v1  ;;  %4610 = vst.msk [vmem:[%s11242_s3 + $0x278] sm:$0xff] %vm2451_vm0, %v4354_v41  ;;  %v4363_v31 = vmax.f32 %v12683_v56, 0.0  ;;  %v4365_v50 = vmax.f32 %v12685_v14, 0.0  ;;  %v12686_v32 = vld [vmem:[#allocation108_spill] sm:$0xff]  ;;  %v12688_v41 = vld [vmem:[#allocation106_spill] sm:$0xff] }
 0x432   :  { %v4366_v59 = vmax.f32 %v12686_v32, 0.0  ;;  %4611 = vst.msk [vmem:[%s11242_s3 + $0x280] sm:$0xff] %vm2451_vm0, %v4355_v61  ;;  %4612 = vst.msk [vmem:[%s11242_s3 + $0x288] sm:$0xff] %vm2451_vm0, %v4356_v9  ;;  %v12687_v29 = vld [vmem:[#allocation112_spill] sm:$0xff]  ;;  %v4368_v0 = vmax.f32 %v12688_v41, 0.0  ;;  %v12689_v61 = vld [vmem:[#allocation110_spill] sm:$0xff] }
 0x433   :  { %4613 = vst.msk [vmem:[%s11242_s3 + $0x290] sm:$0xff] %vm2451_vm0, %v4357_v57  ;;  %4614 = vst.msk [vmem:[%s11242_s3 + $0x298] sm:$0xff] %vm2451_vm0, %v4358_v53  ;;  %v4367_v1 = vmax.f32 %v12687_v29, 0.0  ;;  %v4369_v10 = vmax.f32 %v12689_v61, 0.0  ;;  %v12690_v39 = vld [vmem:[#allocation21_spill] sm:$0xff]  ;;  %v12692_v53 = vld [vmem:[#allocation19_spill] sm:$0xff] }
 0x434   :  { %v4370_v56 = vmax.f32 %v12690_v39, 0.0  ;;  %4615 = vst.msk [vmem:[%s11242_s3 + $0x2a0] sm:$0xff] %vm2451_vm0, %v4359_v27  ;;  %4616 = vst.msk [vmem:[%s11242_s3 + $0x2a8] sm:$0xff] %vm2451_vm0, %v4360_v33  ;;  %v12691_v9 = vld [vmem:[#allocation25_spill] sm:$0xff]  ;;  %v4372_v28 = vmax.f32 %v12692_v53, 0.0  ;;  %v12693_v27 = vld [vmem:[#allocation23_spill] sm:$0xff] }
 0x435   :  { %4617 = vst.msk [vmem:[%s11242_s3 + $0x2b0] sm:$0xff] %vm2451_vm0, %v4361_v25  ;;  %4618 = vst.msk [vmem:[%s11242_s3 + $0x2b8] sm:$0xff] %vm2451_vm0, %v4362_v48  ;;  %v4371_v57 = vmax.f32 %v12691_v9, 0.0  ;;  %v4373_v14 = vmax.f32 %v12693_v27, 0.0  ;;  %v12694_v32 = vld [vmem:[#allocation29_spill] sm:$0xff]  ;;  %v12696_v48 = vld [vmem:[#allocation27_spill] sm:$0xff] }
 0x436   :  { %v4374_v29 = vmax.f32 %v12694_v32, 0.0  ;;  %4619 = vst.msk [vmem:[%s11242_s3 + $0x2c0] sm:$0xff] %vm2451_vm0, %v4363_v31  ;;  %4620 = vst.msk [vmem:[%s11242_s3 + $0x2c8] sm:$0xff] %vm2451_vm0, %v4364_v55  ;;  %v12695_v33 = vld [vmem:[#allocation33_spill] sm:$0xff]  ;;  %v4376_v41 = vmax.f32 %v12696_v48, 0.0  ;;  %v12697_v31 = vld [vmem:[#allocation31_spill] sm:$0xff] }
 0x437   :  { %4621 = vst.msk [vmem:[%s11242_s3 + $0x2d0] sm:$0xff] %vm2451_vm0, %v4365_v50  ;;  %4622 = vst.msk [vmem:[%s11242_s3 + $0x2d8] sm:$0xff] %vm2451_vm0, %v4366_v59  ;;  %v4375_v25 = vmax.f32 %v12695_v33, 0.0  ;;  %v4377_v61 = vmax.f32 %v12697_v31, 0.0  ;;  %v12698_v39 = vld [vmem:[#allocation37_spill] sm:$0xff]  ;;  %v12700_v59 = vld [vmem:[#allocation35_spill] sm:$0xff] }
 0x438   :  { %v4378_v9 = vmax.f32 %v12698_v39, 0.0  ;;  %4623 = vst.msk [vmem:[%s11242_s3 + $0x2e0] sm:$0xff] %vm2451_vm0, %v4367_v1  ;;  %4624 = vst.msk [vmem:[%s11242_s3 + $0x2e8] sm:$0xff] %vm2451_vm0, %v4368_v0  ;;  %v12699_v55 = vld [vmem:[#allocation41_spill] sm:$0xff]  ;;  %v4380_v53 = vmax.f32 %v12700_v59, 0.0  ;;  %v12701_v1 = vld [vmem:[#allocation39_spill] sm:$0xff] }
 0x439   :  { %4625 = vst.msk [vmem:[%s11242_s3 + $0x2f0] sm:$0xff] %vm2451_vm0, %v4369_v10  ;;  %4626 = vst.msk [vmem:[%s11242_s3 + $0x2f8] sm:$0xff] %vm2451_vm0, %v4370_v56  ;;  %v4379_v50 = vmax.f32 %v12699_v55, 0.0  ;;  %v4381_v27 = vmax.f32 %v12701_v1, 0.0  ;;  %v12702_v32 = vld [vmem:[#allocation45_spill] sm:$0xff]  ;;  %v12704_v56 = vld [vmem:[#allocation43_spill] sm:$0xff] }
 0x43a   :  { %v4382_v33 = vmax.f32 %v12702_v32, 0.0  ;;  %4627 = vst.msk [vmem:[%s11242_s3 + $0x300] sm:$0xff] %vm2451_vm0, %v4371_v57  ;;  %4628 = vst.msk [vmem:[%s11242_s3 + $0x308] sm:$0xff] %vm2451_vm0, %v4372_v28  ;;  %v12703_v0 = vld [vmem:[#allocation49_spill] sm:$0xff]  ;;  %v4384_v48 = vmax.f32 %v12704_v56, 0.0  ;;  %v12705_v57 = vld [vmem:[#allocation47_spill] sm:$0xff] }
 0x43b   :  { %4629 = vst.msk [vmem:[%s11242_s3 + $0x310] sm:$0xff] %vm2451_vm0, %v4373_v14  ;;  %4630 = vst.msk [vmem:[%s11242_s3 + $0x318] sm:$0xff] %vm2451_vm0, %v4374_v29  ;;  %v4383_v10 = vmax.f32 %v12703_v0, 0.0  ;;  %v4385_v31 = vmax.f32 %v12705_v57, 0.0  ;;  %v12706_v39 = vld [vmem:[#allocation53_spill] sm:$0xff]  ;;  %v12708_v29 = vld [vmem:[#allocation51_spill] sm:$0xff] }
 0x43c   :  { %v4386_v55 = vmax.f32 %v12706_v39, 0.0  ;;  %4631 = vst.msk [vmem:[%s11242_s3 + $0x320] sm:$0xff] %vm2451_vm0, %v4375_v25  ;;  %4632 = vst.msk [vmem:[%s11242_s3 + $0x328] sm:$0xff] %vm2451_vm0, %v4376_v41  ;;  %v12707_v28 = vld [vmem:[#allocation57_spill] sm:$0xff]  ;;  %v4388_v59 = vmax.f32 %v12708_v29, 0.0  ;;  %v12709_v25 = vld [vmem:[#allocation55_spill] sm:$0xff] }
 0x43d   :  { %4633 = vst.msk [vmem:[%s11242_s3 + $0x330] sm:$0xff] %vm2451_vm0, %v4377_v61  ;;  %4634 = vst.msk [vmem:[%s11242_s3 + $0x338] sm:$0xff] %vm2451_vm0, %v4378_v9  ;;  %v4387_v14 = vmax.f32 %v12707_v28, 0.0  ;;  %v4389_v1 = vmax.f32 %v12709_v25, 0.0  ;;  %v12710_v32 = vld [vmem:[#allocation61_spill] sm:$0xff]  ;;  %v12712_v9 = vld [vmem:[#allocation59_spill] sm:$0xff] }
 0x43e   :  { %v4390_v0 = vmax.f32 %v12710_v32, 0.0  ;;  %4635 = vst.msk [vmem:[%s11242_s3 + $0x340] sm:$0xff] %vm2451_vm0, %v4379_v50  ;;  %4636 = vst.msk [vmem:[%s11242_s3 + $0x348] sm:$0xff] %vm2451_vm0, %v4380_v53  ;;  %v12711_v41 = vld [vmem:[#allocation65_spill] sm:$0xff]  ;;  %v4392_v56 = vmax.f32 %v12712_v9, 0.0  ;;  %v12713_v50 = vld [vmem:[#allocation63_spill] sm:$0xff] }
 0x43f   :  { %4637 = vst.msk [vmem:[%s11242_s3 + $0x350] sm:$0xff] %vm2451_vm0, %v4381_v27  ;;  %4638 = vst.msk [vmem:[%s11242_s3 + $0x358] sm:$0xff] %vm2451_vm0, %v4382_v33  ;;  %v4391_v61 = vmax.f32 %v12711_v41, 0.0  ;;  %v4393_v57 = vmax.f32 %v12713_v50, 0.0  ;;  %v12714_v39 = vld [vmem:[#allocation69_spill] sm:$0xff]  ;;  %v12716_v33 = vld [vmem:[#allocation67_spill] sm:$0xff] }
 0x440   :  { %v4394_v28 = vmax.f32 %v12714_v39, 0.0  ;;  %4639 = vst.msk [vmem:[%s11242_s3 + $0x360] sm:$0xff] %vm2451_vm0, %v4383_v10  ;;  %4640 = vst.msk [vmem:[%s11242_s3 + $0x368] sm:$0xff] %vm2451_vm0, %v4384_v48  ;;  %v12715_v53 = vld [vmem:[#allocation73_spill] sm:$0xff]  ;;  %v4396_v29 = vmax.f32 %v12716_v33, 0.0  ;;  %v12717_v10 = vld [vmem:[#allocation71_spill] sm:$0xff] }
 0x441   :  { %4641 = vst.msk [vmem:[%s11242_s3 + $0x370] sm:$0xff] %vm2451_vm0, %v4385_v31  ;;  %4642 = vst.msk [vmem:[%s11242_s3 + $0x378] sm:$0xff] %vm2451_vm0, %v4386_v55  ;;  %v4395_v27 = vmax.f32 %v12715_v53, 0.0  ;;  %v4397_v25 = vmax.f32 %v12717_v10, 0.0  ;;  %v12718_v32 = vld [vmem:[#allocation77_spill] sm:$0xff]  ;;  %v12720_v55 = vld [vmem:[#allocation75_spill] sm:$0xff] }
 0x442   :  { %v4398_v41 = vmax.f32 %v12718_v32, 0.0  ;;  %4643 = vst.msk [vmem:[%s11242_s3 + $0x380] sm:$0xff] %vm2451_vm0, %v4387_v14  ;;  %4644 = vst.msk [vmem:[%s11242_s3 + $0x388] sm:$0xff] %vm2451_vm0, %v4388_v59  ;;  %v12719_v48 = vld [vmem:[#allocation81_spill] sm:$0xff]  ;;  %v4400_v9 = vmax.f32 %v12720_v55, 0.0  ;;  %v12721_v14 = vld [vmem:[#allocation79_spill] sm:$0xff] }
 0x443   :  { %4645 = vst.msk [vmem:[%s11242_s3 + $0x390] sm:$0xff] %vm2451_vm0, %v4389_v1  ;;  %4646 = vst.msk [vmem:[%s11242_s3 + $0x398] sm:$0xff] %vm2451_vm0, %v4390_v0  ;;  %v4399_v31 = vmax.f32 %v12719_v48, 0.0  ;;  %v4401_v50 = vmax.f32 %v12721_v14, 0.0  ;;  %v12722_v39 = vld [vmem:[#allocation85_spill] sm:$0xff]  ;;  %v12724_v0 = vld [vmem:[#allocation83_spill] sm:$0xff] }
 0x444   :  { %v4402_v53 = vmax.f32 %v12722_v39, 0.0  ;;  %4647 = vst.msk [vmem:[%s11242_s3 + $0x3a0] sm:$0xff] %vm2451_vm0, %v4391_v61  ;;  %4648 = vst.msk [vmem:[%s11242_s3 + $0x3a8] sm:$0xff] %vm2451_vm0, %v4392_v56  ;;  %v12723_v59 = vld [vmem:[#allocation89_spill] sm:$0xff]  ;;  %v4404_v33 = vmax.f32 %v12724_v0, 0.0  ;;  %v12725_v61 = vld [vmem:[#allocation87_spill] sm:$0xff] }
 0x445   :  { %4649 = vst.msk [vmem:[%s11242_s3 + $0x3b0] sm:$0xff] %vm2451_vm0, %v4393_v57  ;;  %4650 = vst.msk [vmem:[%s11242_s3 + $0x3b8] sm:$0xff] %vm2451_vm0, %v4394_v28  ;;  %v4403_v1 = vmax.f32 %v12723_v59, 0.0  ;;  %v4405_v10 = vmax.f32 %v12725_v61, 0.0  ;;  %v12726_v32 = vld [vmem:[#allocation93_spill] sm:$0xff]  ;;  %v12728_v28 = vld [vmem:[#allocation91_spill] sm:$0xff] }
 0x446   :  { %v4406_v48 = vmax.f32 %v12726_v32, 0.0  ;;  %4651 = vst.msk [vmem:[%s11242_s3 + $0x3c0] sm:$0xff] %vm2451_vm0, %v4395_v27  ;;  %4652 = vst.msk [vmem:[%s11242_s3 + $0x3c8] sm:$0xff] %vm2451_vm0, %v4396_v29  ;;  %v12727_v56 = vld [vmem:[#allocation97_spill] sm:$0xff]  ;;  %v4408_v55 = vmax.f32 %v12728_v28, 0.0  ;;  %v12729_v27 = vld [vmem:[#allocation95_spill] sm:$0xff] }
 0x447   :  { %4653 = vst.msk [vmem:[%s11242_s3 + $0x3d0] sm:$0xff] %vm2451_vm0, %v4397_v25  ;;  %4654 = vst.msk [vmem:[%s11242_s3 + $0x3d8] sm:$0xff] %vm2451_vm0, %v4398_v41  ;;  %v4407_v57 = vmax.f32 %v12727_v56, 0.0  ;;  %v4409_v14 = vmax.f32 %v12729_v27, 0.0  ;;  %v12730_v39 = vld [vmem:[#allocation101_spill] sm:$0xff]  ;;  %v12732_v41 = vld [vmem:[#allocation99_spill] sm:$0xff] }
 0x448   :  { %v4410_v59 = vmax.f32 %v12730_v39, 0.0  ;;  %4655 = vst.msk [vmem:[%s11242_s3 + $0x3e0] sm:$0xff] %vm2451_vm0, %v4399_v31  ;;  %4656 = vst.msk [vmem:[%s11242_s3 + $0x3e8] sm:$0xff] %vm2451_vm0, %v4400_v9  ;;  %v12731_v29 = vld [vmem:[#allocation105_spill] sm:$0xff]  ;;  %v4412_v0 = vmax.f32 %v12732_v41, 0.0  ;;  %v12733_v31 = vld [vmem:[#allocation103_spill] sm:$0xff] }
 0x449   :  { %4657 = vst.msk [vmem:[%s11242_s3 + $0x3f0] sm:$0xff] %vm2451_vm0, %v4401_v50  ;;  %4658 = vst.msk [vmem:[%s11242_s3 + $0x3f8] sm:$0xff] %vm2451_vm0, %v4402_v53  ;;  %v4411_v25 = vmax.f32 %v12731_v29, 0.0  ;;  %v4413_v61 = vmax.f32 %v12733_v31, 0.0  ;;  %v12734_v32 = vld [vmem:[#allocation109_spill] sm:$0xff]  ;;  %v12736_v53 = vld [vmem:[#allocation107_spill] sm:$0xff] }
 0x44a   :  { %v4414_v56 = vmax.f32 %v12734_v32, 0.0  ;;  %4659 = vst.msk [vmem:[%s11242_s3 + $0x400] sm:$0xff] %vm2451_vm0, %v4403_v1  ;;  %4660 = vst.msk [vmem:[%s11242_s3 + $0x408] sm:$0xff] %vm2451_vm0, %v4404_v33  ;;  %v12735_v9 = vld [vmem:[#allocation113_spill] sm:$0xff]  ;;  %v4416_v28 = vmax.f32 %v12736_v53, 0.0  ;;  %v12737_v1 = vld [vmem:[#allocation111_spill] sm:$0xff] }
 0x44b   :  { %4661 = vst.msk [vmem:[%s11242_s3 + $0x410] sm:$0xff] %vm2451_vm0, %v4405_v10  ;;  %4662 = vst.msk [vmem:[%s11242_s3 + $0x418] sm:$0xff] %vm2451_vm0, %v4406_v48  ;;  %v4415_v50 = vmax.f32 %v12735_v9, 0.0  ;;  %v4417_v27 = vmax.f32 %v12737_v1, 0.0  ;;  %v12738_v39 = vld [vmem:[#allocation116_spill] sm:$0xff]  ;;  %v12740_v48 = vld [vmem:[#allocation114_spill] sm:$0xff] }
 0x44c   :  { %v4418_v29 = vmax.f32 %v12738_v39, 0.0  ;;  %4663 = vst.msk [vmem:[%s11242_s3 + $0x420] sm:$0xff] %vm2451_vm0, %v4407_v57  ;;  %4664 = vst.msk [vmem:[%s11242_s3 + $0x428] sm:$0xff] %vm2451_vm0, %v4408_v55  ;;  %v12739_v33 = vld [vmem:[#allocation120_spill] sm:$0xff]  ;;  %v4420_v41 = vmax.f32 %v12740_v48, 0.0  ;;  %v12741_v57 = vld [vmem:[#allocation118_spill] sm:$0xff] }
 0x44d   :  { %4665 = vst.msk [vmem:[%s11242_s3 + $0x430] sm:$0xff] %vm2451_vm0, %v4409_v14  ;;  %4666 = vst.msk [vmem:[%s11242_s3 + $0x438] sm:$0xff] %vm2451_vm0, %v4410_v59  ;;  %v4419_v10 = vmax.f32 %v12739_v33, 0.0  ;;  %v4421_v31 = vmax.f32 %v12741_v57, 0.0  ;;  %v12742_v32 = vld [vmem:[#allocation123_spill] sm:$0xff]  ;;  %v12743_v55 = vld [vmem:[#allocation126_spill] sm:$0xff] }
 0x44e   :  { %v4422_v9 = vmax.f32 %v12742_v32, 0.0  ;;  %4667 = vst.msk [vmem:[%s11242_s3 + $0x440] sm:$0xff] %vm2451_vm0, %v4411_v25  ;;  %4668 = vst.msk [vmem:[%s11242_s3 + $0x448] sm:$0xff] %vm2451_vm0, %v4412_v0  ;;  %v4423_v14 = vmax.f32 %v12743_v55, 0.0  ;;  %v12744_v59 = vld [vmem:[#allocation122_spill] sm:$0xff]  ;;  %v12745_v25 = vld [vmem:[#allocation124_spill] sm:$0xff] }
 0x44f   :  { %4669 = vst.msk [vmem:[%s11242_s3 + $0x450] sm:$0xff] %vm2451_vm0, %v4413_v61  ;;  %4670 = vst.msk [vmem:[%s11242_s3 + $0x458] sm:$0xff] %vm2451_vm0, %v4414_v56  ;;  %v4424_v53 = vmax.f32 %v12744_v59, 0.0  ;;  %v4425_v1 = vmax.f32 %v12745_v25, 0.0  ;;  %v12746_v39 = vld [vmem:[#allocation131_spill] sm:$0xff]  ;;  %v12747_v0 = vld [vmem:[#allocation134_spill] sm:$0xff] }
 0x450   :  { %v4426_v33 = vmax.f32 %v12746_v39, 0.0  ;;  %4671 = vst.msk [vmem:[%s11242_s3 + $0x460] sm:$0xff] %vm2451_vm0, %v4415_v50  ;;  %4672 = vst.msk [vmem:[%s11242_s3 + $0x468] sm:$0xff] %vm2451_vm0, %v4416_v28  ;;  %v4427_v61 = vmax.f32 %v12747_v0, 0.0  ;;  %v12748_v56 = vld [vmem:[#allocation130_spill] sm:$0xff]  ;;  %v12749_v50 = vld [vmem:[#allocation132_spill] sm:$0xff] }
 0x451   :  { %4673 = vst.msk [vmem:[%s11242_s3 + $0x470] sm:$0xff] %vm2451_vm0, %v4417_v27  ;;  %4674 = vst.msk [vmem:[%s11242_s3 + $0x478] sm:$0xff] %vm2451_vm0, %v4418_v29  ;;  %v4428_v48 = vmax.f32 %v12748_v56, 0.0  ;;  %v4429_v57 = vmax.f32 %v12749_v50, 0.0  ;;  %v12750_v32 = vld [vmem:[#allocation139_spill] sm:$0xff]  ;;  %v12751_v28 = vld [vmem:[#allocation142_spill] sm:$0xff] }
 0x452   :  { %v4430_v55 = vmax.f32 %v12750_v32, 0.0  ;;  %4675 = vst.msk [vmem:[%s11242_s3 + $0x480] sm:$0xff] %vm2451_vm0, %v4419_v10  ;;  %4676 = vst.msk [vmem:[%s11242_s3 + $0x488] sm:$0xff] %vm2451_vm0, %v4420_v41  ;;  %v4431_v27 = vmax.f32 %v12751_v28, 0.0  ;;  %v12752_v29 = vld [vmem:[#allocation138_spill] sm:$0xff]  ;;  %v12753_v10 = vld [vmem:[#allocation140_spill] sm:$0xff] }
 0x453   :  { %4677 = vst.msk [vmem:[%s11242_s3 + $0x490] sm:$0xff] %vm2451_vm0, %v4421_v31  ;;  %4678 = vst.msk [vmem:[%s11242_s3 + $0x498] sm:$0xff] %vm2451_vm0, %v4422_v9  ;;  %v4432_v59 = vmax.f32 %v12752_v29, 0.0  ;;  %v4433_v25 = vmax.f32 %v12753_v10, 0.0  ;;  %v12754_v39 = vld [vmem:[#allocation117_spill] sm:$0xff]  ;;  %v12756_v9 = vld [vmem:[#allocation115_spill] sm:$0xff] }
 0x454   :  { %v4434_v0 = vmax.f32 %v12754_v39, 0.0  ;;  %4679 = vst.msk [vmem:[%s11242_s3 + $0x4a0] sm:$0xff] %vm2451_vm0, %v4423_v14  ;;  %4680 = vst.msk [vmem:[%s11242_s3 + $0x4a8] sm:$0xff] %vm2451_vm0, %v4424_v53  ;;  %v12755_v41 = vld [vmem:[#allocation121_spill] sm:$0xff]  ;;  %v4436_v56 = vmax.f32 %v12756_v9, 0.0  ;;  %v12757_v14 = vld [vmem:[#allocation119_spill] sm:$0xff] }
 0x455   :  { %4681 = vst.msk [vmem:[%s11242_s3 + $0x4b0] sm:$0xff] %vm2451_vm0, %v4425_v1  ;;  %4682 = vst.msk [vmem:[%s11242_s3 + $0x4b8] sm:$0xff] %vm2451_vm0, %v4426_v33  ;;  %v4435_v31 = vmax.f32 %v12755_v41, 0.0  ;;  %v4437_v50 = vmax.f32 %v12757_v14, 0.0  ;;  %v12758_v32 = vld [vmem:[#allocation127_spill] sm:$0xff]  ;;  %v12759_v53 = vld [vmem:[#allocation129_spill] sm:$0xff] }
 0x456   :  { %v4438_v28 = vmax.f32 %v12758_v32, 0.0  ;;  %4683 = vst.msk [vmem:[%s11242_s3 + $0x4c0] sm:$0xff] %vm2451_vm0, %v4427_v61  ;;  %4684 = vst.msk [vmem:[%s11242_s3 + $0x4c8] sm:$0xff] %vm2451_vm0, %v4428_v48  ;;  %v4439_v1 = vmax.f32 %v12759_v53, 0.0  ;;  %v12760_v33 = vld [vmem:[#allocation125_spill] sm:$0xff]  ;;  %v12761_v61 = vld [vmem:[#allocation128_spill] sm:$0xff] }
 0x457   :  { %4685 = vst.msk [vmem:[%s11242_s3 + $0x4d0] sm:$0xff] %vm2451_vm0, %v4429_v57  ;;  %4686 = vst.msk [vmem:[%s11242_s3 + $0x4d8] sm:$0xff] %vm2451_vm0, %v4430_v55  ;;  %v4440_v29 = vmax.f32 %v12760_v33, 0.0  ;;  %v4441_v10 = vmax.f32 %v12761_v61, 0.0  ;;  %v12762_v39 = vld [vmem:[#allocation135_spill] sm:$0xff]  ;;  %v12763_v48 = vld [vmem:[#allocation137_spill] sm:$0xff] }
 0x458   :  { %v4442_v41 = vmax.f32 %v12762_v39, 0.0  ;;  %4687 = vst.msk [vmem:[%s11242_s3 + $0x4e0] sm:$0xff] %vm2451_vm0, %v4431_v27  ;;  %4688 = vst.msk [vmem:[%s11242_s3 + $0x4e8] sm:$0xff] %vm2451_vm0, %v4432_v59  ;;  %v4443_v57 = vmax.f32 %v12763_v48, 0.0  ;;  %v12764_v55 = vld [vmem:[#allocation133_spill] sm:$0xff]  ;;  %v12765_v27 = vld [vmem:[#allocation136_spill] sm:$0xff] }
 0x459   :  { %4689 = vst.msk [vmem:[%s11242_s3 + $0x4f0] sm:$0xff] %vm2451_vm0, %v4433_v25  ;;  %4690 = vst.msk [vmem:[%s11242_s3 + $0x4f8] sm:$0xff] %vm2451_vm0, %v4434_v0  ;;  %v4444_v9 = vmax.f32 %v12764_v55, 0.0  ;;  %v4445_v14 = vmax.f32 %v12765_v27, 0.0  ;;  %v12766_v32 = vld [vmem:[#allocation143_spill] sm:$0xff]  ;;  %v12767_v59 = vld [vmem:[#allocation145_spill] sm:$0xff] }
 0x45a   :  { %v4446_v53 = vmax.f32 %v12766_v32, 0.0  ;;  %4691 = vst.msk [vmem:[%s11242_s3 + $0x500] sm:$0xff] %vm2451_vm0, %v4435_v31  ;;  %4692 = vst.msk [vmem:[%s11242_s3 + $0x508] sm:$0xff] %vm2451_vm0, %v4436_v56  ;;  %v4447_v25 = vmax.f32 %v12767_v59, 0.0  ;;  %v12768_v0 = vld [vmem:[#allocation141_spill] sm:$0xff]  ;;  %v12769_v31 = vld [vmem:[#allocation144_spill] sm:$0xff] }
 0x45b   :  { %4693 = vst.msk [vmem:[%s11242_s3 + $0x510] sm:$0xff] %vm2451_vm0, %v4437_v50  ;;  %4694 = vst.msk [vmem:[%s11242_s3 + $0x518] sm:$0xff] %vm2451_vm0, %v4438_v28  ;;  %v4448_v33 = vmax.f32 %v12768_v0, 0.0  ;;  %v4449_v61 = vmax.f32 %v12769_v31, 0.0  ;;  %v12770_v39 = vld [vmem:[#allocation147_spill] sm:$0xff]  ;;  %v12771_v56 = vld [vmem:[#allocation149_spill] sm:$0xff] }
 0x45c   :  { %v4450_v48 = vmax.f32 %v12770_v39, 0.0  ;;  %4695 = vst.msk [vmem:[%s11242_s3 + $0x520] sm:$0xff] %vm2451_vm0, %v4439_v1  ;;  %4696 = vst.msk [vmem:[%s11242_s3 + $0x528] sm:$0xff] %vm2451_vm0, %v4440_v29  ;;  %v4451_v50 = vmax.f32 %v12771_v56, 0.0  ;;  %v12772_v28 = vld [vmem:[#allocation146_spill] sm:$0xff]  ;;  %v12773_v1 = vld [vmem:[#allocation148_spill] sm:$0xff] }
 0x45d   :  { %4697 = vst.msk [vmem:[%s11242_s3 + $0x530] sm:$0xff] %vm2451_vm0, %v4441_v10  ;;  %4698 = vst.msk [vmem:[%s11242_s3 + $0x538] sm:$0xff] %vm2451_vm0, %v4442_v41  ;;  %v4452_v55 = vmax.f32 %v12772_v28, 0.0  ;;  %v4453_v27 = vmax.f32 %v12773_v1, 0.0  ;;  %v12774_v32 = vld [vmem:[#allocation151_spill] sm:$0xff]  ;;  %v12775_v29 = vld [vmem:[#allocation153_spill] sm:$0xff] }
 0x45e   :  { %v4454_v59 = vmax.f32 %v12774_v32, 0.0  ;;  %4699 = vst.msk [vmem:[%s11242_s3 + $0x540] sm:$0xff] %vm2451_vm0, %v4443_v57  ;;  %4700 = vst.msk [vmem:[%s11242_s3 + $0x548] sm:$0xff] %vm2451_vm0, %v4444_v9  ;;  %v4455_v10 = vmax.f32 %v12775_v29, 0.0  ;;  %v12776_v41 = vld [vmem:[#allocation150_spill] sm:$0xff]  ;;  %v12777_v57 = vld [vmem:[#allocation152_spill] sm:$0xff] }
 0x45f   :  { %4701 = vst.msk [vmem:[%s11242_s3 + $0x550] sm:$0xff] %vm2451_vm0, %v4445_v14  ;;  %4702 = vst.msk [vmem:[%s11242_s3 + $0x558] sm:$0xff] %vm2451_vm0, %v4446_v53  ;;  %v4456_v0 = vmax.f32 %v12776_v41, 0.0  ;;  %v4457_v31 = vmax.f32 %v12777_v57, 0.0  ;;  %v12778_v39 = vld [vmem:[#allocation155_spill] sm:$0xff]  ;;  %v4459_v9 = vmax.f32 %v9673_v43, 0.0 }
 0x460   :  { %v4458_v56 = vmax.f32 %v12778_v39, 0.0  ;;  %4703 = vst.msk [vmem:[%s11242_s3 + $0x560] sm:$0xff] %vm2451_vm0, %v4447_v25  ;;  %4704 = vst.msk [vmem:[%s11242_s3 + $0x568] sm:$0xff] %vm2451_vm0, %v4448_v33  ;;  %v12779_v14 = vld [vmem:[#allocation157_spill] sm:$0xff]  ;;  %v12780_v25 = vld [vmem:[#allocation154_spill] sm:$0xff]  ;;  %v4463_v43 = vmax.f32 %v9689_v12, 0.0 }
 0x461   :  { %4705 = vst.msk [vmem:[%s11242_s3 + $0x570] sm:$0xff] %vm2451_vm0, %v4449_v61  ;;  %4706 = vst.msk [vmem:[%s11242_s3 + $0x578] sm:$0xff] %vm2451_vm0, %v4450_v48  ;;  %v4460_v53 = vmax.f32 %v12779_v14, 0.0  ;;  %v4461_v28 = vmax.f32 %v12780_v25, 0.0  ;;  %v12781_v1 = vld [vmem:[#allocation156_spill] sm:$0xff]  ;;  %v4464_v33 = vmax.f32 %v9693_v24, 0.0 }
 0x462   :  { %v4462_v32 = vmax.f32 %v12781_v1, 0.0  ;;  %4707 = vst.msk [vmem:[%s11242_s3 + $0x580] sm:$0xff] %vm2451_vm0, %v4451_v50  ;;  %4708 = vst.msk [vmem:[%s11242_s3 + $0x588] sm:$0xff] %vm2451_vm0, %v4452_v55  ;;  %v12782_v61 = vld [vmem:[#allocation159_spill] sm:$0xff]  ;;  %v12783_v50 = vld [vmem:[#allocation161_spill] sm:$0xff]  ;;  %v4467_v12 = vmax.f32 %v9705_v63, 0.0 }
 0x463   :  { %4709 = vst.msk [vmem:[%s11242_s3 + $0x590] sm:$0xff] %vm2451_vm0, %v4453_v27  ;;  %4710 = vst.msk [vmem:[%s11242_s3 + $0x598] sm:$0xff] %vm2451_vm0, %v4454_v59  ;;  %v4465_v48 = vmax.f32 %v12782_v61, 0.0  ;;  %v4466_v29 = vmax.f32 %v12783_v50, 0.0  ;;  %v4468_v24 = vmax.f32 %v9709_v7, 0.0  ;;  %v4469_v55 = vmax.f32 %v9713_v3, 0.0 }
 0x464   :  { %4711 = vst.msk [vmem:[%s11242_s3 + $0x5a0] sm:$0xff] %vm2451_vm0, %v4455_v10  ;;  %4712 = vst.msk [vmem:[%s11242_s3 + $0x5a8] sm:$0xff] %vm2451_vm0, %v4456_v0  ;;  %v4470_v27 = vmax.f32 %v9717_v34, 0.0  ;;  %v4471_v63 = vmax.f32 %v9721_v11, 0.0  ;;  %v4472_v7 = vmax.f32 %v9725_v35, 0.0  ;;  %v12784_v3 = vld [vmem:[#allocation158_spill] sm:$0xff] }
 0x465   :  { %4713 = vst.msk [vmem:[%s11242_s3 + $0x5b0] sm:$0xff] %vm2451_vm0, %v4457_v31  ;;  %4714 = vst.msk [vmem:[%s11242_s3 + $0x5b8] sm:$0xff] %vm2451_vm0, %v4458_v56  ;;  %v4473_v34 = vmax.f32 %v12784_v3, 0.0  ;;  %v12785_v59 = vld [vmem:[#allocation160_spill] sm:$0xff]  ;;  %v4475_v11 = vmax.f32 %v9737_v8, 0.0  ;;  %v4476_v35 = vmax.f32 %v9741_v44, 0.0 }
 0x466   :  { %4715 = vst.msk [vmem:[%s11242_s3 + $0x5c0] sm:$0xff] %vm2451_vm0, %v4459_v9  ;;  %4716 = vst.msk [vmem:[%s11242_s3 + $0x5c8] sm:$0xff] %vm2451_vm0, %v4460_v53  ;;  %v4474_v10 = vmax.f32 %v12785_v59, 0.0  ;;  %v4477_v41 = vmax.f32 %v9745_v40, 0.0  ;;  %v4478_v0 = vmax.f32 %v9749_v13, 0.0  ;;  %v4479_v8 = vmax.f32 %v9753_v49, 0.0 }
 0x467   :  { %4717 = vst.msk [vmem:[%s11242_s3 + $0x5d0] sm:$0xff] %vm2451_vm0, %v4461_v28  ;;  %4718 = vst.msk [vmem:[%s11242_s3 + $0x5d8] sm:$0xff] %vm2451_vm0, %v4462_v32  ;;  %v4480_v44 = vmax.f32 %v9757_v19, 0.0  ;;  %v4481_v40 = vmax.f32 %v9761_v4, 0.0  ;;  %v4482_v13 = vmax.f32 %v9765_v45, 0.0  ;;  %v4483_v49 = vmax.f32 %v9769_v36, 0.0 }
 0x468   :  { %4719 = vst.msk [vmem:[%s11242_s3 + $0x5e0] sm:$0xff] %vm2451_vm0, %v4463_v43  ;;  %4720 = vst.msk [vmem:[%s11242_s3 + $0x5e8] sm:$0xff] %vm2451_vm0, %v4464_v33  ;;  %v4484_v19 = vmax.f32 %v9773_v37, 0.0  ;;  %v4485_v4 = vmax.f32 %v9777_v38, 0.0  ;;  %v4486_v45 = vmax.f32 %v9781_v22, 0.0  ;;  %v4487_v36 = vmax.f32 %v9785_v2, 0.0 }
 0x469   :  { %4721 = vst.msk [vmem:[%s11242_s3 + $0x5f0] sm:$0xff] %vm2451_vm0, %v4465_v48  ;;  %4722 = vst.msk [vmem:[%s11242_s3 + $0x5f8] sm:$0xff] %vm2451_vm0, %v4466_v29  ;;  %v4488_v37 = vmax.f32 %v9789_v15, 0.0  ;;  %v4489_v38 = vmax.f32 %v9793_v26, 0.0  ;;  %v4490_v22 = vmax.f32 %v9797_v5, 0.0  ;;  %v4491_v2 = vmax.f32 %v9801_v16, 0.0 }
 0x46a   :  { %4723 = vst.msk [vmem:[%s11242_s3 + $0x600] sm:$0xff] %vm2451_vm0, %v4467_v12  ;;  %4724 = vst.msk [vmem:[%s11242_s3 + $0x608] sm:$0xff] %vm2451_vm0, %v4468_v24  ;;  %v4492_v15 = vmax.f32 %v9805_v30, 0.0  ;;  %v4493_v26 = vmax.f32 %v9809_v46, 0.0  ;;  %v4494_v5 = vmax.f32 %v9813_v6, 0.0  ;;  %v4495_v16 = vmax.f32 %v9817_v21, 0.0 }
 0x46b   :  { %4725 = vst.msk [vmem:[%s11242_s3 + $0x610] sm:$0xff] %vm2451_vm0, %v4469_v55  ;;  %4726 = vst.msk [vmem:[%s11242_s3 + $0x618] sm:$0xff] %vm2451_vm0, %v4470_v27  ;;  %v4496_v30 = vmax.f32 %v9821_v42, 0.0  ;;  %v4497_v46 = vmax.f32 %v9825_v18, 0.0  ;;  %v4498_v6 = vmax.f32 %v9829_v58, 0.0  ;;  %v4499_v21 = vmax.f32 %v9833_v20, 0.0 }
 0x46c   :  { %4727 = vst.msk [vmem:[%s11242_s3 + $0x620] sm:$0xff] %vm2451_vm0, %v4471_v63  ;;  %4728 = vst.msk [vmem:[%s11242_s3 + $0x628] sm:$0xff] %vm2451_vm0, %v4472_v7  ;;  %v4500_v42 = vmax.f32 %v9837_v52, 0.0  ;;  %v12786_v18 = vld [vmem:[#allocation163_spill] sm:$0xff]  ;;  %v12787_v57 = vld [vmem:[#allocation165_spill] sm:$0xff]  ;;  %v4503_v20 = vmax.f32 %v9849_v51, 0.0 }
 0x46d   :  { %4729 = vst.msk [vmem:[%s11242_s3 + $0x630] sm:$0xff] %vm2451_vm0, %v4473_v34  ;;  %4730 = vst.msk [vmem:[%s11242_s3 + $0x638] sm:$0xff] %vm2451_vm0, %v4474_v10  ;;  %v4501_v58 = vmax.f32 %v12786_v18, 0.0  ;;  %v4502_v31 = vmax.f32 %v12787_v57, 0.0  ;;  %v4504_v52 = vmax.f32 %v9853_v17, 0.0  ;;  %v12788_v39 = vld [vmem:[#allocation162_spill] sm:$0xff] }
 0x46e   :  { %4731 = vst.msk [vmem:[%s11242_s3 + $0x640] sm:$0xff] %vm2451_vm0, %v4475_v11  ;;  %4732 = vst.msk [vmem:[%s11242_s3 + $0x648] sm:$0xff] %vm2451_vm0, %v4476_v35  ;;  %v4505_v56 = vmax.f32 %v12788_v39, 0.0  ;;  %v12789_v9 = vld [vmem:[#allocation164_spill] sm:$0xff]  ;;  %v4507_v51 = vmax.f32 %v9865_v62, 0.0  ;;  %v4508_v17 = vmax.f32 %v9869_v54, 0.0 }
 0x46f   :  { %4733 = vst.msk [vmem:[%s11242_s3 + $0x650] sm:$0xff] %vm2451_vm0, %v4477_v41  ;;  %4734 = vst.msk [vmem:[%s11242_s3 + $0x658] sm:$0xff] %vm2451_vm0, %v4478_v0  ;;  %v4506_v14 = vmax.f32 %v12789_v9, 0.0  ;;  %v4509_v53 = vmax.f32 %v9873_v47, 0.0  ;;  %v12790_v25 = vld [vmem:[#allocation167_spill] sm:$0xff]  ;;  %v12791_v62 = vld [vmem:[#allocation169_spill] sm:$0xff] }
 0x470   :  { %4735 = vst.msk [vmem:[%s11242_s3 + $0x660] sm:$0xff] %vm2451_vm0, %v4479_v8  ;;  %4736 = vst.msk [vmem:[%s11242_s3 + $0x668] sm:$0xff] %vm2451_vm0, %v4480_v44  ;;  %v4510_v28 = vmax.f32 %v12790_v25, 0.0  ;;  %v4511_v54 = vmax.f32 %v12791_v62, 0.0  ;;  %v12792_v47 = vld [vmem:[#allocation166_spill] sm:$0xff]  ;;  %v12793_v32 = vld [vmem:[#allocation168_spill] sm:$0xff] }
 0x471   :  { %4737 = vst.msk [vmem:[%s11242_s3 + $0x670] sm:$0xff] %vm2451_vm0, %v4481_v40  ;;  %4738 = vst.msk [vmem:[%s11242_s3 + $0x678] sm:$0xff] %vm2451_vm0, %v4482_v13  ;;  %v4512_v1 = vmax.f32 %v12792_v47, 0.0  ;;  %v4513_v43 = vmax.f32 %v12793_v32, 0.0  ;;  %v12794_v33 = vld [vmem:[#allocation171_spill] sm:$0xff]  ;;  %v12795_v48 = vld [vmem:[#allocation173_spill] sm:$0xff] }
 0x472   :  { %4739 = vst.msk [vmem:[%s11242_s3 + $0x680] sm:$0xff] %vm2451_vm0, %v4483_v49  ;;  %4740 = vst.msk [vmem:[%s11242_s3 + $0x688] sm:$0xff] %vm2451_vm0, %v4484_v19  ;;  %v4514_v61 = vmax.f32 %v12794_v33, 0.0  ;;  %v4515_v50 = vmax.f32 %v12795_v48, 0.0  ;;  %v12796_v29 = vld [vmem:[#allocation170_spill] sm:$0xff]  ;;  %v12797_v24 = vld [vmem:[#allocation172_spill] sm:$0xff] }
 0x473   :  { %4741 = vst.msk [vmem:[%s11242_s3 + $0x690] sm:$0xff] %vm2451_vm0, %v4485_v4  ;;  %4742 = vst.msk [vmem:[%s11242_s3 + $0x698] sm:$0xff] %vm2451_vm0, %v4486_v45  ;;  %v4516_v12 = vmax.f32 %v12796_v29, 0.0  ;;  %v4517_v55 = vmax.f32 %v12797_v24, 0.0  ;;  %v12798_v27 = vld [vmem:[#allocation175_spill] sm:$0xff]  ;;  %v12799_v7 = vld [vmem:[#allocation177_spill] sm:$0xff] }
 0x474   :  { %4743 = vst.msk [vmem:[%s11242_s3 + $0x6a0] sm:$0xff] %vm2451_vm0, %v4487_v36  ;;  %4744 = vst.msk [vmem:[%s11242_s3 + $0x6a8] sm:$0xff] %vm2451_vm0, %v4488_v37  ;;  %v4518_v63 = vmax.f32 %v12798_v27, 0.0  ;;  %v4519_v3 = vmax.f32 %v12799_v7, 0.0  ;;  %v12800_v34 = vld [vmem:[#allocation174_spill] sm:$0xff]  ;;  %v4521_v10 = vmax.f32 %v9921_v60, 0.0 }
 0x475   :  { %4745 = vst.msk [vmem:[%s11242_s3 + $0x6b0] sm:$0xff] %vm2451_vm0, %v4489_v38  ;;  %4746 = vst.msk [vmem:[%s11242_s3 + $0x6b8] sm:$0xff] %vm2451_vm0, %v4490_v22  ;;  %v4520_v59 = vmax.f32 %v12800_v34, 0.0  ;;  %v4522_v11 = vmax.f32 %v9925_v23, 0.0  ;;  %v12801_v60 = vld [vmem:[#allocation176_spill] sm:$0xff]  ;;  %v12802_v35 = vld [vmem:[#allocation179_spill] sm:$0xff] }
 0x476   :  { %4747 = vst.msk [vmem:[%s11242_s3 + $0x6c0] sm:$0xff] %vm2451_vm0, %v4491_v2  ;;  %4748 = vst.msk [vmem:[%s11242_s3 + $0x6c8] sm:$0xff] %vm2451_vm0, %v4492_v15  ;;  %v4523_v23 = vmax.f32 %v12801_v60, 0.0  ;;  %v4524_v41 = vmax.f32 %v12802_v35, 0.0  ;;  %v12803_v0 = vld [vmem:[#allocation181_spill] sm:$0xff]  ;;  %v12804_v44 = vld [vmem:[#allocation178_spill] sm:$0xff] }
 0x477   :  { %4749 = vst.msk [vmem:[%s11242_s3 + $0x6d0] sm:$0xff] %vm2451_vm0, %v4493_v26  ;;  %4750 = vst.msk [vmem:[%s11242_s3 + $0x6d8] sm:$0xff] %vm2451_vm0, %v4494_v5  ;;  %v4525_v8 = vmax.f32 %v12803_v0, 0.0  ;;  %v4526_v40 = vmax.f32 %v12804_v44, 0.0  ;;  %v12805_v13 = vld [vmem:[#allocation180_spill] sm:$0xff]  ;;  %v12806_v19 = vld [vmem:[#allocation183_spill] sm:$0xff] }
 0x478   :  { %4751 = vst.msk [vmem:[%s11242_s3 + $0x6e0] sm:$0xff] %vm2451_vm0, %v4495_v16  ;;  %4752 = vst.msk [vmem:[%s11242_s3 + $0x6e8] sm:$0xff] %vm2451_vm0, %v4496_v30  ;;  %v4527_v49 = vmax.f32 %v12805_v13, 0.0  ;;  %v4528_v4 = vmax.f32 %v12806_v19, 0.0  ;;  %v12807_v45 = vld [vmem:[#allocation185_spill] sm:$0xff]  ;;  %v12808_v37 = vld [vmem:[#allocation182_spill] sm:$0xff] }
 0x479   :  { %4753 = vst.msk [vmem:[%s11242_s3 + $0x6f0] sm:$0xff] %vm2451_vm0, %v4497_v46  ;;  %4754 = vst.msk [vmem:[%s11242_s3 + $0x6f8] sm:$0xff] %vm2451_vm0, %v4498_v6  ;;  %v4529_v36 = vmax.f32 %v12807_v45, 0.0  ;;  %v4530_v38 = vmax.f32 %v12808_v37, 0.0 }
 0x47a   :  { %4755 = vst.msk [vmem:[%s11242_s3 + $0x700] sm:$0xff] %vm2451_vm0, %v4499_v21  ;;  %4756 = vst.msk [vmem:[%s11242_s3 + $0x708] sm:$0xff] %vm2451_vm0, %v4500_v42 }
 0x47b   :  { %4757 = vst.msk [vmem:[%s11242_s3 + $0x710] sm:$0xff] %vm2451_vm0, %v4501_v58  ;;  %4758 = vst.msk [vmem:[%s11242_s3 + $0x718] sm:$0xff] %vm2451_vm0, %v4502_v31 }
 0x47c   :  { %4759 = vst.msk [vmem:[%s11242_s3 + $0x720] sm:$0xff] %vm2451_vm0, %v4503_v20  ;;  %4760 = vst.msk [vmem:[%s11242_s3 + $0x728] sm:$0xff] %vm2451_vm0, %v4504_v52 }
 0x47d   :  { %4761 = vst.msk [vmem:[%s11242_s3 + $0x730] sm:$0xff] %vm2451_vm0, %v4505_v56  ;;  %4762 = vst.msk [vmem:[%s11242_s3 + $0x738] sm:$0xff] %vm2451_vm0, %v4506_v14 }
 0x47e   :  { %4763 = vst.msk [vmem:[%s11242_s3 + $0x740] sm:$0xff] %vm2451_vm0, %v4507_v51  ;;  %4764 = vst.msk [vmem:[%s11242_s3 + $0x748] sm:$0xff] %vm2451_vm0, %v4508_v17 }
 0x47f   :  { %4765 = vst.msk [vmem:[%s11242_s3 + $0x750] sm:$0xff] %vm2451_vm0, %v4509_v53  ;;  %4766 = vst.msk [vmem:[%s11242_s3 + $0x758] sm:$0xff] %vm2451_vm0, %v4510_v28 }
 0x480   :  { %4767 = vst.msk [vmem:[%s11242_s3 + $0x760] sm:$0xff] %vm2451_vm0, %v4511_v54  ;;  %4768 = vst.msk [vmem:[%s11242_s3 + $0x768] sm:$0xff] %vm2451_vm0, %v4512_v1 }
 0x481   :  { %4769 = vst.msk [vmem:[%s11242_s3 + $0x770] sm:$0xff] %vm2451_vm0, %v4513_v43  ;;  %4770 = vst.msk [vmem:[%s11242_s3 + $0x778] sm:$0xff] %vm2451_vm0, %v4514_v61 }
 0x482   :  { %4771 = vst.msk [vmem:[%s11242_s3 + $0x780] sm:$0xff] %vm2451_vm0, %v4515_v50  ;;  %4772 = vst.msk [vmem:[%s11242_s3 + $0x788] sm:$0xff] %vm2451_vm0, %v4516_v12 }
 0x483   :  { %4773 = vst.msk [vmem:[%s11242_s3 + $0x790] sm:$0xff] %vm2451_vm0, %v4517_v55  ;;  %4774 = vst.msk [vmem:[%s11242_s3 + $0x798] sm:$0xff] %vm2451_vm0, %v4518_v63 }
 0x484   :  { %4775 = vst.msk [vmem:[%s11242_s3 + $0x7a0] sm:$0xff] %vm2451_vm0, %v4519_v3  ;;  %4776 = vst.msk [vmem:[%s11242_s3 + $0x7a8] sm:$0xff] %vm2451_vm0, %v4520_v59 }
 0x485   :  { %4777 = vst.msk [vmem:[%s11242_s3 + $0x7b0] sm:$0xff] %vm2451_vm0, %v4521_v10  ;;  %4778 = vst.msk [vmem:[%s11242_s3 + $0x7b8] sm:$0xff] %vm2451_vm0, %v4522_v11 }
 0x486   :  { %4779 = vst.msk [vmem:[%s11242_s3 + $0x7c0] sm:$0xff] %vm2451_vm0, %v4523_v23  ;;  %4780 = vst.msk [vmem:[%s11242_s3 + $0x7c8] sm:$0xff] %vm2451_vm0, %v4524_v41 }
 0x487   :  { %4781 = vst.msk [vmem:[%s11242_s3 + $0x7d0] sm:$0xff] %vm2451_vm0, %v4525_v8  ;;  %4782 = vst.msk [vmem:[%s11242_s3 + $0x7d8] sm:$0xff] %vm2451_vm0, %v4526_v40 }
 0x488   :  { %4783 = vst.msk [vmem:[%s11242_s3 + $0x7e0] sm:$0xff] %vm2451_vm0, %v4527_v49  ;;  %4784 = vst.msk [vmem:[%s11242_s3 + $0x7e8] sm:$0xff] %vm2451_vm0, %v4528_v4 }
 0x489   :  { %4785 = vst.msk [vmem:[%s11242_s3 + $0x7f0] sm:$0xff] %vm2451_vm0, %v4529_v36  ;;  %4786 = vst.msk [vmem:[%s11242_s3 + $0x7f8] sm:$0xff] %vm2451_vm0, %v4530_v38 }

// kernel: gen_nn_ske_to_image.9
= control target key start
LH: loop header
LB: loop body
LE: loop exit
PB: predicated region body
PF: predicated region fallthrough
CT: control target
= control target key end

     0   :  { %s776_s12 = smov 0   ;;  %s778_s13 = smov 0   ;;  %s912_s0 = inlined_call_operand.vmem [shape: bf16[4,64,2048], index: 0, kind: input, shape index: {}]   ;;  %s913_s1 = inlined_call_operand.vmem [shape: bf16[4,3,64], index: 1, kind: input, shape index: {}]   ;;  %s914_s2 = inlined_call_operand.vmem [shape: f32[3,1], index: 2, kind: input, shape index: {}]   ;;  %s915_s3 = inlined_call_operand.vmem [shape: f32[4,3,2048], index: 3, kind: output, shape index: {}]  }
   0x1   :  { %s780_s14 = smov 0   ;;  %s782_s15 = smov 0  }
   0x2   :  { %s784_s16 = smov 0   ;;  %s786_s17 = smov 0  }
   0x3   :  { %s788_s18 = smov 0  }
   0x4 LB: > { %s22_s19 = sadd.s32 1, %s745_s16  ;;  %s25_s20 = sadd.s32 1, %s749_s17  ;;  %s753_s18 = sphi %s788_s18, %s13_s18   ;;  %s749_s17 = sphi %s786_s17, %s921_s17   ;;  %s745_s16 = sphi %s784_s16, %s920_s16   ;;  %s741_s15 = sphi %s782_s15, %s919_s15   ;;  %s737_s14 = sphi %s780_s14, %s918_s14   ;;  %s733_s13 = sphi %s778_s13, %s917_s13   ;;  %s729_s12 = sphi %s776_s12, %s916_s12  }
   0x5   : > { %p23_p0 = scmp.ge.s32.totalorder %s22_s19, 4  ;;  %p41_p1 = scmp.ne.s32.totalorder %s733_s13, %s729_s12 }
   0x6   : > { %p42_p2 = scmp.eq.s32.totalorder %s753_s18, 0  ;;  %s34_s24 = sadd.s32 1, %s733_s13 }
   0x7   : > { %s923_s19 = smov (%p23_p0, %s22_s19), 0  ;;  %s925_s20 = smov (!%p23_p0, %s25_s20), %s749_s17 }
   0x8   : > { %p43_p3 = por %p42_p2, %p41_p1  ;;  %p27_p4 = scmp.ge.s32.totalorder %s925_s20, 4 }
   0x9   : > { %s30_s21 = ssub.s32 %s745_s16, %s923_s19  ;;  %p578_p6 = scmp.ge.s32.totalorder %s753_s18, 16 }
   0xa   : > { %s927_s20 = smov (%p27_p4, %s925_s20), 0 }
   0xb   : > { %s29_s22 = ssub.s32 %s749_s17, %s927_s20  ;;  %145 = sbr.rel (%p578_p6) target bundleno = 33 (0x21), region = 20 }
   0xc   : > { %s31_s23 = sor.u32 %s30_s21, %s29_s22 }
   0xd   : > { %p32_p5 = scmp.eq.s32.totalorder %s31_s23, 0 }
   0xf   : > { %s827_s25 = scalar_select %p32_p5, %s733_s13, %s34_s24  }
  0x12   : > { %148 = sbr.rel (!%p43_p3) target bundleno = 33 (0x21), region = 24  ;;  %s150_s26 = sand.u32 (%p43_p3), 1, %s733_s13  }
  0x13   : > { %s580_s27 = sshll.u32 (%p43_p3), %s745_s16, 2  ;;  %s579_s28 = sshll.u32 (%p43_p3), %s150_s26, 7 }
  0x14   : > { %s581_s29 = sshll.u32 (%p43_p3), %s749_s17, 7  ;;  %s152_s8 = scalar_lea.vmem (%p43_p3), [#allocation2], %s579_s28 }
  0x15   : > { %s155_s30 = sadd.s32 (%p43_p3), %s581_s29, %s580_s27 }
  0x16   : > { %s582_s4 = sshll.u32 (%p43_p3), %s155_s30, 2 }
  0x17   : > { %s836_s7 = scalar_lea.vmem (%p43_p3), %s912_s0, %s582_s4 }
  0x18   : > { %v170_v0 = vld [vmem:[%s836_s7] sm:$0xff] (%p43_p3)  ;;  %v172_v1 = vld [vmem:[%s836_s7 + $0x8] sm:$0xff] (%p43_p3) }
  0x19   : > { %v174_v2 = vld [vmem:[%s836_s7 + $0x40] sm:$0xff]  ;;  %171 = vst [vmem:[%s152_s8] sm:$0xff] %v170_v0  ;;  %173 = vst [vmem:[%s152_s8 + $0x8] sm:$0xff] %v172_v1  ;;  %v176_v3 = vld [vmem:[%s836_s7 + $0x48] sm:$0xff] }
  0x1a   : > { %175 = vst [vmem:[%s152_s8 + $0x10] sm:$0xff] %v174_v2  ;;  %v178_v4 = vld [vmem:[%s836_s7 + $0x80] sm:$0xff]  ;;  %v180_v5 = vld [vmem:[%s836_s7 + $0x88] sm:$0xff]  ;;  %177 = vst [vmem:[%s152_s8 + $0x18] sm:$0xff] %v176_v3 }
  0x1b   : > { %179 = vst [vmem:[%s152_s8 + $0x20] sm:$0xff] %v178_v4  ;;  %181 = vst [vmem:[%s152_s8 + $0x28] sm:$0xff] %v180_v5  ;;  %v182_v6 = vld [vmem:[%s836_s7 + $0xc0] sm:$0xff]  ;;  %v184_v7 = vld [vmem:[%s836_s7 + $0xc8] sm:$0xff] }
  0x1c   : > { %v186_v8 = vld [vmem:[%s836_s7 + $0x100] sm:$0xff]  ;;  %183 = vst [vmem:[%s152_s8 + $0x30] sm:$0xff] %v182_v6  ;;  %185 = vst [vmem:[%s152_s8 + $0x38] sm:$0xff] %v184_v7  ;;  %v188_v9 = vld [vmem:[%s836_s7 + $0x108] sm:$0xff] }
  0x1d   : > { %187 = vst [vmem:[%s152_s8 + $0x40] sm:$0xff] %v186_v8  ;;  %v190_v10 = vld [vmem:[%s836_s7 + $0x140] sm:$0xff]  ;;  %v192_v11 = vld [vmem:[%s836_s7 + $0x148] sm:$0xff]  ;;  %189 = vst [vmem:[%s152_s8 + $0x48] sm:$0xff] %v188_v9 }
  0x1e   : > { %191 = vst [vmem:[%s152_s8 + $0x50] sm:$0xff] %v190_v10  ;;  %193 = vst [vmem:[%s152_s8 + $0x58] sm:$0xff] %v192_v11  ;;  %v194_v12 = vld [vmem:[%s836_s7 + $0x180] sm:$0xff]  ;;  %v196_v13 = vld [vmem:[%s836_s7 + $0x188] sm:$0xff] }
  0x1f   : > { %v198_v14 = vld [vmem:[%s836_s7 + $0x1c0] sm:$0xff]  ;;  %195 = vst [vmem:[%s152_s8 + $0x60] sm:$0xff] %v194_v12  ;;  %197 = vst [vmem:[%s152_s8 + $0x68] sm:$0xff] %v196_v13  ;;  %v200_v15 = vld [vmem:[%s836_s7 + $0x1c8] sm:$0xff] }
  0x20   : > { %199 = vst [vmem:[%s152_s8 + $0x70] sm:$0xff] %v198_v14  ;;  %201 = vst [vmem:[%s152_s8 + $0x78] sm:$0xff] %v200_v15 }
  0x21 PF: > { %p583_p7 = scmp.ge.s32.totalorder %s753_s18, 1  ;;  %p213_p8 = scmp.lt.s32.totalorder %s753_s18, 17 }
  0x23   : > { %p214_p9 = pnand %p583_p7, %p213_p8 }
  0x24   : > { %s220_s9 = sand.u32 (!%p214_p9), 1, %s729_s12   ;;  %v284_v16 = vld [vmem:[%s914_s2] sm:$0x7] (!%p214_p9)  ;;  %v755_v17 = vmov (!%p214_p9), 0   ;;  %p252_p10 = scmp.lt.s32.totalorder (!%p214_p9), %s741_s15, 3  ;;  %vm370_vm0 = vcmask (!%p214_p9), 523264  }
  0x25   : > { %217 = sbr.rel (%p214_p9) target bundleno = 287 (0x11f), region = 51  ;;  %s584_s21 = sshll.u32 (!%p214_p9), %s220_s9, 7  ;;  %406 = vmatprep.mubr.bf16.mxu0 (!%p214_p9), %v755_v17  ;;  %447 = vmatprep.mubr.bf16.mxu1 (!%p214_p9), %v755_v17 }
  0x26   : > { %666 = vset.pattern.permute.xlu0 (!%p214_p9), %v755_v17  ;;  %s860_s22 = scalar_lea.vmem (!%p214_p9), [#allocation2], %s584_s21  ;;  %s586_s27 = sshll.u32 (!%p214_p9), %s737_s14, 2 }
  0x27   : > { %v667_v18 = vld [vmem:[%s860_s22 + $0x4] ss:$16 sps:$4 sm:$0xff] (!%p214_p9)   ;;  %287 = vperm.xlu0 (!%p214_p9), %666, %v284_v16   ;;  %v669_v19 = vld [vmem:[%s860_s22 + $0xc] ss:$16 sps:$4 sm:$0xff] (!%p214_p9)   ;;  %v671_v20 = vld [vmem:[%s860_s22] ss:$16 sps:$4 sm:$0xff] (!%p214_p9)  }
  0x28   : > { %374 = vmatprep.subr.bf16.mxu0 (!%p214_p9), %v667_v18  ;;  %v672_v21 = vld [vmem:[%s860_s22 + $0x8] ss:$16 sps:$4 sm:$0xff] (!%p214_p9)   ;;  %415 = vmatprep.subr.bf16.mxu1 (!%p214_p9), %v669_v19  ;;  %v673_v22 = vld [vmem:[%s860_s22 + $0x24] ss:$16 sps:$4 sm:$0xff] (!%p214_p9)   ;;  %v675_v23 = vld [vmem:[%s860_s22 + $0x2c] ss:$16 sps:$4 sm:$0xff] (!%p214_p9)  }
  0x29   : > { %375 = vmatpush1.bf16.msra.mxu0 (!%p214_p9), %v671_v20  ;;  %416 = vmatpush1.bf16.msra.mxu1 (!%p214_p9), %v672_v21  ;;  %v677_v24 = vld [vmem:[%s860_s22 + $0x20] ss:$16 sps:$4 sm:$0xff] (!%p214_p9)   ;;  %v678_v25 = vld [vmem:[%s860_s22 + $0x28] ss:$16 sps:$4 sm:$0xff] (!%p214_p9)   ;;  %v679_v26 = vld [vmem:[%s860_s22 + $0x44] ss:$16 sps:$4 sm:$0xff] (!%p214_p9)  }
  0x2a   : > { %376 = vmatprep.subr.bf16.mxu0 (!%p214_p9), %v673_v22  ;;  %417 = vmatprep.subr.bf16.mxu1 (!%p214_p9), %v675_v23  ;;  %v681_v27 = vld [vmem:[%s860_s22 + $0x4c] ss:$16 sps:$4 sm:$0xff] (!%p214_p9)   ;;  %v683_v28 = vld [vmem:[%s860_s22 + $0x40] ss:$16 sps:$4 sm:$0xff] (!%p214_p9)   ;;  %v684_v29 = vld [vmem:[%s860_s22 + $0x48] ss:$16 sps:$4 sm:$0xff] (!%p214_p9)  }
  0x2b   : > { %v685_v30 = vld [vmem:[%s860_s22 + $0x64] ss:$16 sps:$4 sm:$0xff] (!%p214_p9)   ;;  %v687_v31 = vld [vmem:[%s860_s22 + $0x6c] ss:$16 sps:$4 sm:$0xff] (!%p214_p9)   ;;  %v689_v32 = vld [vmem:[%s860_s22 + $0x60] ss:$16 sps:$4 sm:$0xff] (!%p214_p9)  }
  0x2c   : > { %s929_s15 = smov (!%p252_p10, %s741_s15), 3  ;;  %v690_v33 = vld [vmem:[%s860_s22 + $0x68] ss:$16 sps:$4 sm:$0xff]   ;;  %p259_p11 = scmp.lt.s32.totalorder %s586_s27, 15 }
  0x2d   : > { %377 = vmatpush1.bf16.msra.mxu0 %v677_v24  ;;  %418 = vmatpush1.bf16.msra.mxu1 %v678_v25  ;;  %s585_s12 = sshll.u32 %s929_s15, 1  ;;  %s587_s14 = sshll.u32 %s929_s15, 4 }
  0x2e   : > { %378 = vmatprep.subr.bf16.mxu0 %v679_v26  ;;  %419 = vmatprep.subr.bf16.mxu1 %v681_v27  ;;  %s255_s26 = scalar_lea.vmem %s913_s1, %s585_s12  ;;  %s931_s27 = smov (!%p259_p11, %s586_s27), 15 }
  0x2f   : > { %v267_v34 = vld [vmem:[%s255_s26] sm:$0x3]  ;;  %s262_s28 = sadd.s32 %s587_s14, %s931_s27 }
  0x30   : > { %s588_s29 = sshll.u32 %s262_s28, 2 }
  0x31   : > { %379 = vmatpush1.bf16.msra.mxu0 %v683_v28  ;;  %420 = vmatpush1.bf16.msra.mxu1 %v684_v29  ;;  %s264_s5 = scalar_lea.vmem %s915_s3, %s588_s29 }
  0x32   : > { %380 = vmatprep.subr.bf16.mxu0 %v685_v30  ;;  %421 = vmatprep.subr.bf16.mxu1 %v687_v31 }
  0x35   : > { %381 = vmatpush1.bf16.msra.mxu0 %v689_v32  ;;  %422 = vmatpush1.bf16.msra.mxu1 %v690_v33 }
  0x38   : > { %605 = vmatmul.mubr.msk.bf16.vlgmr.msra.gmra.mrb[0].mxu0 %vm370_vm0, %v267_v34  ;;  %606 = vmatmul.mubr.msk.bf16.vlgmr.msra.gmra.mrb[0].mxu1 %vm370_vm0, %v267_v34 }
  0xa6   : > { %v288_v35 = vpop.permute.xlu0 %287 }
 0x10b   : > { %v408_v36 = vpop.f32.mrb[0].mxu0  ;;  %v449_v37 = vpop.f32.mrb[0].mxu1 }
 0x10c   : > { %v409_v38 = vadd.f32 %v408_v36, %v288_v35  ;;  %v450_v39 = vadd.f32 %v449_v37, %v288_v35  ;;  %v410_v40 = vpop.f32.mrb[1].mxu0  ;;  %v451_v41 = vpop.f32.mrb[1].mxu1 }
 0x10d   : > { %v411_v42 = vadd.f32 %v410_v40, %v288_v35  ;;  %v452_v43 = vadd.f32 %v451_v41, %v288_v35  ;;  %v412_v44 = vpop.f32.mrb[2].mxu0  ;;  %v453_v45 = vpop.f32.mrb[2].mxu1 }
 0x10e   : > { %691 = vtanh.f32 %v409_v38  ;;  %v413_v46 = vpop.f32.mrb[3].mxu0  ;;  %v454_v47 = vpop.f32.mrb[3].mxu1 }
 0x10f   : > { %693 = vtanh.f32 %v450_v39 }
 0x110   : > { %695 = vtanh.f32 %v411_v42 }
 0x111   : > { %697 = vtanh.f32 %v452_v43 }
 0x118   : > { %v692_v48 = vpop.eup %691 }
 0x119   : > { %v694_v49 = vpop.eup %693 }
 0x11a   : > { %v696_v50 = vpop.eup %695 }
 0x11b   : > { %v698_v51 = vpop.eup %697  ;;  %v464_v52 = vcombine.low %v692_v48, %v696_v50 }
 0x11c   : > { %v465_v53 = vcombine.low %v694_v49, %v698_v51 }
 0x11d   : > { %468 = vst [vmem:[%s264_s5] sm:$0x77] %v464_v52 }
 0x11e   : > { %469 = vst [vmem:[%s264_s5 + $0x8] sm:$0x77] %v465_v53 }
 0x11f PF: > { %s13_s18 = sadd.s32 1, %s753_s18   ;;  %s916_s12 = smov %s733_s13 }
 0x120   : > { %p10_p12 = scmp.ge.s32.totalorder %s13_s18, 18   ;;  %s917_s13 = smov %s827_s25 }
 0x121   : > { %s918_s14 = smov %s745_s16  ;;  %s919_s15 = smov %s749_s17 }
 0x122   : > { %s920_s16 = smov %s923_s19  ;;  %s921_s17 = smov %s927_s20 }
 0x123   :  { %12 = sbr.rel (!%p10_p12) target bundleno = 4 (0x4), region = 93 }

</bundles_post_ra>
